<compile_context>
chip_gen: v5e
topology: v5e:2x2
jax: 0.10.0
libtpu: 0.0.40
codegen_flags: <defaults>
</compile_context>

<pallas_src>
import functools

import jax
import jax.numpy as jnp
from jax.experimental import pallas as pl
from jax.experimental.pallas import tpu as pltpu


# ---------------------------------------------------------------------------
# VMEM limit: generation-aware (half of physical VMEM, never more than 64 MiB).
# Actual per-call requirement at these tile sizes is a few MiB.
# ---------------------------------------------------------------------------
@functools.lru_cache(maxsize=None)
def _vmem_limit():
    phys = 64 << 20                         # conservative fallback (v7x-sized)
    try:
        info = pltpu.get_tpu_info()
        phys = int(getattr(info, "vmem_capacity_bytes", phys))
    except Exception:
        pass
    return min(phys // 2, 64 << 20)


# ---------------------------------------------------------------------------
# Tile choosers.
# ---------------------------------------------------------------------------
def _choose_tile_g(g, nsample, cout, *, max_m=1024, max_act_bytes=8 << 20):
    """tile_g: multiple of 16 (bf16-native output sublanes), matmul M dim
    (tile_g*nsample) <= max_m, f32 activation block bounded, and as many grid
    steps as possible (prefer >=4 so each v7x core gets a pipelined >=2-step
    slice, then >=2, then whatever divides)."""
    def ok(t):
        return (g % t == 0 and t * nsample <= max_m
                and t * nsample * cout * 4 <= max_act_bytes)

    cands = [t for t in range(16, g + 1, 16) if ok(t)]
    if not cands:
        cands = [t for t in range(8, g + 1, 8) if ok(t)]
    if not cands:
        cands = [g]                          # full-extent block is always legal
    for min_steps in (4, 2, 1):
        viable = [t for t in cands if g // t >= min_steps]
        if viable:
            return max(viable)
    return cands[-1]


def _choose_tile_b(b, npts, *, max_rows=1024):
    """Batches per tail step: keep the group-all matmul M dim <= max_rows and
    keep >=2 grid steps when the batch allows it."""
    best = 1
    for t in range(1, b + 1):
        if b % t:
            continue
        if t * npts > max_rows:
            continue
        if t > 1 and b // t < 2:
            continue
        best = t
    return best


# ---------------------------------------------------------------------------
# Kernel 1: first SA layer (input features = xyz only, Cin = 3).
# (x - c) @ W + b  ==  x @ W + (b - c @ W): the centroid subtraction is folded
# into a per-group bias, the K=3 contraction runs on the MXU.
# ---------------------------------------------------------------------------
def _sa_xyz_kernel(gx_ref, cent_ref, wx_ref, shift_ref, o_ref, *, nsample):
    m = gx_ref.shape[0]                       # m = tile_g * nsample
    tile_g = m // nsample
    cout = wx_ref.shape[1]
    wx = wx_ref[...]                          # (3, cout) f32, BN scale folded
    y = jnp.dot(gx_ref[...], wx, preferred_element_type=jnp.float32)
    bias = shift_ref[...] - jnp.dot(cent_ref[...], wx,
                                    preferred_element_type=jnp.float32)
    y = jnp.maximum(y.reshape(tile_g, nsample, cout) + bias[:, None, :], 0.0)
    o_ref[...] = jnp.max(y, axis=1).astype(o_ref.dtype)


# ---------------------------------------------------------------------------
# Kernel 2: SA layer with point features.  concat([rel_xyz, feats]) @ W is
# realised as feats @ W[3:] (bf16 MXU) + xyz @ W[:3] (f32 MXU) + per-group
# bias; no padded / concatenated intermediate ever touches HBM.
# ---------------------------------------------------------------------------
def _sa_concat_kernel(gx_ref, gf_ref, cent_ref, wx_ref, wf_ref, shift_ref,
                      o_ref, *, nsample):
    m, _ = gf_ref.shape                       # m = tile_g * nsample
    tile_g = m // nsample
    cout = wf_ref.shape[1]
    wx = wx_ref[...]                          # (3, cout) f32
    y = jnp.dot(gf_ref[...], wf_ref[...], preferred_element_type=jnp.float32)
    y = y + jnp.dot(gx_ref[...], wx, preferred_element_type=jnp.float32)
    bias = shift_ref[...] - jnp.dot(cent_ref[...], wx,
                                    preferred_element_type=jnp.float32)
    y = jnp.maximum(y.reshape(tile_g, nsample, cout) + bias[:, None, :], 0.0)
    o_ref[...] = jnp.max(y, axis=1).astype(o_ref.dtype)


# ---------------------------------------------------------------------------
# Kernel 3: fused tail = group-all SA module + FC(1024,512)+BN+ReLU
#           + FC(512,512)+BN+ReLU (Dropout is identity in eval mode).
# Tiled over the batch: each grid step handles `tile_b` independent batches,
# all intermediates stay in VMEM, weights are resident broadcast blocks.
# ---------------------------------------------------------------------------
def _tail_kernel(xyz_ref, feat_ref,
                 w4x_ref, w4f_ref, sh4_ref,
                 w1_ref, sh1_ref, w2_ref, sh2_ref,
                 o_ref, *, npts):
    rows = feat_ref.shape[1]                  # rows = tile_b * npts
    tb = rows // npts
    c4 = w4f_ref.shape[1]
    y = jnp.dot(feat_ref[0], w4f_ref[...], preferred_element_type=jnp.float32)
    y = y + jnp.dot(xyz_ref[0], w4x_ref[...], preferred_element_type=jnp.float32)
    y = jnp.maximum(y + sh4_ref[...], 0.0)
    g = jnp.max(y.reshape(tb, npts, c4), axis=1)            # (tb, 1024) f32
    h = jnp.dot(g.astype(w1_ref.dtype), w1_ref[...],
                preferred_element_type=jnp.float32)
    h = jnp.maximum(h + sh1_ref[...], 0.0)
    h = jnp.dot(h.astype(w2_ref.dtype), w2_ref[...],
                preferred_element_type=jnp.float32)
    h = jnp.maximum(h + sh2_ref[...], 0.0)
    o_ref[0] = h.astype(o_ref.dtype)


# ------------------------------ pallas_call wrappers ------------------------

def sa_xyz_layer(gxyz, cent, wx, shift, *, nsample, out_dtype=jnp.bfloat16):
    m = gxyz.shape[0]
    g = m // nsample
    cout = wx.shape[1]
    tile_g = _choose_tile_g(g, nsample, cout)
    tm = tile_g * nsample
    return pl.pallas_call(
        functools.partial(_sa_xyz_kernel, nsample=nsample),
        out_shape=jax.ShapeDtypeStruct((g, cout), out_dtype),
        grid=(g // tile_g,),
        in_specs=[
            pl.BlockSpec((tm, 3), lambda i: (i, 0)),
            pl.BlockSpec((tile_g, 3), lambda i: (i, 0)),
            pl.BlockSpec((3, cout), lambda i: (0, 0)),
            pl.BlockSpec((1, cout), lambda i: (0, 0)),
        ],
        out_specs=pl.BlockSpec((tile_g, cout), lambda i: (i, 0)),
        compiler_params=pltpu.CompilerParams(
            dimension_semantics=("parallel",),
            vmem_limit_bytes=_vmem_limit()),
    )(gxyz, cent, wx, shift)


def sa_concat_layer(gxyz, gfeat, cent, wx, wf, shift, *, nsample,
                    out_dtype=jnp.bfloat16):
    m, cf = gfeat.shape
    g = m // nsample
    cout = wf.shape[1]
    tile_g = _choose_tile_g(g, nsample, cout)
    tm = tile_g * nsample
    return pl.pallas_call(
        functools.partial(_sa_concat_kernel, nsample=nsample),
        out_shape=jax.ShapeDtypeStruct((g, cout), out_dtype),
        grid=(g // tile_g,),
        in_specs=[
            pl.BlockSpec((tm, 3), lambda i: (i, 0)),
            pl.BlockSpec((tm, cf), lambda i: (i, 0)),
            pl.BlockSpec((tile_g, 3), lambda i: (i, 0)),
            pl.BlockSpec((3, cout), lambda i: (0, 0)),
            pl.BlockSpec((cf, cout), lambda i: (0, 0)),
            pl.BlockSpec((1, cout), lambda i: (0, 0)),
        ],
        out_specs=pl.BlockSpec((tile_g, cout), lambda i: (i, 0)),
        compiler_params=pltpu.CompilerParams(
            dimension_semantics=("parallel",),
            vmem_limit_bytes=_vmem_limit()),
    )(gxyz, gfeat, cent, wx, wf, shift)


def tail_fused(xyz, feat, p4, p_fc1, p_fc2):
    """Group-all SA + FC(1024,512)+BN+ReLU + FC(512,512)+BN+ReLU, tiled over
    the batch so the resident f32 activation stays a few MiB even at real
    sizes and both v7x cores get work."""
    B, n, _ = xyz.shape
    cf = feat.shape[-1]
    cout = p_fc2["w"].shape[1]
    tb = _choose_tile_b(B, n)
    nb = B // tb
    rows = tb * n
    xyz3 = xyz.reshape(nb, rows, 3)
    feat3 = feat.reshape(nb, rows, cf).astype(jnp.bfloat16)

    def bcast(shape):
        return pl.BlockSpec(shape, lambda i, _r=len(shape): (0,) * _r)

    out = pl.pallas_call(
        functools.partial(_tail_kernel, npts=n),
        out_shape=jax.ShapeDtypeStruct((nb, tb, cout), jnp.float32),
        grid=(nb,),
        in_specs=[
            pl.BlockSpec((1, rows, 3), lambda i: (i, 0, 0)),
            pl.BlockSpec((1, rows, cf), lambda i: (i, 0, 0)),
            bcast(p4["wx"].shape), bcast(p4["wf"].shape), bcast(p4["shift"].shape),
            bcast(p_fc1["w"].shape), bcast(p_fc1["shift"].shape),
            bcast(p_fc2["w"].shape), bcast(p_fc2["shift"].shape),
        ],
        out_specs=pl.BlockSpec((1, tb, cout), lambda i: (i, 0, 0)),
        compiler_params=pltpu.CompilerParams(
            dimension_semantics=("parallel",),
            vmem_limit_bytes=_vmem_limit()),
    )(xyz3, feat3, p4["wx"], p4["wf"], p4["shift"],
      p_fc1["w"], p_fc1["shift"], p_fc2["w"], p_fc2["shift"])
    return out.reshape(B, cout)


# ------------------------------- glue (JAX) -------------------------------

def _sample_and_group(xyz, features, npoint, nsample):
    """Centroid sampling + neighbour grouping (use_xyz=True semantics).
    Returns centroids and gathered ABSOLUTE xyz / features separately; the
    relative-coordinate subtraction is folded into the kernels."""
    # TODO(synk): furthest-point-sampling and radius ball-query (CUDA ops)
    # replaced by deterministic strided sampling + kNN grouping (glue, not the
    # hot path).
    # TODO(synk): move this gather into the SA kernels (scalar-prefetched
    # nn_idx + manual double-buffered make_async_copy gather) once grouping is
    # page-structured; the XLA gather currently inflates features by nsample.
    B, N, _ = xyz.shape
    idx = (jnp.arange(npoint) * (N // npoint)).astype(jnp.int32)
    new_xyz = xyz[:, idx, :]                                        # (B, np, 3)
    d2 = jnp.sum((new_xyz[:, :, None, :] - xyz[:, None, :, :]) ** 2, axis=-1)
    nn_idx = jax.lax.top_k(-d2, nsample)[1]                         # (B, np, S)
    gather = jax.vmap(lambda pts, ix: pts[ix])
    grouped_xyz = gather(xyz, nn_idx)                               # absolute
    grouped_feat = gather(features, nn_idx) if features is not None else None
    return new_xyz, grouped_xyz, grouped_feat


def _sa_module(xyz, features, npoint, nsample, params):
    """PointnetSAModuleMSG (single scale): grouping + fused shared-MLP kernel."""
    # TODO(synk): RSConv relation-prior weight generation simplified to a
    # shared pointwise conv (PointNet++-style SA module).
    new_xyz, gxyz, gfeat = _sample_and_group(xyz, features, npoint, nsample)
    B = xyz.shape[0]
    g = B * npoint
    gxyz2 = gxyz.reshape(g * nsample, 3)
    cent2 = new_xyz.reshape(g, 3)
    if gfeat is None:
        out = sa_xyz_layer(gxyz2, cent2, params["wx"], params["shift"],
                           nsample=nsample)
    else:
        gfeat2 = gfeat.reshape(g * nsample, gfeat.shape[-1]).astype(jnp.bfloat16)
        out = sa_concat_layer(gxyz2, gfeat2, cent2, params["wx"], params["wf"],
                              params["shift"], nsample=nsample)
    return new_xyz, out.reshape(B, npoint, -1)


# ------------------------------- parameters -------------------------------
# Eval-mode BatchNorm is folded into the weights (scale) + a shift vector.
# Synthetic running stats (mean=0, var=1, gamma=1, beta=0, eps=1e-5); real
# trained stats must be folded the same way when porting weights.

def _fold_bn(cout, eps=1e-5):
    gamma = jnp.ones((cout,), jnp.float32)
    beta = jnp.zeros((cout,), jnp.float32)
    mean = jnp.zeros((cout,), jnp.float32)
    var = jnp.ones((cout,), jnp.float32)
    scale = gamma * jax.lax.rsqrt(var + eps)
    shift = beta - mean * scale
    return scale, shift


def _conv_params(key, cin_feat, cout):
    """Shared-MLP conv weights split into xyz rows (f32) and feature rows
    (bf16, MXU path), with the BN scale pre-multiplied into both."""
    cin = 3 + cin_feat
    kx, kf = jax.random.split(key)
    std = 1.0 / jnp.sqrt(jnp.float32(cin))
    scale, shift = _fold_bn(cout)
    wx = jax.random.normal(kx, (3, cout), jnp.float32) * std
    p = dict(wx=wx * scale[None, :], shift=shift[None, :])
    if cin_feat:
        wf = jax.random.normal(kf, (cin_feat, cout), jnp.float32) * std
        p["wf"] = (wf * scale[None, :]).astype(jnp.bfloat16)
    return p


def _fc_params(key, cin, cout):
    std = 1.0 / jnp.sqrt(jnp.float32(cin))
    scale, shift = _fold_bn(cout)
    w = jax.random.normal(key, (cin, cout), jnp.float32) * std
    return dict(w=(w * scale[None, :]).astype(jnp.bfloat16),
                shift=shift[None, :])


def init_params(key):
    ks = jax.random.split(key, 6)
    return dict(
        sa1=_conv_params(ks[0], 0, 128),      # input_channels=0, use_xyz -> 3 in
        sa2=_conv_params(ks[1], 128, 256),
        sa3=_conv_params(ks[2], 256, 512),
        sa4=_conv_params(ks[3], 512, 1024),   # group-all SA module
        fc1=_fc_params(ks[4], 1024, 512),
        fc2=_fc_params(ks[5], 512, 512),
    )


# Scaled-down sampling config for the synthetic smoke run
# (module defaults: npoint=(1024, 512, 256), nsample=(32, 48, 64), group_all=256).
NPOINTS = (64, 32, 16)
NSAMPLES = (8, 8, 8)


def rscnn_forward(params, pointcloud):
    """Forward pass with target=None -> returns mediate_features (B, 512)."""
    # _break_up_pc: pointcloud has exactly 3 channels here, so features=None.
    xyz = pointcloud[..., 0:3]
    feat = None
    xyz, feat = _sa_module(xyz, feat, NPOINTS[0], NSAMPLES[0], params["sa1"])
    xyz, feat = _sa_module(xyz, feat, NPOINTS[1], NSAMPLES[1], params["sa2"])
    xyz, feat = _sa_module(xyz, feat, NPOINTS[2], NSAMPLES[2], params["sa3"])
    # Fused, batch-tiled tail: group-all SA + FC(1024,512)+BN+ReLU +
    # FC(512,512)+BN+ReLU (Dropout p=0.5 in eval mode is identity).
    # TODO(synk): AMS.ArcFace margin head (only taken when target is not None)
    # is not implemented; forward(pointcloud) returns mediate_features.
    return tail_fused(xyz, feat, params["sa4"], params["fc1"], params["fc2"])


if __name__ == "__main__":
    key = jax.random.PRNGKey(0)
    kp, kx = jax.random.split(key)
    params = init_params(kp)

    B, N = 2, 128
    pointcloud = jax.random.normal(kx, (B, N, 3), jnp.float32)

    out = jax.jit(rscnn_forward)(params, pointcloud)
    out = jax.block_until_ready(out)
    assert out.shape == (B, 512) and out.dtype == jnp.float32
    print("KERNEL_OK")
</pallas_src>

<mosaic_0001>
module attributes {stable_mosaic.version = 11 : i64} {
  func.func @_sa_xyz_kernel(%arg0: i32, %arg1: memref<256x3xf32, #tpu.memory_space<vmem>>, %arg2: memref<32x3xf32, #tpu.memory_space<vmem>>, %arg3: memref<3x128xf32, #tpu.memory_space<vmem>>, %arg4: memref<1x128xf32, #tpu.memory_space<vmem>>, %arg5: memref<32x128xbf16, #tpu.memory_space<vmem>>) attributes {dimension_semantics = [#tpu.dimension_semantics<parallel>], iteration_bounds = array<i64: 4>, scalar_prefetch = 0 : i64, scratch_operands = 0 : i64, tpu.core_type = #tpu.core_type<tc>, window_params = [{transform_indices = @transform_0, window_bounds = array<i64: 256, 3>}, {transform_indices = @transform_1, window_bounds = array<i64: 32, 3>}, {pipeline_mode = #tpu.pipeline_mode<synchronous>, transform_indices = @transform_2, window_bounds = array<i64: 3, 128>}, {pipeline_mode = #tpu.pipeline_mode<synchronous>, transform_indices = @transform_3, window_bounds = array<i64: 1, 128>}, {transform_indices = @transform_4, window_bounds = array<i64: 32, 128>}]} {
    %c0 = arith.constant 0 : index
    %c0_0 = arith.constant 0 : index
    %0 = vector.load %arg3[%c0, %c0_0] : memref<3x128xf32, #tpu.memory_space<vmem>>, vector<3x128xf32>
    %c0_1 = arith.constant 0 : index
    %c0_2 = arith.constant 0 : index
    %1 = vector.load %arg1[%c0_1, %c0_2] : memref<256x3xf32, #tpu.memory_space<vmem>>, vector<256x3xf32>
    %cst = arith.constant dense<0.000000e+00> : vector<256x128xf32>
    %2 = tpu.matmul %1, %0, %cst {dimension_numbers = #tpu.dot_dimension_numbers<[1], [0], [0], [1], [0, 0, 1, 1], [], []>} : vector<256x3xf32>, vector<3x128xf32>, vector<256x128xf32> -> vector<256x128xf32>
    %c0_3 = arith.constant 0 : index
    %c0_4 = arith.constant 0 : index
    %3 = vector.load %arg4[%c0_3, %c0_4] : memref<1x128xf32, #tpu.memory_space<vmem>>, vector<1x128xf32>
    %c0_5 = arith.constant 0 : index
    %c0_6 = arith.constant 0 : index
    %4 = vector.load %arg2[%c0_5, %c0_6] : memref<32x3xf32, #tpu.memory_space<vmem>>, vector<32x3xf32>
    %cst_7 = arith.constant dense<0.000000e+00> : vector<32x128xf32>
    %5 = tpu.matmul %4, %0, %cst_7 {dimension_numbers = #tpu.dot_dimension_numbers<[1], [0], [0], [1], [0, 0, 1, 1], [], []>} : vector<32x3xf32>, vector<3x128xf32>, vector<32x128xf32> -> vector<32x128xf32>
    %6 = vector.broadcast %3 : vector<1x128xf32> to vector<32x128xf32>
    %7 = arith.subf %6, %5 : vector<32x128xf32>
    %8 = vector.shape_cast %2 : vector<256x128xf32> to vector<32x8x128xf32>
    %9 = vector.shape_cast %7 : vector<32x128xf32> to vector<32x1x128xf32>
    %10 = vector.broadcast %9 : vector<32x1x128xf32> to vector<32x8x128xf32>
    %11 = arith.addf %8, %10 : vector<32x8x128xf32>
    %cst_8 = arith.constant 0.000000e+00 : f32
    %12 = vector.broadcast %cst_8 : f32 to vector<32x8x128xf32>
    %13 = arith.maximumf %11, %12 : vector<32x8x128xf32>
    %cst_9 = arith.constant dense<0xFF800000> : vector<32x128xf32>
    %14 = vector.multi_reduction <maximumf>, %13, %cst_9 [1] : vector<32x8x128xf32> to vector<32x128xf32>
    %15 = arith.truncf %14 : vector<32x128xf32> to vector<32x128xbf16>
    %c0_10 = arith.constant 0 : index
    %c0_11 = arith.constant 0 : index
    %16 = vector.load %arg5[%c0_10, %c0_11] : memref<32x128xbf16, #tpu.memory_space<vmem>>, vector<32x128xbf16>
    tpu.vector_store %arg5[%c0_10, %c0_11], %15 {strides = array<i32>} : memref<32x128xbf16, #tpu.memory_space<vmem>>, vector<32x128xbf16>,
    return
  }
  func.func @transform_0(%arg0: i32) -> (i32, i32) {
    %c0_i32 = arith.constant 0 : i32
    %c0_i32_0 = arith.constant 0 : i32
    return %arg0, %c0_i32 : i32, i32
  }
  func.func @transform_1(%arg0: i32) -> (i32, i32) {
    %c0_i32 = arith.constant 0 : i32
    %c0_i32_0 = arith.constant 0 : i32
    return %arg0, %c0_i32 : i32, i32
  }
  func.func @transform_2(%arg0: i32) -> (i32, i32) {
    %c0_i32 = arith.constant 0 : i32
    %c0_i32_0 = arith.constant 0 : i32
    %c0_i32_1 = arith.constant 0 : i32
    return %c0_i32, %c0_i32_0 : i32, i32
  }
  func.func @transform_3(%arg0: i32) -> (i32, i32) {
    %c0_i32 = arith.constant 0 : i32
    %c0_i32_0 = arith.constant 0 : i32
    %c0_i32_1 = arith.constant 0 : i32
    return %c0_i32, %c0_i32_0 : i32, i32
  }
  func.func @transform_4(%arg0: i32) -> (i32, i32) {
    %c0_i32 = arith.constant 0 : i32
    %c0_i32_0 = arith.constant 0 : i32
    return %arg0, %c0_i32 : i32, i32
  }
}

module attributes {stable_mosaic.version = 11 : i64} {
  func.func @_sa_concat_kernel(%arg0: i32, %arg1: memref<128x3xf32, #tpu.memory_space<vmem>>, %arg2: memref<128x128xbf16, #tpu.memory_space<vmem>>, %arg3: memref<16x3xf32, #tpu.memory_space<vmem>>, %arg4: memref<3x256xf32, #tpu.memory_space<vmem>>, %arg5: memref<128x256xbf16, #tpu.memory_space<vmem>>, %arg6: memref<1x256xf32, #tpu.memory_space<vmem>>, %arg7: memref<16x256xbf16, #tpu.memory_space<vmem>>) attributes {dimension_semantics = [#tpu.dimension_semantics<parallel>], iteration_bounds = array<i64: 4>, scalar_prefetch = 0 : i64, scratch_operands = 0 : i64, tpu.core_type = #tpu.core_type<tc>, window_params = [{transform_indices = @transform_0, window_bounds = array<i64: 128, 3>}, {transform_indices = @transform_1, window_bounds = array<i64: 128, 128>}, {transform_indices = @transform_2, window_bounds = array<i64: 16, 3>}, {pipeline_mode = #tpu.pipeline_mode<synchronous>, transform_indices = @transform_3, window_bounds = array<i64: 3, 256>}, {pipeline_mode = #tpu.pipeline_mode<synchronous>, transform_indices = @transform_4, window_bounds = array<i64: 128, 256>}, {pipeline_mode = #tpu.pipeline_mode<synchronous>, transform_indices = @transform_5, window_bounds = array<i64: 1, 256>}, {transform_indices = @transform_6, window_bounds = array<i64: 16, 256>}]} {
    %c0 = arith.constant 0 : index
    %c0_0 = arith.constant 0 : index
    %0 = vector.load %arg4[%c0, %c0_0] : memref<3x256xf32, #tpu.memory_space<vmem>>, vector<3x256xf32>
    %c0_1 = arith.constant 0 : index
    %c0_2 = arith.constant 0 : index
    %1 = vector.load %arg2[%c0_1, %c0_2] : memref<128x128xbf16, #tpu.memory_space<vmem>>, vector<128x128xbf16>
    %c0_3 = arith.constant 0 : index
    %c0_4 = arith.constant 0 : index
    %2 = vector.load %arg5[%c0_3, %c0_4] : memref<128x256xbf16, #tpu.memory_space<vmem>>, vector<128x256xbf16>
    %cst = arith.constant dense<0.000000e+00> : vector<128x256xf32>
    %3 = tpu.matmul %1, %2, %cst {dimension_numbers = #tpu.dot_dimension_numbers<[1], [0], [0], [1], [0, 0, 1, 1], [], []>} : vector<128x128xbf16>, vector<128x256xbf16>, vector<128x256xf32> -> vector<128x256xf32>
    %c0_5 = arith.constant 0 : index
    %c0_6 = arith.constant 0 : index
    %4 = vector.load %arg1[%c0_5, %c0_6] : memref<128x3xf32, #tpu.memory_space<vmem>>, vector<128x3xf32>
    %cst_7 = arith.constant dense<0.000000e+00> : vector<128x256xf32>
    %5 = tpu.matmul %4, %0, %cst_7 {dimension_numbers = #tpu.dot_dimension_numbers<[1], [0], [0], [1], [0, 0, 1, 1], [], []>} : vector<128x3xf32>, vector<3x256xf32>, vector<128x256xf32> -> vector<128x256xf32>
    %6 = arith.addf %3, %5 : vector<128x256xf32>
    %c0_8 = arith.constant 0 : index
    %c0_9 = arith.constant 0 : index
    %7 = vector.load %arg6[%c0_8, %c0_9] : memref<1x256xf32, #tpu.memory_space<vmem>>, vector<1x256xf32>
    %c0_10 = arith.constant 0 : index
    %c0_11 = arith.constant 0 : index
    %8 = vector.load %arg3[%c0_10, %c0_11] : memref<16x3xf32, #tpu.memory_space<vmem>>, vector<16x3xf32>
    %cst_12 = arith.constant dense<0.000000e+00> : vector<16x256xf32>
    %9 = tpu.matmul %8, %0, %cst_12 {dimension_numbers = #tpu.dot_dimension_numbers<[1], [0], [0], [1], [0, 0, 1, 1], [], []>} : vector<16x3xf32>, vector<3x256xf32>, vector<16x256xf32> -> vector<16x256xf32>
    %10 = vector.broadcast %7 : vector<1x256xf32> to vector<16x256xf32>
    %11 = arith.subf %10, %9 : vector<16x256xf32>
    %12 = vector.shape_cast %6 : vector<128x256xf32> to vector<16x8x256xf32>
    %13 = vector.shape_cast %11 : vector<16x256xf32> to vector<16x1x256xf32>
    %14 = vector.broadcast %13 : vector<16x1x256xf32> to vector<16x8x256xf32>
    %15 = arith.addf %12, %14 : vector<16x8x256xf32>
    %cst_13 = arith.constant 0.000000e+00 : f32
    %16 = vector.broadcast %cst_13 : f32 to vector<16x8x256xf32>
    %17 = arith.maximumf %15, %16 : vector<16x8x256xf32>
    %cst_14 = arith.constant dense<0xFF800000> : vector<16x256xf32>
    %18 = vector.multi_reduction <maximumf>, %17, %cst_14 [1] : vector<16x8x256xf32> to vector<16x256xf32>
    %19 = arith.truncf %18 : vector<16x256xf32> to vector<16x256xbf16>
    %c0_15 = arith.constant 0 : index
    %c0_16 = arith.constant 0 : index
    %20 = vector.load %arg7[%c0_15, %c0_16] : memref<16x256xbf16, #tpu.memory_space<vmem>>, vector<16x256xbf16>
    tpu.vector_store %arg7[%c0_15, %c0_16], %19 {strides = array<i32>} : memref<16x256xbf16, #tpu.memory_space<vmem>>, vector<16x256xbf16>,
    return
  }
  func.func @transform_0(%arg0: i32) -> (i32, i32) {
    %c0_i32 = arith.constant 0 : i32
    %c0_i32_0 = arith.constant 0 : i32
    return %arg0, %c0_i32 : i32, i32
  }
  func.func @transform_1(%arg0: i32) -> (i32, i32) {
    %c0_i32 = arith.constant 0 : i32
    %c0_i32_0 = arith.constant 0 : i32
    return %arg0, %c0_i32 : i32, i32
  }
  func.func @transform_2(%arg0: i32) -> (i32, i32) {
    %c0_i32 = arith.constant 0 : i32
    %c0_i32_0 = arith.constant 0 : i32
    return %arg0, %c0_i32 : i32, i32
  }
  func.func @transform_3(%arg0: i32) -> (i32, i32) {
    %c0_i32 = arith.constant 0 : i32
    %c0_i32_0 = arith.constant 0 : i32
    %c0_i32_1 = arith.constant 0 : i32
    return %c0_i32, %c0_i32_0 : i32, i32
  }
  func.func @transform_4(%arg0: i32) -> (i32, i32) {
    %c0_i32 = arith.constant 0 : i32
    %c0_i32_0 = arith.constant 0 : i32
    %c0_i32_1 = arith.constant 0 : i32
    return %c0_i32, %c0_i32_0 : i32, i32
  }
  func.func @transform_5(%arg0: i32) -> (i32, i32) {
    %c0_i32 = arith.constant 0 : i32
    %c0_i32_0 = arith.constant 0 : i32
    %c0_i32_1 = arith.constant 0 : i32
    return %c0_i32, %c0_i32_0 : i32, i32
  }
  func.func @transform_6(%arg0: i32) -> (i32, i32) {
    %c0_i32 = arith.constant 0 : i32
    %c0_i32_0 = arith.constant 0 : i32
    return %arg0, %c0_i32 : i32, i32
  }
}

module attributes {stable_mosaic.version = 11 : i64} {
  func.func @_sa_concat_kernel(%arg0: i32, %arg1: memref<128x3xf32, #tpu.memory_space<vmem>>, %arg2: memref<128x256xbf16, #tpu.memory_space<vmem>>, %arg3: memref<16x3xf32, #tpu.memory_space<vmem>>, %arg4: memref<3x512xf32, #tpu.memory_space<vmem>>, %arg5: memref<256x512xbf16, #tpu.memory_space<vmem>>, %arg6: memref<1x512xf32, #tpu.memory_space<vmem>>, %arg7: memref<16x512xbf16, #tpu.memory_space<vmem>>) attributes {dimension_semantics = [#tpu.dimension_semantics<parallel>], iteration_bounds = array<i64: 2>, scalar_prefetch = 0 : i64, scratch_operands = 0 : i64, tpu.core_type = #tpu.core_type<tc>, window_params = [{transform_indices = @transform_0, window_bounds = array<i64: 128, 3>}, {transform_indices = @transform_1, window_bounds = array<i64: 128, 256>}, {transform_indices = @transform_2, window_bounds = array<i64: 16, 3>}, {pipeline_mode = #tpu.pipeline_mode<synchronous>, transform_indices = @transform_3, window_bounds = array<i64: 3, 512>}, {pipeline_mode = #tpu.pipeline_mode<synchronous>, transform_indices = @transform_4, window_bounds = array<i64: 256, 512>}, {pipeline_mode = #tpu.pipeline_mode<synchronous>, transform_indices = @transform_5, window_bounds = array<i64: 1, 512>}, {transform_indices = @transform_6, window_bounds = array<i64: 16, 512>}]} {
    %c0 = arith.constant 0 : index
    %c0_0 = arith.constant 0 : index
    %0 = vector.load %arg4[%c0, %c0_0] : memref<3x512xf32, #tpu.memory_space<vmem>>, vector<3x512xf32>
    %c0_1 = arith.constant 0 : index
    %c0_2 = arith.constant 0 : index
    %1 = vector.load %arg2[%c0_1, %c0_2] : memref<128x256xbf16, #tpu.memory_space<vmem>>, vector<128x256xbf16>
    %c0_3 = arith.constant 0 : index
    %c0_4 = arith.constant 0 : index
    %2 = vector.load %arg5[%c0_3, %c0_4] : memref<256x512xbf16, #tpu.memory_space<vmem>>, vector<256x512xbf16>
    %cst = arith.constant dense<0.000000e+00> : vector<128x512xf32>
    %3 = tpu.matmul %1, %2, %cst {dimension_numbers = #tpu.dot_dimension_numbers<[1], [0], [0], [1], [0, 0, 1, 1], [], []>} : vector<128x256xbf16>, vector<256x512xbf16>, vector<128x512xf32> -> vector<128x512xf32>
    %c0_5 = arith.constant 0 : index
    %c0_6 = arith.constant 0 : index
    %4 = vector.load %arg1[%c0_5, %c0_6] : memref<128x3xf32, #tpu.memory_space<vmem>>, vector<128x3xf32>
    %cst_7 = arith.constant dense<0.000000e+00> : vector<128x512xf32>
    %5 = tpu.matmul %4, %0, %cst_7 {dimension_numbers = #tpu.dot_dimension_numbers<[1], [0], [0], [1], [0, 0, 1, 1], [], []>} : vector<128x3xf32>, vector<3x512xf32>, vector<128x512xf32> -> vector<128x512xf32>
    %6 = arith.addf %3, %5 : vector<128x512xf32>
    %c0_8 = arith.constant 0 : index
    %c0_9 = arith.constant 0 : index
    %7 = vector.load %arg6[%c0_8, %c0_9] : memref<1x512xf32, #tpu.memory_space<vmem>>, vector<1x512xf32>
    %c0_10 = arith.constant 0 : index
    %c0_11 = arith.constant 0 : index
    %8 = vector.load %arg3[%c0_10, %c0_11] : memref<16x3xf32, #tpu.memory_space<vmem>>, vector<16x3xf32>
    %cst_12 = arith.constant dense<0.000000e+00> : vector<16x512xf32>
    %9 = tpu.matmul %8, %0, %cst_12 {dimension_numbers = #tpu.dot_dimension_numbers<[1], [0], [0], [1], [0, 0, 1, 1], [], []>} : vector<16x3xf32>, vector<3x512xf32>, vector<16x512xf32> -> vector<16x512xf32>
    %10 = vector.broadcast %7 : vector<1x512xf32> to vector<16x512xf32>
    %11 = arith.subf %10, %9 : vector<16x512xf32>
    %12 = vector.shape_cast %6 : vector<128x512xf32> to vector<16x8x512xf32>
    %13 = vector.shape_cast %11 : vector<16x512xf32> to vector<16x1x512xf32>
    %14 = vector.broadcast %13 : vector<16x1x512xf32> to vector<16x8x512xf32>
    %15 = arith.addf %12, %14 : vector<16x8x512xf32>
    %cst_13 = arith.constant 0.000000e+00 : f32
    %16 = vector.broadcast %cst_13 : f32 to vector<16x8x512xf32>
    %17 = arith.maximumf %15, %16 : vector<16x8x512xf32>
    %cst_14 = arith.constant dense<0xFF800000> : vector<16x512xf32>
    %18 = vector.multi_reduction <maximumf>, %17, %cst_14 [1] : vector<16x8x512xf32> to vector<16x512xf32>
    %19 = arith.truncf %18 : vector<16x512xf32> to vector<16x512xbf16>
    %c0_15 = arith.constant 0 : index
    %c0_16 = arith.constant 0 : index
    %20 = vector.load %arg7[%c0_15, %c0_16] : memref<16x512xbf16, #tpu.memory_space<vmem>>, vector<16x512xbf16>
    tpu.vector_store %arg7[%c0_15, %c0_16], %19 {strides = array<i32>} : memref<16x512xbf16, #tpu.memory_space<vmem>>, vector<16x512xbf16>,
    return
  }
  func.func @transform_0(%arg0: i32) -> (i32, i32) {
    %c0_i32 = arith.constant 0 : i32
    %c0_i32_0 = arith.constant 0 : i32
    return %arg0, %c0_i32 : i32, i32
  }
  func.func @transform_1(%arg0: i32) -> (i32, i32) {
    %c0_i32 = arith.constant 0 : i32
    %c0_i32_0 = arith.constant 0 : i32
    return %arg0, %c0_i32 : i32, i32
  }
  func.func @transform_2(%arg0: i32) -> (i32, i32) {
    %c0_i32 = arith.constant 0 : i32
    %c0_i32_0 = arith.constant 0 : i32
    return %arg0, %c0_i32 : i32, i32
  }
  func.func @transform_3(%arg0: i32) -> (i32, i32) {
    %c0_i32 = arith.constant 0 : i32
    %c0_i32_0 = arith.constant 0 : i32
    %c0_i32_1 = arith.constant 0 : i32
    return %c0_i32, %c0_i32_0 : i32, i32
  }
  func.func @transform_4(%arg0: i32) -> (i32, i32) {
    %c0_i32 = arith.constant 0 : i32
    %c0_i32_0 = arith.constant 0 : i32
    %c0_i32_1 = arith.constant 0 : i32
    return %c0_i32, %c0_i32_0 : i32, i32
  }
  func.func @transform_5(%arg0: i32) -> (i32, i32) {
    %c0_i32 = arith.constant 0 : i32
    %c0_i32_0 = arith.constant 0 : i32
    %c0_i32_1 = arith.constant 0 : i32
    return %c0_i32, %c0_i32_0 : i32, i32
  }
  func.func @transform_6(%arg0: i32) -> (i32, i32) {
    %c0_i32 = arith.constant 0 : i32
    %c0_i32_0 = arith.constant 0 : i32
    return %arg0, %c0_i32 : i32, i32
  }
}

module attributes {stable_mosaic.version = 11 : i64} {
  func.func @_tail_kernel(%arg0: i32, %arg1: memref<1x16x3xf32, #tpu.memory_space<vmem>>, %arg2: memref<1x16x512xbf16, #tpu.memory_space<vmem>>, %arg3: memref<3x1024xf32, #tpu.memory_space<vmem>>, %arg4: memref<512x1024xbf16, #tpu.memory_space<vmem>>, %arg5: memref<1x1024xf32, #tpu.memory_space<vmem>>, %arg6: memref<1024x512xbf16, #tpu.memory_space<vmem>>, %arg7: memref<1x512xf32, #tpu.memory_space<vmem>>, %arg8: memref<512x512xbf16, #tpu.memory_space<vmem>>, %arg9: memref<1x512xf32, #tpu.memory_space<vmem>>, %arg10: memref<1x1x512xf32, #tpu.memory_space<vmem>>) attributes {dimension_semantics = [#tpu.dimension_semantics<parallel>], iteration_bounds = array<i64: 2>, scalar_prefetch = 0 : i64, scratch_operands = 0 : i64, tpu.core_type = #tpu.core_type<tc>, window_params = [{transform_indices = @transform_0, window_bounds = array<i64: 1, 16, 3>}, {transform_indices = @transform_1, window_bounds = array<i64: 1, 16, 512>}, {pipeline_mode = #tpu.pipeline_mode<synchronous>, transform_indices = @transform_2, window_bounds = array<i64: 3, 1024>}, {pipeline_mode = #tpu.pipeline_mode<synchronous>, transform_indices = @transform_3, window_bounds = array<i64: 512, 1024>}, {pipeline_mode = #tpu.pipeline_mode<synchronous>, transform_indices = @transform_4, window_bounds = array<i64: 1, 1024>}, {pipeline_mode = #tpu.pipeline_mode<synchronous>, transform_indices = @transform_5, window_bounds = array<i64: 1024, 512>}, {pipeline_mode = #tpu.pipeline_mode<synchronous>, transform_indices = @transform_6, window_bounds = array<i64: 1, 512>}, {pipeline_mode = #tpu.pipeline_mode<synchronous>, transform_indices = @transform_7, window_bounds = array<i64: 512, 512>}, {pipeline_mode = #tpu.pipeline_mode<synchronous>, transform_indices = @transform_8, window_bounds = array<i64: 1, 512>}, {transform_indices = @transform_9, window_bounds = array<i64: 1, 1, 512>}]} {
    %c0 = arith.constant 0 : index
    %c0_0 = arith.constant 0 : index
    %c0_1 = arith.constant 0 : index
    %0 = vector.load %arg2[%c0, %c0_0, %c0_1] : memref<1x16x512xbf16, #tpu.memory_space<vmem>>, vector<1x16x512xbf16>
    %1 = vector.shape_cast %0 : vector<1x16x512xbf16> to vector<16x512xbf16>
    %c0_2 = arith.constant 0 : index
    %c0_3 = arith.constant 0 : index
    %2 = vector.load %arg4[%c0_2, %c0_3] : memref<512x1024xbf16, #tpu.memory_space<vmem>>, vector<512x1024xbf16>
    %cst = arith.constant dense<0.000000e+00> : vector<16x1024xf32>
    %3 = tpu.matmul %1, %2, %cst {dimension_numbers = #tpu.dot_dimension_numbers<[1], [0], [0], [1], [0, 0, 1, 1], [], []>} : vector<16x512xbf16>, vector<512x1024xbf16>, vector<16x1024xf32> -> vector<16x1024xf32>
    %c0_4 = arith.constant 0 : index
    %c0_5 = arith.constant 0 : index
    %c0_6 = arith.constant 0 : index
    %4 = vector.load %arg1[%c0_4, %c0_5, %c0_6] : memref<1x16x3xf32, #tpu.memory_space<vmem>>, vector<1x16x3xf32>
    %5 = vector.shape_cast %4 : vector<1x16x3xf32> to vector<16x3xf32>
    %c0_7 = arith.constant 0 : index
    %c0_8 = arith.constant 0 : index
    %6 = vector.load %arg3[%c0_7, %c0_8] : memref<3x1024xf32, #tpu.memory_space<vmem>>, vector<3x1024xf32>
    %cst_9 = arith.constant dense<0.000000e+00> : vector<16x1024xf32>
    %7 = tpu.matmul %5, %6, %cst_9 {dimension_numbers = #tpu.dot_dimension_numbers<[1], [0], [0], [1], [0, 0, 1, 1], [], []>} : vector<16x3xf32>, vector<3x1024xf32>, vector<16x1024xf32> -> vector<16x1024xf32>
    %8 = arith.addf %3, %7 : vector<16x1024xf32>
    %c0_10 = arith.constant 0 : index
    %c0_11 = arith.constant 0 : index
    %9 = vector.load %arg5[%c0_10, %c0_11] : memref<1x1024xf32, #tpu.memory_space<vmem>>, vector<1x1024xf32>
    %10 = vector.broadcast %9 : vector<1x1024xf32> to vector<16x1024xf32>
    %11 = arith.addf %8, %10 : vector<16x1024xf32>
    %cst_12 = arith.constant 0.000000e+00 : f32
    %12 = vector.broadcast %cst_12 : f32 to vector<16x1024xf32>
    %13 = arith.maximumf %11, %12 : vector<16x1024xf32>
    %14 = vector.shape_cast %13 : vector<16x1024xf32> to vector<1x16x1024xf32>
    %cst_13 = arith.constant dense<0xFF800000> : vector<1x1024xf32>
    %15 = vector.multi_reduction <maximumf>, %14, %cst_13 [1] : vector<1x16x1024xf32> to vector<1x1024xf32>
    %16 = arith.truncf %15 : vector<1x1024xf32> to vector<1x1024xbf16>
    %c0_14 = arith.constant 0 : index
    %c0_15 = arith.constant 0 : index
    %17 = vector.load %arg6[%c0_14, %c0_15] : memref<1024x512xbf16, #tpu.memory_space<vmem>>, vector<1024x512xbf16>
    %cst_16 = arith.constant dense<0.000000e+00> : vector<1x512xf32>
    %18 = tpu.matmul %16, %17, %cst_16 {dimension_numbers = #tpu.dot_dimension_numbers<[1], [0], [0], [1], [0, 0, 1, 1], [], []>} : vector<1x1024xbf16>, vector<1024x512xbf16>, vector<1x512xf32> -> vector<1x512xf32>
    %c0_17 = arith.constant 0 : index
    %c0_18 = arith.constant 0 : index
    %19 = vector.load %arg7[%c0_17, %c0_18] : memref<1x512xf32, #tpu.memory_space<vmem>>, vector<1x512xf32>
    %20 = arith.addf %18, %19 : vector<1x512xf32>
    %cst_19 = arith.constant 0.000000e+00 : f32
    %21 = vector.broadcast %cst_19 : f32 to vector<1x512xf32>
    %22 = arith.maximumf %20, %21 : vector<1x512xf32>
    %23 = arith.truncf %22 : vector<1x512xf32> to vector<1x512xbf16>
    %c0_20 = arith.constant 0 : index
    %c0_21 = arith.constant 0 : index
    %24 = vector.load %arg8[%c0_20, %c0_21] : memref<512x512xbf16, #tpu.memory_space<vmem>>, vector<512x512xbf16>
    %cst_22 = arith.constant dense<0.000000e+00> : vector<1x512xf32>
    %25 = tpu.matmul %23, %24, %cst_22 {dimension_numbers = #tpu.dot_dimension_numbers<[1], [0], [0], [1], [0, 0, 1, 1], [], []>} : vector<1x512xbf16>, vector<512x512xbf16>, vector<1x512xf32> -> vector<1x512xf32>
    %c0_23 = arith.constant 0 : index
    %c0_24 = arith.constant 0 : index
    %26 = vector.load %arg9[%c0_23, %c0_24] : memref<1x512xf32, #tpu.memory_space<vmem>>, vector<1x512xf32>
    %27 = arith.addf %25, %26 : vector<1x512xf32>
    %cst_25 = arith.constant 0.000000e+00 : f32
    %28 = vector.broadcast %cst_25 : f32 to vector<1x512xf32>
    %29 = arith.maximumf %27, %28 : vector<1x512xf32>
    %c0_26 = arith.constant 0 : index
    %c0_27 = arith.constant 0 : index
    %c0_28 = arith.constant 0 : index
    %30 = vector.load %arg10[%c0_26, %c0_27, %c0_28] : memref<1x1x512xf32, #tpu.memory_space<vmem>>, vector<1x1x512xf32>
    %31 = vector.shape_cast %30 : vector<1x1x512xf32> to vector<1x512xf32>
    %32 = vector.shape_cast %29 : vector<1x512xf32> to vector<1x1x512xf32>
    tpu.vector_store %arg10[%c0_26, %c0_27, %c0_28], %32 {strides = array<i32>} : memref<1x1x512xf32, #tpu.memory_space<vmem>>, vector<1x1x512xf32>,
    return
  }
  func.func @transform_0(%arg0: i32) -> (i32, i32, i32) {
    %c0_i32 = arith.constant 0 : i32
    %c0_i32_0 = arith.constant 0 : i32
    %c0_i32_1 = arith.constant 0 : i32
    return %arg0, %c0_i32, %c0_i32_0 : i32, i32, i32
  }
  func.func @transform_1(%arg0: i32) -> (i32, i32, i32) {
    %c0_i32 = arith.constant 0 : i32
    %c0_i32_0 = arith.constant 0 : i32
    %c0_i32_1 = arith.constant 0 : i32
    return %arg0, %c0_i32, %c0_i32_0 : i32, i32, i32
  }
  func.func @transform_2(%arg0: i32) -> (i32, i32) {
    %c0_i32 = arith.constant 0 : i32
    %c0_i32_0 = arith.constant 0 : i32
    %c0_i32_1 = arith.constant 0 : i32
    return %c0_i32, %c0_i32_0 : i32, i32
  }
  func.func @transform_3(%arg0: i32) -> (i32, i32) {
    %c0_i32 = arith.constant 0 : i32
    %c0_i32_0 = arith.constant 0 : i32
    %c0_i32_1 = arith.constant 0 : i32
    return %c0_i32, %c0_i32_0 : i32, i32
  }
  func.func @transform_4(%arg0: i32) -> (i32, i32) {
    %c0_i32 = arith.constant 0 : i32
    %c0_i32_0 = arith.constant 0 : i32
    %c0_i32_1 = arith.constant 0 : i32
    return %c0_i32, %c0_i32_0 : i32, i32
  }
  func.func @transform_5(%arg0: i32) -> (i32, i32) {
    %c0_i32 = arith.constant 0 : i32
    %c0_i32_0 = arith.constant 0 : i32
    %c0_i32_1 = arith.constant 0 : i32
    return %c0_i32, %c0_i32_0 : i32, i32
  }
  func.func @transform_6(%arg0: i32) -> (i32, i32) {
    %c0_i32 = arith.constant 0 : i32
    %c0_i32_0 = arith.constant 0 : i32
    %c0_i32_1 = arith.constant 0 : i32
    return %c0_i32, %c0_i32_0 : i32, i32
  }
  func.func @transform_7(%arg0: i32) -> (i32, i32) {
    %c0_i32 = arith.constant 0 : i32
    %c0_i32_0 = arith.constant 0 : i32
    %c0_i32_1 = arith.constant 0 : i32
    return %c0_i32, %c0_i32_0 : i32, i32
  }
  func.func @transform_8(%arg0: i32) -> (i32, i32) {
    %c0_i32 = arith.constant 0 : i32
    %c0_i32_0 = arith.constant 0 : i32
    %c0_i32_1 = arith.constant 0 : i32
    return %c0_i32, %c0_i32_0 : i32, i32
  }
  func.func @transform_9(%arg0: i32) -> (i32, i32, i32) {
    %c0_i32 = arith.constant 0 : i32
    %c0_i32_0 = arith.constant 0 : i32
    %c0_i32_1 = arith.constant 0 : i32
    return %arg0, %c0_i32, %c0_i32_0 : i32, i32, i32
  }
}

</mosaic_0001>

<bundles_post_ra>
// kernel: neg.4
= control target key start
LH: loop header
LB: loop body
LE: loop exit
PB: predicated region body
PF: predicated region fallthrough
CT: control target
= control target key end

     0   :  { %s136_s0 = inlined_call_operand.vmem [shape: f32[2,32,64], index: 0, kind: input, shape index: {}]   ;;  %s137_s1 = inlined_call_operand.vmem [shape: f32[2,32,64], index: 1, kind: output, shape index: {}]  }
   0x1   :  { %v2_v0 = vld [vmem:[%s136_s0] sm:$0xff]  ;;  %v66_v2 = vld [vmem:[%s136_s0 + $0x8] sm:$0xff]  ;;  %v70_v7 = vld [vmem:[%s136_s0 + $0x10] sm:$0xff] }
   0x2   :  { %v64_v1 = vld [vmem:[%s136_s0 + $0x20] sm:$0xff]  ;;  %v5_v3 = vxor.u32 2147483648, %v2_v0  ;;  %v20_v5 = vxor.u32 2147483648, %v66_v2  ;;  %v68_v6 = vld [vmem:[%s136_s0 + $0x28] sm:$0xff]  ;;  %v72_v8 = vld [vmem:[%s136_s0 + $0x30] sm:$0xff]  ;;  %v36_v11 = vxor.u32 2147483648, %v70_v7 }
   0x3   :  { %v12_v4 = vxor.u32 2147483648, %v64_v1  ;;  %v28_v9 = vxor.u32 2147483648, %v68_v6  ;;  %v74_v10 = vld [vmem:[%s136_s0 + $0x18] sm:$0xff]  ;;  %v44_v13 = vxor.u32 2147483648, %v72_v8 }
   0x4   :  { %7 = vst [vmem:[%s137_s1] sm:$0xff] %v5_v3  ;;  %v76_v12 = vld [vmem:[%s136_s0 + $0x38] sm:$0xff]  ;;  %v52_v14 = vxor.u32 2147483648, %v74_v10 }
   0x5   :  { %65 = vst [vmem:[%s137_s1 + $0x20] sm:$0xff] %v12_v4  ;;  %v60_v15 = vxor.u32 2147483648, %v76_v12 }
   0x6   :  { %67 = vst [vmem:[%s137_s1 + $0x8] sm:$0xff] %v20_v5 }
   0x7   :  { %69 = vst [vmem:[%s137_s1 + $0x28] sm:$0xff] %v28_v9 }
   0x8   :  { %71 = vst [vmem:[%s137_s1 + $0x10] sm:$0xff] %v36_v11 }
   0x9   :  { %73 = vst [vmem:[%s137_s1 + $0x30] sm:$0xff] %v44_v13 }
   0xa   :  { %75 = vst [vmem:[%s137_s1 + $0x18] sm:$0xff] %v52_v14 }
   0xb   :  { %77 = vst [vmem:[%s137_s1 + $0x38] sm:$0xff] %v60_v15 }

// kernel: neg.3
= control target key start
LH: loop header
LB: loop body
LE: loop exit
PB: predicated region body
PF: predicated region fallthrough
CT: control target
= control target key end

     0   :  { %s264_s0 = inlined_call_operand.vmem [shape: f32[2,64,128], index: 0, kind: input, shape index: {}]   ;;  %s265_s1 = inlined_call_operand.vmem [shape: f32[2,64,128], index: 1, kind: output, shape index: {}]  }
   0x1   :  { %v2_v0 = vld [vmem:[%s264_s0] sm:$0xff]  ;;  %v130_v2 = vld [vmem:[%s264_s0 + $0x8] sm:$0xff]  ;;  %v134_v7 = vld [vmem:[%s264_s0 + $0x10] sm:$0xff] }
   0x2   :  { %v128_v1 = vld [vmem:[%s264_s0 + $0x40] sm:$0xff]  ;;  %v5_v3 = vxor.u32 2147483648, %v2_v0  ;;  %v20_v5 = vxor.u32 2147483648, %v130_v2  ;;  %v132_v6 = vld [vmem:[%s264_s0 + $0x48] sm:$0xff]  ;;  %v136_v8 = vld [vmem:[%s264_s0 + $0x50] sm:$0xff]  ;;  %v36_v11 = vxor.u32 2147483648, %v134_v7 }
   0x3   :  { %v12_v4 = vxor.u32 2147483648, %v128_v1  ;;  %v28_v9 = vxor.u32 2147483648, %v132_v6  ;;  %v138_v10 = vld [vmem:[%s264_s0 + $0x18] sm:$0xff]  ;;  %v44_v13 = vxor.u32 2147483648, %v136_v8  ;;  %v142_v14 = vld [vmem:[%s264_s0 + $0x20] sm:$0xff]  ;;  %v146_v18 = vld [vmem:[%s264_s0 + $0x28] sm:$0xff] }
   0x4   :  { %7 = vst [vmem:[%s265_s1] sm:$0xff] %v5_v3  ;;  %v140_v12 = vld [vmem:[%s264_s0 + $0x58] sm:$0xff]  ;;  %v52_v15 = vxor.u32 2147483648, %v138_v10  ;;  %v144_v16 = vld [vmem:[%s264_s0 + $0x60] sm:$0xff]  ;;  %v68_v19 = vxor.u32 2147483648, %v142_v14  ;;  %v148_v20 = vld [vmem:[%s264_s0 + $0x68] sm:$0xff]  ;;  %v84_v23 = vxor.u32 2147483648, %v146_v18 }
   0x5   :  { %129 = vst [vmem:[%s265_s1 + $0x40] sm:$0xff] %v12_v4  ;;  %v60_v17 = vxor.u32 2147483648, %v140_v12  ;;  %v76_v21 = vxor.u32 2147483648, %v144_v16  ;;  %v150_v22 = vld [vmem:[%s264_s0 + $0x30] sm:$0xff]  ;;  %v92_v25 = vxor.u32 2147483648, %v148_v20  ;;  %v154_v26 = vld [vmem:[%s264_s0 + $0x38] sm:$0xff] }
   0x6   :  { %131 = vst [vmem:[%s265_s1 + $0x8] sm:$0xff] %v20_v5  ;;  %v152_v24 = vld [vmem:[%s264_s0 + $0x70] sm:$0xff]  ;;  %v100_v27 = vxor.u32 2147483648, %v150_v22  ;;  %v156_v28 = vld [vmem:[%s264_s0 + $0x78] sm:$0xff]  ;;  %v116_v30 = vxor.u32 2147483648, %v154_v26 }
   0x7   :  { %133 = vst [vmem:[%s265_s1 + $0x48] sm:$0xff] %v28_v9  ;;  %v108_v29 = vxor.u32 2147483648, %v152_v24  ;;  %v124_v31 = vxor.u32 2147483648, %v156_v28 }
   0x8   :  { %135 = vst [vmem:[%s265_s1 + $0x10] sm:$0xff] %v36_v11 }
   0x9   :  { %137 = vst [vmem:[%s265_s1 + $0x50] sm:$0xff] %v44_v13 }
   0xa   :  { %139 = vst [vmem:[%s265_s1 + $0x18] sm:$0xff] %v52_v15 }
   0xb   :  { %141 = vst [vmem:[%s265_s1 + $0x58] sm:$0xff] %v60_v17 }
   0xc   :  { %143 = vst [vmem:[%s265_s1 + $0x20] sm:$0xff] %v68_v19 }
   0xd   :  { %145 = vst [vmem:[%s265_s1 + $0x60] sm:$0xff] %v76_v21 }
   0xe   :  { %147 = vst [vmem:[%s265_s1 + $0x28] sm:$0xff] %v84_v23 }
   0xf   :  { %149 = vst [vmem:[%s265_s1 + $0x68] sm:$0xff] %v92_v25 }
  0x10   :  { %151 = vst [vmem:[%s265_s1 + $0x30] sm:$0xff] %v100_v27 }
  0x11   :  { %153 = vst [vmem:[%s265_s1 + $0x70] sm:$0xff] %v108_v29 }
  0x12   :  { %155 = vst [vmem:[%s265_s1 + $0x38] sm:$0xff] %v116_v30 }
  0x13   :  { %157 = vst [vmem:[%s265_s1 + $0x78] sm:$0xff] %v124_v31 }

// kernel: rscnn_forward.4
= control target key start
LH: loop header
LB: loop body
LE: loop exit
PB: predicated region body
PF: predicated region fallthrough
CT: control target
= control target key end

     0   :  { %s1182_s15 = smov 0   ;;  %s1421_s0 = inlined_call_operand.vmem [shape: f32[1024,3], index: 0, kind: input, shape index: {}]   ;;  %s1422_s1 = inlined_call_operand.vmem [shape: f32[128,3], index: 1, kind: input, shape index: {}]   ;;  %s1423_s2 = inlined_call_operand.vmem [shape: f32[3,128], index: 2, kind: input, shape index: {}]   ;;  %s1424_s3 = inlined_call_operand.vmem [shape: f32[1,128], index: 3, kind: input, shape index: {}]   ;;  %s1425_s4 = inlined_call_operand.vmem [shape: bf16[128,128], index: 4, kind: output, shape index: {}]  }
   0x1 LB: > { %s1086_s16 = sadd.s32 4294967295, %s1155_s15   ;;  %p1090_p0 = scmp.ge.s32.totalorder %s1155_s15, 1  ;;  %s1155_s15 = sphi %s1182_s15, %s14_s15  }
   0x2   : > { %p174_p1 = scmp.lt.s32.totalorder %s1155_s15, 5 }
   0x4   : > { %p175_p2 = pnand %p1090_p0, %p174_p1 }
   0x5   : > { %s1091_s19 = sshll.u32 (!%p175_p2), %s1086_s16, 5  ;;  %s1093_s24 = sshll.u32 (!%p175_p2), %s1086_s16, 2 }
   0x6   : > { %178 = sbr.rel (%p175_p2) target bundleno = 297 (0x129), region = 36  ;;  %p206_p3 = scmp.lt.s32.totalorder (!%p175_p2), %s1091_s19, 127 }
   0x7   : > { %p212_p4 = scmp.lt.s32.totalorder (!%p175_p2), %s1093_s24, 15 }
   0xb   : > { %v223_v0 = vld [vmem:[%s1423_s2] sm:$0x7]  ;;  %vm353_vm0 = vcmask 1042432   ;;  %s1427_s19 = smov (!%p206_p3, %s1091_s19), 127  ;;  %vm256_vm1 = vcmask 23552   ;;  %s1429_s24 = smov (!%p212_p4, %s1093_s24), 15 }
   0xc   : > { %1097 = vmatpush.msk.msra.mxu0 %vm353_vm0, %v223_v0  ;;  %1137 = vmatpush.msk.msra.mxu1 %vm353_vm0, %v223_v0  ;;  %s1092_s20 = sshll.u32 %s1427_s19, 3  ;;  %s1094_s25 = sshll.u32 %s1429_s24, 3  ;;  %v1297_v51 = vld [vmem:[%s1424_s3] ss:$0 sm:$0xff]  ;;  %vm971_vm2 = vcmask 1041409   ;;  %vm973_vm3 = vcmask 1042434  }
   0xd   : > { %1138 = vmatpush.msk.msra.mxu2 %vm353_vm0, %v223_v0  ;;  %1139 = vmatpush.msk.msra.mxu3 %vm353_vm0, %v223_v0  ;;  %s1198_s23 = scalar_lea.vmem %s1421_s0, %s1092_s20  ;;  %s215_s28 = scalar_lea.vmem %s1422_s1, %s1094_s25  ;;  %vm975_vm4 = vcmask 1043459   ;;  %vm977_vm5 = vcmask 1044484   ;;  %vm979_vm6 = vcmask 1045509   ;;  %vm981_vm7 = vcmask 1046534  }
   0xe   : > { %1130 = vmatpush.msk.msrb.mxu1 %vm353_vm0, %v223_v0  ;;  %v224_v1 = vld [vmem:[%s1198_s23] sm:$0xff]  ;;  %v233_v2 = vld [vmem:[%s1198_s23 + $0x48] sm:$0xff]  ;;  %v238_v3 = vld [vmem:[%s1198_s23 + $0x70] sm:$0xff]  ;;  %vm983_vm8 = vcmask 1047559   ;;  %s1096_s5 = sshll.u32 %s1429_s24, 2 }
   0xf   : > { %1098 = vmatmul.msk.f32.vlgmr.msra.gmra.mxu0 %vm256_vm1, %v224_v1  ;;  %1107 = vmatmul.msk.f32.vlgmr.msra.gmra.mxu1 %vm256_vm1, %v233_v2  ;;  %v247_v4 = vld [vmem:[%s1198_s23 + $0xb8] sm:$0xff]  ;;  %v225_v5 = vld [vmem:[%s1198_s23 + $0x8] sm:$0xff]  ;;  %v234_v6 = vld [vmem:[%s1198_s23 + $0x50] sm:$0xff]  ;;  %s1364_s8 = scalar_lea.vmem %s1425_s4, %s1096_s5 }
  0x10   : > { %1112 = vmatmul.msk.f32.vlgmr.msra.gmra.mxu2 %vm256_vm1, %v238_v3  ;;  %1121 = vmatmul.msk.f32.vlgmr.msra.gmra.mxu3 %vm256_vm1, %v247_v4  ;;  %v239_v7 = vld [vmem:[%s1198_s23 + $0x78] sm:$0xff]  ;;  %v248_v8 = vld [vmem:[%s1198_s23 + $0xc0] sm:$0xff]  ;;  %v226_v9 = vld [vmem:[%s1198_s23 + $0x10] sm:$0xff] }
  0x11   : > { %v235_v10 = vld [vmem:[%s1198_s23 + $0x58] sm:$0xff]  ;;  %v240_v11 = vld [vmem:[%s1198_s23 + $0x80] sm:$0xff]  ;;  %v249_v12 = vld [vmem:[%s1198_s23 + $0xc8] sm:$0xff] }
  0x12   : > { %v227_v13 = vld [vmem:[%s1198_s23 + $0x18] sm:$0xff]  ;;  %v236_v14 = vld [vmem:[%s1198_s23 + $0x60] sm:$0xff]  ;;  %v241_v15 = vld [vmem:[%s1198_s23 + $0x88] sm:$0xff] }
  0x13   : > { %v250_v16 = vld [vmem:[%s1198_s23 + $0xd0] sm:$0xff]  ;;  %v228_v17 = vld [vmem:[%s1198_s23 + $0x20] sm:$0xff]  ;;  %v237_v18 = vld [vmem:[%s1198_s23 + $0x68] sm:$0xff] }
  0x14   : > { %v242_v19 = vld [vmem:[%s1198_s23 + $0x90] sm:$0xff]  ;;  %v251_v20 = vld [vmem:[%s1198_s23 + $0xd8] sm:$0xff]  ;;  %v229_v21 = vld [vmem:[%s1198_s23 + $0x28] sm:$0xff] }
  0x15   : > { %v471_v22 = vld [vmem:[%s215_s28] sm:$0xff]  ;;  %v243_v23 = vld [vmem:[%s1198_s23 + $0x98] sm:$0xff]  ;;  %v230_v25 = vld [vmem:[%s1198_s23 + $0x30] sm:$0xff] }
  0x16   : > { %v252_v24 = vld [vmem:[%s1198_s23 + $0xe0] sm:$0xff]  ;;  %v472_v26 = vld [vmem:[%s215_s28 + $0x8] sm:$0xff]  ;;  %v231_v29 = vld [vmem:[%s1198_s23 + $0x38] sm:$0xff] }
  0x17   : > { %1099 = vmatmul.msk.f32.gmra.mxu0 %vm256_vm1, %v225_v5  ;;  %1108 = vmatmul.msk.f32.gmra.mxu1 %vm256_vm1, %v234_v6  ;;  %v244_v27 = vld [vmem:[%s1198_s23 + $0xa0] sm:$0xff]  ;;  %v253_v28 = vld [vmem:[%s1198_s23 + $0xe8] sm:$0xff]  ;;  %v473_v30 = vld [vmem:[%s215_s28 + $0x10] sm:$0xff] }
  0x18   : > { %1113 = vmatmul.msk.f32.gmra.mxu2 %vm256_vm1, %v239_v7  ;;  %1122 = vmatmul.msk.f32.gmra.mxu3 %vm256_vm1, %v248_v8  ;;  %v245_v31 = vld [vmem:[%s1198_s23 + $0xa8] sm:$0xff]  ;;  %v254_v32 = vld [vmem:[%s1198_s23 + $0xf0] sm:$0xff]  ;;  %v232_v33 = vld [vmem:[%s1198_s23 + $0x40] sm:$0xff] }
  0x19   : > { %v474_v34 = vld [vmem:[%s215_s28 + $0x18] sm:$0xff]  ;;  %v246_v35 = vld [vmem:[%s1198_s23 + $0xb0] sm:$0xff] }
  0x1a   : > { %v255_v36 = vld [vmem:[%s1198_s23 + $0xf8] sm:$0xff] }
  0x1f   : > { %1100 = vmatmul.msk.f32.gmra.mxu0 %vm256_vm1, %v226_v9  ;;  %1109 = vmatmul.msk.f32.gmra.mxu1 %vm256_vm1, %v235_v10 }
  0x20   : > { %1114 = vmatmul.msk.f32.gmra.mxu2 %vm256_vm1, %v240_v11  ;;  %1123 = vmatmul.msk.f32.gmra.mxu3 %vm256_vm1, %v249_v12 }
  0x27   : > { %1101 = vmatmul.msk.f32.gmra.mxu0 %vm256_vm1, %v227_v13  ;;  %1110 = vmatmul.msk.f32.gmra.mxu1 %vm256_vm1, %v236_v14 }
  0x28   : > { %1115 = vmatmul.msk.f32.gmra.mxu2 %vm256_vm1, %v241_v15  ;;  %1124 = vmatmul.msk.f32.gmra.mxu3 %vm256_vm1, %v250_v16 }
  0x2f   : > { %1102 = vmatmul.msk.f32.gmra.mxu0 %vm256_vm1, %v228_v17  ;;  %1111 = vmatmul.msk.f32.gmra.mxu1 %vm256_vm1, %v237_v18 }
  0x30   : > { %1116 = vmatmul.msk.f32.gmra.mxu2 %vm256_vm1, %v242_v19  ;;  %1125 = vmatmul.msk.f32.gmra.mxu3 %vm256_vm1, %v251_v20 }
  0x37   : > { %1103 = vmatmul.msk.f32.gmra.mxu0 %vm256_vm1, %v229_v21  ;;  %1131 = vmatmul.msk.f32.vlgmr.msrb.gmra.mxu1 %vm256_vm1, %v471_v22 }
  0x38   : > { %1117 = vmatmul.msk.f32.gmra.mxu2 %vm256_vm1, %v243_v23  ;;  %1126 = vmatmul.msk.f32.gmra.mxu3 %vm256_vm1, %v252_v24 }
  0x3f   : > { %1104 = vmatmul.msk.f32.gmra.mxu0 %vm256_vm1, %v230_v25  ;;  %1132 = vmatmul.msk.f32.gmra.mxu1 %vm256_vm1, %v472_v26 }
  0x40   : > { %1118 = vmatmul.msk.f32.gmra.mxu2 %vm256_vm1, %v244_v27  ;;  %1127 = vmatmul.msk.f32.gmra.mxu3 %vm256_vm1, %v253_v28 }
  0x47   : > { %1105 = vmatmul.msk.f32.gmra.mxu0 %vm256_vm1, %v231_v29  ;;  %1133 = vmatmul.msk.f32.gmra.mxu1 %vm256_vm1, %v473_v30 }
  0x48   : > { %1119 = vmatmul.msk.f32.gmra.mxu2 %vm256_vm1, %v245_v31  ;;  %1128 = vmatmul.msk.f32.gmra.mxu3 %vm256_vm1, %v254_v32 }
  0x4f   : > { %1106 = vmatmul.msk.f32.gmra.mxu0 %vm256_vm1, %v232_v33  ;;  %1134 = vmatmul.msk.f32.gmra.mxu1 %vm256_vm1, %v474_v34 }
  0x50   : > { %1120 = vmatmul.msk.f32.gmra.mxu2 %vm256_vm1, %v246_v35  ;;  %1129 = vmatmul.msk.f32.gmra.mxu3 %vm256_vm1, %v255_v36 }
  0x8c   : > { %v374_v37 = vpop.f32.mrf.mxu0  ;;  %v1276_v38 = vpop.f32.mrf.mxu1 }
  0x93   : > { %v1278_v39 = vpop.f32.mrf.mxu2  ;;  %v1299_v54 = vpop.f32.mrf.mxu3 }
  0x94   : > { %v377_v40 = vpop.f32.mrf.mxu0  ;;  %v1280_v41 = vpop.f32.mrf.mxu1 }
  0x9b   : > { %v1282_v42 = vpop.f32.mrf.mxu2  ;;  %v1304_v23 = vpop.f32.mrf.mxu3 }
  0x9c   : > { %v380_v43 = vpop.f32.mrf.mxu0  ;;  %v1284_v44 = vpop.f32.mrf.mxu1 }
  0xa3   : > { %v1286_v45 = vpop.f32.mrf.mxu2 }
  0xa4   : > { %v383_v46 = vpop.f32.mrf.mxu0  ;;  %v1288_v47 = vpop.f32.mrf.mxu1 }
  0xab   : > { %v1292_v50 = vpop.f32.mrf.mxu2 }
  0xac   : > { %v386_v48 = vpop.f32.mrf.mxu0  ;;  %v1290_v49 = vpop.f32.mrf.mxu1 }
  0xb3   : > { %v1302_v60 = vpop.f32.mrf.mxu2 }
  0xb4   : > { %v389_v52 = vpop.f32.mrf.mxu0  ;;  %v504_v53 = vpop.f32.mrf.mxu1 }
  0xb5   : > { %v519_v55 = vsub.f32 %v1297_v51, %v504_v53 }
  0xb7   : > { %v527_v56 = vrot.slane %v519_v55, 1  ;;  %v528_v57 = vrot.slane %v519_v55, 2  ;;  %v529_v58 = vrot.slane %v519_v55, 3  ;;  %v555_v59 = vperm.slane %v519_v55, 0 }
  0xb8   : > { %v530_v61 = vrot.slane %v519_v55, 4  ;;  %v531_v62 = vrot.slane %v519_v55, 5  ;;  %v532_v63 = vrot.slane %v519_v55, 6  ;;  %v533_v22 = vrot.slane %v519_v55, 7 }
  0xb9   : > { %v556_v0 = vperm.slane %v527_v56, 0  ;;  %v557_v1 = vperm.slane %v528_v57, 0  ;;  %v558_v2 = vperm.slane %v529_v58, 0  ;;  %v619_v3 = vadd.f32 %v555_v59, %v374_v37 }
  0xba   : > { %v559_v4 = vperm.slane %v530_v61, 0  ;;  %v560_v5 = vperm.slane %v531_v62, 0  ;;  %v561_v6 = vperm.slane %v532_v63, 0 }
  0xbb   : > { %v620_v7 = vadd.f32 %v556_v0, %v377_v40  ;;  %v651_v8 = vmax.f32 %v619_v3, 0.0  ;;  %v621_v9 = vadd.f32 %v557_v1, %v380_v43  ;;  %v622_v10 = vadd.f32 %v558_v2, %v383_v46  ;;  %v1309_v36 = vpop.f32.mrf.mxu2 }
  0xbc   : > { %v392_v11 = vpop.f32.mrf.mxu0  ;;  %v623_v12 = vadd.f32 %v559_v4, %v386_v48  ;;  %v624_v13 = vadd.f32 %v560_v5, %v389_v52  ;;  %v507_v18 = vpop.f32.mrf.mxu1  ;;  %v562_v46 = vperm.slane %v533_v22, 0 }
  0xbd   : > { %v625_v14 = vadd.f32 %v561_v6, %v392_v11  ;;  %v652_v15 = vmax.f32 %v620_v7, 0.0  ;;  %v653_v16 = vmax.f32 %v621_v9, 0.0  ;;  %v654_v17 = vmax.f32 %v622_v10, 0.0 }
  0xbe   : > { %v655_v19 = vmax.f32 %v623_v12, 0.0  ;;  %v656_v20 = vmax.f32 %v624_v13, 0.0  ;;  %v683_v21 = vrot.slane %v651_v8, 4  ;;  %v1307_v31 = vsub.f32 %v1297_v51, %v507_v18  ;;  %v1314_v13 = vpop.f32.mrf.mxu3 }
  0xbf   : > { %v657_v24 = vmax.f32 %v625_v14, 0.0  ;;  %v689_v25 = vrot.slane %v652_v15, 4  ;;  %v695_v26 = vrot.slane %v653_v16, 4  ;;  %v701_v27 = vrot.slane %v654_v17, 4 }
  0xc0   : > { %v684_v28 = vmax.f32 %v651_v8, %v683_v21  ;;  %v707_v29 = vrot.slane %v655_v19, 4  ;;  %v713_v30 = vrot.slane %v656_v20, 4  ;;  %v537_v59 = vrot.slane %v1307_v31, 4 }
  0xc1   : > { %v690_v32 = vmax.f32 %v652_v15, %v689_v25  ;;  %v696_v33 = vmax.f32 %v653_v16, %v695_v26  ;;  %v702_v34 = vmax.f32 %v654_v17, %v701_v27  ;;  %v719_v35 = vrot.slane %v657_v24, 4 }
  0xc2   : > { %v685_v37 = vrot.slane %v684_v28, 2  ;;  %v708_v40 = vmax.f32 %v655_v19, %v707_v29  ;;  %v714_v43 = vmax.f32 %v656_v20, %v713_v30  ;;  %v538_v4 = vrot.slane %v1307_v31, 5 }
  0xc3   : > { %v691_v48 = vrot.slane %v690_v32, 2  ;;  %v697_v52 = vrot.slane %v696_v33, 2  ;;  %v703_v53 = vrot.slane %v702_v34, 2  ;;  %v720_v55 = vmax.f32 %v657_v24, %v719_v35 }
  0xc4   : > { %v686_v56 = vmax.f32 %v684_v28, %v685_v37  ;;  %v709_v57 = vrot.slane %v708_v40, 2  ;;  %v715_v58 = vrot.slane %v714_v43, 2  ;;  %v539_v12 = vrot.slane %v1307_v31, 6 }
  0xc5   : > { %v692_v61 = vmax.f32 %v690_v32, %v691_v48  ;;  %v698_v62 = vmax.f32 %v696_v33, %v697_v52  ;;  %v704_v63 = vmax.f32 %v702_v34, %v703_v53  ;;  %v721_v0 = vrot.slane %v720_v55, 2  ;;  %v434_v32 = vpop.f32.mrf.mxu2  ;;  %v395_v33 = vpop.f32.mrf.mxu0 }
  0xc6   : > { %v687_v1 = vrot.slane %v686_v56, 1  ;;  %v710_v2 = vmax.f32 %v708_v40, %v709_v57  ;;  %v716_v3 = vmax.f32 %v714_v43, %v715_v58  ;;  %v540_v21 = vrot.slane %v1307_v31, 7  ;;  %v510_v43 = vpop.f32.mrf.mxu1 }
  0xc7   : > { %v693_v5 = vrot.slane %v692_v61, 1  ;;  %v699_v6 = vrot.slane %v698_v62, 1  ;;  %v705_v7 = vrot.slane %v704_v63, 1  ;;  %v722_v8 = vmax.f32 %v720_v55, %v721_v0 }
  0xc8   : > { %v688_v9 = vmax.f32 %v686_v56, %v687_v1  ;;  %v711_v10 = vrot.slane %v710_v2, 1  ;;  %v717_v11 = vrot.slane %v716_v3, 1  ;;  %v1317_v29 = vperm.slane %v537_v59, 0 }
  0xc9   : > { %v694_v14 = vmax.f32 %v692_v61, %v693_v5  ;;  %v700_v15 = vmax.f32 %v698_v62, %v699_v6  ;;  %v706_v16 = vmax.f32 %v704_v63, %v705_v7  ;;  %v723_v17 = vrot.slane %v722_v8, 1 }
  0xca   : > { %v712_v18 = vmax.f32 %v710_v2, %v711_v10  ;;  %v718_v19 = vmax.f32 %v716_v3, %v717_v11  ;;  %v875_v20 = vpack.c.bf16 %v688_v9, %v688_v9  ;;  %v569_v30 = vperm.slane %v539_v12, 0 }
  0xcb   : > { %v724_v22 = vmax.f32 %v722_v8, %v723_v17  ;;  %v876_v24 = vpack.c.bf16 %v694_v14, %v694_v14  ;;  %v877_v25 = vpack.c.bf16 %v700_v15, %v700_v15  ;;  %v878_v26 = vpack.c.bf16 %v706_v16, %v706_v16 }
  0xcc   : > { %v879_v27 = vpack.c.bf16 %v712_v18, %v712_v18  ;;  %v880_v28 = vpack.c.bf16 %v718_v19, %v718_v19  ;;  %v939_v35 = vunpack.c.l.b16 %v875_v20  ;;  %v1319_v53 = vperm.slane %v538_v4, 0 }
  0xcd   : > { %v881_v34 = vpack.c.bf16 %v724_v22, %v724_v22  ;;  %v940_v37 = vunpack.c.l.b16 %v876_v24  ;;  %v941_v40 = vunpack.c.l.b16 %v877_v25  ;;  %v942_v48 = vunpack.c.l.b16 %v878_v26  ;;  %v437_v20 = vpop.f32.mrf.mxu2 }
  0xce   : > { %v943_v52 = vunpack.c.l.b16 %v879_v27  ;;  %v570_v55 = vperm.slane %v540_v21, 0  ;;  %v944_v56 = vunpack.c.l.b16 %v880_v28  ;;  %v1323_v58 = vadd.f32 %v569_v30, %v1278_v39 }
  0xcf   : > { %v972_v57 = vsel %vm971_vm2, %v940_v37, %v939_v35  ;;  %v626_v59 = vadd.f32 %v562_v46, %v395_v33  ;;  %v945_v61 = vunpack.c.l.b16 %v881_v34  ;;  %v1330_v0 = vsub.f32 %v1297_v51, %v510_v43 }
  0xd0   : > { %v974_v62 = vsel %vm973_vm3, %v941_v40, %v972_v57  ;;  %v1327_v63 = vadd.f32 %v570_v55, %v1282_v42  ;;  %v534_v3 = vrot.slane %v1307_v31, 1  ;;  %v535_v4 = vrot.slane %v1307_v31, 2  ;;  %v1339_v42 = vpop.f32.mrf.mxu3 }
  0xd1   : > { %v976_v1 = vsel %vm975_vm4, %v942_v48, %v974_v62  ;;  %v658_v2 = vmax.f32 %v626_v59, 0.0  ;;  %v541_v46 = vrot.slane %v1330_v0, 1  ;;  %v542_v5 = vrot.slane %v1330_v0, 2 }
  0xd2   : > { %v978_v39 = vsel %vm977_vm5, %v943_v52, %v976_v1  ;;  %v536_v6 = vrot.slane %v1307_v31, 3  ;;  %v571_v9 = vperm.slane %v1330_v0, 0  ;;  %v543_v10 = vrot.slane %v1330_v0, 3 }
  0xd3   : > { %v980_v7 = vsel %vm979_vm6, %v944_v56, %v978_v39  ;;  %v725_v8 = vrot.slane %v658_v2, 4  ;;  %v572_v12 = vperm.slane %v541_v46, 0  ;;  %v573_v14 = vperm.slane %v542_v5, 0 }
  0xd4   : > { %v1345_v11 = vsel %vm981_vm7, %v945_v61, %v980_v7  ;;  %v544_v15 = vrot.slane %v1330_v0, 4  ;;  %v545_v17 = vrot.slane %v1330_v0, 5  ;;  %v574_v18 = vperm.slane %v543_v10, 0  ;;  %v398_v61 = vpop.f32.mrf.mxu0 }
  0xd5   : > { %v726_v16 = vmax.f32 %v658_v2, %v725_v8  ;;  %v635_v19 = vadd.f32 %v571_v9, %v1286_v45  ;;  %v636_v22 = vadd.f32 %v572_v12, %v1292_v50  ;;  %v637_v24 = vadd.f32 %v573_v14, %v1302_v60 }
  0xd6   : > { %v575_v21 = vperm.slane %v544_v15, 0  ;;  %v563_v25 = vperm.slane %v1307_v31, 0  ;;  %v576_v27 = vperm.slane %v545_v17, 0  ;;  %v638_v28 = vadd.f32 %v574_v18, %v1309_v36 }
  0xd7   : > { %v727_v26 = vrot.slane %v726_v16, 2  ;;  %v667_v30 = vmax.f32 %v635_v19, 0.0  ;;  %v668_v34 = vmax.f32 %v636_v22, 0.0  ;;  %v669_v35 = vmax.f32 %v637_v24, 0.0 }
  0xd8   : > { %v639_v33 = vadd.f32 %v575_v21, %v434_v32  ;;  %v564_v37 = vperm.slane %v534_v3, 0  ;;  %v640_v45 = vadd.f32 %v576_v27, %v437_v20  ;;  %v670_v43 = vmax.f32 %v638_v28, 0.0  ;;  %v1354_v2 = vpop.f32.mrf.mxu3 }
  0xd9   : > { %v728_v40 = vmax.f32 %v726_v16, %v727_v26  ;;  %v779_v48 = vrot.slane %v667_v30, 4  ;;  %v785_v50 = vrot.slane %v668_v34, 4  ;;  %v791_v55 = vrot.slane %v669_v35, 4 }
  0xda   : > { %v671_v52 = vmax.f32 %v639_v33, 0.0  ;;  %v565_v60 = vperm.slane %v535_v4, 0  ;;  %v672_v31 = vmax.f32 %v640_v45, 0.0  ;;  %v797_v59 = vrot.slane %v670_v43, 4 }
  0xdb   : > { %v729_v56 = vrot.slane %v728_v40, 1  ;;  %v780_v57 = vmax.f32 %v667_v30, %v779_v48  ;;  %v786_v36 = vmax.f32 %v668_v34, %v785_v50  ;;  %v792_v62 = vmax.f32 %v669_v35, %v791_v55 }
  0xdc   : > { %v803_v32 = vrot.slane %v671_v52, 4  ;;  %v566_v1 = vperm.slane %v536_v6, 0  ;;  %v798_v46 = vmax.f32 %v670_v43, %v797_v59  ;;  %v809_v5 = vrot.slane %v672_v31, 4 }
  0xdd   : > { %v730_v3 = vmax.f32 %v728_v40, %v729_v56  ;;  %v781_v39 = vrot.slane %v780_v57, 2  ;;  %v787_v7 = vrot.slane %v786_v36, 2  ;;  %v793_v8 = vrot.slane %v792_v62, 2 }
  0xde   : > { %v804_v9 = vmax.f32 %v671_v52, %v803_v32  ;;  %v1356_v4 = vadd.f32 %v563_v25, %v398_v61  ;;  %v799_v14 = vrot.slane %v798_v46, 2  ;;  %v810_v15 = vmax.f32 %v672_v31, %v809_v5 }
  0xdf   : > { %v882_v10 = vpack.c.bf16 %v730_v3, %v730_v3  ;;  %v782_v12 = vmax.f32 %v780_v57, %v781_v39  ;;  %v788_v16 = vmax.f32 %v786_v36, %v787_v7  ;;  %v794_v17 = vmax.f32 %v792_v62, %v793_v8 }
  0xe0   : > { %v805_v18 = vrot.slane %v804_v9, 2  ;;  %v628_v6 = vadd.f32 %v564_v37, %v1276_v38  ;;  %v800_v21 = vmax.f32 %v798_v46, %v799_v14  ;;  %v811_v22 = vrot.slane %v810_v15, 2 }
  0xe1   : > { %v946_v19 = vunpack.c.l.b16 %v882_v10  ;;  %v783_v20 = vrot.slane %v782_v12, 1  ;;  %v789_v24 = vrot.slane %v788_v16, 1  ;;  %v795_v26 = vrot.slane %v794_v17, 1 }
  0xe2   : > { %v806_v27 = vmax.f32 %v804_v9, %v805_v18  ;;  %v629_v25 = vadd.f32 %v565_v60, %v1280_v41  ;;  %v801_v38 = vrot.slane %v800_v21, 1  ;;  %v812_v33 = vmax.f32 %v810_v15, %v811_v22 }
  0xe3   : > { %v984_v28 = vsel %vm983_vm8, %v946_v19, %v1345_v11  ;;  %v784_v30 = vmax.f32 %v782_v12, %v783_v20  ;;  %v790_v35 = vmax.f32 %v788_v16, %v789_v24  ;;  %v796_v37 = vmax.f32 %v794_v17, %v795_v26  ;;  %v1372_v11 = vpop.f32.mrf.mxu3 }
  0xe4   : > { %v1006_v34 = vpack.c.b16 %v984_v28, %v984_v28  ;;  %v807_v40 = vrot.slane %v806_v27, 1  ;;  %v802_v45 = vmax.f32 %v800_v21, %v801_v38  ;;  %v813_v43 = vrot.slane %v812_v33, 1 }
  0xe5   : > { %v891_v48 = vpack.c.bf16 %v784_v30, %v784_v30  ;;  %v630_v41 = vadd.f32 %v566_v1, %v1284_v44  ;;  %v892_v50 = vpack.c.bf16 %v790_v35, %v790_v35  ;;  %v893_v55 = vpack.c.bf16 %v796_v37, %v796_v37 }
  0xe6   : > { %1014 = vst [vmem:[%s1364_s8] sm:$0xf] %v1006_v34  ;;  %v808_v52 = vmax.f32 %v806_v27, %v807_v40  ;;  %v631_v60 = vadd.f32 %v1317_v29, %v1288_v47  ;;  %v814_v56 = vmax.f32 %v812_v33, %v813_v43  ;;  %v894_v31 = vpack.c.bf16 %v802_v45, %v802_v45 }
  0xe7   : > { %v955_v57 = vunpack.c.l.b16 %v891_v48  ;;  %v632_v59 = vadd.f32 %v1319_v53, %v1290_v49  ;;  %v956_v36 = vunpack.c.l.b16 %v892_v50  ;;  %v957_v62 = vunpack.c.l.b16 %v893_v55 }
  0xe8   : > { %v895_v61 = vpack.c.bf16 %v808_v52, %v808_v52  ;;  %v659_v44 = vmax.f32 %v1356_v4, 0.0  ;;  %v666_v32 = vmax.f32 %v1327_v63, 0.0  ;;  %v896_v1 = vpack.c.bf16 %v814_v56, %v814_v56 }
  0xe9   : > { %v660_v3 = vmax.f32 %v628_v6, 0.0  ;;  %v661_v39 = vmax.f32 %v629_v25, 0.0  ;;  %v958_v46 = vunpack.c.l.b16 %v894_v31  ;;  %v992_v47 = vsel %vm971_vm2, %v956_v36, %v955_v57 }
  0xea   : > { %v662_v29 = vmax.f32 %v630_v41, 0.0  ;;  %v663_v5 = vmax.f32 %v631_v60, 0.0  ;;  %v959_v7 = vunpack.c.l.b16 %v895_v61  ;;  %v993_v8 = vsel %vm973_vm3, %v957_v62, %v992_v47 }
  0xeb   : > { %v664_v9 = vmax.f32 %v632_v59, 0.0  ;;  %v665_v49 = vmax.f32 %v1323_v58, 0.0  ;;  %v994_v53 = vsel %vm975_vm4, %v958_v46, %v993_v8  ;;  %v731_v10 = vrot.slane %v659_v44, 4  ;;  %v1383_v28 = vpop.f32.mrf.mxu3 }
  0xec   : > { %v737_v4 = vrot.slane %v660_v3, 4  ;;  %v743_v12 = vrot.slane %v661_v39, 4  ;;  %v960_v63 = vunpack.c.l.b16 %v896_v1  ;;  %v749_v14 = vrot.slane %v662_v29, 4 }
  0xed   : > { %v755_v15 = vrot.slane %v663_v5, 4  ;;  %v761_v16 = vrot.slane %v664_v9, 4  ;;  %v995_v17 = vsel %vm977_vm5, %v959_v7, %v994_v53  ;;  %v732_v18 = vmax.f32 %v659_v44, %v731_v10  ;;  %v513_v10 = vpop.f32.mrf.mxu1 }
  0xee   : > { %v738_v6 = vmax.f32 %v660_v3, %v737_v4  ;;  %v744_v19 = vmax.f32 %v661_v39, %v743_v12  ;;  %v750_v20 = vmax.f32 %v662_v29, %v749_v14  ;;  %v767_v24 = vrot.slane %v665_v49, 4 }
  0xef   : > { %v756_v21 = vmax.f32 %v663_v5, %v755_v15  ;;  %v762_v22 = vmax.f32 %v664_v9, %v761_v16  ;;  %v733_v26 = vrot.slane %v732_v18, 2  ;;  %v773_v25 = vrot.slane %v666_v32, 4 }
  0xf0   : > { %v739_v58 = vrot.slane %v738_v6, 2  ;;  %v745_v27 = vrot.slane %v744_v19, 2  ;;  %v751_v30 = vrot.slane %v750_v20, 2  ;;  %v768_v34 = vmax.f32 %v665_v49, %v767_v24 }
  0xf1   : > { %v757_v38 = vrot.slane %v756_v21, 2  ;;  %v763_v33 = vrot.slane %v762_v22, 2  ;;  %v734_v35 = vmax.f32 %v732_v18, %v733_v26  ;;  %v774_v45 = vmax.f32 %v666_v32, %v773_v25 }
  0xf2   : > { %v740_v37 = vmax.f32 %v738_v6, %v739_v58  ;;  %v746_v40 = vmax.f32 %v744_v19, %v745_v27  ;;  %v752_v43 = vmax.f32 %v750_v20, %v751_v30  ;;  %v769_v52 = vrot.slane %v768_v34, 2 }
  0xf3   : > { %v758_v48 = vmax.f32 %v756_v21, %v757_v38  ;;  %v764_v41 = vmax.f32 %v762_v22, %v763_v33  ;;  %v735_v50 = vrot.slane %v734_v35, 1  ;;  %v775_v56 = vrot.slane %v774_v45, 2  ;;  %v464_v16 = vpop.f32.mrf.mxu3 }
  0xf4   : > { %v741_v55 = vrot.slane %v740_v37, 1  ;;  %v747_v60 = vrot.slane %v746_v40, 1  ;;  %v753_v31 = vrot.slane %v752_v43, 1  ;;  %v770_v61 = vmax.f32 %v768_v34, %v769_v52 }
  0xf5   : > { %v759_v57 = vrot.slane %v758_v48, 1  ;;  %v765_v59 = vrot.slane %v764_v41, 1  ;;  %v736_v36 = vmax.f32 %v734_v35, %v735_v50  ;;  %v776_v1 = vmax.f32 %v774_v45, %v775_v56 }
  0xf6   : > { %v742_v62 = vmax.f32 %v740_v37, %v741_v55  ;;  %v748_v44 = vmax.f32 %v746_v40, %v747_v60  ;;  %v754_v3 = vmax.f32 %v752_v43, %v753_v31  ;;  %v771_v32 = vrot.slane %v770_v61, 1 }
  0xf7   : > { %v760_v39 = vmax.f32 %v758_v48, %v759_v57  ;;  %v766_v46 = vmax.f32 %v764_v41, %v765_v59  ;;  %v777_v47 = vrot.slane %v776_v1, 1  ;;  %v883_v29 = vpack.c.bf16 %v736_v36, %v736_v36  ;;  %v440_v48 = vpop.f32.mrf.mxu2 }
  0xf8   : > { %v884_v5 = vpack.c.bf16 %v742_v62, %v742_v62  ;;  %v885_v7 = vpack.c.bf16 %v748_v44, %v748_v44  ;;  %v772_v8 = vmax.f32 %v770_v61, %v771_v32  ;;  %v886_v9 = vpack.c.bf16 %v754_v3, %v754_v3 }
  0xf9   : > { %v887_v49 = vpack.c.bf16 %v760_v39, %v760_v39  ;;  %v888_v53 = vpack.c.bf16 %v766_v46, %v766_v46  ;;  %v1386_v4 = vsel %vm979_vm6, %v960_v63, %v995_v17  ;;  %v778_v12 = vmax.f32 %v776_v1, %v777_v47 }
  0xfa   : > { %v947_v14 = vunpack.c.l.b16 %v883_v29  ;;  %v948_v15 = vunpack.c.l.b16 %v884_v5  ;;  %v889_v18 = vpack.c.bf16 %v772_v8, %v772_v8  ;;  %v949_v6 = vunpack.c.l.b16 %v885_v7 }
  0xfb   : > { %v950_v19 = vunpack.c.l.b16 %v886_v9  ;;  %v951_v20 = vunpack.c.l.b16 %v887_v49  ;;  %v890_v21 = vpack.c.bf16 %v778_v12, %v778_v12  ;;  %v522_v24 = vsub.f32 %v1297_v51, %v513_v10 }
  0xfc   : > { %v985_v22 = vsel %vm971_vm2, %v948_v15, %v947_v14  ;;  %v546_v26 = vrot.slane %v1330_v0, 6  ;;  %v952_v58 = vunpack.c.l.b16 %v888_v53  ;;  %v953_v27 = vunpack.c.l.b16 %v889_v18 }
  0xfd   : > { %v986_v63 = vsel %vm973_vm3, %v949_v6, %v985_v22  ;;  %v547_v17 = vrot.slane %v1330_v0, 7  ;;  %v954_v25 = vunpack.c.l.b16 %v890_v21  ;;  %v548_v38 = vrot.slane %v522_v24, 1 }
  0xfe   : > { %v987_v30 = vsel %vm975_vm4, %v950_v19, %v986_v63  ;;  %v549_v33 = vrot.slane %v522_v24, 2  ;;  %v550_v35 = vrot.slane %v522_v24, 3  ;;  %v551_v37 = vrot.slane %v522_v24, 4 }
  0xff   : > { %v988_v34 = vsel %vm977_vm5, %v951_v20, %v987_v30  ;;  %v579_v40 = vperm.slane %v522_v24, 0  ;;  %v580_v45 = vperm.slane %v548_v38, 0  ;;  %v577_v41 = vperm.slane %v546_v26, 0 }
 0x100   : > { %v989_v51 = vsel %vm979_vm6, %v952_v58, %v988_v34  ;;  %v581_v43 = vperm.slane %v549_v33, 0  ;;  %v582_v0 = vperm.slane %v550_v35, 0  ;;  %v583_v50 = vperm.slane %v551_v37, 0 }
 0x101   : > { %v990_v52 = vsel %vm981_vm7, %v953_v27, %v989_v51  ;;  %v643_v55 = vadd.f32 %v579_v40, %v1304_v23  ;;  %v644_v56 = vadd.f32 %v580_v45, %v1314_v13  ;;  %v578_v57 = vperm.slane %v547_v17, 0  ;;  %v467_v23 = vpop.f32.mrf.mxu3 }
 0x102   : > { %v991_v60 = vsel %vm983_vm8, %v954_v25, %v990_v52  ;;  %v645_v31 = vadd.f32 %v581_v43, %v1339_v42  ;;  %v641_v36 = vadd.f32 %v577_v41, %v440_v48  ;;  %v552_v62 = vrot.slane %v522_v24, 5 }
 0x103   : > { %v1007_v59 = vpack.c.b16 %v991_v60, %v991_v60  ;;  %v675_v61 = vmax.f32 %v643_v55, 0.0  ;;  %v676_v44 = vmax.f32 %v644_v56, 0.0  ;;  %v642_v1 = vadd.f32 %v578_v57, %v1299_v54 }
 0x104   : > { %v553_v3 = vrot.slane %v522_v24, 6  ;;  %v554_v39 = vrot.slane %v522_v24, 7  ;;  %v673_v32 = vmax.f32 %v641_v36, 0.0  ;;  %v584_v47 = vperm.slane %v552_v62, 0 }
 0x105   : > { %1015 = vst [vmem:[%s1364_s8 + $0x4] sm:$0xf] %v1007_v59  ;;  %v827_v46 = vrot.slane %v675_v61, 4  ;;  %v646_v29 = vadd.f32 %v582_v0, %v1354_v2  ;;  %v674_v13 = vmax.f32 %v642_v1, 0.0  ;;  %v647_v7 = vadd.f32 %v583_v50, %v1372_v11 }
 0x106   : > { %v585_v5 = vperm.slane %v553_v3, 0  ;;  %v586_v42 = vperm.slane %v554_v39, 0  ;;  %v815_v8 = vrot.slane %v673_v32, 4  ;;  %v648_v9 = vadd.f32 %v584_v47, %v1383_v28 }
 0x107   : > { %v677_v49 = vmax.f32 %v645_v31, 0.0  ;;  %v678_v53 = vmax.f32 %v646_v29, 0.0  ;;  %v821_v54 = vrot.slane %v674_v13, 4  ;;  %v679_v14 = vmax.f32 %v647_v7, 0.0 }
 0x108   : > { %v649_v10 = vadd.f32 %v585_v5, %v464_v16  ;;  %v650_v12 = vadd.f32 %v586_v42, %v467_v23  ;;  %v816_v15 = vmax.f32 %v673_v32, %v815_v8  ;;  %v680_v18 = vmax.f32 %v648_v9, 0.0 }
 0x109   : > { %v828_v6 = vmax.f32 %v675_v61, %v827_v46  ;;  %v833_v19 = vrot.slane %v676_v44, 4  ;;  %v822_v20 = vmax.f32 %v674_v13, %v821_v54  ;;  %v839_v22 = vrot.slane %v677_v49, 4 }
 0x10a   : > { %v681_v2 = vmax.f32 %v649_v10, 0.0  ;;  %v682_v21 = vmax.f32 %v650_v12, 0.0  ;;  %v817_v24 = vrot.slane %v816_v15, 2  ;;  %v845_v58 = vrot.slane %v678_v53, 4 }
 0x10b   : > { %v829_v26 = vrot.slane %v828_v6, 2  ;;  %v834_v11 = vmax.f32 %v676_v44, %v833_v19  ;;  %v823_v27 = vrot.slane %v822_v20, 2  ;;  %v840_v28 = vmax.f32 %v677_v49, %v839_v22 }
 0x10c   : > { %v851_v63 = vrot.slane %v679_v14, 4  ;;  %v857_v17 = vrot.slane %v680_v18, 4  ;;  %v818_v25 = vmax.f32 %v816_v15, %v817_v24  ;;  %v846_v38 = vmax.f32 %v678_v53, %v845_v58 }
 0x10d   : > { %v830_v16 = vmax.f32 %v828_v6, %v829_v26  ;;  %v835_v30 = vrot.slane %v834_v11, 2  ;;  %v824_v33 = vmax.f32 %v822_v20, %v823_v27  ;;  %v841_v34 = vrot.slane %v840_v28, 2 }
 0x10e   : > { %v852_v35 = vmax.f32 %v679_v14, %v851_v63  ;;  %v858_v37 = vmax.f32 %v680_v18, %v857_v17  ;;  %v819_v40 = vrot.slane %v818_v25, 1  ;;  %v847_v43 = vrot.slane %v846_v38, 2 }
 0x10f   : > { %v831_v51 = vrot.slane %v830_v16, 1  ;;  %v836_v45 = vmax.f32 %v834_v11, %v835_v30  ;;  %v825_v48 = vrot.slane %v824_v33, 1  ;;  %v842_v41 = vmax.f32 %v840_v28, %v841_v34 }
 0x110   : > { %v853_v52 = vrot.slane %v852_v35, 2  ;;  %v859_v0 = vrot.slane %v858_v37, 2  ;;  %v820_v50 = vmax.f32 %v818_v25, %v819_v40  ;;  %v848_v56 = vmax.f32 %v846_v38, %v847_v43 }
 0x111   : > { %v832_v55 = vmax.f32 %v830_v16, %v831_v51  ;;  %v837_v60 = vrot.slane %v836_v45, 1  ;;  %v826_v31 = vmax.f32 %v824_v33, %v825_v48  ;;  %v843_v57 = vrot.slane %v842_v41, 1 }
 0x112   : > { %v854_v59 = vmax.f32 %v852_v35, %v853_v52  ;;  %v860_v61 = vmax.f32 %v858_v37, %v859_v0  ;;  %v897_v36 = vpack.c.bf16 %v820_v50, %v820_v50  ;;  %v849_v44 = vrot.slane %v848_v56, 1 }
 0x113   : > { %v838_v62 = vmax.f32 %v836_v45, %v837_v60  ;;  %v863_v1 = vrot.slane %v681_v2, 4  ;;  %v898_v3 = vpack.c.bf16 %v826_v31, %v826_v31  ;;  %v844_v39 = vmax.f32 %v842_v41, %v843_v57 }
 0x114   : > { %v855_v46 = vrot.slane %v854_v59, 1  ;;  %v861_v32 = vrot.slane %v860_v61, 1  ;;  %v961_v23 = vunpack.c.l.b16 %v897_v36  ;;  %v850_v47 = vmax.f32 %v848_v56, %v849_v44 }
 0x115   : > { %v864_v29 = vmax.f32 %v681_v2, %v863_v1  ;;  %v869_v13 = vrot.slane %v682_v21, 4  ;;  %v962_v5 = vunpack.c.l.b16 %v898_v3  ;;  %v899_v8 = vpack.c.bf16 %v832_v55, %v832_v55 }
 0x116   : > { %v856_v42 = vmax.f32 %v854_v59, %v855_v46  ;;  %v862_v7 = vmax.f32 %v860_v61, %v861_v32  ;;  %v997_v9 = vsel %vm981_vm7, %v961_v23, %v1386_v4  ;;  %v900_v54 = vpack.c.bf16 %v838_v62, %v838_v62 }
 0x117   : > { %v865_v49 = vrot.slane %v864_v29, 2  ;;  %v870_v53 = vmax.f32 %v682_v21, %v869_v13  ;;  %v998_v10 = vsel %vm983_vm8, %v962_v5, %v997_v9  ;;  %v901_v12 = vpack.c.bf16 %v844_v39, %v844_v39 }
 0x118   : > { %v902_v14 = vpack.c.bf16 %v850_v47, %v850_v47  ;;  %v1008_v15 = vpack.c.b16 %v998_v10, %v998_v10  ;;  %v903_v19 = vpack.c.bf16 %v856_v42, %v856_v42  ;;  %v904_v20 = vpack.c.bf16 %v862_v7, %v862_v7 }
 0x119   : > { %v866_v18 = vmax.f32 %v864_v29, %v865_v49  ;;  %v871_v6 = vrot.slane %v870_v53, 2  ;;  %v963_v2 = vunpack.c.l.b16 %v899_v8  ;;  %v964_v22 = vunpack.c.l.b16 %v900_v54 }
 0x11a   : > { %v965_v24 = vunpack.c.l.b16 %v901_v12  ;;  %1016 = vst [vmem:[%s1364_s8 + $0x8] sm:$0xf] %v1008_v15  ;;  %v966_v58 = vunpack.c.l.b16 %v902_v14  ;;  %v967_v28 = vunpack.c.l.b16 %v903_v19  ;;  %v968_v17 = vunpack.c.l.b16 %v904_v20 }
 0x11b   : > { %v867_v26 = vrot.slane %v866_v18, 1  ;;  %v872_v11 = vmax.f32 %v870_v53, %v871_v6  ;;  %v999_v4 = vsel %vm971_vm2, %v964_v22, %v963_v2 }
 0x11c   : > { %v1000_v63 = vsel %vm973_vm3, %v965_v24, %v999_v4 }
 0x11d   : > { %v868_v21 = vmax.f32 %v866_v18, %v867_v26  ;;  %v873_v27 = vrot.slane %v872_v11, 1  ;;  %v1001_v25 = vsel %vm975_vm4, %v966_v58, %v1000_v63 }
 0x11e   : > { %v1002_v38 = vsel %vm977_vm5, %v967_v28, %v1001_v25 }
 0x11f   : > { %v874_v16 = vmax.f32 %v872_v11, %v873_v27  ;;  %v905_v30 = vpack.c.bf16 %v868_v21, %v868_v21  ;;  %v1003_v33 = vsel %vm979_vm6, %v968_v17, %v1002_v38 }
 0x121   : > { %v906_v34 = vpack.c.bf16 %v874_v16, %v874_v16  ;;  %v969_v35 = vunpack.c.l.b16 %v905_v30 }
 0x123   : > { %v970_v37 = vunpack.c.l.b16 %v906_v34  ;;  %v1004_v40 = vsel %vm981_vm7, %v969_v35, %v1003_v33 }
 0x125   : > { %v1005_v51 = vsel %vm983_vm8, %v970_v37, %v1004_v40 }
 0x126   : > { %v1009_v45 = vpack.c.b16 %v1005_v51, %v1005_v51 }
 0x128   : > { %1017 = vst [vmem:[%s1364_s8 + $0xc] sm:$0xf] %v1009_v45 }
 0x129 PF: > { %s14_s15 = sadd.s32 1, %s1155_s15  }
 0x12a   : > { %p11_p5 = scmp.ge.s32.totalorder %s14_s15, 6  }
 0x12c   :  { %13 = sbr.rel (!%p11_p5) target bundleno = 1 (0x1), region = 69 }

// kernel: neg.5
= control target key start
LH: loop header
LB: loop body
LE: loop exit
PB: predicated region body
PF: predicated region fallthrough
CT: control target
= control target key end

     0   :  { %s72_s0 = inlined_call_operand.vmem [shape: f32[2,16,32], index: 0, kind: input, shape index: {}]   ;;  %s73_s1 = inlined_call_operand.vmem [shape: f32[2,16,32], index: 1, kind: output, shape index: {}]  }
   0x1   :  { %v2_v0 = vld [vmem:[%s72_s0] sm:$0xff]  ;;  %v32_v1 = vld [vmem:[%s72_s0 + $0x10] sm:$0xff]  ;;  %v34_v2 = vld [vmem:[%s72_s0 + $0x8] sm:$0xff] }
   0x2   :  { %v5_v3 = vxor.u32 2147483648, %v2_v0  ;;  %v12_v4 = vxor.u32 2147483648, %v32_v1  ;;  %v20_v5 = vxor.u32 2147483648, %v34_v2  ;;  %v36_v6 = vld [vmem:[%s72_s0 + $0x18] sm:$0xff] }
   0x3   :  { %v28_v7 = vxor.u32 2147483648, %v36_v6 }
   0x4   :  { %7 = vst [vmem:[%s73_s1] sm:$0xff] %v5_v3 }
   0x5   :  { %33 = vst [vmem:[%s73_s1 + $0x10] sm:$0xff] %v12_v4 }
   0x6   :  { %35 = vst [vmem:[%s73_s1 + $0x8] sm:$0xff] %v20_v5 }
   0x7   :  { %37 = vst [vmem:[%s73_s1 + $0x18] sm:$0xff] %v28_v7 }

// kernel: rscnn_forward.5
= control target key start
LH: loop header
LB: loop body
LE: loop exit
PB: predicated region body
PF: predicated region fallthrough
CT: control target
= control target key end

     0   :  { %s1608_s21 = smov 0   ;;  %s2142_s0 = inlined_call_operand.vmem [shape: f32[512,3], index: 0, kind: input, shape index: {}]   ;;  %s2143_s1 = inlined_call_operand.vmem [shape: bf16[512,128], index: 1, kind: input, shape index: {}]   ;;  %s2144_s2 = inlined_call_operand.vmem [shape: f32[64,3], index: 2, kind: input, shape index: {}]   ;;  %s2145_s3 = inlined_call_operand.vmem [shape: f32[3,256], index: 3, kind: input, shape index: {}]   ;;  %s2146_s4 = inlined_call_operand.vmem [shape: bf16[128,256], index: 4, kind: input, shape index: {}]   ;;  %s2147_s5 = inlined_call_operand.vmem [shape: f32[1,256], index: 5, kind: input, shape index: {}]   ;;  %s2148_s6 = inlined_call_operand.vmem [shape: bf16[64,256], index: 6, kind: output, shape index: {}]  }
   0x1 LB: > { %s1380_s22 = sadd.s32 4294967295, %s1571_s21   ;;  %p1384_p0 = scmp.ge.s32.totalorder %s1571_s21, 1  ;;  %s1571_s21 = sphi %s1608_s21, %s16_s21  }
   0x2   : > { %p235_p1 = scmp.lt.s32.totalorder %s1571_s21, 5 }
   0x4   : > { %p236_p2 = pnand %p1384_p0, %p235_p1 }
   0x6   : > { %239 = sbr.rel (%p236_p2) target bundleno = 396 (0x18c), region = 44 }
   0xb   : > { %v1518_v0 = vld [vmem:[%s2146_s4 + $0x70] sm:$0xf]  ;;  %v1556_v1 = vld [vmem:[%s2146_s4 + $0x74] sm:$0xf0]  ;;  %v1555_v2 = vld [vmem:[%s2146_s4 + $0x74] sm:$0xf] }
   0xc   : > { %v1519_v3 = vor.u32 %v1556_v1, %v1518_v0  ;;  %v1520_v4 = vld [vmem:[%s2146_s4 + $0x78] sm:$0xf0]  ;;  %v1510_v5 = vld [vmem:[%s2146_s4 + $0x60] sm:$0xf]  ;;  %v1554_v6 = vld [vmem:[%s2146_s4 + $0x64] sm:$0xf0] }
   0xd   : > { %v1523_v7 = vor.u32 %v1555_v2, %v1520_v4  ;;  %v1553_v8 = vld [vmem:[%s2146_s4 + $0x64] sm:$0xf]  ;;  %v1512_v9 = vld [vmem:[%s2146_s4 + $0x68] sm:$0xf0]  ;;  %v1511_v11 = vor.u32 %v1554_v6, %v1510_v5  ;;  %s1385_s17 = sshll.u32 %s1380_s22, 4  ;;  %vm403_vm0 = vcmask 1042432  }
   0xe   : > { %v301_v10 = vld [vmem:[%s2145_s3] sm:$0x77]  ;;  %666 = vmatpush.bf16.msra.mxu2 %v1519_v3  ;;  %v1515_v12 = vor.u32 %v1553_v8, %v1512_v9  ;;  %p277_p3 = scmp.lt.s32.totalorder %s1385_s17, 63  ;;  %v1502_v13 = vld [vmem:[%s2146_s4 + $0x50] sm:$0xf]  ;;  %vm354_vm1 = vcmask 23552  }
   0xf   : > { %351 = vst [vmem:[#allocation1] ss:$2 sm:$0xff] %v301_v10  ;;  %715 = vmatpush.bf16.msra.mxu3 %v1523_v7  ;;  %v1552_v14 = vld [vmem:[%s2146_s4 + $0x54] sm:$0xf0]  ;;  %v1551_v15 = vld [vmem:[%s2146_s4 + $0x54] sm:$0xf] }
  0x10   : > { %s2166_s17 = smov (!%p277_p3, %s1385_s17), 63  ;;  %v1504_v16 = vld [vmem:[%s2146_s4 + $0x58] sm:$0xf0]  ;;  %v1503_v17 = vor.u32 %v1552_v14, %v1502_v13  ;;  %v1494_v18 = vld [vmem:[%s2146_s4 + $0x40] sm:$0xf]  ;;  %vm841_vm2 = vcmask 1040384  }
  0x11   : > { %s1386_s28 = sshll.u32 %s2166_s17, 3  ;;  %v1550_v19 = vld [vmem:[%s2146_s4 + $0x44] sm:$0xf0]  ;;  %v1507_v20 = vor.u32 %v1551_v15, %v1504_v16  ;;  %v1549_v21 = vld [vmem:[%s2146_s4 + $0x44] sm:$0xf]  ;;  %s1388_s27 = sshll.u32 %s2166_s17, 2 }
  0x12   : > { %667 = vmatpush.bf16.msra.mxu2 %v1511_v11  ;;  %s1669_s11 = scalar_lea.vmem %s2142_s0, %s1386_s28  ;;  %v1496_v24 = vld [vmem:[%s2146_s4 + $0x48] sm:$0xf0]  ;;  %v1495_v26 = vor.u32 %v1550_v19, %v1494_v18  ;;  %v1486_v27 = vld [vmem:[%s2146_s4 + $0x30] sm:$0xf]  ;;  %v1548_v28 = vld [vmem:[%s2146_s4 + $0x34] sm:$0xf0]  ;;  %s1740_s10 = scalar_lea.vmem %s2143_s1, %s1388_s27 }
  0x13   : > { %716 = vmatpush.bf16.msra.mxu3 %v1515_v12  ;;  %v334_v23 = vld [vmem:[%s1669_s11] sm:$0xff]  ;;  %v1499_v29 = vor.u32 %v1549_v21, %v1496_v24  ;;  %v1547_v30 = vld [vmem:[%s2146_s4 + $0x34] sm:$0xf]  ;;  %v1488_v31 = vld [vmem:[%s2146_s4 + $0x38] sm:$0xf0]  ;;  %v1487_v32 = vor.u32 %v1548_v28, %v1486_v27  ;;  %s1389_s17 = sshll.u32 %s1380_s22, 1 }
  0x14   : > { %v1478_v33 = vld [vmem:[%s2146_s4 + $0x20] sm:$0xf]  ;;  %v1546_v34 = vld [vmem:[%s2146_s4 + $0x24] sm:$0xf0]  ;;  %v1491_v35 = vor.u32 %v1547_v30, %v1488_v31  ;;  %v1545_v37 = vld [vmem:[%s2146_s4 + $0x24] sm:$0xf] }
  0x15   : > { %v335_v36 = vld [vmem:[%s1669_s11 + $0x8] sm:$0xff]  ;;  %v1479_v41 = vor.u32 %v1546_v34, %v1478_v33  ;;  %v1470_v42 = vld [vmem:[%s2146_s4 + $0x10] sm:$0xf]  ;;  %v1544_v43 = vld [vmem:[%s2146_s4 + $0x14] sm:$0xf0]  ;;  %p289_p4 = scmp.lt.s32.totalorder %s1389_s17, 7 }
  0x16   : > { %v353_v22 = vld.sshfl [vmem:[#allocation1 + $0x8] sm:$0xff pattern:$0x75316420]  ;;  %v352_v25 = vld.sshfl [vmem:[#allocation1] sm:$0xff pattern:$0x75316420]  ;;  %668 = vmatpush.bf16.msra.mxu2 %v1503_v17  ;;  %v1471_v47 = vor.u32 %v1544_v43, %v1470_v42 }
  0x17   : > { %1411 = vmatpush.msk.msra.mxu1 %vm403_vm0, %v353_v22  ;;  %1394 = vmatpush.msk.msra.mxu0 %vm403_vm0, %v352_v25  ;;  %767 = vst [vmem:[#allocation1] ss:$2 sm:$0xff] %v301_v10  ;;  %v1480_v38 = vld [vmem:[%s2146_s4 + $0x28] sm:$0xf0]  ;;  %v1543_v45 = vld [vmem:[%s2146_s4 + $0x14] sm:$0xf] }
  0x18   : > { %1412 = vmatmul.msk.f32.vlgmr.msra.gmra.mxu1 %vm354_vm1, %v334_v23  ;;  %717 = vmatpush.bf16.msra.mxu3 %v1507_v20  ;;  %v1483_v44 = vor.u32 %v1545_v37, %v1480_v38  ;;  %v1472_v46 = vld [vmem:[%s2146_s4 + $0x18] sm:$0xf0]  ;;  %v1462_v48 = vld [vmem:[%s2146_s4] sm:$0xf]  ;;  %v1542_v49 = vld [vmem:[%s2146_s4 + $0x4] sm:$0xf0] }
  0x19   : > { %1395 = vmatmul.msk.f32.vlgmr.msra.gmra.mxu0 %vm354_vm1, %v334_v23  ;;  %v1475_v50 = vor.u32 %v1543_v45, %v1472_v46  ;;  %v336_v51 = vld [vmem:[%s1669_s11 + $0x10] sm:$0xff]  ;;  %v1541_v52 = vld [vmem:[%s2146_s4 + $0x4] sm:$0xf]  ;;  %v1464_v53 = vld [vmem:[%s2146_s4 + $0x8] sm:$0xf0]  ;;  %v1463_v54 = vor.u32 %v1542_v49, %v1462_v48  ;;  %s2168_s17 = smov (!%p289_p4, %s1389_s17), 7 }
  0x1a   : > { %669 = vmatpush.bf16.msra.mxu2 %v1495_v26  ;;  %v1467_v55 = vor.u32 %v1541_v52, %v1464_v53  ;;  %v1533_v56 = vld [vmem:[%s1740_s10] sm:$0xff]  ;;  %v337_v57 = vld [vmem:[%s1669_s11 + $0x18] sm:$0xff]  ;;  %v1534_v59 = vld [vmem:[%s1740_s10 + $0x8] sm:$0xff]  ;;  %s1390_s12 = sshll.u32 %s2168_s17, 3  ;;  %vm843_vm3 = vcmask 1041409   ;;  %vm846_vm4 = vcmask 1042434  }
  0x1b   : > { %v338_v58 = vld [vmem:[%s1669_s11 + $0x20] sm:$0xff]  ;;  %v339_v60 = vld [vmem:[%s1669_s11 + $0x28] sm:$0xff]  ;;  %v340_v61 = vld [vmem:[%s1669_s11 + $0x30] sm:$0xff]  ;;  %s292_s14 = scalar_lea.vmem %s2144_s2, %s1390_s12  ;;  %vm849_vm5 = vcmask 1043459   ;;  %vm852_vm6 = vcmask 1044484   ;;  %vm855_vm7 = vcmask 1045509   ;;  %s299_s19 = scalar_lea.vmem %s2148_s6, %s1390_s12 }
  0x1c   : > { %718 = vmatpush.bf16.msra.mxu3 %v1499_v29  ;;  %v1535_v62 = vld [vmem:[%s1740_s10 + $0x10] sm:$0xff]  ;;  %v341_v63 = vld [vmem:[%s1669_s11 + $0x38] sm:$0xff]  ;;  %v342_v0 = vld [vmem:[%s1669_s11 + $0x40] sm:$0xff]  ;;  %vm858_vm8 = vcmask 1046534   ;;  %vm861_vm9 = vcmask 1046528   ;;  %vm1269_vm10 = vcmask 1047559  }
  0x1d   : > { %v1536_v1 = vld [vmem:[%s1740_s10 + $0x18] sm:$0xff]  ;;  %v343_v2 = vld [vmem:[%s1669_s11 + $0x48] sm:$0xff]  ;;  %v344_v3 = vld [vmem:[%s1669_s11 + $0x50] sm:$0xff] }
  0x1e   : > { %v769_v39 = vld.sshfl [vmem:[#allocation1 + $0x8] sm:$0xff pattern:$0x75316420]  ;;  %670 = vmatpush.bf16.msra.mxu2 %v1487_v32  ;;  %v768_v40 = vld.sshfl [vmem:[#allocation1] sm:$0xff pattern:$0x75316420] }
  0x1f   : > { %1527 = vmatpush.msk.msrb.mxu1 %vm403_vm0, %v769_v39  ;;  %1524 = vmatpush.msk.msrb.mxu0 %vm403_vm0, %v768_v40  ;;  %v1537_v4 = vld [vmem:[%s1740_s10 + $0x20] sm:$0xff]  ;;  %v345_v5 = vld [vmem:[%s1669_s11 + $0x58] sm:$0xff]  ;;  %v1538_v7 = vld [vmem:[%s1740_s10 + $0x28] sm:$0xff] }
  0x20   : > { %1413 = vmatmul.msk.f32.gmra.mxu1 %vm354_vm1, %v335_v36  ;;  %719 = vmatpush.bf16.msra.mxu3 %v1491_v35  ;;  %v346_v6 = vld [vmem:[%s1669_s11 + $0x60] sm:$0xff]  ;;  %v347_v8 = vld [vmem:[%s1669_s11 + $0x68] sm:$0xff]  ;;  %v348_v9 = vld [vmem:[%s1669_s11 + $0x70] sm:$0xff] }
  0x21   : > { %1396 = vmatmul.msk.f32.gmra.mxu0 %vm354_vm1, %v335_v36  ;;  %v1539_v10 = vld [vmem:[%s1740_s10 + $0x30] sm:$0xff]  ;;  %v349_v11 = vld [vmem:[%s1669_s11 + $0x78] sm:$0xff]  ;;  %v765_v14 = vld [vmem:[%s292_s14] sm:$0xff] }
  0x22   : > { %671 = vmatpush.bf16.msra.mxu2 %v1479_v41  ;;  %v1540_v15 = vld [vmem:[%s1740_s10 + $0x38] sm:$0xff]  ;;  %v766_v17 = vld [vmem:[%s292_s14 + $0x8] sm:$0xff] }
  0x24   : > { %720 = vmatpush.bf16.msra.mxu3 %v1483_v44 }
  0x26   : > { %672 = vmatpush.bf16.msra.mxu2 %v1471_v47 }
  0x28   : > { %1414 = vmatmul.msk.f32.gmra.mxu1 %vm354_vm1, %v336_v51  ;;  %721 = vmatpush.bf16.msra.mxu3 %v1475_v50 }
  0x29   : > { %1397 = vmatmul.msk.f32.gmra.mxu0 %vm354_vm1, %v336_v51 }
  0x2a   : > { %673 = vmatpush.bf16.msra.mxu2 %v1463_v54 }
  0x2c   : > { %722 = vmatpush.bf16.msra.mxu3 %v1467_v55 }
  0x2d   : > { %674 = vmatmul.bf16.vlgmr.msra.gmra.mxu2 %v1533_v56 }
  0x2f   : > { %723 = vmatmul.bf16.vlgmr.msra.gmra.mxu3 %v1533_v56 }
  0x30   : > { %1415 = vmatmul.msk.f32.gmra.mxu1 %vm354_vm1, %v337_v57 }
  0x31   : > { %1398 = vmatmul.msk.f32.gmra.mxu0 %vm354_vm1, %v337_v57 }
  0x38   : > { %1416 = vmatmul.msk.f32.gmra.mxu1 %vm354_vm1, %v338_v58 }
  0x39   : > { %1399 = vmatmul.msk.f32.gmra.mxu0 %vm354_vm1, %v338_v58 }
  0x3d   : > { %679 = vmatmul.bf16.gmra.mxu2 %v1534_v59 }
  0x3f   : > { %728 = vmatmul.bf16.gmra.mxu3 %v1534_v59 }
  0x40   : > { %1417 = vmatmul.msk.f32.gmra.mxu1 %vm354_vm1, %v339_v60 }
  0x41   : > { %1400 = vmatmul.msk.f32.gmra.mxu0 %vm354_vm1, %v339_v60 }
  0x48   : > { %1418 = vmatmul.msk.f32.gmra.mxu1 %vm354_vm1, %v340_v61 }
  0x49   : > { %1401 = vmatmul.msk.f32.gmra.mxu0 %vm354_vm1, %v340_v61 }
  0x4d   : > { %684 = vmatmul.bf16.gmra.mxu2 %v1535_v62 }
  0x4f   : > { %733 = vmatmul.bf16.gmra.mxu3 %v1535_v62 }
  0x50   : > { %1419 = vmatmul.msk.f32.gmra.mxu1 %vm354_vm1, %v341_v63 }
  0x51   : > { %1402 = vmatmul.msk.f32.gmra.mxu0 %vm354_vm1, %v341_v63 }
  0x58   : > { %1420 = vmatmul.msk.f32.gmra.mxu1 %vm354_vm1, %v342_v0 }
  0x59   : > { %1403 = vmatmul.msk.f32.gmra.mxu0 %vm354_vm1, %v342_v0 }
  0x5d   : > { %689 = vmatmul.bf16.gmra.mxu2 %v1536_v1 }
  0x5f   : > { %738 = vmatmul.bf16.gmra.mxu3 %v1536_v1 }
  0x60   : > { %1421 = vmatmul.msk.f32.gmra.mxu1 %vm354_vm1, %v343_v2 }
  0x61   : > { %1404 = vmatmul.msk.f32.gmra.mxu0 %vm354_vm1, %v343_v2 }
  0x68   : > { %1422 = vmatmul.msk.f32.gmra.mxu1 %vm354_vm1, %v344_v3 }
  0x69   : > { %1405 = vmatmul.msk.f32.gmra.mxu0 %vm354_vm1, %v344_v3 }
  0x6d   : > { %694 = vmatmul.bf16.gmra.mxu2 %v1537_v4 }
  0x6f   : > { %743 = vmatmul.bf16.gmra.mxu3 %v1537_v4 }
  0x70   : > { %1423 = vmatmul.msk.f32.gmra.mxu1 %vm354_vm1, %v345_v5 }
  0x71   : > { %1406 = vmatmul.msk.f32.gmra.mxu0 %vm354_vm1, %v345_v5 }
  0x78   : > { %1424 = vmatmul.msk.f32.gmra.mxu1 %vm354_vm1, %v346_v6 }
  0x79   : > { %1407 = vmatmul.msk.f32.gmra.mxu0 %vm354_vm1, %v346_v6 }
  0x7d   : > { %699 = vmatmul.bf16.gmra.mxu2 %v1538_v7 }
  0x7f   : > { %748 = vmatmul.bf16.gmra.mxu3 %v1538_v7 }
  0x80   : > { %1425 = vmatmul.msk.f32.gmra.mxu1 %vm354_vm1, %v347_v8 }
  0x81   : > { %1408 = vmatmul.msk.f32.gmra.mxu0 %vm354_vm1, %v347_v8 }
  0x88   : > { %1426 = vmatmul.msk.f32.gmra.mxu1 %vm354_vm1, %v348_v9 }
  0x89   : > { %1409 = vmatmul.msk.f32.gmra.mxu0 %vm354_vm1, %v348_v9 }
  0x8d   : > { %704 = vmatmul.bf16.gmra.mxu2 %v1539_v10 }
  0x8f   : > { %753 = vmatmul.bf16.gmra.mxu3 %v1539_v10 }
  0x90   : > { %1427 = vmatmul.msk.f32.gmra.mxu1 %vm354_vm1, %v349_v11 }
  0x91   : > { %1410 = vmatmul.msk.f32.gmra.mxu0 %vm354_vm1, %v349_v11 }
  0x95   : > { %v490_v12 = vpop.f32.mrf.mxu1 }
  0x96   : > { %v425_v13 = vpop.f32.mrf.mxu0 }
  0x98   : > { %1528 = vmatmul.msk.f32.vlgmr.msrb.gmra.mxu1 %vm354_vm1, %v765_v14 }
  0x99   : > { %1525 = vmatmul.msk.f32.vlgmr.msrb.gmra.mxu0 %vm354_vm1, %v765_v14 }
  0x9d   : > { %v493_v16 = vpop.f32.mrf.mxu1  ;;  %709 = vmatmul.bf16.gmra.mxu2 %v1540_v15 }
  0x9e   : > { %v428_v18 = vpop.f32.mrf.mxu0 }
  0x9f   : > { %758 = vmatmul.bf16.gmra.mxu3 %v1540_v15 }
  0xa0   : > { %1529 = vmatmul.msk.f32.gmra.mxu1 %vm354_vm1, %v766_v17 }
  0xa1   : > { %1526 = vmatmul.msk.f32.gmra.mxu0 %vm354_vm1, %v766_v17 }
  0xa5   : > { %v496_v19 = vpop.f32.mrf.mxu1 }
  0xa6   : > { %v431_v20 = vpop.f32.mrf.mxu0 }
  0xad   : > { %v499_v21 = vpop.f32.mrf.mxu1 }
  0xae   : > { %v434_v22 = vpop.f32.mrf.mxu0 }
  0xb0   : > { %v675_v23 = vpop.f32.mrf.mxu2 }
  0xb1   : > { %v1805_v24 = vadd.f32 %v675_v23, %v425_v13 }
  0xb2   : > { %v724_v25 = vpop.f32.mrf.mxu3 }
  0xb3   : > { %v1807_v26 = vadd.f32 %v724_v25, %v490_v12 }
  0xb5   : > { %v502_v27 = vpop.f32.mrf.mxu1 }
  0xb6   : > { %v437_v28 = vpop.f32.mrf.mxu0 }
  0xb8   : > { %v677_v29 = vpop.f32.mrf.mxu2 }
  0xb9   : > { %v1809_v30 = vadd.f32 %v677_v29, %v428_v18 }
  0xba   : > { %v726_v31 = vpop.f32.mrf.mxu3 }
  0xbb   : > { %v1811_v32 = vadd.f32 %v726_v31, %v493_v16 }
  0xbd   : > { %v505_v33 = vpop.f32.mrf.mxu1 }
  0xbe   : > { %v440_v34 = vpop.f32.mrf.mxu0 }
  0xc0   : > { %v680_v35 = vpop.f32.mrf.mxu2 }
  0xc1   : > { %v1813_v36 = vadd.f32 %v680_v35, %v431_v20 }
  0xc2   : > { %v729_v37 = vpop.f32.mrf.mxu3 }
  0xc3   : > { %v1815_v38 = vadd.f32 %v729_v37, %v496_v19  ;;  %v1880_v19 = vld [vmem:[%s2147_s5] sm:$0x3] }
  0xc4   : > { %v2150_v20 = vperm.slane %v1880_v19, 1 }
  0xc5   : > { %v508_v39 = vpop.f32.mrf.mxu1 }
  0xc6   : > { %v443_v40 = vpop.f32.mrf.mxu0 }
  0xc8   : > { %v682_v41 = vpop.f32.mrf.mxu2 }
  0xc9   : > { %v1817_v42 = vadd.f32 %v682_v41, %v434_v22 }
  0xca   : > { %v731_v43 = vpop.f32.mrf.mxu3 }
  0xcb   : > { %v1819_v44 = vadd.f32 %v731_v43, %v499_v21  ;;  %v2149_v21 = vperm.slane %v1880_v19, 0 }
  0xcd   : > { %v1821_v45 = vpop.f32.mrf.mxu1 }
  0xce   : > { %v1823_v46 = vpop.f32.mrf.mxu0 }
  0xd0   : > { %v685_v47 = vpop.f32.mrf.mxu2 }
  0xd1   : > { %v1825_v48 = vadd.f32 %v685_v47, %v437_v28 }
  0xd2   : > { %v734_v49 = vpop.f32.mrf.mxu3 }
  0xd3   : > { %v1827_v50 = vadd.f32 %v734_v49, %v502_v27 }
  0xd5   : > { %v514_v51 = vpop.f32.mrf.mxu1 }
  0xd6   : > { %v449_v52 = vpop.f32.mrf.mxu0 }
  0xd8   : > { %v687_v53 = vpop.f32.mrf.mxu2 }
  0xd9   : > { %v1829_v54 = vadd.f32 %v687_v53, %v440_v34 }
  0xda   : > { %v736_v55 = vpop.f32.mrf.mxu3 }
  0xdb   : > { %v1831_v56 = vadd.f32 %v736_v55, %v505_v33 }
  0xdd   : > { %v1833_v57 = vpop.f32.mrf.mxu1 }
  0xde   : > { %v1835_v58 = vpop.f32.mrf.mxu0 }
  0xe0   : > { %v690_v59 = vpop.f32.mrf.mxu2 }
  0xe1   : > { %v1837_v60 = vadd.f32 %v690_v59, %v443_v40 }
  0xe2   : > { %v739_v61 = vpop.f32.mrf.mxu3 }
  0xe3   : > { %v1839_v62 = vadd.f32 %v739_v61, %v508_v39 }
  0xe5   : > { %v1841_v63 = vpop.f32.mrf.mxu1 }
  0xe6   : > { %v1843_v0 = vpop.f32.mrf.mxu0 }
  0xe8   : > { %v1845_v1 = vpop.f32.mrf.mxu2 }
  0xea   : > { %v1849_v3 = vpop.f32.mrf.mxu3 }
  0xed   : > { %v1847_v2 = vpop.f32.mrf.mxu1 }
  0xee   : > { %v1851_v4 = vpop.f32.mrf.mxu0 }
  0xf0   : > { %v695_v6 = vpop.f32.mrf.mxu2 }
  0xf1   : > { %v1908_v47 = vadd.f32 %v695_v6, %v449_v52 }
  0xf2   : > { %v744_v8 = vpop.f32.mrf.mxu3 }
  0xf3   : > { %v1910_v49 = vadd.f32 %v744_v8, %v514_v51 }
  0xf5   : > { %v1853_v5 = vpop.f32.mrf.mxu1 }
  0xf6   : > { %v1855_v7 = vpop.f32.mrf.mxu0 }
  0xf8   : > { %v1861_v11 = vpop.f32.mrf.mxu2 }
  0xfa   : > { %v1863_v12 = vpop.f32.mrf.mxu3 }
  0xfd   : > { %v1857_v9 = vpop.f32.mrf.mxu1 }
  0xfe   : > { %v1859_v10 = vpop.f32.mrf.mxu0 }
 0x100   : > { %v1869_v15 = vpop.f32.mrf.mxu2 }
 0x102   : > { %v1871_v16 = vpop.f32.mrf.mxu3 }
 0x105   : > { %v1865_v13 = vpop.f32.mrf.mxu1 }
 0x106   : > { %v1867_v14 = vpop.f32.mrf.mxu0 }
 0x108   : > { %v1884_v22 = vpop.f32.mrf.mxu2 }
 0x10a   : > { %v1886_v25 = vpop.f32.mrf.mxu3 }
 0x10d   : > { %v1873_v17 = vpop.f32.mrf.mxu1 }
 0x10e   : > { %2154 = vst [vmem:[#allocation2_spill] sm:$0xff] %v1873_v17  ;;  %v1875_v18 = vpop.f32.mrf.mxu0 }
 0x10f   : > { %2155 = vst [vmem:[#allocation3_spill] sm:$0xff] %v1875_v18 }
 0x112   : > { %v754_v6 = vpop.f32.mrf.mxu3 }
 0x115   : > { %v820_v23 = vpop.f32.mrf.mxu1 }
 0x116   : > { %v832_v27 = vsub.f32 %v2150_v20, %v820_v23  ;;  %v797_v28 = vpop.f32.mrf.mxu0 }
 0x117   : > { %v1892_v29 = vsub.f32 %v2149_v21, %v797_v28 }
 0x118   : > { %v1894_v31 = vrot.slane %v832_v27, 7  ;;  %v705_v27 = vpop.f32.mrf.mxu2 }
 0x11a   : > { %v842_v33 = vsel %vm841_vm2, %v1892_v29, %v1894_v31  ;;  %v844_v34 = vsel %vm843_vm3, %v1892_v29, %v1894_v31  ;;  %v847_v35 = vsel %vm846_vm4, %v1892_v29, %v1894_v31  ;;  %v850_v37 = vsel %vm849_vm5, %v1892_v29, %v1894_v31 }
 0x11b   : > { %v845_v39 = vrot.slane %v844_v34, 1  ;;  %v848_v40 = vrot.slane %v847_v35, 2  ;;  %v851_v41 = vrot.slane %v850_v37, 3  ;;  %v879_v43 = vperm.slane %v842_v33, 0 }
 0x11c   : > { %v880_v53 = vperm.slane %v842_v33, 1 }
 0x11d   : > { %v881_v55 = vperm.slane %v845_v39, 0  ;;  %v882_v59 = vperm.slane %v845_v39, 1  ;;  %v883_v61 = vperm.slane %v848_v40, 0  ;;  %v884_v23 = vperm.slane %v848_v40, 1 }
 0x11e   : > { %v885_v28 = vperm.slane %v851_v41, 0  ;;  %v886_v21 = vperm.slane %v851_v41, 1  ;;  %v943_v20 = vadd.f32 %v879_v43, %v1805_v24  ;;  %v944_v17 = vadd.f32 %v880_v53, %v1807_v26 }
 0x11f   : > { %v945_v34 = vadd.f32 %v881_v55, %v1809_v30  ;;  %v946_v35 = vadd.f32 %v882_v59, %v1811_v32  ;;  %v947_v52 = vadd.f32 %v883_v61, %v1813_v36  ;;  %v948_v51 = vadd.f32 %v884_v23, %v1815_v38 }
 0x120   : > { %v949_v8 = vadd.f32 %v885_v28, %v1817_v42  ;;  %v950_v33 = vadd.f32 %v886_v21, %v1819_v44  ;;  %v975_v37 = vmax.f32 %v943_v20, 0.0  ;;  %v976_v39 = vmax.f32 %v944_v17, 0.0 }
 0x121   : > { %v977_v40 = vmax.f32 %v945_v34, 0.0  ;;  %v978_v41 = vmax.f32 %v946_v35, 0.0  ;;  %v979_v24 = vmax.f32 %v947_v52, 0.0  ;;  %v980_v43 = vmax.f32 %v948_v51, 0.0 }
 0x122   : > { %v981_v26 = vmax.f32 %v949_v8, 0.0  ;;  %v982_v53 = vmax.f32 %v950_v33, 0.0  ;;  %v1007_v30 = vrot.slane %v975_v37, 4  ;;  %v1013_v55 = vrot.slane %v976_v39, 4 }
 0x123   : > { %v1019_v32 = vrot.slane %v977_v40, 4  ;;  %v1025_v59 = vrot.slane %v978_v41, 4  ;;  %v1031_v36 = vrot.slane %v979_v24, 4  ;;  %v1037_v61 = vrot.slane %v980_v43, 4 }
 0x124   : > { %v1008_v38 = vmax.f32 %v975_v37, %v1007_v30  ;;  %v1014_v23 = vmax.f32 %v976_v39, %v1013_v55  ;;  %v1043_v18 = vrot.slane %v981_v26, 4  ;;  %v1049_v42 = vrot.slane %v982_v53, 4 }
 0x125   : > { %v1922_v44 = vadd.f32 %v1861_v11, %v1835_v58  ;;  %v1020_v17 = vmax.f32 %v977_v40, %v1019_v32  ;;  %v1026_v20 = vmax.f32 %v978_v41, %v1025_v59  ;;  %v1032_v21 = vmax.f32 %v979_v24, %v1031_v36  ;;  %v823_v40 = vpop.f32.mrf.mxu1  ;;  %v800_v41 = vpop.f32.mrf.mxu0 }
 0x126   : > { %v1926_v28 = vadd.f32 %v1863_v12, %v1833_v57  ;;  %v1009_v34 = vrot.slane %v1008_v38, 2  ;;  %v1015_v35 = vrot.slane %v1014_v23, 2  ;;  %v1038_v52 = vmax.f32 %v980_v43, %v1037_v61  ;;  %v707_v57 = vpop.f32.mrf.mxu2  ;;  %v756_v24 = vpop.f32.mrf.mxu3 }
 0x127   : > { %v1021_v51 = vrot.slane %v1020_v17, 2  ;;  %v1027_v8 = vrot.slane %v1026_v20, 2  ;;  %v1044_v33 = vmax.f32 %v981_v26, %v1043_v18  ;;  %v1050_v37 = vmax.f32 %v982_v53, %v1049_v42 }
 0x128   : > { %v1930_v39 = vadd.f32 %v1869_v15, %v1843_v0  ;;  %v1934_v58 = vadd.f32 %v1871_v16, %v1841_v63  ;;  %v1938_v11 = vadd.f32 %v1884_v22, %v1851_v4  ;;  %v1942_v12 = vadd.f32 %v1886_v25, %v1847_v2 }
 0x129   : > { %v1033_v18 = vrot.slane %v1032_v21, 2  ;;  %v1945_v0 = vadd.f32 %v705_v27, %v1855_v7  ;;  %v1010_v63 = vmax.f32 %v1008_v38, %v1009_v34  ;;  %v1016_v15 = vmax.f32 %v1014_v23, %v1015_v35 }
 0x12a   : > { %v1039_v16 = vrot.slane %v1038_v52, 2  ;;  %v1022_v4 = vmax.f32 %v1020_v17, %v1021_v51  ;;  %v1028_v22 = vmax.f32 %v1026_v20, %v1027_v8  ;;  %v1045_v43 = vrot.slane %v1044_v33, 2 }
 0x12b   : > { %v1051_v26 = vrot.slane %v1050_v37, 2  ;;  %v1948_v53 = vadd.f32 %v754_v6, %v1853_v5  ;;  %v1951_v2 = vadd.f32 %v707_v57, %v1859_v10  ;;  %v2156_v25 = vperm.slane %v1880_v19, 1 }
 0x12c   : > { %v2157_v7 = vperm.slane %v1880_v19, 0  ;;  %v1034_v55 = vmax.f32 %v1032_v21, %v1033_v18  ;;  %v1960_v32 = vadd.f32 %v756_v24, %v1857_v9  ;;  %v853_v59 = vsel %vm852_vm6, %v1892_v29, %v1894_v31 }
 0x12d   : > { %v834_v30 = vsub.f32 %v2156_v25, %v823_v40  ;;  %v856_v5 = vsel %vm855_vm7, %v1892_v29, %v1894_v31  ;;  %v1011_v10 = vrot.slane %v1010_v63, 1  ;;  %v1017_v6 = vrot.slane %v1016_v15, 1 }
 0x12e   : > { %v1957_v27 = vsub.f32 %v2157_v7, %v800_v41  ;;  %v1040_v36 = vmax.f32 %v1038_v52, %v1039_v16  ;;  %v1023_v19 = vrot.slane %v1022_v4, 1  ;;  %v1029_v38 = vrot.slane %v1028_v22, 1  ;;  %v710_v18 = vpop.f32.mrf.mxu2 }
 0x12f   : > { %v1968_v61 = vrot.slane %v834_v30, 7  ;;  %v1970_v23 = vmax.f32 %v1044_v33, %v1045_v43  ;;  %v1972_v42 = vmax.f32 %v1050_v37, %v1051_v26  ;;  %v1035_v34 = vrot.slane %v1034_v55, 1 }
 0x130   : > { %v1986_v8 = vmax.f32 %v1010_v63, %v1011_v10  ;;  %v1041_v33 = vrot.slane %v1040_v36, 1  ;;  %v854_v16 = vrot.slane %v853_v59, 4  ;;  %v859_v24 = vsel %vm858_vm8, %v1892_v29, %v1894_v31 }
 0x131   : > { %v864_v9 = vsel %vm841_vm2, %v1957_v27, %v1968_v61  ;;  %v865_v17 = vsel %vm843_vm3, %v1957_v27, %v1968_v61  ;;  %v867_v20 = vsel %vm846_vm4, %v1957_v27, %v1968_v61  ;;  %v869_v21 = vsel %vm849_vm5, %v1957_v27, %v1968_v61 }
 0x132   : > { %v866_v35 = vrot.slane %v865_v17, 1  ;;  %v868_v52 = vrot.slane %v867_v20, 2  ;;  %v895_v51 = vperm.slane %v864_v9, 0  ;;  %v870_v37 = vrot.slane %v869_v21, 3 }
 0x133   : > { %v896_v57 = vperm.slane %v864_v9, 1  ;;  %v1991_v43 = vmax.f32 %v1016_v15, %v1017_v6  ;;  %v1994_v7 = vmax.f32 %v1022_v4, %v1023_v19  ;;  %v1996_v63 = vmax.f32 %v1028_v22, %v1029_v38 }
 0x134   : > { %v897_v40 = vperm.slane %v866_v35, 0  ;;  %v898_v41 = vperm.slane %v866_v35, 1  ;;  %v899_v26 = vperm.slane %v868_v52, 0  ;;  %v900_v25 = vperm.slane %v868_v52, 1 }
 0x135   : > { %v959_v30 = vadd.f32 %v895_v51, %v1908_v47  ;;  %v1999_v10 = vadd.f32 %v710_v18, %v1867_v14  ;;  %v857_v9 = vrot.slane %v856_v5, 5  ;;  %v901_v17 = vperm.slane %v870_v37, 0 }
 0x136   : > { %v2002_v59 = vadd.f32 %v896_v57, %v1910_v49  ;;  %v2005_v20 = vadd.f32 %v897_v40, %v1922_v44  ;;  %v860_v15 = vrot.slane %v859_v24, 6  ;;  %v902_v6 = vperm.slane %v870_v37, 1 }
 0x137   : > { %v2008_v21 = vadd.f32 %v898_v41, %v1926_v28  ;;  %v887_v47 = vperm.slane %v854_v16, 0  ;;  %v2010_v4 = vmax.f32 %v1034_v55, %v1035_v34  ;;  %v2013_v22 = vadd.f32 %v899_v26, %v1930_v39 }
 0x138   : > { %v2016_v14 = vadd.f32 %v900_v25, %v1934_v58  ;;  %v991_v5 = vmax.f32 %v959_v30, 0.0  ;;  %v888_v49 = vperm.slane %v854_v16, 1  ;;  %v2021_v44 = vsel %vm858_vm8, %v1957_v27, %v1968_v61 }
 0x139   : > { %v889_v19 = vperm.slane %v857_v9, 0  ;;  %v890_v38 = vperm.slane %v857_v9, 1  ;;  %v1042_v28 = vmax.f32 %v1040_v36, %v1041_v33  ;;  %v2024_v35 = vadd.f32 %v901_v17, %v1938_v11 }
 0x13a   : > { %v992_v55 = vmax.f32 %v2002_v59, 0.0  ;;  %v2153_v39 = vmax.f32 %v2005_v20, 0.0  ;;  %v891_v34 = vperm.slane %v860_v15, 0  ;;  %v2029_v58 = vadd.f32 %v902_v6, %v1942_v12 }
 0x13b   : > { %v2152_v52 = vmax.f32 %v2008_v21, 0.0  ;;  %v892_v51 = vperm.slane %v860_v15, 1  ;;  %v951_v37 = vadd.f32 %v887_v47, %v1825_v48  ;;  %v2151_v57 = vmax.f32 %v2013_v22, 0.0 }
 0x13c   : > { %v1103_v33 = vrot.slane %v991_v5, 4  ;;  %v952_v11 = vadd.f32 %v888_v49, %v1827_v50  ;;  %v953_v18 = vadd.f32 %v889_v19, %v1829_v54  ;;  %v954_v40 = vadd.f32 %v890_v38, %v1831_v56 }
 0x13d   : > { %v955_v41 = vadd.f32 %v891_v34, %v1837_v60  ;;  %v956_v12 = vadd.f32 %v892_v51, %v1839_v62  ;;  %v1109_v16 = vrot.slane %v992_v55, 4  ;;  %v1115_v24 = vrot.slane %v2153_v39, 4 }
 0x13e   : > { %v983_v48 = vmax.f32 %v951_v37, 0.0  ;;  %v984_v26 = vmax.f32 %v952_v11, 0.0  ;;  %v985_v25 = vmax.f32 %v953_v18, 0.0  ;;  %v986_v30 = vmax.f32 %v954_v40, 0.0 }
 0x13f   : > { %v987_v9 = vmax.f32 %v955_v41, 0.0  ;;  %v988_v17 = vmax.f32 %v956_v12, 0.0  ;;  %v2044_v50 = vrot.slane %v2152_v52, 4  ;;  %v2048_v54 = vrot.slane %v2151_v57, 4 }
 0x140   : > { %v1047_v56 = vrot.slane %v1970_v23, 1  ;;  %v1055_v60 = vrot.slane %v983_v48, 4  ;;  %v1061_v62 = vrot.slane %v984_v26, 4  ;;  %v1067_v59 = vrot.slane %v985_v25, 4 }
 0x141   : > { %v1073_v15 = vrot.slane %v986_v30, 4  ;;  %v1079_v6 = vrot.slane %v987_v9, 4  ;;  %v2051_v47 = vmax.f32 %v991_v5, %v1103_v33  ;;  %v1053_v49 = vrot.slane %v1972_v42, 1 }
 0x142   : > { %v1056_v19 = vmax.f32 %v983_v48, %v1055_v60  ;;  %v1085_v38 = vrot.slane %v988_v17, 4  ;;  %v1062_v34 = vmax.f32 %v984_v26, %v1061_v62  ;;  %v1068_v51 = vmax.f32 %v985_v25, %v1067_v59 }
 0x143   : > { %v1074_v37 = vmax.f32 %v986_v30, %v1073_v15  ;;  %v1080_v11 = vmax.f32 %v987_v9, %v1079_v6  ;;  %v1048_v18 = vmax.f32 %v1970_v23, %v1047_v56  ;;  %v1199_v12 = vpack.c.bf16 %v1991_v43, %v1986_v8 }
 0x144   : > { %v1057_v40 = vrot.slane %v1056_v19, 2  ;;  %v1086_v41 = vmax.f32 %v988_v17, %v1085_v38  ;;  %v1063_v57 = vrot.slane %v1062_v34, 2  ;;  %v1069_v52 = vrot.slane %v1068_v51, 2 }
 0x145   : > { %v1075_v36 = vrot.slane %v1074_v37, 2  ;;  %v1081_v5 = vrot.slane %v1080_v11, 2  ;;  %v1054_v33 = vmax.f32 %v1972_v42, %v1053_v49  ;;  %v1200_v26 = vpack.c.bf16 %v1996_v63, %v1994_v7 }
 0x146   : > { %v1058_v39 = vmax.f32 %v1056_v19, %v1057_v40  ;;  %v1087_v48 = vrot.slane %v1086_v41, 2  ;;  %v1064_v25 = vmax.f32 %v1062_v34, %v1063_v57  ;;  %v1070_v30 = vmax.f32 %v1068_v51, %v1069_v52 }
 0x147   : > { %v1076_v9 = vmax.f32 %v1074_v37, %v1075_v36  ;;  %v1082_v23 = vmax.f32 %v1080_v11, %v1081_v5  ;;  %v2060_v56 = vmax.f32 %v992_v55, %v1109_v16  ;;  %v1201_v8 = vpack.c.bf16 %v1042_v28, %v2010_v4 }
 0x148   : > { %v1059_v17 = vrot.slane %v1058_v39, 1  ;;  %v1088_v60 = vmax.f32 %v1086_v41, %v1087_v48  ;;  %v1065_v43 = vrot.slane %v1064_v25, 1  ;;  %v1071_v62 = vrot.slane %v1070_v30, 1 }
 0x149   : > { %v1077_v59 = vrot.slane %v1076_v9, 1  ;;  %v1083_v15 = vrot.slane %v1082_v23, 1  ;;  %v876_v42 = vrot.slane %v2021_v44, 6  ;;  %v1202_v19 = vpack.c.bf16 %v1054_v33, %v1048_v18 }
 0x14a   : > { %v1060_v6 = vmax.f32 %v1058_v39, %v1059_v17  ;;  %v1089_v49 = vrot.slane %v1088_v60, 1  ;;  %v1066_v7 = vmax.f32 %v1064_v25, %v1065_v43  ;;  %v1072_v63 = vmax.f32 %v1070_v30, %v1071_v62 }
 0x14b   : > { %v1078_v52 = vmax.f32 %v1076_v9, %v1077_v59  ;;  %v1084_v57 = vmax.f32 %v1082_v23, %v1083_v15  ;;  %v1105_v55 = vrot.slane %v2051_v47, 2  ;;  %v1111_v36 = vrot.slane %v2060_v56, 2 }
 0x14c   : > { %v2158_v16 = vmax.f32 %v2005_v20, 0.0  ;;  %v1090_v28 = vmax.f32 %v1088_v60, %v1089_v49  ;;  %v1203_v38 = vpack.c.bf16 %v1066_v7, %v1060_v6  ;;  %v1233_v51 = vunpack.c.l.b16 %v1200_v26 }
 0x14d   : > { %v1204_v34 = vpack.c.bf16 %v1078_v52, %v1072_v63  ;;  %v1234_v37 = vunpack.c.h.b16 %v1200_v26  ;;  %v1231_v39 = vunpack.c.l.b16 %v1199_v12  ;;  %v1235_v11 = vunpack.c.l.b16 %v1201_v8 }
 0x14e   : > { %v1116_v4 = vmax.f32 %v2158_v16, %v1115_v24  ;;  %v1205_v44 = vpack.c.bf16 %v1090_v28, %v1084_v57  ;;  %v1236_v18 = vunpack.c.h.b16 %v1201_v8  ;;  %v1232_v40 = vunpack.c.h.b16 %v1199_v12  ;;  %v759_v28 = vpop.f32.mrf.mxu3 }
 0x14f   : > { %v1237_v41 = vunpack.c.l.b16 %v1202_v19  ;;  %v1238_v5 = vunpack.c.h.b16 %v1202_v19  ;;  %v1239_v33 = vunpack.c.l.b16 %v1203_v38  ;;  %v1240_v48 = vunpack.c.h.b16 %v1203_v38 }
 0x150   : > { %v1241_v25 = vunpack.c.l.b16 %v1204_v34  ;;  %v1242_v30 = vunpack.c.h.b16 %v1204_v34  ;;  %v1263_v9 = vsel %vm843_vm3, %v1233_v51, %v1231_v39  ;;  %v1243_v20 = vunpack.c.l.b16 %v1205_v44 }
 0x151   : > { %v1264_v24 = vsel %vm846_vm4, %v1235_v11, %v1263_v9  ;;  %v1271_v23 = vsel %vm843_vm3, %v1234_v37, %v1232_v40  ;;  %v871_v26 = vsel %vm852_vm6, %v1957_v27, %v1968_v61  ;;  %v873_v8 = vsel %vm855_vm7, %v1957_v27, %v1968_v61 }
 0x152   : > { %v1265_v17 = vsel %vm849_vm5, %v1237_v41, %v1264_v24  ;;  %v1272_v12 = vsel %vm846_vm4, %v1236_v18, %v1271_v23  ;;  %v872_v60 = vrot.slane %v871_v26, 4  ;;  %v1244_v43 = vunpack.c.h.b16 %v1205_v44 }
 0x153   : > { %v1266_v62 = vsel %vm852_vm6, %v1239_v33, %v1265_v17  ;;  %v1273_v59 = vsel %vm849_vm5, %v1238_v5, %v1272_v12  ;;  %v874_v15 = vrot.slane %v873_v8, 5  ;;  %v2159_v63 = vmax.f32 %v2016_v14, 0.0 }
 0x154   : > { %v1267_v6 = vsel %vm855_vm7, %v1241_v25, %v1266_v62  ;;  %v1274_v49 = vsel %vm852_vm6, %v1240_v48, %v1273_v59  ;;  %v903_v19 = vperm.slane %v872_v60, 0  ;;  %v904_v7 = vperm.slane %v872_v60, 1 }
 0x155   : > { %v1133_v52 = vrot.slane %v2159_v63, 4  ;;  %v2086_v57 = vsel %vm858_vm8, %v1243_v20, %v1267_v6  ;;  %v1275_v16 = vsel %vm855_vm7, %v1242_v30, %v1274_v49  ;;  %v905_v38 = vperm.slane %v874_v15, 0 }
 0x156   : > { %v2160_v34 = vmax.f32 %v2008_v21, 0.0  ;;  %v2093_v37 = vsel %vm858_vm8, %v1244_v43, %v1275_v16  ;;  %v967_v44 = vadd.f32 %v903_v19, %v1945_v0  ;;  %v968_v39 = vadd.f32 %v904_v7, %v1948_v53 }
 0x157   : > { %v997_v11 = vmax.f32 %v2024_v35, 0.0  ;;  %v906_v18 = vperm.slane %v874_v15, 1  ;;  %v1106_v40 = vmax.f32 %v2051_v47, %v1105_v55  ;;  %v1112_v41 = vmax.f32 %v2060_v56, %v1111_v36 }
 0x158   : > { %v1122_v51 = vmax.f32 %v2160_v34, %v2044_v50  ;;  %v998_v5 = vmax.f32 %v2029_v58, 0.0  ;;  %v907_v33 = vperm.slane %v876_v42, 0  ;;  %v760_v21 = vadd.f32 %v759_v28, %v1865_v13 }
 0x159   : > { %v1117_v50 = vrot.slane %v1116_v4, 2  ;;  %v908_v48 = vperm.slane %v876_v42, 1  ;;  %v969_v25 = vadd.f32 %v905_v38, %v1951_v2  ;;  %v999_v30 = vmax.f32 %v967_v44, 0.0 }
 0x15a   : > { %v1000_v0 = vmax.f32 %v968_v39, 0.0  ;;  %v1123_v53 = vrot.slane %v1122_v51, 2  ;;  %v2161_v35 = vmax.f32 %v2013_v22, 0.0  ;;  %v2162_v47 = vmov %v2159_v63 }
 0x15b   : > { %v1118_v9 = vmax.f32 %v1116_v4, %v1117_v50  ;;  %v1134_v56 = vmax.f32 %v2162_v47, %v1133_v52  ;;  %v970_v58 = vadd.f32 %v906_v18, %v1960_v32  ;;  %v1107_v55 = vrot.slane %v1106_v40, 1 }
 0x15c   : > { %v1128_v20 = vmax.f32 %v2161_v35, %v2048_v54  ;;  %v1113_v36 = vrot.slane %v1112_v41, 1  ;;  %v1139_v13 = vrot.slane %v997_v11, 4  ;;  %v1124_v24 = vmax.f32 %v1122_v51, %v1123_v53 }
 0x15d   : > { %v1135_v23 = vrot.slane %v1134_v56, 2  ;;  %v1145_v2 = vrot.slane %v998_v5, 4  ;;  %v971_v26 = vadd.f32 %v907_v33, %v1999_v10  ;;  %v1001_v4 = vmax.f32 %v969_v25, 0.0 }
 0x15e   : > { %v1129_v42 = vrot.slane %v1128_v20, 2  ;;  %v1119_v17 = vrot.slane %v1118_v9, 1  ;;  %v1151_v12 = vrot.slane %v999_v30, 4  ;;  %v1125_v60 = vrot.slane %v1124_v24, 1 }
 0x15f   : > { %v1136_v54 = vmax.f32 %v1134_v56, %v1135_v23  ;;  %v1157_v8 = vrot.slane %v1000_v0, 4  ;;  %v972_v14 = vadd.f32 %v908_v48, %v760_v21  ;;  %v1002_v43 = vmax.f32 %v970_v58, 0.0 }
 0x160   : > { %v1130_v22 = vmax.f32 %v1128_v20, %v1129_v42  ;;  %v1108_v62 = vmax.f32 %v1106_v40, %v1107_v55  ;;  %v1140_v32 = vmax.f32 %v997_v11, %v1139_v13  ;;  %v1114_v59 = vmax.f32 %v1112_v41, %v1113_v36 }
 0x161   : > { %v1137_v6 = vrot.slane %v1136_v54, 1  ;;  %v1146_v49 = vmax.f32 %v998_v5, %v1145_v2  ;;  %v1003_v19 = vmax.f32 %v971_v26, 0.0  ;;  %v1152_v7 = vmax.f32 %v999_v30, %v1151_v12 }
 0x162   : > { %v1131_v15 = vrot.slane %v1130_v22, 1  ;;  %v1120_v63 = vmax.f32 %v1118_v9, %v1119_v17  ;;  %v1126_v52 = vmax.f32 %v1124_v24, %v1125_v60  ;;  %v1158_v10 = vmax.f32 %v1000_v0, %v1157_v8  ;;  %v712_v8 = vpop.f32.mrf.mxu2 }
 0x163   : > { %v1163_v16 = vrot.slane %v1001_v4, 4  ;;  %v1138_v38 = vmax.f32 %v1136_v54, %v1137_v6  ;;  %v1141_v34 = vrot.slane %v1140_v32, 2  ;;  %v1004_v51 = vmax.f32 %v972_v14, 0.0  ;;  %v761_v14 = vpop.f32.mrf.mxu3 }
 0x164   : > { %v1132_v28 = vmax.f32 %v1130_v22, %v1131_v15  ;;  %v1147_v44 = vrot.slane %v1146_v49, 2  ;;  %v1169_v39 = vrot.slane %v1002_v43, 4  ;;  %v1207_v18 = vpack.c.bf16 %v1114_v59, %v1108_v62 }
 0x165   : > { %v1175_v33 = vrot.slane %v1003_v19, 4  ;;  %v1153_v40 = vrot.slane %v1152_v7, 2  ;;  %v1159_v11 = vrot.slane %v1158_v10, 2  ;;  %v1164_v41 = vmax.f32 %v1001_v4, %v1163_v16  ;;  %v2164_v16 = vld [vmem:[#allocation2_spill] sm:$0xff] }
 0x166   : > { %v1208_v21 = vpack.c.bf16 %v1126_v52, %v1120_v63  ;;  %v1142_v50 = vmax.f32 %v1140_v32, %v1141_v34  ;;  %v1209_v5 = vpack.c.bf16 %v1138_v38, %v1132_v28  ;;  %v1148_v48 = vmax.f32 %v1146_v49, %v1147_v44 }
 0x167   : > { %v1170_v25 = vmax.f32 %v1002_v43, %v1169_v39  ;;  %v1181_v30 = vrot.slane %v1004_v51, 4  ;;  %v1176_v9 = vmax.f32 %v1003_v19, %v1175_v33  ;;  %v1154_v0 = vmax.f32 %v1152_v7, %v1153_v40  ;;  %v2163_v7 = vld [vmem:[#allocation3_spill] sm:$0xff] }
 0x168   : > { %v1249_v53 = vunpack.c.l.b16 %v1208_v21  ;;  %v1250_v35 = vunpack.c.h.b16 %v1208_v21  ;;  %v1160_v20 = vmax.f32 %v1158_v10, %v1159_v11  ;;  %v1165_v47 = vrot.slane %v1164_v41, 2 }
 0x169   : > { %v1247_v56 = vunpack.c.l.b16 %v1207_v18  ;;  %v1251_v58 = vunpack.c.l.b16 %v1209_v5  ;;  %v1143_v55 = vrot.slane %v1142_v50, 1  ;;  %v1248_v36 = vunpack.c.h.b16 %v1207_v18 }
 0x16a   : > { %v1252_v13 = vunpack.c.h.b16 %v1209_v5  ;;  %v1149_v24 = vrot.slane %v1148_v48, 1  ;;  %v1171_v42 = vrot.slane %v1170_v25, 2  ;;  %v1182_v23 = vmax.f32 %v1004_v51, %v1181_v30 }
 0x16b   : > { %v1278_v2 = vsel %vm843_vm3, %v1249_v53, %v1247_v56  ;;  %v1177_v26 = vrot.slane %v1176_v9, 2  ;;  %v1285_v17 = vsel %vm843_vm3, %v1250_v35, %v1248_v36  ;;  %v1155_v12 = vrot.slane %v1154_v0, 1 }
 0x16c   : > { %v1279_v4 = vsel %vm846_vm4, %v1251_v58, %v1278_v2  ;;  %v1161_v60 = vrot.slane %v1160_v20, 1  ;;  %v1166_v22 = vmax.f32 %v1164_v41, %v1165_v47  ;;  %v1286_v54 = vsel %vm846_vm4, %v1252_v13, %v1285_v17 }
 0x16d   : > { %v693_v43 = vadd.f32 %v1845_v1, %v1823_v46  ;;  %v742_v62 = vadd.f32 %v1849_v3, %v1821_v45  ;;  %v862_v32 = vsel %vm861_vm9, %v1894_v31, %v1892_v29  ;;  %v877_v59 = vsel %vm861_vm9, %v1968_v61, %v1957_v27 }
 0x16e   : > { %v1144_v15 = vmax.f32 %v1142_v50, %v1143_v55  ;;  %v1150_v6 = vmax.f32 %v1148_v48, %v1149_v24  ;;  %v1172_v49 = vmax.f32 %v1170_v25, %v1171_v42  ;;  %v1183_v19 = vrot.slane %v1182_v23, 2 }
 0x16f   : > { %v713_v63 = vadd.f32 %v712_v8, %v2163_v7  ;;  %v863_v52 = vrot.slane %v862_v32, 7  ;;  %v878_v10 = vrot.slane %v877_v59, 7  ;;  %v762_v28 = vadd.f32 %v761_v14, %v2164_v16 }
 0x170   : > { %v1178_v46 = vmax.f32 %v1176_v9, %v1177_v26  ;;  %v1156_v1 = vmax.f32 %v1154_v0, %v1155_v12  ;;  %v1162_v38 = vmax.f32 %v1160_v20, %v1161_v60  ;;  %v1167_v45 = vrot.slane %v1166_v22, 1 }
 0x171   : > { %v893_v3 = vperm.slane %v863_v52, 0  ;;  %v894_v34 = vperm.slane %v863_v52, 1  ;;  %v909_v29 = vperm.slane %v878_v10, 0  ;;  %v910_v31 = vperm.slane %v878_v10, 1 }
 0x172   : > { %v1173_v51 = vrot.slane %v1172_v49, 1  ;;  %v1184_v27 = vmax.f32 %v1182_v23, %v1183_v19  ;;  %v1210_v61 = vpack.c.bf16 %v1150_v6, %v1144_v15  ;;  %v1179_v40 = vrot.slane %v1178_v46, 1 }
 0x173   : > { %v957_v44 = vadd.f32 %v893_v3, %v693_v43  ;;  %v958_v39 = vadd.f32 %v894_v34, %v742_v62  ;;  %v973_v18 = vadd.f32 %v909_v29, %v713_v63  ;;  %v974_v33 = vadd.f32 %v910_v31, %v762_v28 }
 0x174   : > { %v1168_v11 = vmax.f32 %v1166_v22, %v1167_v45  ;;  %v1211_v41 = vpack.c.bf16 %v1162_v38, %v1156_v1  ;;  %v1174_v25 = vmax.f32 %v1172_v49, %v1173_v51  ;;  %v1185_v30 = vrot.slane %v1184_v27, 1 }
 0x175   : > { %v989_v21 = vmax.f32 %v957_v44, 0.0  ;;  %v990_v50 = vmax.f32 %v958_v39, 0.0  ;;  %v1005_v5 = vmax.f32 %v973_v18, 0.0  ;;  %v1006_v48 = vmax.f32 %v974_v33, 0.0 }
 0x176   : > { %v1253_v9 = vunpack.c.l.b16 %v1210_v61  ;;  %v1254_v0 = vunpack.c.h.b16 %v1210_v61  ;;  %v1180_v56 = vmax.f32 %v1178_v46, %v1179_v40  ;;  %v1186_v23 = vmax.f32 %v1184_v27, %v1185_v30 }
 0x177   : > { %v1091_v53 = vrot.slane %v989_v21, 4  ;;  %v1097_v35 = vrot.slane %v990_v50, 4  ;;  %v1187_v20 = vrot.slane %v1005_v5, 4  ;;  %v1193_v47 = vrot.slane %v1006_v48, 4 }
 0x178   : > { %v1280_v58 = vsel %vm849_vm5, %v1253_v9, %v1279_v4  ;;  %v1287_v55 = vsel %vm849_vm5, %v1254_v0, %v1286_v54  ;;  %v1212_v2 = vpack.c.bf16 %v1174_v25, %v1168_v11  ;;  %v1255_v26 = vunpack.c.l.b16 %v1211_v41 }
 0x179   : > { %v1092_v36 = vmax.f32 %v989_v21, %v1091_v53  ;;  %v1098_v13 = vmax.f32 %v990_v50, %v1097_v35  ;;  %v1188_v24 = vmax.f32 %v1005_v5, %v1187_v20  ;;  %v1194_v42 = vmax.f32 %v1006_v48, %v1193_v47 }
 0x17a   : > { %v1256_v17 = vunpack.c.h.b16 %v1211_v41  ;;  %v1281_v14 = vsel %vm852_vm6, %v1255_v26, %v1280_v58  ;;  %v1213_v59 = vpack.c.bf16 %v1186_v23, %v1180_v56  ;;  %v1257_v15 = vunpack.c.l.b16 %v1212_v2 }
 0x17b   : > { %v1093_v12 = vrot.slane %v1092_v36, 2  ;;  %v1099_v60 = vrot.slane %v1098_v13, 2  ;;  %v1189_v22 = vrot.slane %v1188_v24, 2  ;;  %v1195_v8 = vrot.slane %v1194_v42, 2 }
 0x17c   : > { %v1288_v43 = vsel %vm852_vm6, %v1256_v17, %v1287_v55  ;;  %v1258_v6 = vunpack.c.h.b16 %v1212_v2  ;;  %v1282_v52 = vsel %vm855_vm7, %v1257_v15, %v1281_v14  ;;  %v1259_v38 = vunpack.c.l.b16 %v1213_v59 }
 0x17d   : > { %v1094_v62 = vmax.f32 %v1092_v36, %v1093_v12  ;;  %v1100_v4 = vmax.f32 %v1098_v13, %v1099_v60  ;;  %v1190_v32 = vmax.f32 %v1188_v24, %v1189_v22  ;;  %v1196_v54 = vmax.f32 %v1194_v42, %v1195_v8 }
 0x17e   : > { %v1289_v10 = vsel %vm855_vm7, %v1258_v6, %v1288_v43  ;;  %v1260_v45 = vunpack.c.h.b16 %v1213_v59  ;;  %v1283_v29 = vsel %vm858_vm8, %v1259_v38, %v1282_v52 }
 0x17f   : > { %v1095_v49 = vrot.slane %v1094_v62, 1  ;;  %v1101_v19 = vrot.slane %v1100_v4, 1  ;;  %v1191_v7 = vrot.slane %v1190_v32, 1  ;;  %v1197_v63 = vrot.slane %v1196_v54, 1 }
 0x180   : > { %v1290_v31 = vsel %vm858_vm8, %v1260_v45, %v1289_v10 }
 0x181   : > { %v1096_v16 = vmax.f32 %v1094_v62, %v1095_v49  ;;  %v1102_v28 = vmax.f32 %v1100_v4, %v1101_v19  ;;  %v1192_v46 = vmax.f32 %v1190_v32, %v1191_v7  ;;  %v1198_v1 = vmax.f32 %v1196_v54, %v1197_v63 }
 0x183   : > { %v1206_v3 = vpack.c.bf16 %v1102_v28, %v1096_v16  ;;  %v1214_v34 = vpack.c.bf16 %v1198_v1, %v1192_v46 }
 0x185   : > { %v1245_v51 = vunpack.c.l.b16 %v1206_v3  ;;  %v1246_v27 = vunpack.c.h.b16 %v1206_v3  ;;  %v1261_v61 = vunpack.c.l.b16 %v1214_v34  ;;  %v1262_v44 = vunpack.c.h.b16 %v1214_v34 }
 0x187   : > { %v1270_v39 = vsel %vm1269_vm10, %v1245_v51, %v2086_v57  ;;  %v1277_v18 = vsel %vm1269_vm10, %v1246_v27, %v2093_v37  ;;  %v1284_v33 = vsel %vm1269_vm10, %v1261_v61, %v1283_v29  ;;  %v1291_v40 = vsel %vm1269_vm10, %v1262_v44, %v1290_v31 }
 0x188   : > { %v1292_v11 = vpack.c.b16 %v1277_v18, %v1270_v39  ;;  %v1293_v41 = vpack.c.b16 %v1291_v40, %v1284_v33 }
 0x18a   : > { %1296 = vst [vmem:[%s299_s19] sm:$0xff] %v1292_v11 }
 0x18b   : > { %1297 = vst [vmem:[%s299_s19 + $0x8] sm:$0xff] %v1293_v41 }
 0x18c PF: > { %s16_s21 = sadd.s32 1, %s1571_s21  }
 0x18d   : > { %p13_p5 = scmp.ge.s32.totalorder %s16_s21, 6  }
 0x18f   :  { %15 = sbr.rel (!%p13_p5) target bundleno = 1 (0x1), region = 80 }

// kernel: rscnn_forward.6
= control target key start
LH: loop header
LB: loop body
LE: loop exit
PB: predicated region body
PF: predicated region fallthrough
CT: control target
= control target key end

     0   :  { %s3215_s21 = smov 0   ;;  %s4942_s0 = inlined_call_operand.vmem [shape: f32[256,3], index: 0, kind: input, shape index: {}]   ;;  %s4943_s1 = inlined_call_operand.vmem [shape: bf16[256,256], index: 1, kind: input, shape index: {}]   ;;  %s4944_s2 = inlined_call_operand.vmem [shape: f32[32,3], index: 2, kind: input, shape index: {}]   ;;  %s4945_s3 = inlined_call_operand.vmem [shape: f32[3,512], index: 3, kind: input, shape index: {}]   ;;  %s4946_s4 = inlined_call_operand.vmem [shape: bf16[256,512], index: 4, kind: input, shape index: {}]   ;;  %s4947_s5 = inlined_call_operand.vmem [shape: f32[1,512], index: 5, kind: input, shape index: {}]   ;;  %s4948_s6 = inlined_call_operand.vmem [shape: bf16[32,512], index: 6, kind: output, shape index: {}]  }
   0x1 LB: > { %s2665_s22 = sadd.s32 4294967295, %s3178_s21   ;;  %p2669_p0 = scmp.ge.s32.totalorder %s3178_s21, 1  ;;  %s3178_s21 = sphi %s3215_s21, %s16_s21  }
   0x2   : > { %p236_p1 = scmp.lt.s32.totalorder %s3178_s21, 3 }
   0x4   : > { %p237_p2 = pnand %p2669_p0, %p236_p1 }
   0x6   : > { %240 = sbr.rel (%p237_p2) target bundleno = 758 (0x2f6), region = 44 }
   0xb   : > { %v304_v0 = vld [vmem:[%s4945_s3] sm:$0x77]  ;;  %v305_v1 = vld [vmem:[%s4945_s3 + $0x8] sm:$0x77]  ;;  %s2670_s27 = sshll.u32 %s2665_s22, 4  ;;  %vm460_vm0 = vcmask 1042432  }
   0xc   : > { %404 = vst [vmem:[#allocation1] ss:$2 sm:$0xff] %v304_v0  ;;  %p279_p3 = scmp.lt.s32.totalorder %s2670_s27, 31  ;;  %v3128_v2 = vld [vmem:[%s4946_s4 + $0xe4] sm:$0xf]  ;;  %vm411_vm1 = vcmask 23552  }
   0xd   : > { %406 = vst [vmem:[#allocation1 + $0x10] ss:$2 sm:$0xff] %v305_v1  ;;  %v2928_v3 = vld [vmem:[%s4946_s4 + $0xf0] sm:$0xf0]  ;;  %v3160_v4 = vld [vmem:[%s4946_s4 + $0x1e4] sm:$0xf] }
   0xe   : > { %s5180_s27 = smov (!%p279_p3, %s2670_s27), 31  ;;  %v3056_v5 = vld [vmem:[%s4946_s4 + $0x1f0] sm:$0xf0]  ;;  %v3054_v6 = vld [vmem:[%s4946_s4 + $0x1e0] sm:$0xf]  ;;  %v2931_v17 = vor.u32 %v3128_v2, %v2928_v3  ;;  %vm1668_vm2 = vcmask 1040384  }
   0xf   : > { %s2671_s30 = sshll.u32 %s5180_s27, 3  ;;  %v3162_v7 = vld [vmem:[%s4946_s4 + $0x1ec] sm:$0xf0]  ;;  %v2926_v9 = vld [vmem:[%s4946_s4 + $0xe0] sm:$0xf]  ;;  %v3059_v18 = vor.u32 %v3160_v4, %v3056_v5  ;;  %vm1670_vm3 = vcmask 1042434  }
  0x10   : > { %s3248_s13 = scalar_lea.vmem %s4942_s0, %s2671_s30  ;;  %v3130_v10 = vld [vmem:[%s4946_s4 + $0xec] sm:$0xf0]  ;;  %v3124_v13 = vld [vmem:[%s4946_s4 + $0xc4] sm:$0xf]  ;;  %v2912_v14 = vld [vmem:[%s4946_s4 + $0xd0] sm:$0xf0]  ;;  %v3055_v20 = vor.u32 %v3162_v7, %v3054_v6  ;;  %s3554_s9 = scalar_lea.vmem %s4943_s1, %s2671_s30 }
  0x11   : > { %v386_v8 = vld [vmem:[%s3248_s13] sm:$0xff]  ;;  %v2927_v21 = vor.u32 %v3130_v10, %v2926_v9  ;;  %v3040_v22 = vld [vmem:[%s4946_s4 + $0x1d0] sm:$0xf0]  ;;  %v3158_v24 = vld [vmem:[%s4946_s4 + $0x1cc] sm:$0xf0]  ;;  %v2915_v27 = vor.u32 %v3124_v13, %v2912_v14  ;;  %vm1674_vm4 = vcmask 1041409  }
  0x12   : > { %v3156_v15 = vld [vmem:[%s4946_s4 + $0x1c4] sm:$0xf]  ;;  %v3038_v23 = vld [vmem:[%s4946_s4 + $0x1c0] sm:$0xf]  ;;  %v3126_v26 = vld [vmem:[%s4946_s4 + $0xcc] sm:$0xf0] }
  0x13   : > { %v407_v11 = vld.sshfl [vmem:[#allocation1] sm:$0xff pattern:$0x75316420]  ;;  %v408_v12 = vld.sshfl [vmem:[#allocation1 + $0x8] sm:$0xff pattern:$0x75316420]  ;;  %v3043_v28 = vor.u32 %v3156_v15, %v3040_v22  ;;  %v3039_v30 = vor.u32 %v3158_v24, %v3038_v23 }
  0x14   : > { %2680 = vmatpush.msk.msra.mxu0 %vm460_vm0, %v407_v11  ;;  %2697 = vmatpush.msk.msra.mxu1 %vm460_vm0, %v408_v12  ;;  %1524 = vst [vmem:[#allocation1] ss:$2 sm:$0xff] %v304_v0  ;;  %v409_v16 = vld.sshfl [vmem:[#allocation1 + $0x10] sm:$0xff pattern:$0x75316420]  ;;  %v387_v34 = vld [vmem:[%s3248_s13 + $0x8] sm:$0xff] }
  0x15   : > { %2714 = vmatpush.msk.msra.mxu2 %vm460_vm0, %v409_v16  ;;  %v410_v19 = vld.sshfl [vmem:[#allocation1 + $0x18] sm:$0xff pattern:$0x75316420]  ;;  %2681 = vmatmul.msk.f32.vlgmr.msra.gmra.mxu0 %vm411_vm1, %v386_v8  ;;  %v2910_v25 = vld [vmem:[%s4946_s4 + $0xc0] sm:$0xf]  ;;  %v388_v44 = vld [vmem:[%s3248_s13 + $0x10] sm:$0xff] }
  0x16   : > { %2731 = vmatpush.msk.msra.mxu3 %vm460_vm0, %v410_v19  ;;  %1526 = vst [vmem:[#allocation1 + $0x10] ss:$2 sm:$0xff] %v305_v1  ;;  %2698 = vmatmul.msk.f32.vlgmr.msra.gmra.mxu1 %vm411_vm1, %v386_v8  ;;  %v3120_v29 = vld [vmem:[%s4946_s4 + $0xa4] sm:$0xf]  ;;  %v2896_v31 = vld [vmem:[%s4946_s4 + $0xb0] sm:$0xf0]  ;;  %v2911_v35 = vor.u32 %v3126_v26, %v2910_v25 }
  0x17   : > { %2715 = vmatmul.msk.f32.vlgmr.msra.gmra.mxu2 %vm411_vm1, %v386_v8  ;;  %2732 = vmatmul.msk.f32.vlgmr.msra.gmra.mxu3 %vm411_vm1, %v386_v8  ;;  %v3152_v32 = vld [vmem:[%s4946_s4 + $0x1a4] sm:$0xf]  ;;  %v3024_v33 = vld [vmem:[%s4946_s4 + $0x1b0] sm:$0xf0]  ;;  %v3022_v36 = vld [vmem:[%s4946_s4 + $0x1a0] sm:$0xf]  ;;  %v2899_v38 = vor.u32 %v3120_v29, %v2896_v31 }
  0x18   : > { %1227 = vmatpush.bf16.msrb.mxu2 %v2931_v17  ;;  %1276 = vmatpush.bf16.msrb.mxu3 %v3059_v18  ;;  %v3154_v37 = vld [vmem:[%s4946_s4 + $0x1ac] sm:$0xf0]  ;;  %v3027_v39 = vor.u32 %v3152_v32, %v3024_v33  ;;  %v2894_v41 = vld [vmem:[%s4946_s4 + $0xa0] sm:$0xf]  ;;  %v3116_v45 = vld [vmem:[%s4946_s4 + $0x84] sm:$0xf] }
  0x19   : > { %1178 = vmatpush.bf16.msrb.mxu1 %v3055_v20  ;;  %1129 = vmatpush.bf16.msrb.mxu0 %v2927_v21  ;;  %v3023_v40 = vor.u32 %v3154_v37, %v3022_v36  ;;  %v3122_v42 = vld [vmem:[%s4946_s4 + $0xac] sm:$0xf0]  ;;  %v2880_v46 = vld [vmem:[%s4946_s4 + $0x90] sm:$0xf0]  ;;  %v3148_v47 = vld [vmem:[%s4946_s4 + $0x184] sm:$0xf] }
  0x1a   : > { %v2895_v43 = vor.u32 %v3122_v42, %v2894_v41  ;;  %v2883_v48 = vor.u32 %v3116_v45, %v2880_v46  ;;  %v3008_v49 = vld [vmem:[%s4946_s4 + $0x190] sm:$0xf0]  ;;  %v3006_v50 = vld [vmem:[%s4946_s4 + $0x180] sm:$0xf]  ;;  %v3150_v51 = vld [vmem:[%s4946_s4 + $0x18c] sm:$0xf0] }
  0x1b   : > { %v3011_v52 = vor.u32 %v3148_v47, %v3008_v49  ;;  %v3007_v53 = vor.u32 %v3150_v51, %v3006_v50  ;;  %v389_v54 = vld [vmem:[%s3248_s13 + $0x18] sm:$0xff]  ;;  %v2878_v55 = vld [vmem:[%s4946_s4 + $0x80] sm:$0xf]  ;;  %v3118_v56 = vld [vmem:[%s4946_s4 + $0x8c] sm:$0xf0]  ;;  %vm1676_vm5 = vcmask 1043459  }
  0x1c   : > { %1228 = vmatpush.bf16.msrb.mxu2 %v2915_v27  ;;  %1277 = vmatpush.bf16.msrb.mxu3 %v3043_v28  ;;  %v2879_v57 = vor.u32 %v3118_v56, %v2878_v55  ;;  %v390_v58 = vld [vmem:[%s3248_s13 + $0x20] sm:$0xff]  ;;  %v2864_v60 = vld [vmem:[%s4946_s4 + $0x70] sm:$0xf0]  ;;  %v3146_v1 = vld [vmem:[%s4946_s4 + $0x16c] sm:$0xf0]  ;;  %vm1682_vm6 = vcmask 1044484  }
  0x1d   : > { %2682 = vmatmul.msk.f32.gmra.mxu0 %vm411_vm1, %v387_v34  ;;  %1179 = vmatpush.bf16.msrb.mxu1 %v3039_v30  ;;  %v3112_v59 = vld [vmem:[%s4946_s4 + $0x64] sm:$0xf]  ;;  %v2992_v63 = vld [vmem:[%s4946_s4 + $0x170] sm:$0xf0]  ;;  %v2990_v0 = vld [vmem:[%s4946_s4 + $0x160] sm:$0xf] }
  0x1e   : > { %2699 = vmatmul.msk.f32.gmra.mxu1 %vm411_vm1, %v387_v34  ;;  %1130 = vmatpush.bf16.msrb.mxu0 %v2911_v35  ;;  %v3144_v61 = vld [vmem:[%s4946_s4 + $0x164] sm:$0xf]  ;;  %v2867_v62 = vor.u32 %v3112_v59, %v2864_v60  ;;  %v2991_v3 = vor.u32 %v3146_v1, %v2990_v0  ;;  %v391_v4 = vld [vmem:[%s3248_s13 + $0x28] sm:$0xff]  ;;  %v2862_v5 = vld [vmem:[%s4946_s4 + $0x60] sm:$0xf]  ;;  %vm1688_vm7 = vcmask 1045509  }
  0x1f   : > { %2716 = vmatmul.msk.f32.gmra.mxu2 %vm411_vm1, %v387_v34  ;;  %2733 = vmatmul.msk.f32.gmra.mxu3 %vm411_vm1, %v387_v34  ;;  %v2995_v2 = vor.u32 %v3144_v61, %v2992_v63  ;;  %v3114_v6 = vld [vmem:[%s4946_s4 + $0x6c] sm:$0xf0]  ;;  %v3108_v9 = vld [vmem:[%s4946_s4 + $0x44] sm:$0xf]  ;;  %v2848_v10 = vld [vmem:[%s4946_s4 + $0x50] sm:$0xf0] }
  0x20   : > { %1229 = vmatpush.bf16.msrb.mxu2 %v2899_v38  ;;  %1278 = vmatpush.bf16.msrb.mxu3 %v3027_v39  ;;  %v2863_v7 = vor.u32 %v3114_v6, %v2862_v5  ;;  %v392_v8 = vld [vmem:[%s3248_s13 + $0x30] sm:$0xff]  ;;  %v3140_v11 = vld [vmem:[%s4946_s4 + $0x144] sm:$0xf]  ;;  %v2851_v12 = vor.u32 %v3108_v9, %v2848_v10  ;;  %v2974_v14 = vld [vmem:[%s4946_s4 + $0x140] sm:$0xf]  ;;  %vm1694_vm8 = vcmask 1046534  }
  0x21   : > { %1180 = vmatpush.bf16.msrb.mxu1 %v3023_v40  ;;  %v2976_v13 = vld [vmem:[%s4946_s4 + $0x150] sm:$0xf0]  ;;  %v3142_v15 = vld [vmem:[%s4946_s4 + $0x14c] sm:$0xf0]  ;;  %v393_v18 = vld [vmem:[%s3248_s13 + $0x38] sm:$0xff]  ;;  %vm1700_vm9 = vcmask 1046528  }
  0x22   : > { %1131 = vmatpush.bf16.msrb.mxu0 %v2895_v43  ;;  %v2979_v16 = vor.u32 %v3140_v11, %v2976_v13  ;;  %v2975_v17 = vor.u32 %v3142_v15, %v2974_v14  ;;  %v2846_v19 = vld [vmem:[%s4946_s4 + $0x40] sm:$0xf]  ;;  %v3110_v20 = vld [vmem:[%s4946_s4 + $0x4c] sm:$0xf0]  ;;  %v3104_v23 = vld [vmem:[%s4946_s4 + $0x24] sm:$0xf] }
  0x23   : > { %v2847_v21 = vor.u32 %v3110_v20, %v2846_v19  ;;  %v394_v22 = vld [vmem:[%s3248_s13 + $0x40] sm:$0xff]  ;;  %v2832_v24 = vld [vmem:[%s4946_s4 + $0x30] sm:$0xf0]  ;;  %v3138_v29 = vld [vmem:[%s4946_s4 + $0x12c] sm:$0xf0]  ;;  %vm1672_vm10 = vcmask 1041408  }
  0x24   : > { %1230 = vmatpush.bf16.msrb.mxu2 %v2883_v48  ;;  %1279 = vmatpush.bf16.msrb.mxu3 %v3011_v52  ;;  %v3136_v25 = vld [vmem:[%s4946_s4 + $0x124] sm:$0xf]  ;;  %v2835_v26 = vor.u32 %v3104_v23, %v2832_v24  ;;  %v2960_v27 = vld [vmem:[%s4946_s4 + $0x130] sm:$0xf0]  ;;  %v2958_v28 = vld [vmem:[%s4946_s4 + $0x120] sm:$0xf] }
  0x25   : > { %2683 = vmatmul.msk.f32.gmra.mxu0 %vm411_vm1, %v388_v44  ;;  %1181 = vmatpush.bf16.msrb.mxu1 %v3007_v53  ;;  %v2963_v30 = vor.u32 %v3136_v25, %v2960_v27  ;;  %v2959_v31 = vor.u32 %v3138_v29, %v2958_v28  ;;  %v395_v32 = vld [vmem:[%s3248_s13 + $0x48] sm:$0xff]  ;;  %v2830_v33 = vld [vmem:[%s4946_s4 + $0x20] sm:$0xf]  ;;  %v3106_v34 = vld [vmem:[%s4946_s4 + $0x2c] sm:$0xf0]  ;;  %vm1678_vm11 = vcmask 1042433  }
  0x26   : > { %2700 = vmatmul.msk.f32.gmra.mxu1 %vm411_vm1, %v388_v44  ;;  %1132 = vmatpush.bf16.msrb.mxu0 %v2879_v57  ;;  %v2831_v35 = vor.u32 %v3106_v34, %v2830_v33  ;;  %v396_v36 = vld [vmem:[%s3248_s13 + $0x50] sm:$0xff]  ;;  %v3100_v37 = vld [vmem:[%s4946_s4 + $0x4] sm:$0xf]  ;;  %v2942_v42 = vld [vmem:[%s4946_s4 + $0x100] sm:$0xf]  ;;  %vm1684_vm12 = vcmask 1043458  }
  0x27   : > { %2717 = vmatmul.msk.f32.gmra.mxu2 %vm411_vm1, %v388_v44  ;;  %2734 = vmatmul.msk.f32.gmra.mxu3 %vm411_vm1, %v388_v44  ;;  %v2816_v38 = vld [vmem:[%s4946_s4 + $0x10] sm:$0xf0]  ;;  %v3132_v39 = vld [vmem:[%s4946_s4 + $0x104] sm:$0xf]  ;;  %v3134_v43 = vld [vmem:[%s4946_s4 + $0x10c] sm:$0xf0] }
  0x28   : > { %1231 = vmatpush.bf16.msrb.mxu2 %v2867_v62  ;;  %1280 = vmatpush.bf16.msrb.mxu3 %v2995_v2  ;;  %v2819_v40 = vor.u32 %v3100_v37, %v2816_v38  ;;  %v2944_v41 = vld [vmem:[%s4946_s4 + $0x110] sm:$0xf0]  ;;  %v2943_v45 = vor.u32 %v3134_v43, %v2942_v42  ;;  %v397_v46 = vld [vmem:[%s3248_s13 + $0x58] sm:$0xff]  ;;  %v2814_v47 = vld [vmem:[%s4946_s4] sm:$0xf]  ;;  %vm1690_vm13 = vcmask 1044483  }
  0x29   : > { %1182 = vmatpush.bf16.msrb.mxu1 %v2991_v3  ;;  %v2947_v44 = vor.u32 %v3132_v39, %v2944_v41  ;;  %v3102_v48 = vld [vmem:[%s4946_s4 + $0xc] sm:$0xf0]  ;;  %v398_v50 = vld [vmem:[%s3248_s13 + $0x60] sm:$0xff]  ;;  %v3129_v51 = vld [vmem:[%s4946_s4 + $0xec] sm:$0xf]  ;;  %vm1696_vm14 = vcmask 1045508  }
  0x2a   : > { %1133 = vmatpush.bf16.msrb.mxu0 %v2863_v7  ;;  %v2815_v49 = vor.u32 %v3102_v48, %v2814_v47  ;;  %v2936_v52 = vld [vmem:[%s4946_s4 + $0xf8] sm:$0xf0]  ;;  %v3161_v53 = vld [vmem:[%s4946_s4 + $0x1ec] sm:$0xf]  ;;  %v3163_v59 = vld [vmem:[%s4946_s4 + $0x1f4] sm:$0xf0] }
  0x2b   : > { %v3064_v55 = vld [vmem:[%s4946_s4 + $0x1f8] sm:$0xf0]  ;;  %v399_v57 = vld [vmem:[%s3248_s13 + $0x68] sm:$0xff]  ;;  %v3131_v62 = vld [vmem:[%s4946_s4 + $0xf4] sm:$0xf0]  ;;  %vm1702_vm15 = vcmask 1046533  }
  0x2c   : > { %1232 = vmatpush.bf16.msrb.mxu2 %v2851_v12  ;;  %1281 = vmatpush.bf16.msrb.mxu3 %v2979_v16  ;;  %v3067_v56 = vor.u32 %v3161_v53, %v3064_v55  ;;  %v2934_v60 = vld [vmem:[%s4946_s4 + $0xe8] sm:$0xf]  ;;  %v400_v0 = vld [vmem:[%s3248_s13 + $0x70] sm:$0xff]  ;;  %v3125_v1 = vld [vmem:[%s4946_s4 + $0xcc] sm:$0xf] }
  0x2d   : > { %2684 = vmatmul.msk.f32.gmra.mxu0 %vm411_vm1, %v389_v54  ;;  %1183 = vmatpush.bf16.msrb.mxu1 %v2975_v17  ;;  %v2935_v63 = vor.u32 %v3131_v62, %v2934_v60  ;;  %v2920_v2 = vld [vmem:[%s4946_s4 + $0xd8] sm:$0xf0]  ;;  %v3157_v3 = vld [vmem:[%s4946_s4 + $0x1cc] sm:$0xf]  ;;  %v3159_v9 = vld [vmem:[%s4946_s4 + $0x1d4] sm:$0xf0] }
  0x2e   : > { %2701 = vmatmul.msk.f32.gmra.mxu1 %vm411_vm1, %v389_v54  ;;  %1134 = vmatpush.bf16.msrb.mxu0 %v2847_v21  ;;  %v3048_v5 = vld [vmem:[%s4946_s4 + $0x1d8] sm:$0xf0]  ;;  %v2918_v10 = vld [vmem:[%s4946_s4 + $0xc8] sm:$0xf]  ;;  %v3127_v12 = vld [vmem:[%s4946_s4 + $0xd4] sm:$0xf0] }
  0x2f   : > { %2718 = vmatmul.msk.f32.gmra.mxu2 %vm411_vm1, %v389_v54  ;;  %2735 = vmatmul.msk.f32.gmra.mxu3 %vm411_vm1, %v389_v54  ;;  %v2939_v54 = vor.u32 %v3129_v51, %v2936_v52  ;;  %v3051_v6 = vor.u32 %v3157_v3, %v3048_v5  ;;  %v401_v7 = vld [vmem:[%s3248_s13 + $0x78] sm:$0xff]  ;;  %v2919_v13 = vor.u32 %v3127_v12, %v2918_v10  ;;  %v2750_v14 = vld [vmem:[%s3554_s9] sm:$0xf]  ;;  %v3085_v15 = vld [vmem:[%s3554_s9 + $0x4] sm:$0xf0] }
  0x30   : > { %1233 = vmatpush.bf16.msrb.mxu2 %v2835_v26  ;;  %1282 = vmatpush.bf16.msrb.mxu3 %v2963_v30  ;;  %v3084_v16 = vld [vmem:[%s3554_s9 + $0x4] sm:$0xf]  ;;  %v2752_v17 = vld [vmem:[%s3554_s9 + $0x8] sm:$0xf0]  ;;  %v2904_v23 = vld [vmem:[%s4946_s4 + $0xb8] sm:$0xf0] }
  0x31   : > { %1184 = vmatpush.bf16.msrb.mxu1 %v2959_v31  ;;  %v3580_v20 = vor.u32 %v3084_v16, %v2752_v17  ;;  %v3153_v24 = vld [vmem:[%s4946_s4 + $0x1ac] sm:$0xf]  ;;  %v3032_v26 = vld [vmem:[%s4946_s4 + $0x1b8] sm:$0xf0]  ;;  %v3155_v33 = vld [vmem:[%s4946_s4 + $0x1b4] sm:$0xf0] }
  0x32   : > { %1135 = vmatpush.bf16.msrb.mxu0 %v2831_v35  ;;  %v3035_v27 = vor.u32 %v3153_v24, %v3032_v26  ;;  %v2902_v34 = vld [vmem:[%s4946_s4 + $0xa8] sm:$0xf]  ;;  %v2758_v38 = vld [vmem:[%s3554_s9 + $0x10] sm:$0xf]  ;;  %v3087_v39 = vld [vmem:[%s3554_s9 + $0x14] sm:$0xf0] }
  0x33   : > { %v2760_v41 = vld [vmem:[%s3554_s9 + $0x18] sm:$0xf0]  ;;  %v3624_v42 = vor.u32 %v3087_v39, %v2758_v38  ;;  %v3117_v48 = vld [vmem:[%s4946_s4 + $0x8c] sm:$0xf]  ;;  %v2886_v60 = vld [vmem:[%s4946_s4 + $0x88] sm:$0xf] }
  0x34   : > { %1234 = vmatpush.bf16.msrb.mxu2 %v2819_v40  ;;  %1283 = vmatpush.bf16.msrb.mxu3 %v2947_v44  ;;  %v3086_v40 = vld [vmem:[%s3554_s9 + $0x14] sm:$0xf]  ;;  %v3016_v52 = vld [vmem:[%s4946_s4 + $0x198] sm:$0xf0]  ;;  %v3119_v62 = vld [vmem:[%s4946_s4 + $0x94] sm:$0xf0] }
  0x35   : > { %2685 = vmatmul.msk.f32.gmra.mxu0 %vm411_vm1, %v390_v58  ;;  %1185 = vmatpush.bf16.msrb.mxu1 %v2943_v45  ;;  %v3630_v45 = vor.u32 %v3086_v40, %v2760_v41  ;;  %v2768_v3 = vld [vmem:[%s3554_s9 + $0x28] sm:$0xf0]  ;;  %v2998_v24 = vld [vmem:[%s4946_s4 + $0x168] sm:$0xf] }
  0x36   : > { %2702 = vmatmul.msk.f32.gmra.mxu1 %vm411_vm1, %v390_v58  ;;  %1136 = vmatpush.bf16.msrb.mxu0 %v2815_v49  ;;  %v2888_v49 = vld [vmem:[%s4946_s4 + $0x98] sm:$0xf0]  ;;  %v3113_v10 = vld [vmem:[%s4946_s4 + $0x6c] sm:$0xf]  ;;  %v2870_v26 = vld [vmem:[%s4946_s4 + $0x68] sm:$0xf] }
  0x37   : > { %2719 = vmatmul.msk.f32.gmra.mxu2 %vm411_vm1, %v390_v58  ;;  %2736 = vmatmul.msk.f32.gmra.mxu3 %vm411_vm1, %v390_v58  ;;  %v3062_v58 = vld [vmem:[%s4946_s4 + $0x1e8] sm:$0xf]  ;;  %v2891_v51 = vor.u32 %v3117_v48, %v2888_v49  ;;  %v3145_v12 = vld [vmem:[%s4946_s4 + $0x16c] sm:$0xf] }
  0x38   : > { %1423 = vmatpush.bf16.msra.mxu2 %v2939_v54  ;;  %1472 = vmatpush.bf16.msra.mxu3 %v3067_v56  ;;  %v3063_v61 = vor.u32 %v3163_v59, %v3062_v58  ;;  %v3014_v58 = vld [vmem:[%s4946_s4 + $0x188] sm:$0xf]  ;;  %v3151_v59 = vld [vmem:[%s4946_s4 + $0x194] sm:$0xf0] }
  0x3a   : > { %1374 = vmatpush.bf16.msra.mxu1 %v3063_v61  ;;  %1325 = vmatpush.bf16.msra.mxu0 %v2935_v63  ;;  %v3015_v61 = vor.u32 %v3151_v59, %v3014_v58  ;;  %v2887_v63 = vor.u32 %v3119_v62, %v2886_v60  ;;  %v2984_v58 = vld [vmem:[%s4946_s4 + $0x158] sm:$0xf0] }
  0x3c   : > { %1473 = vmatpush.bf16.msra.mxu3 %v3051_v6 }
  0x3d   : > { %2686 = vmatmul.msk.f32.gmra.mxu0 %vm411_vm1, %v391_v4 }
  0x3e   : > { %2703 = vmatmul.msk.f32.gmra.mxu1 %vm411_vm1, %v391_v4  ;;  %1326 = vmatpush.bf16.msra.mxu0 %v2919_v13 }
  0x3f   : > { %2720 = vmatmul.msk.f32.gmra.mxu2 %vm411_vm1, %v391_v4  ;;  %2737 = vmatmul.msk.f32.gmra.mxu3 %vm411_vm1, %v391_v4  ;;  %v2923_v4 = vor.u32 %v3125_v1, %v2920_v2  ;;  %v3089_v1 = vld [vmem:[%s3554_s9 + $0x24] sm:$0xf0]  ;;  %v3088_v2 = vld [vmem:[%s3554_s9 + $0x24] sm:$0xf] }
  0x40   : > { %1474 = vmatpush.bf16.msra.mxu3 %v3035_v27 }
  0x41   : > { %1424 = vmatpush.bf16.msra.mxu2 %v2923_v4 }
  0x45   : > { %2687 = vmatmul.msk.f32.gmra.mxu0 %vm411_vm1, %v392_v8 }
  0x46   : > { %2704 = vmatmul.msk.f32.gmra.mxu1 %vm411_vm1, %v392_v8 }
  0x47   : > { %2721 = vmatmul.msk.f32.gmra.mxu2 %vm411_vm1, %v392_v8  ;;  %2738 = vmatmul.msk.f32.gmra.mxu3 %vm411_vm1, %v392_v8  ;;  %v3046_v8 = vld [vmem:[%s4946_s4 + $0x1c8] sm:$0xf] }
  0x48   : > { %v3047_v11 = vor.u32 %v3159_v9, %v3046_v8 }
  0x4a   : > { %1375 = vmatpush.bf16.msra.mxu1 %v3047_v11  ;;  %v2872_v11 = vld [vmem:[%s4946_s4 + $0x78] sm:$0xf0] }
  0x4b   : > { %v2875_v13 = vor.u32 %v3113_v10, %v2872_v11  ;;  %v3111_v10 = vld [vmem:[%s4946_s4 + $0x54] sm:$0xf0] }
  0x4d   : > { %2688 = vmatmul.msk.f32.gmra.mxu0 %vm411_vm1, %v393_v18 }
  0x4e   : > { %2705 = vmatmul.msk.f32.gmra.mxu1 %vm411_vm1, %v393_v18 }
  0x4f   : > { %2722 = vmatmul.msk.f32.gmra.mxu2 %vm411_vm1, %v393_v18  ;;  %2739 = vmatmul.msk.f32.gmra.mxu3 %vm411_vm1, %v393_v18  ;;  %v3576_v18 = vor.u32 %v3085_v15, %v2750_v14  ;;  %v3000_v14 = vld [vmem:[%s4946_s4 + $0x178] sm:$0xf0] }
  0x50   : > { %v3003_v15 = vor.u32 %v3145_v12, %v3000_v14  ;;  %v2782_v12 = vld [vmem:[%s3554_s9 + $0x40] sm:$0xf]  ;;  %v3092_v14 = vld [vmem:[%s3554_s9 + $0x44] sm:$0xf] }
  0x55   : > { %2689 = vmatmul.msk.f32.gmra.mxu0 %vm411_vm1, %v394_v22 }
  0x56   : > { %2706 = vmatmul.msk.f32.gmra.mxu1 %vm411_vm1, %v394_v22 }
  0x57   : > { %2723 = vmatmul.msk.f32.gmra.mxu2 %vm411_vm1, %v394_v22  ;;  %2740 = vmatmul.msk.f32.gmra.mxu3 %vm411_vm1, %v394_v22  ;;  %v3121_v22 = vld [vmem:[%s4946_s4 + $0xac] sm:$0xf] }
  0x58   : > { %v2907_v25 = vor.u32 %v3121_v22, %v2904_v23 }
  0x5a   : > { %1425 = vmatpush.bf16.msra.mxu2 %v2907_v25  ;;  %v3147_v25 = vld [vmem:[%s4946_s4 + $0x174] sm:$0xf0] }
  0x5b   : > { %v2999_v27 = vor.u32 %v3147_v25, %v2998_v24 }
  0x5d   : > { %2690 = vmatmul.msk.f32.gmra.mxu0 %vm411_vm1, %v395_v32 }
  0x5e   : > { %2707 = vmatmul.msk.f32.gmra.mxu1 %vm411_vm1, %v395_v32  ;;  %1426 = vmatpush.bf16.msra.mxu2 %v2891_v51  ;;  %v2856_v51 = vld [vmem:[%s4946_s4 + $0x58] sm:$0xf0] }
  0x5f   : > { %2724 = vmatmul.msk.f32.gmra.mxu2 %vm411_vm1, %v395_v32  ;;  %2741 = vmatmul.msk.f32.gmra.mxu3 %vm411_vm1, %v395_v32  ;;  %v3030_v32 = vld [vmem:[%s4946_s4 + $0x1a8] sm:$0xf] }
  0x60   : > { %v3031_v35 = vor.u32 %v3155_v33, %v3030_v32  ;;  %v3115_v32 = vld [vmem:[%s4946_s4 + $0x74] sm:$0xf0] }
  0x61   : > { %v2871_v33 = vor.u32 %v3115_v32, %v2870_v26 }
  0x62   : > { %1376 = vmatpush.bf16.msra.mxu1 %v3031_v35  ;;  %1427 = vmatpush.bf16.msra.mxu2 %v2875_v13  ;;  %v3091_v35 = vld [vmem:[%s3554_s9 + $0x34] sm:$0xf0]  ;;  %v3093_v13 = vld [vmem:[%s3554_s9 + $0x44] sm:$0xf0] }
  0x63   : > { %v3780_v24 = vor.u32 %v3093_v13, %v2782_v12  ;;  %v2790_v12 = vld [vmem:[%s3554_s9 + $0x50] sm:$0xf]  ;;  %v3095_v13 = vld [vmem:[%s3554_s9 + $0x54] sm:$0xf0] }
  0x65   : > { %2691 = vmatmul.msk.f32.gmra.mxu0 %vm411_vm1, %v396_v36 }
  0x66   : > { %2708 = vmatmul.msk.f32.gmra.mxu1 %vm411_vm1, %v396_v36 }
  0x67   : > { %2725 = vmatmul.msk.f32.gmra.mxu2 %vm411_vm1, %v396_v36  ;;  %2742 = vmatmul.msk.f32.gmra.mxu3 %vm411_vm1, %v396_v36  ;;  %v3123_v36 = vld [vmem:[%s4946_s4 + $0xb4] sm:$0xf0] }
  0x68   : > { %v2903_v37 = vor.u32 %v3123_v36, %v2902_v34  ;;  %1377 = vmatpush.bf16.msra.mxu1 %v3015_v61  ;;  %v2774_v34 = vld [vmem:[%s3554_s9 + $0x30] sm:$0xf]  ;;  %v3090_v36 = vld [vmem:[%s3554_s9 + $0x34] sm:$0xf] }
  0x69   : > { %v3728_v38 = vor.u32 %v3091_v35, %v2774_v34  ;;  %v3105_v34 = vld [vmem:[%s4946_s4 + $0x2c] sm:$0xf]  ;;  %v2840_v35 = vld [vmem:[%s4946_s4 + $0x38] sm:$0xf0] }
  0x6a   : > { %1327 = vmatpush.bf16.msra.mxu0 %v2903_v37  ;;  %v2776_v37 = vld [vmem:[%s3554_s9 + $0x38] sm:$0xf0] }
  0x6b   : > { %v3734_v41 = vor.u32 %v3090_v36, %v2776_v37  ;;  %v3137_v36 = vld [vmem:[%s4946_s4 + $0x12c] sm:$0xf]  ;;  %v2843_v37 = vor.u32 %v3105_v34, %v2840_v35  ;;  %v3832_v34 = vor.u32 %v3095_v13, %v2790_v12 }
  0x6c   : > { %1378 = vmatpush.bf16.msra.mxu1 %v2999_v27 }
  0x6d   : > { %2692 = vmatmul.msk.f32.gmra.mxu0 %vm411_vm1, %v397_v46 }
  0x6e   : > { %2709 = vmatmul.msk.f32.gmra.mxu1 %vm411_vm1, %v397_v46  ;;  %1328 = vmatpush.bf16.msra.mxu0 %v2887_v63 }
  0x6f   : > { %2726 = vmatmul.msk.f32.gmra.mxu2 %vm411_vm1, %v397_v46  ;;  %2743 = vmatmul.msk.f32.gmra.mxu3 %vm411_vm1, %v397_v46 }
  0x72   : > { %1329 = vmatpush.bf16.msra.mxu0 %v2871_v33 }
  0x75   : > { %2693 = vmatmul.msk.f32.gmra.mxu0 %vm411_vm1, %v398_v50 }
  0x76   : > { %2710 = vmatmul.msk.f32.gmra.mxu1 %vm411_vm1, %v398_v50 }
  0x77   : > { %2727 = vmatmul.msk.f32.gmra.mxu2 %vm411_vm1, %v398_v50  ;;  %2744 = vmatmul.msk.f32.gmra.mxu3 %vm411_vm1, %v398_v50  ;;  %v3149_v50 = vld [vmem:[%s4946_s4 + $0x18c] sm:$0xf] }
  0x78   : > { %v3019_v53 = vor.u32 %v3149_v50, %v3016_v52  ;;  %v3109_v50 = vld [vmem:[%s4946_s4 + $0x4c] sm:$0xf] }
  0x79   : > { %v3141_v52 = vld [vmem:[%s4946_s4 + $0x14c] sm:$0xf] }
  0x7a   : > { %1475 = vmatpush.bf16.msra.mxu3 %v3019_v53  ;;  %v2859_v53 = vor.u32 %v3109_v50, %v2856_v51  ;;  %v2987_v59 = vor.u32 %v3141_v52, %v2984_v58  ;;  %v2968_v50 = vld [vmem:[%s4946_s4 + $0x138] sm:$0xf0] }
  0x7b   : > { %v2971_v51 = vor.u32 %v3137_v36, %v2968_v50 }
  0x7c   : > { %1428 = vmatpush.bf16.msra.mxu2 %v2859_v53 }
  0x7d   : > { %2694 = vmatmul.msk.f32.gmra.mxu0 %vm411_vm1, %v399_v57 }
  0x7e   : > { %2711 = vmatmul.msk.f32.gmra.mxu1 %vm411_vm1, %v399_v57  ;;  %1476 = vmatpush.bf16.msra.mxu3 %v3003_v15  ;;  %v2784_v15 = vld [vmem:[%s3554_s9 + $0x48] sm:$0xf0] }
  0x7f   : > { %2728 = vmatmul.msk.f32.gmra.mxu2 %vm411_vm1, %v399_v57  ;;  %2745 = vmatmul.msk.f32.gmra.mxu3 %vm411_vm1, %v399_v57  ;;  %v3786_v27 = vor.u32 %v3092_v14, %v2784_v15  ;;  %v3094_v14 = vld [vmem:[%s3554_s9 + $0x54] sm:$0xf]  ;;  %v2792_v15 = vld [vmem:[%s3554_s9 + $0x58] sm:$0xf0] }
  0x80   : > { %1429 = vmatpush.bf16.msra.mxu2 %v2843_v37  ;;  %v3838_v37 = vor.u32 %v3094_v14, %v2792_v15 }
  0x82   : > { %1477 = vmatpush.bf16.msra.mxu3 %v2987_v59 }
  0x85   : > { %2695 = vmatmul.msk.f32.gmra.mxu0 %vm411_vm1, %v400_v0 }
  0x86   : > { %2712 = vmatmul.msk.f32.gmra.mxu1 %vm411_vm1, %v400_v0  ;;  %1478 = vmatpush.bf16.msra.mxu3 %v2971_v51 }
  0x87   : > { %2729 = vmatmul.msk.f32.gmra.mxu2 %vm411_vm1, %v400_v0  ;;  %2746 = vmatmul.msk.f32.gmra.mxu3 %vm411_vm1, %v400_v0  ;;  %v2766_v0 = vld [vmem:[%s3554_s9 + $0x20] sm:$0xf] }
  0x88   : > { %v3676_v4 = vor.u32 %v3089_v1, %v2766_v0  ;;  %v2982_v0 = vld [vmem:[%s4946_s4 + $0x148] sm:$0xf]  ;;  %v3143_v1 = vld [vmem:[%s4946_s4 + $0x154] sm:$0xf0] }
  0x8d   : > { %2696 = vmatmul.msk.f32.gmra.mxu0 %vm411_vm1, %v401_v7 }
  0x8e   : > { %2713 = vmatmul.msk.f32.gmra.mxu1 %vm411_vm1, %v401_v7 }
  0x8f   : > { %2730 = vmatmul.msk.f32.gmra.mxu2 %vm411_vm1, %v401_v7  ;;  %2747 = vmatmul.msk.f32.gmra.mxu3 %vm411_vm1, %v401_v7  ;;  %v3682_v7 = vor.u32 %v3088_v2, %v2768_v3  ;;  %v2854_v2 = vld [vmem:[%s4946_s4 + $0x48] sm:$0xf]  ;;  %v2983_v3 = vor.u32 %v3143_v1, %v2982_v0  ;;  %v3139_v1 = vld [vmem:[%s4946_s4 + $0x134] sm:$0xf0] }
  0x90   : > { %v2855_v11 = vor.u32 %v3111_v10, %v2854_v2  ;;  %v2966_v0 = vld [vmem:[%s4946_s4 + $0x128] sm:$0xf]  ;;  %v3107_v10 = vld [vmem:[%s4946_s4 + $0x34] sm:$0xf0] }
  0x91   : > { %1379 = vmatpush.bf16.msra.mxu1 %v2983_v3  ;;  %v2838_v2 = vld [vmem:[%s4946_s4 + $0x28] sm:$0xf]  ;;  %v2967_v3 = vor.u32 %v3139_v1, %v2966_v0  ;;  %v3101_v0 = vld [vmem:[%s4946_s4 + $0xc] sm:$0xf]  ;;  %v2824_v1 = vld [vmem:[%s4946_s4 + $0x18] sm:$0xf0] }
  0x92   : > { %v3578_v19 = vpop.f32.mrf.mxu0  ;;  %1330 = vmatpush.bf16.msra.mxu0 %v2855_v11  ;;  %v2839_v11 = vor.u32 %v3107_v10, %v2838_v2  ;;  %v3133_v2 = vld [vmem:[%s4946_s4 + $0x10c] sm:$0xf]  ;;  %v2952_v10 = vld [vmem:[%s4946_s4 + $0x118] sm:$0xf0] }
  0x93   : > { %v3582_v21 = vpop.f32.mrf.mxu1 }
  0x95   : > { %1137 = vmatmul.bf16.vlgmr.msrb.gmra.mxu0 %v3576_v18  ;;  %1380 = vmatpush.bf16.msra.mxu1 %v2967_v3  ;;  %v2827_v3 = vor.u32 %v3101_v0, %v2824_v1  ;;  %v2950_v0 = vld [vmem:[%s4946_s4 + $0x108] sm:$0xf]  ;;  %v3135_v1 = vld [vmem:[%s4946_s4 + $0x114] sm:$0xf0] }
  0x96   : > { %1186 = vmatmul.bf16.vlgmr.msrb.gmra.mxu1 %v3580_v20  ;;  %1331 = vmatpush.bf16.msra.mxu0 %v2839_v11  ;;  %v2955_v11 = vor.u32 %v3133_v2, %v2952_v10  ;;  %v2822_v2 = vld [vmem:[%s4946_s4 + $0x8] sm:$0xf]  ;;  %v2951_v10 = vor.u32 %v3135_v1, %v2950_v0 }
  0x97   : > { %1235 = vmatmul.bf16.vlgmr.msrb.gmra.mxu2 %v3576_v18  ;;  %1284 = vmatmul.bf16.vlgmr.msrb.gmra.mxu3 %v3580_v20 }
  0x98   : > { %1430 = vmatpush.bf16.msra.mxu2 %v2827_v3  ;;  %1479 = vmatpush.bf16.msra.mxu3 %v2955_v11  ;;  %v3103_v3 = vld [vmem:[%s4946_s4 + $0x14] sm:$0xf0]  ;;  %v3097_v11 = vld [vmem:[%s3554_s9 + $0x64] sm:$0xf0] }
  0x99   : > { %1381 = vmatpush.bf16.msra.mxu1 %v2951_v10 }
  0x9a   : > { %v3600_v28 = vpop.f32.mrf.mxu2  ;;  %v3602_v29 = vpop.f32.mrf.mxu3 }
  0x9b   : > { %v3604_v30 = vpop.f32.mrf.mxu0  ;;  %v3606_v31 = vpop.f32.mrf.mxu1 }
  0xa2   : > { %v3626_v43 = vpop.f32.mrf.mxu2  ;;  %v3628_v44 = vpop.f32.mrf.mxu3 }
  0xa3   : > { %v3632_v46 = vpop.f32.mrf.mxu0  ;;  %v3634_v47 = vpop.f32.mrf.mxu1 }
  0xa5   : > { %1142 = vmatmul.bf16.gmra.mxu0 %v3624_v42 }
  0xa6   : > { %1191 = vmatmul.bf16.gmra.mxu1 %v3630_v45 }
  0xa7   : > { %1240 = vmatmul.bf16.gmra.mxu2 %v3624_v42  ;;  %1289 = vmatmul.bf16.gmra.mxu3 %v3630_v45 }
  0xaa   : > { %v3652_v54 = vpop.f32.mrf.mxu2  ;;  %v3654_v55 = vpop.f32.mrf.mxu3 }
  0xab   : > { %v3656_v56 = vpop.f32.mrf.mxu0  ;;  %v3658_v57 = vpop.f32.mrf.mxu1 }
  0xb2   : > { %v3678_v5 = vpop.f32.mrf.mxu2  ;;  %v3680_v6 = vpop.f32.mrf.mxu3 }
  0xb3   : > { %4956 = vst [vmem:[#allocation2_spill] sm:$0xff] %v3678_v5  ;;  %v3684_v8 = vpop.f32.mrf.mxu0  ;;  %v3686_v9 = vpop.f32.mrf.mxu1 }
  0xb4   : > { %4957 = vst [vmem:[#allocation3_spill] sm:$0xff] %v3680_v6 }
  0xb5   : > { %1147 = vmatmul.bf16.gmra.mxu0 %v3676_v4 }
  0xb6   : > { %1196 = vmatmul.bf16.gmra.mxu1 %v3682_v7 }
  0xb7   : > { %1245 = vmatmul.bf16.gmra.mxu2 %v3676_v4  ;;  %1294 = vmatmul.bf16.gmra.mxu3 %v3682_v7 }
  0xba   : > { %v3704_v16 = vpop.f32.mrf.mxu2  ;;  %v3706_v17 = vpop.f32.mrf.mxu3 }
  0xbb   : > { %4958 = vst [vmem:[#allocation4_spill] sm:$0xff] %v3704_v16  ;;  %v3708_v22 = vpop.f32.mrf.mxu0  ;;  %v3710_v23 = vpop.f32.mrf.mxu1 }
  0xbc   : > { %4959 = vst [vmem:[#allocation5_spill] sm:$0xff] %v3706_v17 }
  0xc2   : > { %v3730_v39 = vpop.f32.mrf.mxu2  ;;  %v3732_v40 = vpop.f32.mrf.mxu3 }
  0xc3   : > { %4960 = vst [vmem:[#allocation6_spill] sm:$0xff] %v3730_v39  ;;  %v3736_v48 = vpop.f32.mrf.mxu0  ;;  %v3738_v49 = vpop.f32.mrf.mxu1 }
  0xc4   : > { %4961 = vst [vmem:[#allocation7_spill] sm:$0xff] %v3732_v40 }
  0xc5   : > { %1152 = vmatmul.bf16.gmra.mxu0 %v3728_v38 }
  0xc6   : > { %1201 = vmatmul.bf16.gmra.mxu1 %v3734_v41 }
  0xc7   : > { %1250 = vmatmul.bf16.gmra.mxu2 %v3728_v38  ;;  %1299 = vmatmul.bf16.gmra.mxu3 %v3734_v41 }
  0xca   : > { %v3756_v60 = vpop.f32.mrf.mxu2  ;;  %v3758_v61 = vpop.f32.mrf.mxu3 }
  0xcb   : > { %4962 = vst [vmem:[#allocation8_spill] sm:$0xff] %v3756_v60  ;;  %v3760_v62 = vpop.f32.mrf.mxu0  ;;  %v3762_v63 = vpop.f32.mrf.mxu1 }
  0xcc   : > { %4963 = vst [vmem:[#allocation9_spill] sm:$0xff] %v3758_v61 }
  0xd2   : > { %v3782_v25 = vpop.f32.mrf.mxu2  ;;  %v3784_v26 = vpop.f32.mrf.mxu3 }
  0xd3   : > { %4964 = vst [vmem:[#allocation10_spill] sm:$0xff] %v3782_v25  ;;  %v3788_v32 = vpop.f32.mrf.mxu0  ;;  %v3790_v33 = vpop.f32.mrf.mxu1  ;;  %v2808_v25 = vld [vmem:[%s3554_s9 + $0x78] sm:$0xf0] }
  0xd4   : > { %4965 = vst [vmem:[#allocation11_spill] sm:$0xff] %v3784_v26  ;;  %v3098_v26 = vld [vmem:[%s3554_s9 + $0x74] sm:$0xf] }
  0xd5   : > { %4966 = vst [vmem:[#allocation12_spill] sm:$0xff] %v3788_v32  ;;  %1157 = vmatmul.bf16.gmra.mxu0 %v3780_v24  ;;  %v2798_v32 = vld [vmem:[%s3554_s9 + $0x60] sm:$0xf] }
  0xd6   : > { %1206 = vmatmul.bf16.gmra.mxu1 %v3786_v27 }
  0xd7   : > { %1255 = vmatmul.bf16.gmra.mxu2 %v3780_v24  ;;  %1304 = vmatmul.bf16.gmra.mxu3 %v3786_v27 }
  0xda   : > { %v3808_v52 = vpop.f32.mrf.mxu2  ;;  %v3810_v53 = vpop.f32.mrf.mxu3 }
  0xdb   : > { %4967 = vst [vmem:[#allocation13_spill] sm:$0xff] %v3808_v52  ;;  %v3812_v58 = vpop.f32.mrf.mxu0  ;;  %v3814_v59 = vpop.f32.mrf.mxu1 }
  0xdc   : > { %4968 = vst [vmem:[#allocation14_spill] sm:$0xff] %v3810_v53 }
  0xdd   : > { %4969 = vst [vmem:[#allocation15_spill] sm:$0xff] %v3812_v58  ;;  %v2823_v58 = vor.u32 %v3103_v3, %v2822_v2  ;;  %v2806_v3 = vld [vmem:[%s3554_s9 + $0x70] sm:$0xf] }
  0xdf   : > { %1332 = vmatpush.bf16.msra.mxu0 %v2823_v58  ;;  %v1530_v58 = vld.sshfl [vmem:[#allocation1 + $0x18] sm:$0xff pattern:$0x75316420] }
  0xe0   : > { %3077 = vmatpush.msk.msrb.mxu3 %vm460_vm0, %v1530_v58 }
  0xe2   : > { %v3834_v35 = vpop.f32.mrf.mxu2  ;;  %v3836_v36 = vpop.f32.mrf.mxu3 }
  0xe3   : > { %4970 = vst [vmem:[#allocation16_spill] sm:$0xff] %v3834_v35  ;;  %v3840_v50 = vpop.f32.mrf.mxu0  ;;  %v3842_v51 = vpop.f32.mrf.mxu1 }
  0xe4   : > { %4971 = vst [vmem:[#allocation17_spill] sm:$0xff] %v3836_v36  ;;  %v3884_v36 = vor.u32 %v3097_v11, %v2798_v32  ;;  %v1529_v32 = vld.sshfl [vmem:[#allocation1 + $0x10] sm:$0xff pattern:$0x75316420]  ;;  %v3099_v11 = vld [vmem:[%s3554_s9 + $0x74] sm:$0xf0] }
  0xe5   : > { %1162 = vmatmul.bf16.gmra.mxu0 %v3832_v34  ;;  %3074 = vmatpush.msk.msrb.mxu2 %vm460_vm0, %v1529_v32  ;;  %v3916_v32 = vor.u32 %v3099_v11, %v2806_v3 }
  0xe6   : > { %1211 = vmatmul.bf16.gmra.mxu1 %v3838_v37 }
  0xe7   : > { %1260 = vmatmul.bf16.gmra.mxu2 %v3832_v34  ;;  %1309 = vmatmul.bf16.gmra.mxu3 %v3838_v37 }
  0xea   : > { %v3860_v12 = vpop.f32.mrf.mxu2  ;;  %v3862_v13 = vpop.f32.mrf.mxu3 }
  0xeb   : > { %4972 = vst [vmem:[#allocation18_spill] sm:$0xff] %v3860_v12  ;;  %v3864_v14 = vpop.f32.mrf.mxu0  ;;  %v3866_v15 = vpop.f32.mrf.mxu1  ;;  %v2800_v12 = vld [vmem:[%s3554_s9 + $0x68] sm:$0xf0] }
  0xec   : > { %4973 = vst [vmem:[#allocation19_spill] sm:$0xff] %v3862_v13  ;;  %v3096_v13 = vld [vmem:[%s3554_s9 + $0x64] sm:$0xf]  ;;  %s2675_s9 = sshll.u32 %s2665_s22, 1 }
  0xed   : > { %v3890_v52 = vor.u32 %v3096_v13, %v2800_v12  ;;  %p292_p4 = scmp.lt.s32.totalorder %s2675_s9, 3 }
  0xef   : > { %s5182_s9 = smov (!%p292_p4, %s2675_s9), 3 }
  0xf0   : > { %s2676_s22 = sshll.u32 %s5182_s9, 3  ;;  %s3083_s13 = sshll.u32 %s5182_s9, 4 }
  0xf1   : > { %s295_s11 = scalar_lea.vmem %s4944_s2, %s2676_s22  ;;  %s4574_s15 = scalar_lea.vmem %s4948_s6, %s3083_s13 }
  0xf2   : > { %v3886_v35 = vpop.f32.mrf.mxu2  ;;  %v3888_v53 = vpop.f32.mrf.mxu3 }
  0xf3   : > { %4974 = vst [vmem:[#allocation20_spill] sm:$0xff] %v3886_v35  ;;  %v3892_v0 = vpop.f32.mrf.mxu0  ;;  %v3894_v1 = vpop.f32.mrf.mxu1  ;;  %v1527_v35 = vld.sshfl [vmem:[#allocation1] sm:$0xff pattern:$0x75316420] }
  0xf4   : > { %4975 = vst [vmem:[#allocation21_spill] sm:$0xff] %v3888_v53  ;;  %v1528_v53 = vld.sshfl [vmem:[#allocation1 + $0x8] sm:$0xff pattern:$0x75316420]  ;;  %3068 = vmatpush.msk.msrb.mxu0 %vm460_vm0, %v1527_v35 }
  0xf5   : > { %1167 = vmatmul.bf16.gmra.mxu0 %v3884_v36  ;;  %3071 = vmatpush.msk.msrb.mxu1 %vm460_vm0, %v1528_v53  ;;  %vm1707_vm0 = vcmask 1045504  }
  0xf6   : > { %1216 = vmatmul.bf16.gmra.mxu1 %v3890_v52 }
  0xf7   : > { %1265 = vmatmul.bf16.gmra.mxu2 %v3884_v36  ;;  %1314 = vmatmul.bf16.gmra.mxu3 %v3890_v52 }
  0xfa   : > { %v3902_v12 = vpop.f32.mrf.mxu2  ;;  %v3904_v13 = vpop.f32.mrf.mxu3 }
  0xfb   : > { %4976 = vst [vmem:[#allocation22_spill] sm:$0xff] %v3902_v12  ;;  %v3906_v2 = vpop.f32.mrf.mxu0  ;;  %v3908_v10 = vpop.f32.mrf.mxu1 }
  0xfc   : > { %4977 = vst [vmem:[#allocation23_spill] sm:$0xff] %v3904_v13  ;;  %v3922_v13 = vor.u32 %v3098_v26, %v2808_v25 }
 0x102   : > { %v3918_v58 = vpop.f32.mrf.mxu2  ;;  %v3920_v12 = vpop.f32.mrf.mxu3 }
 0x103   : > { %4978 = vst [vmem:[#allocation24_spill] sm:$0xff] %v3918_v58  ;;  %v3924_v61 = vpop.f32.mrf.mxu0  ;;  %v3926_v60 = vpop.f32.mrf.mxu1 }
 0x104   : > { %4979 = vst [vmem:[#allocation25_spill] sm:$0xff] %v3920_v12 }
 0x105   : > { %1172 = vmatmul.bf16.gmra.mxu0 %v3916_v32 }
 0x106   : > { %1221 = vmatmul.bf16.gmra.mxu1 %v3922_v13 }
 0x107   : > { %1270 = vmatmul.bf16.gmra.mxu2 %v3916_v32  ;;  %1319 = vmatmul.bf16.gmra.mxu3 %v3922_v13 }
 0x10a   : > { %v3932_v53 = vpop.f32.mrf.mxu2  ;;  %v3934_v35 = vpop.f32.mrf.mxu3 }
 0x10b   : > { %4980 = vst [vmem:[#allocation26_spill] sm:$0xff] %v3932_v53  ;;  %v3936_v3 = vpop.f32.mrf.mxu0  ;;  %v3938_v25 = vpop.f32.mrf.mxu1 }
 0x10c   : > { %4981 = vst [vmem:[#allocation27_spill] sm:$0xff] %v3934_v35 }
 0x112   : > { %v3940_v26 = vpop.f32.mrf.mxu2  ;;  %v3942_v11 = vpop.f32.mrf.mxu3 }
 0x113   : > { %4982 = vst [vmem:[#allocation28_spill] sm:$0xff] %v3940_v26  ;;  %v1138_v12 = vpop.f32.mrf.mxu0  ;;  %v1187_v58 = vpop.f32.mrf.mxu1 }
 0x114   : > { %4983 = vst [vmem:[#allocation29_spill] sm:$0xff] %v3942_v11  ;;  %v1139_v40 = vadd.f32 %v1138_v12, %v3578_v19 }
 0x115   : > { %1333 = vmatmul.bf16.vlgmr.msra.gmra.mxu0 %v3576_v18 }
 0x116   : > { %v3946_v39 = vadd.f32 %v1187_v58, %v1139_v40  ;;  %1382 = vmatmul.bf16.vlgmr.msra.gmra.mxu1 %v3580_v20 }
 0x117   : > { %1431 = vmatmul.bf16.vlgmr.msra.gmra.mxu2 %v3576_v18  ;;  %1480 = vmatmul.bf16.vlgmr.msra.gmra.mxu3 %v3580_v20 }
 0x118   : > { %4984 = vst [vmem:[#allocation30_spill] sm:$0xff] %v3946_v39 }
 0x11a   : > { %v1236_v35 = vpop.f32.mrf.mxu2  ;;  %v1285_v53 = vpop.f32.mrf.mxu3 }
 0x11b   : > { %v1237_v26 = vadd.f32 %v1236_v35, %v3582_v21  ;;  %v1140_v17 = vpop.f32.mrf.mxu0  ;;  %v1189_v11 = vpop.f32.mrf.mxu1 }
 0x11c   : > { %v1141_v16 = vadd.f32 %v1140_v17, %v3604_v30 }
 0x11d   : > { %v3953_v6 = vadd.f32 %v1285_v53, %v1237_v26 }
 0x11e   : > { %v3955_v19 = vadd.f32 %v1189_v11, %v1141_v16 }
 0x122   : > { %v1238_v40 = vpop.f32.mrf.mxu2  ;;  %v1287_v12 = vpop.f32.mrf.mxu3 }
 0x123   : > { %v1239_v58 = vadd.f32 %v1238_v40, %v3606_v31  ;;  %v1143_v39 = vpop.f32.mrf.mxu0  ;;  %v1192_v18 = vpop.f32.mrf.mxu1 }
 0x124   : > { %v1144_v20 = vadd.f32 %v1143_v39, %v3632_v46 }
 0x125   : > { %v3959_v5 = vadd.f32 %v1287_v12, %v1239_v58  ;;  %1338 = vmatmul.bf16.gmra.mxu0 %v3624_v42 }
 0x126   : > { %v3962_v21 = vadd.f32 %v1192_v18, %v1144_v20  ;;  %1387 = vmatmul.bf16.gmra.mxu1 %v3630_v45 }
 0x127   : > { %1436 = vmatmul.bf16.gmra.mxu2 %v3624_v42  ;;  %1485 = vmatmul.bf16.gmra.mxu3 %v3630_v45 }
 0x12a   : > { %v1241_v30 = vpop.f32.mrf.mxu2  ;;  %v1290_v16 = vpop.f32.mrf.mxu3 }
 0x12b   : > { %v1242_v31 = vadd.f32 %v1241_v30, %v3634_v47  ;;  %v1145_v17 = vpop.f32.mrf.mxu0  ;;  %v1194_v53 = vpop.f32.mrf.mxu1 }
 0x12c   : > { %v1146_v46 = vadd.f32 %v1145_v17, %v3656_v56 }
 0x12d   : > { %v3969_v39 = vadd.f32 %v1290_v16, %v1242_v31 }
 0x12e   : > { %v3971_v35 = vadd.f32 %v1194_v53, %v1146_v46 }
 0x132   : > { %v1243_v26 = vpop.f32.mrf.mxu2  ;;  %v1292_v11 = vpop.f32.mrf.mxu3 }
 0x133   : > { %v1244_v40 = vadd.f32 %v1243_v26, %v3658_v57  ;;  %v1148_v12 = vpop.f32.mrf.mxu0  ;;  %v1197_v42 = vpop.f32.mrf.mxu1 }
 0x134   : > { %v1149_v45 = vadd.f32 %v1148_v12, %v3684_v8 }
 0x135   : > { %v3975_v58 = vadd.f32 %v1292_v11, %v1244_v40  ;;  %1343 = vmatmul.bf16.gmra.mxu0 %v3676_v4 }
 0x136   : > { %v3978_v47 = vadd.f32 %v1197_v42, %v1149_v45  ;;  %1392 = vmatmul.bf16.gmra.mxu1 %v3682_v7 }
 0x137   : > { %1441 = vmatmul.bf16.gmra.mxu2 %v3676_v4  ;;  %1490 = vmatmul.bf16.gmra.mxu3 %v3682_v7 }
 0x13a   : > { %v1246_v56 = vpop.f32.mrf.mxu2  ;;  %v1295_v18 = vpop.f32.mrf.mxu3 }
 0x13b   : > { %v1247_v57 = vadd.f32 %v1246_v56, %v3686_v9  ;;  %v1150_v20 = vpop.f32.mrf.mxu0  ;;  %v1199_v30 = vpop.f32.mrf.mxu1 }
 0x13c   : > { %v1151_v8 = vadd.f32 %v1150_v20, %v3708_v22 }
 0x13d   : > { %v3985_v16 = vadd.f32 %v1295_v18, %v1247_v57 }
 0x13e   : > { %v3987_v31 = vadd.f32 %v1199_v30, %v1151_v8 }
 0x142   : > { %v1248_v17 = vpop.f32.mrf.mxu2  ;;  %v1297_v53 = vpop.f32.mrf.mxu3 }
 0x143   : > { %v1249_v46 = vadd.f32 %v1248_v17, %v3710_v23  ;;  %v1153_v26 = vpop.f32.mrf.mxu0  ;;  %v1202_v4 = vpop.f32.mrf.mxu1 }
 0x144   : > { %v1154_v7 = vadd.f32 %v1153_v26, %v3736_v48 }
 0x145   : > { %v3991_v11 = vadd.f32 %v1297_v53, %v1249_v46  ;;  %1348 = vmatmul.bf16.gmra.mxu0 %v3728_v38 }
 0x146   : > { %v3994_v9 = vadd.f32 %v1202_v4, %v1154_v7  ;;  %1397 = vmatmul.bf16.gmra.mxu1 %v3734_v41 }
 0x147   : > { %1446 = vmatmul.bf16.gmra.mxu2 %v3728_v38  ;;  %1495 = vmatmul.bf16.gmra.mxu3 %v3734_v41 }
 0x14a   : > { %v1251_v22 = vpop.f32.mrf.mxu2  ;;  %v1300_v40 = vpop.f32.mrf.mxu3 }
 0x14b   : > { %v1252_v23 = vadd.f32 %v1251_v22, %v3738_v49  ;;  %v1155_v12 = vpop.f32.mrf.mxu0  ;;  %v1204_v42 = vpop.f32.mrf.mxu1 }
 0x14c   : > { %v1156_v48 = vadd.f32 %v1155_v12, %v3760_v62 }
 0x14d   : > { %v4001_v45 = vadd.f32 %v1300_v40, %v1252_v23 }
 0x14e   : > { %v4003_v56 = vadd.f32 %v1204_v42, %v1156_v48 }
 0x14f   : > { %4985 = vst [vmem:[#allocation31_spill] sm:$0xff] %v4001_v45 }
 0x150   : > { %4986 = vst [vmem:[#allocation32_spill] sm:$0xff] %v4003_v56  ;;  %v5055_v56 = vld [vmem:[#allocation30_spill] sm:$0xff] }
 0x152   : > { %v1253_v18 = vpop.f32.mrf.mxu2  ;;  %v1302_v57 = vpop.f32.mrf.mxu3 }
 0x153   : > { %v1254_v20 = vadd.f32 %v1253_v18, %v3762_v63  ;;  %v4006_v30 = vpop.f32.mrf.mxu0  ;;  %v4008_v38 = vpop.f32.mrf.mxu1 }
 0x154   : > { %4987 = vst [vmem:[#allocation33_spill] sm:$0xff] %v4008_v38 }
 0x155   : > { %v4010_v41 = vadd.f32 %v1302_v57, %v1254_v20  ;;  %1353 = vmatmul.bf16.gmra.mxu0 %v3780_v24 }
 0x156   : > { %1402 = vmatmul.bf16.gmra.mxu1 %v3786_v27 }
 0x157   : > { %4988 = vst [vmem:[#allocation34_spill] sm:$0xff] %v4010_v41  ;;  %1451 = vmatmul.bf16.gmra.mxu2 %v3780_v24  ;;  %1500 = vmatmul.bf16.gmra.mxu3 %v3786_v27 }
 0x15a   : > { %v1256_v49 = vpop.f32.mrf.mxu2  ;;  %v1305_v62 = vpop.f32.mrf.mxu3 }
 0x15b   : > { %v1257_v8 = vadd.f32 %v1256_v49, %v3790_v33  ;;  %v4017_v17 = vpop.f32.mrf.mxu0  ;;  %v4019_v63 = vpop.f32.mrf.mxu1 }
 0x15c   : > { %4989 = vst [vmem:[#allocation35_spill] sm:$0xff] %v4019_v63 }
 0x15d   : > { %v4021_v53 = vadd.f32 %v1305_v62, %v1257_v8 }
 0x15f   : > { %4990 = vst [vmem:[#allocation36_spill] sm:$0xff] %v4021_v53 }
 0x162   : > { %v1258_v46 = vpop.f32.mrf.mxu2  ;;  %v1307_v26 = vpop.f32.mrf.mxu3 }
 0x163   : > { %v1259_v4 = vadd.f32 %v1258_v46, %v3814_v59  ;;  %v1163_v7 = vpop.f32.mrf.mxu0  ;;  %v1212_v22 = vpop.f32.mrf.mxu1 }
 0x164   : > { %v1164_v24 = vadd.f32 %v1163_v7, %v3840_v50 }
 0x165   : > { %v4025_v40 = vadd.f32 %v1307_v26, %v1259_v4  ;;  %1358 = vmatmul.bf16.gmra.mxu0 %v3832_v34 }
 0x166   : > { %v4028_v27 = vadd.f32 %v1212_v22, %v1164_v24  ;;  %1407 = vmatmul.bf16.gmra.mxu1 %v3838_v37 }
 0x167   : > { %4991 = vst [vmem:[#allocation37_spill] sm:$0xff] %v4025_v40  ;;  %1456 = vmatmul.bf16.gmra.mxu2 %v3832_v34  ;;  %1505 = vmatmul.bf16.gmra.mxu3 %v3838_v37 }
 0x168   : > { %4992 = vst [vmem:[#allocation38_spill] sm:$0xff] %v4028_v27 }
 0x16a   : > { %v1261_v33 = vpop.f32.mrf.mxu2  ;;  %v1310_v23 = vpop.f32.mrf.mxu3 }
 0x16b   : > { %v1262_v59 = vadd.f32 %v1261_v33, %v3842_v51  ;;  %v1165_v12 = vpop.f32.mrf.mxu0  ;;  %v1214_v42 = vpop.f32.mrf.mxu1 }
 0x16c   : > { %v1166_v50 = vadd.f32 %v1165_v12, %v3864_v14 }
 0x16d   : > { %v4035_v48 = vadd.f32 %v1310_v23, %v1262_v59 }
 0x16e   : > { %v4037_v18 = vadd.f32 %v1214_v42, %v1166_v50 }
 0x16f   : > { %4993 = vst [vmem:[#allocation39_spill] sm:$0xff] %v4035_v48 }
 0x170   : > { %4994 = vst [vmem:[#allocation40_spill] sm:$0xff] %v4037_v18 }
 0x172   : > { %v1263_v57 = vpop.f32.mrf.mxu2  ;;  %v1312_v20 = vpop.f32.mrf.mxu3 }
 0x173   : > { %v1264_v49 = vadd.f32 %v1263_v57, %v3866_v15  ;;  %v1168_v62 = vpop.f32.mrf.mxu0  ;;  %v1217_v34 = vpop.f32.mrf.mxu1 }
 0x174   : > { %v1169_v37 = vadd.f32 %v1168_v62, %v3892_v0 }
 0x175   : > { %v4041_v8 = vadd.f32 %v1312_v20, %v1264_v49  ;;  %1363 = vmatmul.bf16.gmra.mxu0 %v3884_v36 }
 0x176   : > { %v4044_v51 = vadd.f32 %v1217_v34, %v1169_v37  ;;  %1412 = vmatmul.bf16.gmra.mxu1 %v3890_v52 }
 0x177   : > { %4995 = vst [vmem:[#allocation41_spill] sm:$0xff] %v4041_v8  ;;  %1461 = vmatmul.bf16.gmra.mxu2 %v3884_v36  ;;  %1510 = vmatmul.bf16.gmra.mxu3 %v3890_v52  ;;  %v5032_v8 = vld [vmem:[#allocation21_spill] sm:$0xff] }
 0x178   : > { %4996 = vst [vmem:[#allocation42_spill] sm:$0xff] %v4044_v51 }
 0x17a   : > { %v1266_v14 = vpop.f32.mrf.mxu2  ;;  %v1315_v46 = vpop.f32.mrf.mxu3 }
 0x17b   : > { %v1267_v15 = vadd.f32 %v1266_v14, %v3894_v1  ;;  %v1170_v26 = vpop.f32.mrf.mxu0  ;;  %v1219_v4 = vpop.f32.mrf.mxu1  ;;  %v1522_v14 = vld [vmem:[%s295_s11] sm:$0xff] }
 0x17c   : > { %v1171_v0 = vadd.f32 %v1170_v26, %v3906_v2 }
 0x17d   : > { %v4051_v7 = vadd.f32 %v1315_v46, %v1267_v15 }
 0x17e   : > { %v4053_v22 = vadd.f32 %v1219_v4, %v1171_v0 }
 0x17f   : > { %4997 = vst [vmem:[#allocation43_spill] sm:$0xff] %v4051_v7  ;;  %v5028_v7 = vld [vmem:[#allocation19_spill] sm:$0xff] }
 0x180   : > { %4998 = vst [vmem:[#allocation44_spill] sm:$0xff] %v4053_v22 }
 0x182   : > { %v1268_v24 = vpop.f32.mrf.mxu2  ;;  %v1317_v33 = vpop.f32.mrf.mxu3 }
 0x183   : > { %v1269_v23 = vadd.f32 %v1268_v24, %v3908_v10  ;;  %v1173_v59 = vpop.f32.mrf.mxu0  ;;  %v1222_v36 = vpop.f32.mrf.mxu1  ;;  %v1523_v24 = vld [vmem:[%s295_s11 + $0x8] sm:$0xff] }
 0x184   : > { %v1174_v52 = vadd.f32 %v1173_v59, %v3924_v61 }
 0x185   : > { %v4059_v12 = vadd.f32 %v1317_v33, %v1269_v23  ;;  %1368 = vmatmul.bf16.gmra.mxu0 %v3916_v32 }
 0x186   : > { %v4062_v1 = vadd.f32 %v1222_v36, %v1174_v52  ;;  %1417 = vmatmul.bf16.gmra.mxu1 %v3922_v13 }
 0x187   : > { %4999 = vst [vmem:[#allocation45_spill] sm:$0xff] %v4059_v12  ;;  %1466 = vmatmul.bf16.gmra.mxu2 %v3916_v32  ;;  %1515 = vmatmul.bf16.gmra.mxu3 %v3922_v13  ;;  %v5024_v12 = vld [vmem:[#allocation17_spill] sm:$0xff] }
 0x188   : > { %5000 = vst [vmem:[#allocation46_spill] sm:$0xff] %v4062_v1 }
 0x18a   : > { %v1271_v2 = vpop.f32.mrf.mxu2  ;;  %v1320_v10 = vpop.f32.mrf.mxu3 }
 0x18b   : > { %v1272_v61 = vadd.f32 %v1271_v2, %v3926_v60  ;;  %v1175_v42 = vpop.f32.mrf.mxu0  ;;  %v1224_v50 = vpop.f32.mrf.mxu1 }
 0x18c   : > { %v1176_v57 = vadd.f32 %v1175_v42, %v3936_v3 }
 0x18d   : > { %v4071_v20 = vadd.f32 %v1320_v10, %v1272_v61 }
 0x18e   : > { %v4073_v49 = vadd.f32 %v1224_v50, %v1176_v57 }
 0x18f   : > { %5001 = vst [vmem:[#allocation47_spill] sm:$0xff] %v4071_v20  ;;  %v5020_v20 = vld [vmem:[#allocation14_spill] sm:$0xff] }
 0x190   : > { %5002 = vst [vmem:[#allocation48_spill] sm:$0xff] %v4073_v49 }
 0x192   : > { %v1273_v13 = vpop.f32.mrf.mxu2  ;;  %v1322_v32 = vpop.f32.mrf.mxu3 }
 0x193   : > { %v1274_v62 = vadd.f32 %v1273_v13, %v3938_v25  ;;  %v1334_v34 = vpop.f32.mrf.mxu0  ;;  %v1383_v37 = vpop.f32.mrf.mxu1 }
 0x194   : > { %v1335_v60 = vadd.f32 %v1334_v34, %v3600_v28 }
 0x195   : > { %v4081_v46 = vadd.f32 %v1322_v32, %v1274_v62  ;;  %3069 = vmatmul.msk.f32.vlgmr.msrb.gmra.mxu0 %vm411_vm1, %v1522_v14  ;;  %v5004_v62 = vld [vmem:[#allocation2_spill] sm:$0xff] }
 0x196   : > { %v4084_v3 = vadd.f32 %v1383_v37, %v1335_v60  ;;  %3072 = vmatmul.msk.f32.vlgmr.msrb.gmra.mxu1 %vm411_vm1, %v1522_v14 }
 0x197   : > { %5003 = vst [vmem:[#allocation49_spill] sm:$0xff] %v4081_v46  ;;  %3075 = vmatmul.msk.f32.vlgmr.msrb.gmra.mxu2 %vm411_vm1, %v1522_v14  ;;  %3078 = vmatmul.msk.f32.vlgmr.msrb.gmra.mxu3 %vm411_vm1, %v1522_v14  ;;  %v5016_v46 = vld [vmem:[#allocation11_spill] sm:$0xff] }
 0x19a   : > { %v1432_v15 = vpop.f32.mrf.mxu2  ;;  %v1481_v26 = vpop.f32.mrf.mxu3 }
 0x19b   : > { %v1433_v25 = vadd.f32 %v1432_v15, %v3602_v29  ;;  %v1336_v4 = vpop.f32.mrf.mxu0  ;;  %v1385_v0 = vpop.f32.mrf.mxu1  ;;  %v5005_v15 = vld [vmem:[#allocation3_spill] sm:$0xff] }
 0x19c   : > { %v1337_v28 = vadd.f32 %v1336_v4, %v3626_v43  ;;  %v5006_v4 = vld [vmem:[#allocation4_spill] sm:$0xff] }
 0x19d   : > { %v4091_v33 = vadd.f32 %v1481_v26, %v1433_v25  ;;  %3070 = vmatmul.msk.f32.gmra.mxu0 %vm411_vm1, %v1523_v24 }
 0x19e   : > { %v4094_v23 = vadd.f32 %v1385_v0, %v1337_v28  ;;  %3073 = vmatmul.msk.f32.gmra.mxu1 %vm411_vm1, %v1523_v24 }
 0x19f   : > { %3076 = vmatmul.msk.f32.gmra.mxu2 %vm411_vm1, %v1523_v24  ;;  %3079 = vmatmul.msk.f32.gmra.mxu3 %vm411_vm1, %v1523_v24  ;;  %vm4955_vm1 = vcmask 1046529  }
 0x1a2   : > { %v1434_v59 = vpop.f32.mrf.mxu2  ;;  %v1483_v36 = vpop.f32.mrf.mxu3 }
 0x1a3   : > { %v1435_v29 = vadd.f32 %v1434_v59, %v3628_v44  ;;  %v1339_v52 = vpop.f32.mrf.mxu0  ;;  %v1388_v2 = vpop.f32.mrf.mxu1 }
 0x1a4   : > { %v1340_v43 = vadd.f32 %v1339_v52, %v3652_v54 }
 0x1a5   : > { %v4101_v10 = vadd.f32 %v1483_v36, %v1435_v29  ;;  %v5007_v36 = vld [vmem:[#allocation5_spill] sm:$0xff] }
 0x1a6   : > { %v4103_v61 = vadd.f32 %v1388_v2, %v1340_v43  ;;  %v5008_v43 = vld [vmem:[#allocation6_spill] sm:$0xff] }
 0x1aa   : > { %v1437_v42 = vpop.f32.mrf.mxu2  ;;  %v1486_v50 = vpop.f32.mrf.mxu3 }
 0x1ab   : > { %v1438_v57 = vadd.f32 %v1437_v42, %v3654_v55  ;;  %v1341_v13 = vpop.f32.mrf.mxu0  ;;  %v1390_v32 = vpop.f32.mrf.mxu1 }
 0x1ac   : > { %v1342_v34 = vadd.f32 %v1341_v13, %v5004_v62  ;;  %v5009_v62 = vld [vmem:[#allocation7_spill] sm:$0xff] }
 0x1ad   : > { %v4107_v37 = vadd.f32 %v1486_v50, %v1438_v57 }
 0x1ae   : > { %v4109_v60 = vadd.f32 %v1390_v32, %v1342_v34 }
 0x1b2   : > { %v1439_v44 = vpop.f32.mrf.mxu2  ;;  %v1488_v14 = vpop.f32.mrf.mxu3 }
 0x1b3   : > { %v1440_v54 = vadd.f32 %v1439_v44, %v5005_v15  ;;  %v1344_v26 = vpop.f32.mrf.mxu0  ;;  %v1393_v25 = vpop.f32.mrf.mxu1  ;;  %v5010_v15 = vld [vmem:[#allocation8_spill] sm:$0xff] }
 0x1b4   : > { %v1345_v0 = vadd.f32 %v1344_v26, %v5006_v4 }
 0x1b5   : > { %v4113_v28 = vadd.f32 %v1488_v14, %v1440_v54 }
 0x1b6   : > { %v4115_v24 = vadd.f32 %v1393_v25, %v1345_v0 }
 0x1ba   : > { %v1442_v55 = vpop.f32.mrf.mxu2  ;;  %v1491_v59 = vpop.f32.mrf.mxu3 }
 0x1bb   : > { %v1443_v29 = vadd.f32 %v1442_v55, %v5007_v36  ;;  %v1346_v52 = vpop.f32.mrf.mxu0  ;;  %v1395_v2 = vpop.f32.mrf.mxu1  ;;  %v5012_v55 = vld [vmem:[#allocation9_spill] sm:$0xff] }
 0x1bc   : > { %v1347_v42 = vadd.f32 %v1346_v52, %v5008_v43  ;;  %v5013_v52 = vld [vmem:[#allocation10_spill] sm:$0xff] }
 0x1bd   : > { %v4119_v50 = vadd.f32 %v1491_v59, %v1443_v29 }
 0x1be   : > { %v4121_v57 = vadd.f32 %v1395_v2, %v1347_v42 }
 0x1c2   : > { %v1444_v13 = vpop.f32.mrf.mxu2  ;;  %v1493_v32 = vpop.f32.mrf.mxu3 }
 0x1c3   : > { %v1445_v34 = vadd.f32 %v1444_v13, %v5009_v62  ;;  %v1349_v44 = vpop.f32.mrf.mxu0  ;;  %v1398_v14 = vpop.f32.mrf.mxu1 }
 0x1c4   : > { %v1350_v54 = vadd.f32 %v1349_v44, %v5010_v15 }
 0x1c5   : > { %v4125_v26 = vadd.f32 %v1493_v32, %v1445_v34 }
 0x1c6   : > { %v4127_v25 = vadd.f32 %v1398_v14, %v1350_v54  ;;  %v5017_v14 = vld [vmem:[#allocation13_spill] sm:$0xff] }
 0x1c8   : > { %5011 = vst [vmem:[#allocation2_spill] sm:$0xff] %v4127_v25 }
 0x1ca   : > { %v1447_v4 = vpop.f32.mrf.mxu2  ;;  %v1496_v0 = vpop.f32.mrf.mxu3 }
 0x1cb   : > { %v1448_v36 = vadd.f32 %v1447_v4, %v5012_v55  ;;  %v1351_v59 = vpop.f32.mrf.mxu0  ;;  %v1400_v29 = vpop.f32.mrf.mxu1 }
 0x1cc   : > { %v1352_v2 = vadd.f32 %v1351_v59, %v5013_v52 }
 0x1cd   : > { %v4131_v43 = vadd.f32 %v1496_v0, %v1448_v36 }
 0x1ce   : > { %v4133_v42 = vadd.f32 %v1400_v29, %v1352_v2  ;;  %v5021_v29 = vld [vmem:[#allocation16_spill] sm:$0xff] }
 0x1cf   : > { %5014 = vst [vmem:[#allocation3_spill] sm:$0xff] %v4131_v43 }
 0x1d0   : > { %5015 = vst [vmem:[#allocation4_spill] sm:$0xff] %v4133_v42 }
 0x1d2   : > { %v1449_v13 = vpop.f32.mrf.mxu2  ;;  %v1498_v62 = vpop.f32.mrf.mxu3 }
 0x1d3   : > { %v1450_v44 = vadd.f32 %v1449_v13, %v5016_v46  ;;  %v1354_v32 = vpop.f32.mrf.mxu0  ;;  %v1403_v34 = vpop.f32.mrf.mxu1 }
 0x1d4   : > { %v1355_v15 = vadd.f32 %v1354_v32, %v5017_v14 }
 0x1d5   : > { %v4137_v54 = vadd.f32 %v1498_v62, %v1450_v44 }
 0x1d6   : > { %v4139_v49 = vadd.f32 %v1403_v34, %v1355_v15  ;;  %v5025_v34 = vld [vmem:[#allocation18_spill] sm:$0xff] }
 0x1d7   : > { %5018 = vst [vmem:[#allocation5_spill] sm:$0xff] %v4137_v54 }
 0x1d8   : > { %5019 = vst [vmem:[#allocation6_spill] sm:$0xff] %v4139_v49 }
 0x1da   : > { %v1452_v4 = vpop.f32.mrf.mxu2  ;;  %v1501_v55 = vpop.f32.mrf.mxu3 }
 0x1db   : > { %v1453_v59 = vadd.f32 %v1452_v4, %v5020_v20  ;;  %v1356_v0 = vpop.f32.mrf.mxu0  ;;  %v1405_v36 = vpop.f32.mrf.mxu1 }
 0x1dc   : > { %v1357_v52 = vadd.f32 %v1356_v0, %v5021_v29 }
 0x1dd   : > { %v4143_v2 = vadd.f32 %v1501_v55, %v1453_v59 }
 0x1de   : > { %v4145_v1 = vadd.f32 %v1405_v36, %v1357_v52  ;;  %v5029_v36 = vld [vmem:[#allocation20_spill] sm:$0xff] }
 0x1df   : > { %5022 = vst [vmem:[#allocation7_spill] sm:$0xff] %v4143_v2 }
 0x1e0   : > { %5023 = vst [vmem:[#allocation8_spill] sm:$0xff] %v4145_v1 }
 0x1e2   : > { %v1454_v46 = vpop.f32.mrf.mxu2  ;;  %v1503_v13 = vpop.f32.mrf.mxu3 }
 0x1e3   : > { %v1455_v32 = vadd.f32 %v1454_v46, %v5024_v12  ;;  %v1359_v62 = vpop.f32.mrf.mxu0  ;;  %v1408_v44 = vpop.f32.mrf.mxu1 }
 0x1e4   : > { %v1360_v14 = vadd.f32 %v1359_v62, %v5025_v34 }
 0x1e5   : > { %v4149_v15 = vadd.f32 %v1503_v13, %v1455_v32 }
 0x1e6   : > { %v4151_v22 = vadd.f32 %v1408_v44, %v1360_v14  ;;  %v5033_v44 = vld [vmem:[#allocation22_spill] sm:$0xff] }
 0x1e7   : > { %5026 = vst [vmem:[#allocation9_spill] sm:$0xff] %v4149_v15 }
 0x1e8   : > { %5027 = vst [vmem:[#allocation10_spill] sm:$0xff] %v4151_v22  ;;  %v5036_v22 = vld [vmem:[#allocation23_spill] sm:$0xff] }
 0x1ea   : > { %v1457_v20 = vpop.f32.mrf.mxu2  ;;  %v1506_v4 = vpop.f32.mrf.mxu3 }
 0x1eb   : > { %v1458_v0 = vadd.f32 %v1457_v20, %v5028_v7  ;;  %v1361_v55 = vpop.f32.mrf.mxu0  ;;  %v1410_v59 = vpop.f32.mrf.mxu1 }
 0x1ec   : > { %v1362_v29 = vadd.f32 %v1361_v55, %v5029_v36 }
 0x1ed   : > { %v4155_v52 = vadd.f32 %v1506_v4, %v1458_v0 }
 0x1ee   : > { %v4157_v51 = vadd.f32 %v1410_v59, %v1362_v29  ;;  %v5037_v59 = vld [vmem:[#allocation24_spill] sm:$0xff] }
 0x1ef   : > { %5030 = vst [vmem:[#allocation11_spill] sm:$0xff] %v4155_v52  ;;  %v5040_v52 = vld [vmem:[#allocation25_spill] sm:$0xff] }
 0x1f0   : > { %5031 = vst [vmem:[#allocation13_spill] sm:$0xff] %v4157_v51 }
 0x1f2   : > { %v1459_v12 = vpop.f32.mrf.mxu2  ;;  %v1508_v46 = vpop.f32.mrf.mxu3 }
 0x1f3   : > { %v1460_v62 = vadd.f32 %v1459_v12, %v5032_v8  ;;  %v1364_v13 = vpop.f32.mrf.mxu0  ;;  %v1413_v32 = vpop.f32.mrf.mxu1 }
 0x1f4   : > { %v1365_v34 = vadd.f32 %v1364_v13, %v5033_v44 }
 0x1f5   : > { %v4161_v14 = vadd.f32 %v1508_v46, %v1460_v62 }
 0x1f6   : > { %v4163_v18 = vadd.f32 %v1413_v32, %v1365_v34  ;;  %v5041_v32 = vld [vmem:[#allocation26_spill] sm:$0xff] }
 0x1f7   : > { %5034 = vst [vmem:[#allocation14_spill] sm:$0xff] %v4161_v14  ;;  %v5044_v14 = vld [vmem:[#allocation27_spill] sm:$0xff] }
 0x1f8   : > { %5035 = vst [vmem:[#allocation16_spill] sm:$0xff] %v4163_v18 }
 0x1fa   : > { %v1462_v7 = vpop.f32.mrf.mxu2  ;;  %v1511_v20 = vpop.f32.mrf.mxu3 }
 0x1fb   : > { %v1463_v55 = vadd.f32 %v1462_v7, %v5036_v22  ;;  %v1366_v4 = vpop.f32.mrf.mxu0  ;;  %v1415_v0 = vpop.f32.mrf.mxu1 }
 0x1fc   : > { %v1367_v36 = vadd.f32 %v1366_v4, %v5037_v59 }
 0x1fd   : > { %v4167_v29 = vadd.f32 %v1511_v20, %v1463_v55 }
 0x1fe   : > { %v4169_v51 = vadd.f32 %v1415_v0, %v1367_v36  ;;  %v5045_v0 = vld [vmem:[#allocation28_spill] sm:$0xff] }
 0x1ff   : > { %5038 = vst [vmem:[#allocation17_spill] sm:$0xff] %v4167_v29 }
 0x200   : > { %5039 = vst [vmem:[#allocation18_spill] sm:$0xff] %v4169_v51 }
 0x202   : > { %v1464_v8 = vpop.f32.mrf.mxu2  ;;  %v1513_v12 = vpop.f32.mrf.mxu3 }
 0x203   : > { %v1465_v13 = vadd.f32 %v1464_v8, %v5040_v52  ;;  %v1369_v46 = vpop.f32.mrf.mxu0  ;;  %v1418_v62 = vpop.f32.mrf.mxu1  ;;  %v4184_v52 = vld [vmem:[%s4947_s5] sm:$0xf] }
 0x204   : > { %v1370_v44 = vadd.f32 %v1369_v46, %v5041_v32  ;;  %5047 = vst [vmem:[#allocation22_spill] sm:$0xff] %v4184_v52 }
 0x205   : > { %v4173_v34 = vadd.f32 %v1513_v12, %v1465_v13  ;;  %v4950_v12 = vperm.slane %v4184_v52, 1 }
 0x206   : > { %v4175_v18 = vadd.f32 %v1418_v62, %v1370_v44  ;;  %v5049_v62 = vld [vmem:[#allocation29_spill] sm:$0xff] }
 0x207   : > { %5042 = vst [vmem:[#allocation19_spill] sm:$0xff] %v4173_v34 }
 0x208   : > { %5043 = vst [vmem:[#allocation20_spill] sm:$0xff] %v4175_v18 }
 0x20a   : > { %v1467_v22 = vpop.f32.mrf.mxu2  ;;  %v1516_v7 = vpop.f32.mrf.mxu3 }
 0x20b   : > { %v1468_v4 = vadd.f32 %v1467_v22, %v5044_v14  ;;  %v1371_v20 = vpop.f32.mrf.mxu0  ;;  %v1420_v55 = vpop.f32.mrf.mxu1  ;;  %v4949_v22 = vperm.slane %v4184_v52, 0 }
 0x20c   : > { %v1372_v59 = vadd.f32 %v1371_v20, %v5045_v0  ;;  %v5051_v20 = vld [vmem:[#allocation12_spill] sm:$0xff] }
 0x20d   : > { %v4179_v36 = vadd.f32 %v1516_v7, %v1468_v4  ;;  %v4197_v0 = vadd.f32 %v4006_v30, %v5051_v20 }
 0x20e   : > { %v4186_v8 = vadd.f32 %v1420_v55, %v1372_v59  ;;  %v5053_v55 = vld [vmem:[#allocation15_spill] sm:$0xff] }
 0x20f   : > { %5046 = vst [vmem:[#allocation21_spill] sm:$0xff] %v4179_v36  ;;  %v4201_v59 = vadd.f32 %v4017_v17, %v5053_v55 }
 0x210   : > { %5048 = vst [vmem:[#allocation23_spill] sm:$0xff] %v4186_v8  ;;  %v4952_v8 = vperm.slane %v4184_v52, 2 }
 0x211   : > { %5052 = vst [vmem:[#allocation25_spill] sm:$0xff] %v4197_v0 }
 0x212   : > { %v1469_v13 = vpop.f32.mrf.mxu2  ;;  %v1518_v46 = vpop.f32.mrf.mxu3  ;;  %5054 = vst [vmem:[#allocation26_spill] sm:$0xff] %v4201_v59 }
 0x213   : > { %v1470_v32 = vadd.f32 %v1469_v13, %v5049_v62  ;;  %v1585_v14 = vpop.f32.mrf.mxu1  ;;  %v1562_v4 = vpop.f32.mrf.mxu0  ;;  %v4951_v13 = vperm.slane %v4184_v52, 3 }
 0x214   : > { %v1647_v44 = vsub.f32 %v4950_v12, %v1585_v14 }
 0x215   : > { %v4193_v7 = vadd.f32 %v1518_v46, %v1470_v32  ;;  %v1646_v46 = vsub.f32 %v4949_v22, %v1562_v4 }
 0x216   : > { %v1662_v62 = vrot.slane %v1647_v44, 7 }
 0x217   : > { %5050 = vst [vmem:[#allocation24_spill] sm:$0xff] %v4193_v7 }
 0x218   : > { %v1669_v44 = vsel %vm1668_vm2, %v1646_v46, %v1662_v62  ;;  %v1675_v4 = vsel %vm1674_vm4, %v1646_v46, %v1662_v62  ;;  %v1681_v22 = vsel %vm1670_vm3, %v1646_v46, %v1662_v62  ;;  %v1687_v12 = vsel %vm1676_vm5, %v1646_v46, %v1662_v62 }
 0x219   : > { %v1693_v7 = vsel %vm1682_vm6, %v1646_v46, %v1662_v62 }
 0x21a   : > { %v1608_v30 = vpop.f32.mrf.mxu2  ;;  %v1631_v32 = vpop.f32.mrf.mxu3 }
 0x21b   : > { %v1648_v17 = vsub.f32 %v4952_v8, %v1608_v30  ;;  %v1649_v14 = vsub.f32 %v4951_v13, %v1631_v32  ;;  %v1699_v30 = vsel %vm1688_vm7, %v1646_v46, %v1662_v62  ;;  %v1705_v32 = vsel %vm1694_vm8, %v1646_v46, %v1662_v62 }
 0x21c   : > { %v1710_v13 = vsel %vm1700_vm9, %v1662_v62, %v1646_v46 }
 0x21d   : > { %v1663_v20 = vrot.slane %v1648_v17, 6  ;;  %v1664_v55 = vrot.slane %v1649_v14, 5 }
 0x21f   : > { %v1671_v8 = vsel %vm1670_vm3, %v1663_v20, %v1664_v55  ;;  %v1677_v36 = vsel %vm1676_vm5, %v1663_v20, %v1664_v55  ;;  %v1683_v18 = vsel %vm1682_vm6, %v1663_v20, %v1664_v55  ;;  %v1689_v17 = vsel %vm1688_vm7, %v1663_v20, %v1664_v55 }
 0x220   : > { %v1695_v14 = vsel %vm1694_vm8, %v1663_v20, %v1664_v55  ;;  %v1701_v34 = vsel %vm1700_vm9, %v1664_v55, %v1663_v20  ;;  %v1706_v51 = vsel %vm1668_vm2, %v1663_v20, %v1664_v55  ;;  %v1711_v29 = vsel %vm1674_vm4, %v1663_v20, %v1664_v55 }
 0x221   : > { %v1673_v48 = vsel %vm1672_vm10, %v1669_v44, %v1671_v8  ;;  %v1679_v62 = vsel %vm1678_vm11, %v1675_v4, %v1677_v36  ;;  %v1685_v46 = vsel %vm1684_vm12, %v1681_v22, %v1683_v18  ;;  %v1691_v27 = vsel %vm1690_vm13, %v1687_v12, %v1689_v17 }
 0x222   : > { %v1680_v15 = vrot.slane %v1679_v62, 1  ;;  %v1686_v1 = vrot.slane %v1685_v46, 2  ;;  %v1692_v40 = vrot.slane %v1691_v27, 3  ;;  %v1697_v2 = vsel %vm1696_vm14, %v1693_v7, %v1695_v14 }
 0x223   : > { %v1698_v49 = vrot.slane %v1697_v2, 4  ;;  %v1703_v53 = vsel %vm1702_vm15, %v1699_v30, %v1701_v34  ;;  %v1708_v63 = vsel %vm1707_vm0, %v1706_v51, %v1705_v32  ;;  %v1713_v20 = vsel %vm4955_vm1, %v1711_v29, %v1710_v13 }
 0x224   : > { %v1704_v55 = vrot.slane %v1703_v53, 5  ;;  %v1709_v8 = vrot.slane %v1708_v63, 6  ;;  %v4235_v44 = vrot.slane %v1713_v20, 7  ;;  %v1746_v36 = vperm.slane %v1673_v48, 0 }
 0x225   : > { %v1747_v18 = vperm.slane %v1673_v48, 1  ;;  %v1748_v22 = vperm.slane %v1673_v48, 2  ;;  %v1749_v12 = vperm.slane %v1673_v48, 3  ;;  %v1750_v4 = vperm.slane %v1680_v15, 0 }
 0x226   : > { %v1751_v17 = vperm.slane %v1680_v15, 1  ;;  %v1752_v27 = vperm.slane %v1680_v15, 2  ;;  %v1753_v62 = vperm.slane %v1680_v15, 3  ;;  %v1754_v7 = vperm.slane %v1686_v1, 0 }
 0x227   : > { %v1755_v2 = vperm.slane %v1686_v1, 1  ;;  %v1756_v14 = vperm.slane %v1686_v1, 2  ;;  %v1757_v34 = vperm.slane %v1686_v1, 3  ;;  %v1758_v30 = vperm.slane %v1692_v40, 0 }
 0x228   : > { %v1759_v51 = vperm.slane %v1692_v40, 1  ;;  %v1760_v32 = vperm.slane %v1692_v40, 2  ;;  %v1761_v29 = vperm.slane %v1692_v40, 3  ;;  %v1762_v53 = vperm.slane %v1698_v49, 0 }
 0x229   : > { %v1763_v63 = vperm.slane %v1698_v49, 1  ;;  %v1764_v13 = vperm.slane %v1698_v49, 2  ;;  %v1765_v46 = vperm.slane %v1698_v49, 3  ;;  %v1766_v20 = vperm.slane %v1704_v55, 0 }
 0x22a   : > { %v1767_v59 = vperm.slane %v1704_v55, 1  ;;  %v1768_v38 = vperm.slane %v1704_v55, 2  ;;  %v1769_v48 = vperm.slane %v1704_v55, 3  ;;  %v1770_v0 = vperm.slane %v1709_v8, 0 }
 0x22b   : > { %v1771_v52 = vperm.slane %v1709_v8, 1  ;;  %v1772_v54 = vperm.slane %v1709_v8, 2  ;;  %v1773_v15 = vperm.slane %v1709_v8, 3  ;;  %v1774_v42 = vperm.slane %v4235_v44, 0 }
 0x22c   : > { %v1775_v1 = vperm.slane %v4235_v44, 1  ;;  %v1776_v41 = vperm.slane %v4235_v44, 2  ;;  %v1777_v40 = vperm.slane %v4235_v44, 3  ;;  %v4242_v43 = vadd.f32 %v1746_v36, %v5055_v56 }
 0x22d   : > { %v4245_v49 = vadd.f32 %v1747_v18, %v3953_v6  ;;  %v4248_v55 = vadd.f32 %v1748_v22, %v4084_v3  ;;  %v4251_v25 = vadd.f32 %v1749_v12, %v4091_v33  ;;  %v4254_v8 = vadd.f32 %v1750_v4, %v3955_v19 }
 0x22e   : > { %v4257_v45 = vadd.f32 %v1751_v17, %v3959_v5  ;;  %v4260_v44 = vadd.f32 %v1752_v27, %v4094_v23  ;;  %v4263_v56 = vadd.f32 %v1753_v62, %v4101_v10  ;;  %v4266_v6 = vadd.f32 %v1754_v7, %v3962_v21 }
 0x22f   : > { %v4269_v3 = vadd.f32 %v1755_v2, %v3969_v39  ;;  %v4272_v33 = vadd.f32 %v1756_v14, %v4103_v61  ;;  %v4275_v19 = vadd.f32 %v1757_v34, %v4107_v37  ;;  %v4278_v5 = vadd.f32 %v1758_v30, %v3971_v35 }
 0x230   : > { %v4281_v23 = vadd.f32 %v1759_v51, %v3975_v58  ;;  %v4284_v10 = vadd.f32 %v1760_v32, %v4109_v60  ;;  %v4287_v21 = vadd.f32 %v1761_v29, %v4113_v28  ;;  %v4290_v39 = vadd.f32 %v1762_v53, %v3978_v47 }
 0x231   : > { %v4293_v61 = vadd.f32 %v1763_v63, %v3985_v16  ;;  %v4296_v37 = vadd.f32 %v1764_v13, %v4115_v24  ;;  %v4299_v35 = vadd.f32 %v1765_v46, %v4119_v50  ;;  %v4302_v58 = vadd.f32 %v1766_v20, %v3987_v31  ;;  %v5056_v24 = vld [vmem:[#allocation31_spill] sm:$0xff]  ;;  %v5057_v50 = vld [vmem:[#allocation2_spill] sm:$0xff] }
 0x232   : > { %v4305_v60 = vadd.f32 %v1767_v59, %v3991_v11  ;;  %v4308_v28 = vadd.f32 %v1768_v38, %v4121_v57  ;;  %v4311_v47 = vadd.f32 %v1769_v48, %v4125_v26  ;;  %v4314_v16 = vadd.f32 %v1770_v0, %v3994_v9  ;;  %v5058_v31 = vld [vmem:[#allocation3_spill] sm:$0xff]  ;;  %v5059_v11 = vld [vmem:[#allocation32_spill] sm:$0xff]  ;;  %v5060_v38 = vld [vmem:[#allocation34_spill] sm:$0xff] }
 0x233   : > { %v4317_v36 = vadd.f32 %v1771_v52, %v5056_v24  ;;  %v4320_v18 = vadd.f32 %v1772_v54, %v5057_v50  ;;  %v4323_v22 = vadd.f32 %v1773_v15, %v5058_v31  ;;  %v4326_v59 = vadd.f32 %v1774_v42, %v5059_v11  ;;  %v5061_v26 = vld [vmem:[#allocation4_spill] sm:$0xff]  ;;  %v5062_v9 = vld [vmem:[#allocation5_spill] sm:$0xff] }
 0x234   : > { %v4329_v57 = vadd.f32 %v1775_v1, %v5060_v38  ;;  %v4332_v12 = vadd.f32 %v1776_v41, %v5061_v26  ;;  %v4335_v0 = vadd.f32 %v1777_v40, %v5062_v9  ;;  %v1938_v52 = vmax.f32 %v4242_v43, 0.0 }
 0x235   : > { %v1939_v54 = vmax.f32 %v4245_v49, 0.0  ;;  %v1940_v4 = vmax.f32 %v4248_v55, 0.0  ;;  %v1941_v17 = vmax.f32 %v4251_v25, 0.0  ;;  %v1942_v42 = vmax.f32 %v4254_v8, 0.0 }
 0x236   : > { %v1943_v27 = vmax.f32 %v4257_v45, 0.0  ;;  %v1944_v62 = vmax.f32 %v4260_v44, 0.0  ;;  %v1945_v41 = vmax.f32 %v4263_v56, 0.0  ;;  %v1946_v7 = vmax.f32 %v4266_v6, 0.0 }
 0x237   : > { %v1947_v2 = vmax.f32 %v4269_v3, 0.0  ;;  %v1948_v43 = vmax.f32 %v4272_v33, 0.0  ;;  %v1949_v14 = vmax.f32 %v4275_v19, 0.0  ;;  %v1950_v34 = vmax.f32 %v4278_v5, 0.0 }
 0x238   : > { %v2002_v56 = vrot.slane %v1938_v52, 4  ;;  %v2008_v24 = vrot.slane %v1939_v54, 4  ;;  %v2014_v50 = vrot.slane %v1940_v4, 4  ;;  %v2020_v31 = vrot.slane %v1941_v17, 4 }
 0x239   : > { %v2026_v11 = vrot.slane %v1942_v42, 4  ;;  %v2032_v26 = vrot.slane %v1943_v27, 4  ;;  %v2038_v9 = vrot.slane %v1944_v62, 4  ;;  %v2044_v15 = vrot.slane %v1945_v41, 4 }
 0x23a   : > { %v2003_v38 = vmax.f32 %v1938_v52, %v2002_v56  ;;  %v2009_v1 = vmax.f32 %v1939_v54, %v2008_v24  ;;  %v2015_v48 = vmax.f32 %v1940_v4, %v2014_v50  ;;  %v2021_v40 = vmax.f32 %v1941_v17, %v2020_v31 }
 0x23b   : > { %v2027_v20 = vmax.f32 %v1942_v42, %v2026_v11  ;;  %v2033_v46 = vmax.f32 %v1943_v27, %v2032_v26  ;;  %v2039_v55 = vmax.f32 %v1944_v62, %v2038_v9  ;;  %v2045_v13 = vmax.f32 %v1945_v41, %v2044_v15 }
 0x23c   : > { %v2004_v49 = vrot.slane %v2003_v38, 2  ;;  %v2010_v8 = vrot.slane %v2009_v1, 2  ;;  %v2016_v63 = vrot.slane %v2015_v48, 2  ;;  %v2022_v44 = vrot.slane %v2021_v40, 2 }
 0x23d   : > { %v2028_v53 = vrot.slane %v2027_v20, 2  ;;  %v2034_v32 = vrot.slane %v2033_v46, 2  ;;  %v2040_v51 = vrot.slane %v2039_v55, 2  ;;  %v2046_v45 = vrot.slane %v2045_v13, 2 }
 0x23e   : > { %v2005_v29 = vmax.f32 %v2003_v38, %v2004_v49  ;;  %v2011_v52 = vmax.f32 %v2009_v1, %v2010_v8  ;;  %v2017_v56 = vmax.f32 %v2015_v48, %v2016_v63  ;;  %v2023_v30 = vmax.f32 %v2021_v40, %v2022_v44 }
 0x23f   : > { %v2029_v25 = vmax.f32 %v2027_v20, %v2028_v53  ;;  %v2035_v4 = vmax.f32 %v2033_v46, %v2034_v32  ;;  %v2041_v17 = vmax.f32 %v2039_v55, %v2040_v51  ;;  %v2047_v42 = vmax.f32 %v2045_v13, %v2046_v45 }
 0x240   : > { %v2006_v54 = vrot.slane %v2005_v29, 1  ;;  %v2012_v24 = vrot.slane %v2011_v52, 1  ;;  %v2018_v27 = vrot.slane %v2017_v56, 1  ;;  %v2024_v62 = vrot.slane %v2023_v30, 1 }
 0x241   : > { %v2030_v41 = vrot.slane %v2029_v25, 1  ;;  %v2036_v50 = vrot.slane %v2035_v4, 1  ;;  %v2042_v31 = vrot.slane %v2041_v17, 1  ;;  %v2048_v49 = vrot.slane %v2047_v42, 1 }
 0x242   : > { %v4369_v15 = vmax.f32 %v2005_v29, %v2006_v54  ;;  %v4371_v11 = vmax.f32 %v2011_v52, %v2012_v24  ;;  %v4373_v38 = vmax.f32 %v2017_v56, %v2018_v27  ;;  %v4375_v63 = vmax.f32 %v2023_v30, %v2024_v62 }
 0x243   : > { %v4377_v53 = vmax.f32 %v2029_v25, %v2030_v41  ;;  %v4379_v32 = vmax.f32 %v2035_v4, %v2036_v50  ;;  %v4381_v45 = vmax.f32 %v2041_v17, %v2042_v31  ;;  %v4383_v51 = vmax.f32 %v2047_v42, %v2048_v49 }
 0x244   : > { %v2050_v29 = vrot.slane %v1946_v7, 4  ;;  %v2056_v13 = vrot.slane %v1947_v2, 4  ;;  %v2062_v46 = vrot.slane %v1948_v43, 4  ;;  %v2068_v30 = vrot.slane %v1949_v14, 4 }
 0x245   : > { %v2074_v25 = vrot.slane %v1950_v34, 4  ;;  %v5063_v48 = vmax.f32 %v4281_v23, 0.0  ;;  %v5064_v40 = vmax.f32 %v4284_v10, 0.0  ;;  %v5065_v8 = vmax.f32 %v4287_v21, 0.0 }
 0x246   : > { %v2051_v20 = vmax.f32 %v1946_v7, %v2050_v29  ;;  %v2057_v26 = vmax.f32 %v1947_v2, %v2056_v13  ;;  %v2063_v9 = vmax.f32 %v1948_v43, %v2062_v46  ;;  %v2069_v52 = vmax.f32 %v1949_v14, %v2068_v30 }
 0x247   : > { %v2080_v1 = vrot.slane %v5063_v48, 4  ;;  %v2086_v55 = vrot.slane %v5064_v40, 4  ;;  %v2092_v44 = vrot.slane %v5065_v8, 4  ;;  %v2075_v6 = vmax.f32 %v1950_v34, %v2074_v25 }
 0x248   : > { %v2052_v7 = vrot.slane %v2051_v20, 2  ;;  %v5066_v56 = vmov %v5063_v48  ;;  %v5067_v4 = vmov %v5064_v40  ;;  %v5068_v42 = vmov %v5065_v8 }
 0x249   : > { %v2081_v54 = vmax.f32 %v5066_v56, %v2080_v1  ;;  %v2087_v17 = vmax.f32 %v5067_v4, %v2086_v55  ;;  %v2093_v3 = vmax.f32 %v5068_v42, %v2092_v44  ;;  %v2058_v2 = vrot.slane %v2057_v26, 2 }
 0x24a   : > { %v2064_v24 = vrot.slane %v2063_v9, 2  ;;  %v2070_v33 = vrot.slane %v2069_v52, 2  ;;  %v2076_v43 = vrot.slane %v2075_v6, 2  ;;  %v2053_v27 = vmax.f32 %v2051_v20, %v2052_v7 }
 0x24b   : > { %v2082_v19 = vrot.slane %v2081_v54, 2  ;;  %v2088_v14 = vrot.slane %v2087_v17, 2  ;;  %v2094_v62 = vrot.slane %v2093_v3, 2  ;;  %v2059_v5 = vmax.f32 %v2057_v26, %v2058_v2 }
 0x24c   : > { %v2065_v34 = vmax.f32 %v2063_v9, %v2064_v24  ;;  %v2071_v41 = vmax.f32 %v2069_v52, %v2070_v33  ;;  %v2077_v50 = vmax.f32 %v2075_v6, %v2076_v43  ;;  %v2054_v23 = vrot.slane %v2053_v27, 1 }
 0x24d   : > { %v2083_v31 = vmax.f32 %v2081_v54, %v2082_v19  ;;  %v2089_v49 = vmax.f32 %v2087_v17, %v2088_v14  ;;  %v2095_v10 = vmax.f32 %v2093_v3, %v2094_v62  ;;  %v2060_v29 = vrot.slane %v2059_v5, 1 }
 0x24e   : > { %v2066_v13 = vrot.slane %v2065_v34, 1  ;;  %v2072_v21 = vrot.slane %v2071_v41, 1  ;;  %v2078_v46 = vrot.slane %v2077_v50, 1  ;;  %v4417_v30 = vmax.f32 %v2053_v27, %v2054_v23 }
 0x24f   : > { %v2084_v25 = vrot.slane %v2083_v31, 1  ;;  %v2090_v48 = vrot.slane %v2089_v49, 1  ;;  %v2096_v20 = vrot.slane %v2095_v10, 1  ;;  %v4419_v1 = vmax.f32 %v2059_v5, %v2060_v29 }
 0x250   : > { %v4421_v40 = vmax.f32 %v2065_v34, %v2066_v13  ;;  %v4423_v55 = vmax.f32 %v2071_v41, %v2072_v21  ;;  %v4425_v8 = vmax.f32 %v2077_v50, %v2078_v46  ;;  %v5069_v52 = vmax.f32 %v4290_v39, 0.0 }
 0x251   : > { %v4427_v44 = vmax.f32 %v2083_v31, %v2084_v25  ;;  %v4429_v26 = vmax.f32 %v2089_v49, %v2090_v48  ;;  %v4431_v9 = vmax.f32 %v2095_v10, %v2096_v20  ;;  %v5070_v7 = vmax.f32 %v4293_v61, 0.0 }
 0x252   : > { %v2098_v6 = vrot.slane %v5069_v52, 4  ;;  %v5071_v54 = vmax.f32 %v4296_v37, 0.0  ;;  %v5072_v17 = vmax.f32 %v4299_v35, 0.0  ;;  %v5073_v3 = vmax.f32 %v4302_v58, 0.0 }
 0x253   : > { %v2104_v56 = vrot.slane %v5070_v7, 4  ;;  %v5074_v24 = vmov %v5069_v52  ;;  %v5075_v43 = vmax.f32 %v4305_v60, 0.0  ;;  %v5076_v19 = vmax.f32 %v4308_v28, 0.0 }
 0x254   : > { %v2110_v4 = vrot.slane %v5071_v54, 4  ;;  %v2116_v42 = vrot.slane %v5072_v17, 4  ;;  %v2122_v2 = vrot.slane %v5073_v3, 4  ;;  %v2099_v33 = vmax.f32 %v5074_v24, %v2098_v6 }
 0x255   : > { %v2128_v27 = vrot.slane %v5075_v43, 4  ;;  %v2134_v14 = vrot.slane %v5076_v19, 4  ;;  %v5077_v62 = vmax.f32 %v4311_v47, 0.0  ;;  %v5078_v34 = vmov %v5070_v7 }
 0x256   : > { %v2105_v41 = vmax.f32 %v5078_v34, %v2104_v56  ;;  %v5079_v50 = vmov %v5071_v54  ;;  %v5080_v31 = vmov %v5072_v17  ;;  %v5081_v39 = vmov %v5073_v3 }
 0x257   : > { %v2140_v5 = vrot.slane %v5077_v62, 4  ;;  %v2111_v23 = vmax.f32 %v5079_v50, %v2110_v4  ;;  %v2117_v49 = vmax.f32 %v5080_v31, %v2116_v42  ;;  %v2123_v10 = vmax.f32 %v5081_v39, %v2122_v2 }
 0x258   : > { %v2100_v29 = vrot.slane %v2099_v33, 2  ;;  %v5082_v13 = vmov %v5075_v43  ;;  %v5083_v46 = vmov %v5076_v19  ;;  %v5084_v48 = vmov %v5077_v62 }
 0x259   : > { %v2129_v21 = vmax.f32 %v5082_v13, %v2128_v27  ;;  %v2135_v25 = vmax.f32 %v5083_v46, %v2134_v14  ;;  %v2141_v61 = vmax.f32 %v5084_v48, %v2140_v5  ;;  %v2106_v20 = vrot.slane %v2105_v41, 2 }
 0x25a   : > { %v2112_v52 = vrot.slane %v2111_v23, 2  ;;  %v2118_v37 = vrot.slane %v2117_v49, 2  ;;  %v2124_v6 = vrot.slane %v2123_v10, 2  ;;  %v2101_v7 = vmax.f32 %v2099_v33, %v2100_v29 }
 0x25b   : > { %v2130_v35 = vrot.slane %v2129_v21, 2  ;;  %v2136_v56 = vrot.slane %v2135_v25, 2  ;;  %v2142_v54 = vrot.slane %v2141_v61, 2  ;;  %v2107_v58 = vmax.f32 %v2105_v41, %v2106_v20 }
 0x25c   : > { %v2113_v4 = vmax.f32 %v2111_v23, %v2112_v52  ;;  %v2119_v17 = vmax.f32 %v2117_v49, %v2118_v37  ;;  %v2125_v42 = vmax.f32 %v2123_v10, %v2124_v6  ;;  %v2102_v60 = vrot.slane %v2101_v7, 1 }
 0x25d   : > { %v2131_v3 = vmax.f32 %v2129_v21, %v2130_v35  ;;  %v2137_v2 = vmax.f32 %v2135_v25, %v2136_v56  ;;  %v2143_v28 = vmax.f32 %v2141_v61, %v2142_v54  ;;  %v2108_v24 = vrot.slane %v2107_v58, 1 }
 0x25e   : > { %v2114_v43 = vrot.slane %v2113_v4, 1  ;;  %v2120_v47 = vrot.slane %v2119_v17, 1  ;;  %v2126_v27 = vrot.slane %v2125_v42, 1  ;;  %v4465_v19 = vmax.f32 %v2101_v7, %v2102_v60 }
 0x25f   : > { %v2132_v14 = vrot.slane %v2131_v3, 1  ;;  %v2138_v62 = vrot.slane %v2137_v2, 1  ;;  %v2144_v33 = vrot.slane %v2143_v28, 1  ;;  %v4467_v5 = vmax.f32 %v2107_v58, %v2108_v24 }
 0x260   : > { %v4469_v34 = vmax.f32 %v2113_v4, %v2114_v43  ;;  %v2121_v41 = vmax.f32 %v2119_v17, %v2120_v47  ;;  %v2127_v50 = vmax.f32 %v2125_v42, %v2126_v27  ;;  %v5085_v39 = vmax.f32 %v4314_v16, 0.0 }
 0x261   : > { %v2133_v23 = vmax.f32 %v2131_v3, %v2132_v14  ;;  %v2139_v31 = vmax.f32 %v2137_v2, %v2138_v62  ;;  %v2145_v49 = vmax.f32 %v2143_v28, %v2144_v33  ;;  %v5086_v29 = vmax.f32 %v4317_v36, 0.0 }
 0x262   : > { %v2146_v10 = vrot.slane %v5085_v39, 4  ;;  %v5087_v21 = vmax.f32 %v4320_v18, 0.0  ;;  %v5088_v25 = vmax.f32 %v4323_v22, 0.0  ;;  %v5089_v61 = vmax.f32 %v4326_v59, 0.0 }
 0x263   : > { %v2152_v13 = vrot.slane %v5086_v29, 4  ;;  %v5090_v52 = vmov %v5085_v39  ;;  %v5091_v6 = vmax.f32 %v4329_v57, 0.0  ;;  %v5092_v35 = vmax.f32 %v4332_v12, 0.0 }
 0x264   : > { %v2158_v46 = vrot.slane %v5087_v21, 4  ;;  %v2164_v48 = vrot.slane %v5088_v25, 4  ;;  %v2170_v20 = vrot.slane %v5089_v61, 4  ;;  %v2147_v37 = vmax.f32 %v5090_v52, %v2146_v10 }
 0x265   : > { %v2176_v7 = vrot.slane %v5091_v6, 4  ;;  %v2182_v56 = vrot.slane %v5092_v35, 4  ;;  %v5093_v54 = vmax.f32 %v4335_v0, 0.0  ;;  %v5094_v4 = vmov %v5086_v29 }
 0x266   : > { %v2153_v17 = vmax.f32 %v5094_v4, %v2152_v13  ;;  %v5095_v42 = vmov %v5087_v21  ;;  %v5096_v3 = vmov %v5088_v25  ;;  %v5097_v16 = vmov %v5089_v61 }
 0x267   : > { %v2188_v58 = vrot.slane %v5093_v54, 4  ;;  %v2159_v60 = vmax.f32 %v5095_v42, %v2158_v46  ;;  %v2165_v2 = vmax.f32 %v5096_v3, %v2164_v48  ;;  %v2171_v28 = vmax.f32 %v5097_v16, %v2170_v20 }
 0x268   : > { %v2148_v24 = vrot.slane %v2147_v37, 2  ;;  %v5098_v43 = vmov %v5091_v6  ;;  %v5099_v27 = vmov %v5092_v35  ;;  %v5100_v62 = vmov %v5093_v54 }
 0x269   : > { %v2177_v47 = vmax.f32 %v5098_v43, %v2176_v7  ;;  %v2183_v14 = vmax.f32 %v5099_v27, %v2182_v56  ;;  %v2189_v36 = vmax.f32 %v5100_v62, %v2188_v58  ;;  %v2154_v33 = vrot.slane %v2153_v17, 2 }
 0x26a   : > { %v2160_v39 = vrot.slane %v2159_v60, 2  ;;  %v2166_v18 = vrot.slane %v2165_v2, 2  ;;  %v2172_v10 = vrot.slane %v2171_v28, 2  ;;  %v2149_v29 = vmax.f32 %v2147_v37, %v2148_v24 }
 0x26b   : > { %v2178_v22 = vrot.slane %v2177_v47, 2  ;;  %v2184_v13 = vrot.slane %v2183_v14, 2  ;;  %v2190_v21 = vrot.slane %v2189_v36, 2  ;;  %v2155_v59 = vmax.f32 %v2153_v17, %v2154_v33 }
 0x26c   : > { %v2161_v46 = vmax.f32 %v2159_v60, %v2160_v39  ;;  %v2167_v25 = vmax.f32 %v2165_v2, %v2166_v18  ;;  %v2173_v48 = vmax.f32 %v2171_v28, %v2172_v10  ;;  %v2150_v57 = vrot.slane %v2149_v29, 1 }
 0x26d   : > { %v2179_v61 = vmax.f32 %v2177_v47, %v2178_v22  ;;  %v2185_v20 = vmax.f32 %v2183_v14, %v2184_v13  ;;  %v2191_v12 = vmax.f32 %v2189_v36, %v2190_v21  ;;  %v2156_v52 = vrot.slane %v2155_v59, 1 }
 0x26e   : > { %v2162_v6 = vrot.slane %v2161_v46, 1  ;;  %v2168_v0 = vrot.slane %v2167_v25, 1  ;;  %v2174_v7 = vrot.slane %v2173_v48, 1  ;;  %v2151_v35 = vmax.f32 %v2149_v29, %v2150_v57 }
 0x26f   : > { %v2180_v56 = vrot.slane %v2179_v61, 1  ;;  %v2186_v54 = vrot.slane %v2185_v20, 1  ;;  %v2192_v58 = vrot.slane %v2191_v12, 1  ;;  %v2157_v37 = vmax.f32 %v2155_v59, %v2156_v52 }
 0x270   : > { %v2163_v4 = vmax.f32 %v2161_v46, %v2162_v6  ;;  %v2169_v42 = vmax.f32 %v2167_v25, %v2168_v0  ;;  %v2175_v3 = vmax.f32 %v2173_v48, %v2174_v7  ;;  %v2386_v16 = vpack.c.bf16 %v4371_v11, %v4369_v15 }
 0x271   : > { %v2181_v17 = vmax.f32 %v2179_v61, %v2180_v56  ;;  %v2187_v60 = vmax.f32 %v2185_v20, %v2186_v54  ;;  %v2193_v2 = vmax.f32 %v2191_v12, %v2192_v58  ;;  %v2387_v28 = vpack.c.bf16 %v4375_v63, %v4373_v38 }
 0x272   : > { %v2388_v24 = vpack.c.bf16 %v4379_v32, %v4377_v53  ;;  %v2389_v43 = vpack.c.bf16 %v4383_v51, %v4381_v45  ;;  %v2390_v47 = vpack.c.bf16 %v4419_v1, %v4417_v30  ;;  %v2391_v27 = vpack.c.bf16 %v4423_v55, %v4421_v40 }
 0x273   : > { %v2392_v14 = vpack.c.bf16 %v4427_v44, %v4425_v8  ;;  %v2393_v15 = vpack.c.bf16 %v4431_v9, %v4429_v26  ;;  %v2394_v11 = vpack.c.bf16 %v4467_v5, %v4465_v19  ;;  %v4522_v38 = vpack.c.bf16 %v2121_v41, %v4469_v34 }
 0x274   : > { %v2396_v63 = vpack.c.bf16 %v2133_v23, %v2127_v50  ;;  %v4524_v53 = vpack.c.bf16 %v2145_v49, %v2139_v31  ;;  %v4526_v32 = vpack.c.bf16 %v2157_v37, %v2151_v35  ;;  %v4528_v45 = vpack.c.bf16 %v2169_v42, %v2163_v4 }
 0x275   : > { %v4530_v51 = vpack.c.bf16 %v2181_v17, %v2175_v3  ;;  %v4532_v30 = vpack.c.bf16 %v2193_v2, %v2187_v60  ;;  %v2450_v1 = vunpack.c.l.b16 %v2386_v16  ;;  %v2451_v40 = vunpack.c.h.b16 %v2386_v16  ;;  %v1588_v16 = vpop.f32.mrf.mxu1 }
 0x276   : > { %v2452_v55 = vunpack.c.l.b16 %v2387_v28  ;;  %v2453_v8 = vunpack.c.h.b16 %v2387_v28  ;;  %v2454_v44 = vunpack.c.l.b16 %v2388_v24  ;;  %v2455_v26 = vunpack.c.h.b16 %v2388_v24 }
 0x277   : > { %v2456_v9 = vunpack.c.l.b16 %v2389_v43  ;;  %v2457_v19 = vunpack.c.h.b16 %v2389_v43  ;;  %v2458_v5 = vunpack.c.l.b16 %v2390_v47  ;;  %v2459_v34 = vunpack.c.h.b16 %v2390_v47 }
 0x278   : > { %v2460_v41 = vunpack.c.l.b16 %v2391_v27  ;;  %v2461_v50 = vunpack.c.h.b16 %v2391_v27  ;;  %v2462_v23 = vunpack.c.l.b16 %v2392_v14  ;;  %v2463_v31 = vunpack.c.h.b16 %v2392_v14  ;;  %v1611_v27 = vpop.f32.mrf.mxu2  ;;  %v1634_v14 = vpop.f32.mrf.mxu3 }
 0x279   : > { %v2464_v49 = vunpack.c.l.b16 %v2393_v15  ;;  %v2465_v62 = vunpack.c.h.b16 %v2393_v15  ;;  %v2466_v36 = vunpack.c.l.b16 %v2394_v11  ;;  %v2467_v33 = vunpack.c.h.b16 %v2394_v11 }
 0x27a   : > { %v2468_v39 = vunpack.c.l.b16 %v4522_v38  ;;  %v2469_v18 = vunpack.c.h.b16 %v4522_v38  ;;  %v2470_v10 = vunpack.c.l.b16 %v2396_v63  ;;  %v2471_v29 = vunpack.c.h.b16 %v2396_v63 }
 0x27b   : > { %v2472_v22 = vunpack.c.l.b16 %v4524_v53  ;;  %v2473_v13 = vunpack.c.h.b16 %v4524_v53  ;;  %v2474_v21 = vunpack.c.l.b16 %v4526_v32  ;;  %v2475_v59 = vunpack.c.h.b16 %v4526_v32  ;;  %v1565_v53 = vpop.f32.mrf.mxu0 }
 0x27c   : > { %v2476_v46 = vunpack.c.l.b16 %v4528_v45  ;;  %v2477_v25 = vunpack.c.h.b16 %v4528_v45  ;;  %v2478_v48 = vunpack.c.l.b16 %v4530_v51  ;;  %v2479_v57 = vunpack.c.h.b16 %v4530_v51 }
 0x27d   : > { %v2480_v61 = vunpack.c.l.b16 %v4532_v30  ;;  %v2481_v20 = vunpack.c.h.b16 %v4532_v30  ;;  %v2514_v12 = vsel %vm1674_vm4, %v2454_v44, %v2450_v1  ;;  %vm2520_vm1 = vcmask 1047559   ;;  %v5101_v30 = vld [vmem:[#allocation22_spill] sm:$0xff] }
 0x27e   : > { %v2515_v52 = vsel %vm1670_vm3, %v2458_v5, %v2514_v12  ;;  %v2522_v6 = vsel %vm1674_vm4, %v2455_v26, %v2451_v40  ;;  %v2529_v0 = vsel %vm1674_vm4, %v2456_v9, %v2452_v55  ;;  %v2536_v54 = vsel %vm1674_vm4, %v2457_v19, %v2453_v8 }
 0x27f   : > { %v2516_v7 = vsel %vm1676_vm5, %v2462_v23, %v2515_v52  ;;  %v2523_v35 = vsel %vm1670_vm3, %v2459_v34, %v2522_v6  ;;  %v2530_v56 = vsel %vm1670_vm3, %v2460_v41, %v2529_v0  ;;  %v2537_v42 = vsel %vm1670_vm3, %v2461_v50, %v2536_v54  ;;  %v5106_v23 = vld [vmem:[#allocation25_spill] sm:$0xff] }
 0x280   : > { %v2517_v58 = vsel %vm1682_vm6, %v2466_v36, %v2516_v7  ;;  %v2524_v37 = vsel %vm1676_vm5, %v2463_v31, %v2523_v35  ;;  %v2531_v4 = vsel %vm1676_vm5, %v2464_v49, %v2530_v56  ;;  %v2538_v2 = vsel %vm1676_vm5, %v2465_v62, %v2537_v42  ;;  %v5107_v31 = vld [vmem:[#allocation33_spill] sm:$0xff]  ;;  %v5108_v62 = vld [vmem:[#allocation26_spill] sm:$0xff]  ;;  %v5109_v36 = vld [vmem:[#allocation35_spill] sm:$0xff] }
 0x281   : > { %v2518_v3 = vsel %vm1688_vm7, %v2470_v10, %v2517_v58  ;;  %v2525_v17 = vsel %vm1682_vm6, %v2467_v33, %v2524_v37  ;;  %v2532_v60 = vsel %vm1682_vm6, %v2468_v39, %v2531_v4  ;;  %v2539_v47 = vsel %vm1682_vm6, %v2469_v18, %v2538_v2 }
 0x282   : > { %v2519_v28 = vsel %vm1694_vm8, %v2474_v21, %v2518_v3  ;;  %v2526_v24 = vsel %vm1688_vm7, %v2471_v29, %v2525_v17  ;;  %v2533_v43 = vsel %vm1688_vm7, %v2472_v22, %v2532_v60  ;;  %v2540_v63 = vsel %vm1688_vm7, %v2473_v13, %v2539_v47 }
 0x283   : > { %v2521_v15 = vsel %vm2520_vm1, %v2478_v48, %v2519_v28  ;;  %v2527_v11 = vsel %vm1694_vm8, %v2475_v59, %v2526_v24  ;;  %v2534_v38 = vsel %vm1694_vm8, %v2476_v46, %v2533_v43  ;;  %v2541_v51 = vsel %vm1694_vm8, %v2477_v25, %v2540_v63 }
 0x284   : > { %v2528_v32 = vsel %vm2520_vm1, %v2479_v57, %v2527_v11  ;;  %v2535_v45 = vsel %vm2520_vm1, %v2480_v61, %v2534_v38  ;;  %v5102_v1 = vperm.slane %v5101_v30, 1  ;;  %v2542_v55 = vsel %vm2520_vm1, %v2481_v20, %v2541_v51 }
 0x285   : > { %v2571_v8 = vpack.c.b16 %v2528_v32, %v2521_v15  ;;  %v5103_v44 = vperm.slane %v5101_v30, 2  ;;  %v5104_v9 = vperm.slane %v5101_v30, 3  ;;  %v2572_v5 = vpack.c.b16 %v2542_v55, %v2535_v45 }
 0x286   : > { %v1651_v40 = vsub.f32 %v5102_v1, %v1588_v16  ;;  %v5105_v41 = vperm.slane %v5101_v30, 0  ;;  %v4590_v49 = vadd.f32 %v5107_v31, %v5106_v23  ;;  %v4594_v33 = vadd.f32 %v5109_v36, %v5108_v62 }
 0x287   : > { %v1652_v26 = vsub.f32 %v5103_v44, %v1611_v27  ;;  %v1653_v19 = vsub.f32 %v5104_v9, %v1634_v14  ;;  %2579 = vst [vmem:[%s4574_s15] sm:$0xff] %v2571_v8 }
 0x288   : > { %v1665_v34 = vrot.slane %v1651_v40, 7  ;;  %v1650_v50 = vsub.f32 %v5105_v41, %v1565_v53  ;;  %2580 = vst [vmem:[%s4574_s15 + $0x8] sm:$0xff] %v2572_v5 }
 0x289   : > { %v1666_v39 = vrot.slane %v1652_v26, 6  ;;  %v1667_v18 = vrot.slane %v1653_v19, 5 }
 0x28a   : > { %v1715_v10 = vsel %vm1668_vm2, %v1650_v50, %v1665_v34  ;;  %v1718_v29 = vsel %vm1674_vm4, %v1650_v50, %v1665_v34  ;;  %v1722_v22 = vsel %vm1670_vm3, %v1650_v50, %v1665_v34  ;;  %v1726_v13 = vsel %vm1676_vm5, %v1650_v50, %v1665_v34 }
 0x28b   : > { %v1716_v21 = vsel %vm1670_vm3, %v1666_v39, %v1667_v18  ;;  %v1719_v59 = vsel %vm1676_vm5, %v1666_v39, %v1667_v18  ;;  %v1723_v46 = vsel %vm1682_vm6, %v1666_v39, %v1667_v18  ;;  %v1727_v25 = vsel %vm1688_vm7, %v1666_v39, %v1667_v18 }
 0x28c   : > { %v1731_v48 = vsel %vm1694_vm8, %v1666_v39, %v1667_v18  ;;  %v1735_v57 = vsel %vm1700_vm9, %v1667_v18, %v1666_v39  ;;  %v1739_v61 = vsel %vm1668_vm2, %v1666_v39, %v1667_v18  ;;  %v1743_v20 = vsel %vm1674_vm4, %v1666_v39, %v1667_v18 }
 0x28d   : > { %v1717_v12 = vsel %vm1672_vm10, %v1715_v10, %v1716_v21  ;;  %v1720_v52 = vsel %vm1678_vm11, %v1718_v29, %v1719_v59  ;;  %v1724_v6 = vsel %vm1684_vm12, %v1722_v22, %v1723_v46  ;;  %v1728_v0 = vsel %vm1690_vm13, %v1726_v13, %v1727_v25  ;;  %v5111_v22 = vld [vmem:[#allocation36_spill] sm:$0xff]  ;;  %v5112_v21 = vld [vmem:[#allocation6_spill] sm:$0xff]  ;;  %v5113_v46 = vld [vmem:[#allocation7_spill] sm:$0xff] }
 0x28e   : > { %v1721_v7 = vrot.slane %v1720_v52, 1  ;;  %v1725_v35 = vrot.slane %v1724_v6, 2  ;;  %v1729_v56 = vrot.slane %v1728_v0, 3  ;;  %v1730_v54 = vsel %vm1682_vm6, %v1650_v50, %v1665_v34  ;;  %v5117_v6 = vld [vmem:[#allocation38_spill] sm:$0xff] }
 0x28f   : > { %v1732_v58 = vsel %vm1696_vm14, %v1730_v54, %v1731_v48  ;;  %v1734_v37 = vsel %vm1688_vm7, %v1650_v50, %v1665_v34  ;;  %v1738_v4 = vsel %vm1694_vm8, %v1650_v50, %v1665_v34  ;;  %v1742_v42 = vsel %vm1700_vm9, %v1665_v34, %v1650_v50 }
 0x290   : > { %v1733_v3 = vrot.slane %v1732_v58, 4  ;;  %v1736_v17 = vsel %vm1702_vm15, %v1734_v37, %v1735_v57  ;;  %v1740_v60 = vsel %vm1707_vm0, %v1739_v61, %v1738_v4  ;;  %vm5110_vm2 = vcmask 1046529   ;;  %v5114_v57 = vld [vmem:[#allocation37_spill] sm:$0xff]  ;;  %v5121_v37 = vld [vmem:[#allocation40_spill] sm:$0xff] }
 0x291   : > { %v1744_v2 = vsel %vm5110_vm2, %v1743_v20, %v1742_v42  ;;  %v1737_v16 = vrot.slane %v1736_v17, 5  ;;  %v1741_v28 = vrot.slane %v1740_v60, 6  ;;  %v1778_v43 = vperm.slane %v1717_v12, 0  ;;  %v5115_v20 = vld [vmem:[#allocation8_spill] sm:$0xff]  ;;  %v5122_v42 = vld [vmem:[#allocation41_spill] sm:$0xff] }
 0x292   : > { %v4622_v24 = vrot.slane %v1744_v2, 7  ;;  %v1779_v47 = vperm.slane %v1717_v12, 1  ;;  %v1780_v27 = vperm.slane %v1717_v12, 2  ;;  %v1781_v14 = vperm.slane %v1717_v12, 3  ;;  %v5123_v17 = vld [vmem:[#allocation13_spill] sm:$0xff]  ;;  %v5124_v2 = vld [vmem:[#allocation14_spill] sm:$0xff] }
 0x293   : > { %v1782_v15 = vperm.slane %v1721_v7, 0  ;;  %v1783_v11 = vperm.slane %v1721_v7, 1  ;;  %v1784_v38 = vperm.slane %v1721_v7, 2  ;;  %v1785_v63 = vperm.slane %v1721_v7, 3  ;;  %v5118_v7 = vld [vmem:[#allocation39_spill] sm:$0xff] }
 0x294   : > { %v1786_v53 = vperm.slane %v1725_v35, 0  ;;  %v1787_v32 = vperm.slane %v1725_v35, 1  ;;  %v1788_v45 = vperm.slane %v1725_v35, 2  ;;  %v1789_v51 = vperm.slane %v1725_v35, 3 }
 0x295   : > { %v1790_v30 = vperm.slane %v1729_v56, 0  ;;  %v1791_v1 = vperm.slane %v1729_v56, 1  ;;  %v1792_v40 = vperm.slane %v1729_v56, 2  ;;  %v1793_v55 = vperm.slane %v1729_v56, 3  ;;  %v5119_v56 = vld [vmem:[#allocation10_spill] sm:$0xff] }
 0x296   : > { %v1794_v8 = vperm.slane %v1733_v3, 0  ;;  %v1795_v44 = vperm.slane %v1733_v3, 1  ;;  %v1796_v26 = vperm.slane %v1733_v3, 2  ;;  %v1797_v9 = vperm.slane %v1733_v3, 3 }
 0x297   : > { %v1798_v19 = vperm.slane %v1737_v16, 0  ;;  %v1799_v5 = vperm.slane %v1737_v16, 1  ;;  %v1800_v34 = vperm.slane %v1737_v16, 2  ;;  %v1801_v41 = vperm.slane %v1737_v16, 3 }
 0x298   : > { %v1802_v50 = vperm.slane %v1741_v28, 0  ;;  %v1803_v23 = vperm.slane %v1741_v28, 1  ;;  %v1804_v31 = vperm.slane %v1741_v28, 2  ;;  %v1805_v62 = vperm.slane %v1741_v28, 3  ;;  %v5125_v28 = vld [vmem:[#allocation42_spill] sm:$0xff] }
 0x299   : > { %v1806_v36 = vperm.slane %v4622_v24, 0  ;;  %v1807_v39 = vperm.slane %v4622_v24, 1  ;;  %v1808_v18 = vperm.slane %v4622_v24, 2  ;;  %v1809_v10 = vperm.slane %v4622_v24, 3 }
 0x29a   : > { %v4629_v29 = vadd.f32 %v1778_v43, %v4590_v49  ;;  %v4632_v13 = vadd.f32 %v1779_v47, %v5111_v22  ;;  %v4635_v59 = vadd.f32 %v1780_v27, %v5112_v21  ;;  %v4638_v25 = vadd.f32 %v1781_v14, %v5113_v46  ;;  %v5116_v49 = vld [vmem:[#allocation9_spill] sm:$0xff]  ;;  %v5126_v43 = vld [vmem:[#allocation43_spill] sm:$0xff]  ;;  %v5127_v27 = vld [vmem:[#allocation16_spill] sm:$0xff] }
 0x29b   : > { %v4641_v48 = vadd.f32 %v1782_v15, %v4594_v33  ;;  %v4644_v61 = vadd.f32 %v1783_v11, %v5114_v57  ;;  %v4647_v12 = vadd.f32 %v1784_v38, %v5115_v20  ;;  %v4650_v52 = vadd.f32 %v1785_v63, %v5116_v49  ;;  %v5120_v33 = vld [vmem:[#allocation11_spill] sm:$0xff]  ;;  %v5128_v15 = vld [vmem:[#allocation17_spill] sm:$0xff]  ;;  %v5129_v38 = vld [vmem:[#allocation44_spill] sm:$0xff] }
 0x29c   : > { %v4653_v0 = vadd.f32 %v1786_v53, %v5117_v6  ;;  %v4656_v35 = vadd.f32 %v1787_v32, %v5118_v7  ;;  %v4659_v54 = vadd.f32 %v1788_v45, %v5119_v56  ;;  %v4662_v58 = vadd.f32 %v1789_v51, %v5120_v33  ;;  %v5130_v53 = vld [vmem:[#allocation45_spill] sm:$0xff]  ;;  %v5131_v45 = vld [vmem:[#allocation18_spill] sm:$0xff] }
 0x29d   : > { %v4665_v4 = vadd.f32 %v1790_v30, %v5121_v37  ;;  %v4668_v3 = vadd.f32 %v1791_v1, %v5122_v42  ;;  %v4671_v60 = vadd.f32 %v1792_v40, %v5123_v17  ;;  %v4674_v16 = vadd.f32 %v1793_v55, %v5124_v2  ;;  %v5132_v30 = vld [vmem:[#allocation19_spill] sm:$0xff]  ;;  %v5133_v40 = vld [vmem:[#allocation46_spill] sm:$0xff] }
 0x29e   : > { %v4677_v24 = vadd.f32 %v1794_v8, %v5125_v28  ;;  %v4680_v47 = vadd.f32 %v1795_v44, %v5126_v43  ;;  %v4683_v14 = vadd.f32 %v1796_v26, %v5127_v27  ;;  %v4686_v11 = vadd.f32 %v1797_v9, %v5128_v15  ;;  %v5134_v8 = vld [vmem:[#allocation47_spill] sm:$0xff]  ;;  %v5135_v26 = vld [vmem:[#allocation20_spill] sm:$0xff] }
 0x29f   : > { %v4689_v63 = vadd.f32 %v1798_v19, %v5129_v38  ;;  %v4692_v32 = vadd.f32 %v1799_v5, %v5130_v53  ;;  %v4695_v51 = vadd.f32 %v1800_v34, %v5131_v45  ;;  %v4698_v1 = vadd.f32 %v1801_v41, %v5132_v30  ;;  %v5136_v19 = vld [vmem:[#allocation21_spill] sm:$0xff]  ;;  %v5137_v5 = vld [vmem:[#allocation48_spill] sm:$0xff]  ;;  %v5139_v41 = vld [vmem:[#allocation23_spill] sm:$0xff] }
 0x2a0   : > { %v4701_v55 = vadd.f32 %v1802_v50, %v5133_v40  ;;  %v4704_v44 = vadd.f32 %v1803_v23, %v5134_v8  ;;  %v4707_v9 = vadd.f32 %v1804_v31, %v5135_v26  ;;  %v4710_v22 = vadd.f32 %v1805_v62, %v5136_v19  ;;  %v5138_v34 = vld [vmem:[#allocation49_spill] sm:$0xff]  ;;  %v5140_v50 = vld [vmem:[#allocation24_spill] sm:$0xff] }
 0x2a1   : > { %v4713_v21 = vadd.f32 %v1806_v36, %v5137_v5  ;;  %v4716_v46 = vadd.f32 %v1807_v39, %v5138_v34  ;;  %v4719_v57 = vadd.f32 %v1808_v18, %v5139_v41  ;;  %v4722_v20 = vadd.f32 %v1809_v10, %v5140_v50 }
 0x2a2   : > { %v1970_v23 = vmax.f32 %v4629_v29, 0.0  ;;  %v1971_v31 = vmax.f32 %v4632_v13, 0.0  ;;  %v1972_v49 = vmax.f32 %v4635_v59, 0.0  ;;  %v1973_v62 = vmax.f32 %v4638_v25, 0.0 }
 0x2a3   : > { %v1974_v36 = vmax.f32 %v4641_v48, 0.0  ;;  %v1975_v6 = vmax.f32 %v4644_v61, 0.0  ;;  %v1976_v39 = vmax.f32 %v4647_v12, 0.0  ;;  %v1977_v18 = vmax.f32 %v4650_v52, 0.0 }
 0x2a4   : > { %v1978_v7 = vmax.f32 %v4653_v0, 0.0  ;;  %v1979_v10 = vmax.f32 %v4656_v35, 0.0  ;;  %v1980_v29 = vmax.f32 %v4659_v54, 0.0  ;;  %v1981_v13 = vmax.f32 %v4662_v58, 0.0 }
 0x2a5   : > { %v1982_v59 = vmax.f32 %v4665_v4, 0.0  ;;  %v2194_v40 = vrot.slane %v1970_v23, 4  ;;  %v2200_v8 = vrot.slane %v1971_v31, 4  ;;  %v2206_v26 = vrot.slane %v1972_v49, 4 }
 0x2a6   : > { %v2212_v19 = vrot.slane %v1973_v62, 4  ;;  %v2218_v5 = vrot.slane %v1974_v36, 4  ;;  %v2224_v41 = vrot.slane %v1975_v6, 4  ;;  %v2230_v50 = vrot.slane %v1976_v39, 4 }
 0x2a7   : > { %v2195_v34 = vmax.f32 %v1970_v23, %v2194_v40  ;;  %v2236_v43 = vrot.slane %v1977_v18, 4  ;;  %v2201_v27 = vmax.f32 %v1971_v31, %v2200_v8  ;;  %v2207_v28 = vmax.f32 %v1972_v49, %v2206_v26 }
 0x2a8   : > { %v2213_v15 = vmax.f32 %v1973_v62, %v2212_v19  ;;  %v2219_v2 = vmax.f32 %v1974_v36, %v2218_v5  ;;  %v2225_v17 = vmax.f32 %v1975_v6, %v2224_v41  ;;  %v2231_v53 = vmax.f32 %v1976_v39, %v2230_v50 }
 0x2a9   : > { %v2196_v38 = vrot.slane %v2195_v34, 2  ;;  %v2237_v42 = vmax.f32 %v1977_v18, %v2236_v43  ;;  %v2202_v45 = vrot.slane %v2201_v27, 2  ;;  %v2208_v37 = vrot.slane %v2207_v28, 2 }
 0x2aa   : > { %v2214_v30 = vrot.slane %v2213_v15, 2  ;;  %v2220_v33 = vrot.slane %v2219_v2, 2  ;;  %v2226_v52 = vrot.slane %v2225_v17, 2  ;;  %v2232_v12 = vrot.slane %v2231_v53, 2 }
 0x2ab   : > { %v2197_v56 = vmax.f32 %v2195_v34, %v2196_v38  ;;  %v2238_v61 = vrot.slane %v2237_v42, 2  ;;  %v2203_v23 = vmax.f32 %v2201_v27, %v2202_v45  ;;  %v2209_v40 = vmax.f32 %v2207_v28, %v2208_v37 }
 0x2ac   : > { %v2215_v48 = vmax.f32 %v2213_v15, %v2214_v30  ;;  %v2221_v25 = vmax.f32 %v2219_v2, %v2220_v33  ;;  %v2227_v49 = vmax.f32 %v2225_v17, %v2226_v52  ;;  %v2233_v62 = vmax.f32 %v2231_v53, %v2232_v12 }
 0x2ad   : > { %v2198_v31 = vrot.slane %v2197_v56, 1  ;;  %v2239_v36 = vmax.f32 %v2237_v42, %v2238_v61  ;;  %v2204_v8 = vrot.slane %v2203_v23, 1  ;;  %v2210_v6 = vrot.slane %v2209_v40, 1 }
 0x2ae   : > { %v2216_v39 = vrot.slane %v2215_v48, 1  ;;  %v2222_v18 = vrot.slane %v2221_v25, 1  ;;  %v2228_v26 = vrot.slane %v2227_v49, 1  ;;  %v2234_v19 = vrot.slane %v2233_v62, 1 }
 0x2af   : > { %v4756_v43 = vmax.f32 %v2197_v56, %v2198_v31  ;;  %v2240_v38 = vrot.slane %v2239_v36, 1  ;;  %v4758_v5 = vmax.f32 %v2203_v23, %v2204_v8  ;;  %v4760_v34 = vmax.f32 %v2209_v40, %v2210_v6 }
 0x2b0   : > { %v4762_v37 = vmax.f32 %v2215_v48, %v2216_v39  ;;  %v4764_v33 = vmax.f32 %v2221_v25, %v2222_v18  ;;  %v4766_v52 = vmax.f32 %v2227_v49, %v2228_v26  ;;  %v4768_v61 = vmax.f32 %v2233_v62, %v2234_v19 }
 0x2b1   : > { %v4770_v12 = vmax.f32 %v2239_v36, %v2240_v38  ;;  %v2242_v56 = vrot.slane %v1978_v7, 4  ;;  %v2248_v42 = vrot.slane %v1979_v10, 4  ;;  %v2254_v17 = vrot.slane %v1980_v29, 4 }
 0x2b2   : > { %v2260_v48 = vrot.slane %v1981_v13, 4  ;;  %v2266_v25 = vrot.slane %v1982_v59, 4  ;;  %v5141_v28 = vmax.f32 %v4668_v3, 0.0  ;;  %v5142_v15 = vmax.f32 %v4671_v60, 0.0 }
 0x2b3   : > { %v2243_v2 = vmax.f32 %v1978_v7, %v2242_v56  ;;  %v5143_v45 = vmax.f32 %v4674_v16, 0.0  ;;  %v2249_v41 = vmax.f32 %v1979_v10, %v2248_v42  ;;  %v2255_v50 = vmax.f32 %v1980_v29, %v2254_v17 }
 0x2b4   : > { %v2272_v27 = vrot.slane %v5141_v28, 4  ;;  %v2278_v53 = vrot.slane %v5142_v15, 4  ;;  %v2261_v23 = vmax.f32 %v1981_v13, %v2260_v48  ;;  %v2267_v0 = vmax.f32 %v1982_v59, %v2266_v25 }
 0x2b5   : > { %v2284_v30 = vrot.slane %v5143_v45, 4  ;;  %v2244_v7 = vrot.slane %v2243_v2, 2  ;;  %v5144_v40 = vmov %v5141_v28  ;;  %v5145_v49 = vmov %v5142_v15 }
 0x2b6   : > { %v2273_v31 = vmax.f32 %v5144_v40, %v2272_v27  ;;  %v2279_v62 = vmax.f32 %v5145_v49, %v2278_v53  ;;  %v5146_v36 = vmov %v5143_v45  ;;  %v2250_v10 = vrot.slane %v2249_v41, 2 }
 0x2b7   : > { %v2285_v35 = vmax.f32 %v5146_v36, %v2284_v30  ;;  %v2256_v8 = vrot.slane %v2255_v50, 2  ;;  %v2262_v54 = vrot.slane %v2261_v23, 2  ;;  %v2268_v29 = vrot.slane %v2267_v0, 2 }
 0x2b8   : > { %v2245_v6 = vmax.f32 %v2243_v2, %v2244_v7  ;;  %v2274_v58 = vrot.slane %v2273_v31, 2  ;;  %v2280_v13 = vrot.slane %v2279_v62, 2  ;;  %v2251_v4 = vmax.f32 %v2249_v41, %v2250_v10 }
 0x2b9   : > { %v2286_v39 = vrot.slane %v2285_v35, 2  ;;  %v2257_v59 = vmax.f32 %v2255_v50, %v2256_v8  ;;  %v2263_v18 = vmax.f32 %v2261_v23, %v2262_v54  ;;  %v2269_v26 = vmax.f32 %v2267_v0, %v2268_v29 }
 0x2ba   : > { %v2246_v3 = vrot.slane %v2245_v6, 1  ;;  %v2275_v19 = vmax.f32 %v2273_v31, %v2274_v58  ;;  %v2281_v38 = vmax.f32 %v2279_v62, %v2280_v13  ;;  %v2252_v56 = vrot.slane %v2251_v4, 1 }
 0x2bb   : > { %v2287_v60 = vmax.f32 %v2285_v35, %v2286_v39  ;;  %v2258_v42 = vrot.slane %v2257_v59, 1  ;;  %v2264_v16 = vrot.slane %v2263_v18, 1  ;;  %v2270_v17 = vrot.slane %v2269_v26, 1 }
 0x2bc   : > { %v4804_v48 = vmax.f32 %v2245_v6, %v2246_v3  ;;  %v2276_v25 = vrot.slane %v2275_v19, 1  ;;  %v2282_v28 = vrot.slane %v2281_v38, 1  ;;  %v4806_v27 = vmax.f32 %v2251_v4, %v2252_v56 }
 0x2bd   : > { %v2288_v2 = vrot.slane %v2287_v60, 1  ;;  %v4808_v15 = vmax.f32 %v2257_v59, %v2258_v42  ;;  %v4810_v53 = vmax.f32 %v2263_v18, %v2264_v16  ;;  %v4812_v45 = vmax.f32 %v2269_v26, %v2270_v17 }
 0x2be   : > { %v4814_v30 = vmax.f32 %v2275_v19, %v2276_v25  ;;  %v4816_v41 = vmax.f32 %v2281_v38, %v2282_v28  ;;  %v5147_v23 = vmax.f32 %v4677_v24, 0.0  ;;  %v5148_v7 = vmax.f32 %v4680_v47, 0.0 }
 0x2bf   : > { %v4818_v50 = vmax.f32 %v2287_v60, %v2288_v2  ;;  %v5149_v31 = vmax.f32 %v4683_v14, 0.0  ;;  %v5150_v62 = vmax.f32 %v4686_v11, 0.0  ;;  %v5151_v35 = vmax.f32 %v4689_v63, 0.0 }
 0x2c0   : > { %v2290_v0 = vrot.slane %v5147_v23, 4  ;;  %v2296_v40 = vrot.slane %v5148_v7, 4  ;;  %v5152_v8 = vmov %v5147_v23  ;;  %v5153_v29 = vmax.f32 %v4692_v32, 0.0 }
 0x2c1   : > { %v2302_v49 = vrot.slane %v5149_v31, 4  ;;  %v2308_v36 = vrot.slane %v5150_v62, 4  ;;  %v2314_v10 = vrot.slane %v5151_v35, 4  ;;  %v5154_v58 = vmax.f32 %v4695_v51, 0.0 }
 0x2c2   : > { %v2291_v54 = vmax.f32 %v5152_v8, %v2290_v0  ;;  %v2320_v6 = vrot.slane %v5153_v29, 4  ;;  %v5155_v39 = vmax.f32 %v4698_v1, 0.0  ;;  %v5156_v59 = vmov %v5148_v7 }
 0x2c3   : > { %v2326_v13 = vrot.slane %v5154_v58, 4  ;;  %v2297_v18 = vmax.f32 %v5156_v59, %v2296_v40  ;;  %v5157_v26 = vmov %v5149_v31  ;;  %v5158_v19 = vmov %v5150_v62 }
 0x2c4   : > { %v2332_v4 = vrot.slane %v5155_v39, 4  ;;  %v2303_v3 = vmax.f32 %v5157_v26, %v2302_v49  ;;  %v2309_v38 = vmax.f32 %v5158_v19, %v2308_v36  ;;  %v5159_v24 = vmov %v5151_v35 }
 0x2c5   : > { %v2315_v60 = vmax.f32 %v5159_v24, %v2314_v10  ;;  %v2292_v56 = vrot.slane %v2291_v54, 2  ;;  %v5160_v42 = vmov %v5153_v29  ;;  %v5161_v17 = vmov %v5154_v58 }
 0x2c6   : > { %v2321_v16 = vmax.f32 %v5160_v42, %v2320_v6  ;;  %v2327_v25 = vmax.f32 %v5161_v17, %v2326_v13  ;;  %v5162_v28 = vmov %v5155_v39  ;;  %v2298_v2 = vrot.slane %v2297_v18, 2 }
 0x2c7   : > { %v2333_v47 = vmax.f32 %v5162_v28, %v2332_v4  ;;  %v2304_v23 = vrot.slane %v2303_v3, 2  ;;  %v2310_v14 = vrot.slane %v2309_v38, 2  ;;  %v2316_v0 = vrot.slane %v2315_v60, 2 }
 0x2c8   : > { %v2293_v7 = vmax.f32 %v2291_v54, %v2292_v56  ;;  %v2322_v11 = vrot.slane %v2321_v16, 2  ;;  %v2328_v40 = vrot.slane %v2327_v25, 2  ;;  %v2299_v63 = vmax.f32 %v2297_v18, %v2298_v2 }
 0x2c9   : > { %v2334_v31 = vrot.slane %v2333_v47, 2  ;;  %v2305_v49 = vmax.f32 %v2303_v3, %v2304_v23  ;;  %v2311_v62 = vmax.f32 %v2309_v38, %v2310_v14  ;;  %v2317_v36 = vmax.f32 %v2315_v60, %v2316_v0 }
 0x2ca   : > { %v2294_v32 = vrot.slane %v2293_v7, 1  ;;  %v2323_v35 = vmax.f32 %v2321_v16, %v2322_v11  ;;  %v2329_v10 = vmax.f32 %v2327_v25, %v2328_v40  ;;  %v2300_v8 = vrot.slane %v2299_v63, 1 }
 0x2cb   : > { %v2335_v51 = vmax.f32 %v2333_v47, %v2334_v31  ;;  %v2306_v29 = vrot.slane %v2305_v49, 1  ;;  %v2312_v1 = vrot.slane %v2311_v62, 1  ;;  %v2318_v6 = vrot.slane %v2317_v36, 1 }
 0x2cc   : > { %v4852_v58 = vmax.f32 %v2293_v7, %v2294_v32  ;;  %v2324_v13 = vrot.slane %v2323_v35, 1  ;;  %v2330_v39 = vrot.slane %v2329_v10, 1  ;;  %v4854_v4 = vmax.f32 %v2299_v63, %v2300_v8 }
 0x2cd   : > { %v2336_v54 = vrot.slane %v2335_v51, 1  ;;  %v4856_v59 = vmax.f32 %v2305_v49, %v2306_v29  ;;  %v2313_v18 = vmax.f32 %v2311_v62, %v2312_v1  ;;  %v2319_v26 = vmax.f32 %v2317_v36, %v2318_v6 }
 0x2ce   : > { %v2325_v3 = vmax.f32 %v2323_v35, %v2324_v13  ;;  %v2331_v19 = vmax.f32 %v2329_v10, %v2330_v39  ;;  %v5163_v24 = vmax.f32 %v4701_v55, 0.0  ;;  %v5164_v56 = vmax.f32 %v4704_v44, 0.0 }
 0x2cf   : > { %v2337_v38 = vmax.f32 %v2335_v51, %v2336_v54  ;;  %v5165_v16 = vmax.f32 %v4707_v9, 0.0  ;;  %v5166_v25 = vmax.f32 %v4710_v22, 0.0  ;;  %v5167_v47 = vmax.f32 %v4713_v21, 0.0 }
 0x2d0   : > { %v2338_v60 = vrot.slane %v5163_v24, 4  ;;  %v2344_v42 = vrot.slane %v5164_v56, 4  ;;  %v5168_v23 = vmov %v5163_v24  ;;  %v5169_v0 = vmax.f32 %v4716_v46, 0.0 }
 0x2d1   : > { %v2350_v17 = vrot.slane %v5165_v16, 4  ;;  %v2356_v28 = vrot.slane %v5166_v25, 4  ;;  %v2362_v2 = vrot.slane %v5167_v47, 4  ;;  %v5170_v11 = vmax.f32 %v4719_v57, 0.0 }
 0x2d2   : > { %v2339_v14 = vmax.f32 %v5168_v23, %v2338_v60  ;;  %v2368_v7 = vrot.slane %v5169_v0, 4  ;;  %v5171_v31 = vmax.f32 %v4722_v20, 0.0  ;;  %v5172_v49 = vmov %v5164_v56 }
 0x2d3   : > { %v2374_v40 = vrot.slane %v5170_v11, 4  ;;  %v2345_v62 = vmax.f32 %v5172_v49, %v2344_v42  ;;  %v5173_v36 = vmov %v5165_v16  ;;  %v5174_v35 = vmov %v5166_v25 }
 0x2d4   : > { %v2380_v63 = vrot.slane %v5171_v31, 4  ;;  %v2351_v32 = vmax.f32 %v5173_v36, %v2350_v17  ;;  %v2357_v10 = vmax.f32 %v5174_v35, %v2356_v28  ;;  %v5175_v55 = vmov %v5167_v47 }
 0x2d5   : > { %v2363_v51 = vmax.f32 %v5175_v55, %v2362_v2  ;;  %v2340_v8 = vrot.slane %v2339_v14, 2  ;;  %v5176_v29 = vmov %v5169_v0  ;;  %v5177_v6 = vmov %v5170_v11 }
 0x2d6   : > { %v2369_v1 = vmax.f32 %v5176_v29, %v2368_v7  ;;  %v2375_v13 = vmax.f32 %v5177_v6, %v2374_v40  ;;  %v5178_v39 = vmov %v5171_v31  ;;  %v2346_v54 = vrot.slane %v2345_v62, 2 }
 0x2d7   : > { %v2381_v44 = vmax.f32 %v5178_v39, %v2380_v63  ;;  %v2352_v24 = vrot.slane %v2351_v32, 2  ;;  %v2358_v9 = vrot.slane %v2357_v10, 2  ;;  %v2364_v60 = vrot.slane %v2363_v51, 2 }
 0x2d8   : > { %v2341_v56 = vmax.f32 %v2339_v14, %v2340_v8  ;;  %v2370_v22 = vrot.slane %v2369_v1, 2  ;;  %v2376_v42 = vrot.slane %v2375_v13, 2  ;;  %v2347_v21 = vmax.f32 %v2345_v62, %v2346_v54 }
 0x2d9   : > { %v2382_v16 = vrot.slane %v2381_v44, 2  ;;  %v2353_v17 = vmax.f32 %v2351_v32, %v2352_v24  ;;  %v2359_v25 = vmax.f32 %v2357_v10, %v2358_v9  ;;  %v2365_v28 = vmax.f32 %v2363_v51, %v2364_v60 }
 0x2da   : > { %v2342_v46 = vrot.slane %v2341_v56, 1  ;;  %v2371_v47 = vmax.f32 %v2369_v1, %v2370_v22  ;;  %v2377_v2 = vmax.f32 %v2375_v13, %v2376_v42  ;;  %v2348_v23 = vrot.slane %v2347_v21, 1 }
 0x2db   : > { %v2383_v57 = vmax.f32 %v2381_v44, %v2382_v16  ;;  %v2354_v0 = vrot.slane %v2353_v17, 1  ;;  %v2360_v20 = vrot.slane %v2359_v25, 1  ;;  %v2366_v7 = vrot.slane %v2365_v28, 1 }
 0x2dc   : > { %v2343_v11 = vmax.f32 %v2341_v56, %v2342_v46  ;;  %v2372_v40 = vrot.slane %v2371_v47, 1  ;;  %v2378_v31 = vrot.slane %v2377_v2, 1  ;;  %v2349_v14 = vmax.f32 %v2347_v21, %v2348_v23 }
 0x2dd   : > { %v2384_v63 = vrot.slane %v2383_v57, 1  ;;  %v2355_v49 = vmax.f32 %v2353_v17, %v2354_v0  ;;  %v2361_v36 = vmax.f32 %v2359_v25, %v2360_v20  ;;  %v2367_v35 = vmax.f32 %v2365_v28, %v2366_v7 }
 0x2de   : > { %v2373_v62 = vmax.f32 %v2371_v47, %v2372_v40  ;;  %v2379_v32 = vmax.f32 %v2377_v2, %v2378_v31  ;;  %v2402_v55 = vpack.c.bf16 %v4758_v5, %v4756_v43  ;;  %v2403_v51 = vpack.c.bf16 %v4762_v37, %v4760_v34 }
 0x2df   : > { %v2385_v10 = vmax.f32 %v2383_v57, %v2384_v63  ;;  %v2404_v8 = vpack.c.bf16 %v4766_v52, %v4764_v33  ;;  %v2405_v29 = vpack.c.bf16 %v4770_v12, %v4768_v61  ;;  %v2406_v1 = vpack.c.bf16 %v4806_v27, %v4804_v48 }
 0x2e0   : > { %v2407_v6 = vpack.c.bf16 %v4810_v53, %v4808_v15  ;;  %v2408_v13 = vpack.c.bf16 %v4814_v30, %v4812_v45  ;;  %v2409_v43 = vpack.c.bf16 %v4818_v50, %v4816_v41  ;;  %v2410_v5 = vpack.c.bf16 %v4854_v4, %v4852_v58 }
 0x2e1   : > { %v2411_v34 = vpack.c.bf16 %v2313_v18, %v4856_v59  ;;  %v2412_v37 = vpack.c.bf16 %v2325_v3, %v2319_v26  ;;  %v2413_v33 = vpack.c.bf16 %v2337_v38, %v2331_v19  ;;  %v2414_v52 = vpack.c.bf16 %v2349_v14, %v2343_v11 }
 0x2e2   : > { %v2415_v61 = vpack.c.bf16 %v2361_v36, %v2355_v49  ;;  %v2416_v12 = vpack.c.bf16 %v2373_v62, %v2367_v35  ;;  %v2417_v48 = vpack.c.bf16 %v2385_v10, %v2379_v32  ;;  %v2482_v27 = vunpack.c.l.b16 %v2402_v55 }
 0x2e3   : > { %v2483_v39 = vunpack.c.h.b16 %v2402_v55  ;;  %v2484_v15 = vunpack.c.l.b16 %v2403_v51  ;;  %v2485_v53 = vunpack.c.h.b16 %v2403_v51  ;;  %v2486_v44 = vunpack.c.l.b16 %v2404_v8 }
 0x2e4   : > { %v2487_v45 = vunpack.c.h.b16 %v2404_v8  ;;  %v2488_v30 = vunpack.c.l.b16 %v2405_v29  ;;  %v2489_v54 = vunpack.c.h.b16 %v2405_v29  ;;  %v2490_v41 = vunpack.c.l.b16 %v2406_v1 }
 0x2e5   : > { %v2491_v50 = vunpack.c.h.b16 %v2406_v1  ;;  %v2492_v24 = vunpack.c.l.b16 %v2407_v6  ;;  %v2493_v58 = vunpack.c.h.b16 %v2407_v6  ;;  %v2494_v4 = vunpack.c.l.b16 %v2408_v13 }
 0x2e6   : > { %v2495_v59 = vunpack.c.h.b16 %v2408_v13  ;;  %v2496_v18 = vunpack.c.l.b16 %v2409_v43  ;;  %v2497_v26 = vunpack.c.h.b16 %v2409_v43  ;;  %v2498_v3 = vunpack.c.l.b16 %v2410_v5 }
 0x2e7   : > { %v2499_v19 = vunpack.c.h.b16 %v2410_v5  ;;  %v2500_v38 = vunpack.c.l.b16 %v2411_v34  ;;  %v2501_v9 = vunpack.c.h.b16 %v2411_v34  ;;  %v2502_v60 = vunpack.c.l.b16 %v2412_v37 }
 0x2e8   : > { %v2503_v56 = vunpack.c.h.b16 %v2412_v37  ;;  %v2504_v22 = vunpack.c.l.b16 %v2413_v33  ;;  %v2505_v42 = vunpack.c.h.b16 %v2413_v33  ;;  %v2506_v16 = vunpack.c.l.b16 %v2414_v52 }
 0x2e9   : > { %v2507_v21 = vunpack.c.h.b16 %v2414_v52  ;;  %v2508_v17 = vunpack.c.l.b16 %v2415_v61  ;;  %v2509_v25 = vunpack.c.h.b16 %v2415_v61  ;;  %v2510_v28 = vunpack.c.l.b16 %v2416_v12 }
 0x2ea   : > { %v2511_v46 = vunpack.c.h.b16 %v2416_v12  ;;  %v2512_v47 = vunpack.c.l.b16 %v2417_v48  ;;  %v2513_v2 = vunpack.c.h.b16 %v2417_v48  ;;  %v2543_v57 = vsel %vm1674_vm4, %v2486_v44, %v2482_v27 }
 0x2eb   : > { %v2544_v23 = vsel %vm1670_vm3, %v2490_v41, %v2543_v57  ;;  %v2550_v0 = vsel %vm1674_vm4, %v2487_v45, %v2483_v39  ;;  %v2557_v20 = vsel %vm1674_vm4, %v2488_v30, %v2484_v15  ;;  %v2564_v7 = vsel %vm1674_vm4, %v2489_v54, %v2485_v53 }
 0x2ec   : > { %v2545_v11 = vsel %vm1676_vm5, %v2494_v4, %v2544_v23  ;;  %v2551_v40 = vsel %vm1670_vm3, %v2491_v50, %v2550_v0  ;;  %v2558_v31 = vsel %vm1670_vm3, %v2492_v24, %v2557_v20  ;;  %v2565_v63 = vsel %vm1670_vm3, %v2493_v58, %v2564_v7 }
 0x2ed   : > { %v2546_v14 = vsel %vm1682_vm6, %v2498_v3, %v2545_v11  ;;  %v2552_v49 = vsel %vm1676_vm5, %v2495_v59, %v2551_v40  ;;  %v2559_v36 = vsel %vm1676_vm5, %v2496_v18, %v2558_v31  ;;  %v2566_v35 = vsel %vm1676_vm5, %v2497_v26, %v2565_v63 }
 0x2ee   : > { %v2547_v62 = vsel %vm1688_vm7, %v2502_v60, %v2546_v14  ;;  %v2553_v32 = vsel %vm1682_vm6, %v2499_v19, %v2552_v49  ;;  %v2560_v10 = vsel %vm1682_vm6, %v2500_v38, %v2559_v36  ;;  %v2567_v55 = vsel %vm1682_vm6, %v2501_v9, %v2566_v35 }
 0x2ef   : > { %v2548_v51 = vsel %vm1694_vm8, %v2506_v16, %v2547_v62  ;;  %v2554_v8 = vsel %vm1688_vm7, %v2503_v56, %v2553_v32  ;;  %v2561_v29 = vsel %vm1688_vm7, %v2504_v22, %v2560_v10  ;;  %v2568_v1 = vsel %vm1688_vm7, %v2505_v42, %v2567_v55 }
 0x2f0   : > { %v2549_v6 = vsel %vm2520_vm1, %v2510_v28, %v2548_v51  ;;  %v2555_v13 = vsel %vm1694_vm8, %v2507_v21, %v2554_v8  ;;  %v2562_v43 = vsel %vm1694_vm8, %v2508_v17, %v2561_v29  ;;  %v2569_v5 = vsel %vm1694_vm8, %v2509_v25, %v2568_v1 }
 0x2f1   : > { %v2556_v34 = vsel %vm2520_vm1, %v2511_v46, %v2555_v13  ;;  %v2563_v37 = vsel %vm2520_vm1, %v2512_v47, %v2562_v43  ;;  %v2570_v33 = vsel %vm2520_vm1, %v2513_v2, %v2569_v5 }
 0x2f2   : > { %v2573_v52 = vpack.c.b16 %v2556_v34, %v2549_v6  ;;  %v2574_v61 = vpack.c.b16 %v2570_v33, %v2563_v37 }
 0x2f4   : > { %2581 = vst [vmem:[%s4574_s15 + $0x10] sm:$0xff] %v2573_v52 }
 0x2f5   : > { %2582 = vst [vmem:[%s4574_s15 + $0x18] sm:$0xff] %v2574_v61 }
 0x2f6 PF: > { %s16_s21 = sadd.s32 1, %s3178_s21  }
 0x2f7   : > { %p13_p5 = scmp.ge.s32.totalorder %s16_s21, 4  }
 0x2f9   :  { %15 = sbr.rel (!%p13_p5) target bundleno = 1 (0x1), region = 82 }

// kernel: rscnn_forward.7
= control target key start
LH: loop header
LB: loop body
LE: loop exit
PB: predicated region body
PF: predicated region fallthrough
CT: control target
= control target key end

     0   :  { %s9076_s30 = smov 0   ;;  %s13329_s0 = inlined_call_operand.vmem [shape: f32[2,16,3], index: 0, kind: input, shape index: {}]   ;;  %s13330_s1 = inlined_call_operand.vmem [shape: bf16[2,16,512], index: 1, kind: input, shape index: {}]   ;;  %s13331_s2 = inlined_call_operand.vmem [shape: f32[3,1024], index: 2, kind: input, shape index: {}]   ;;  %s13332_s3 = inlined_call_operand.vmem [shape: bf16[512,1024], index: 3, kind: input, shape index: {}]   ;;  %s13333_s4 = inlined_call_operand.vmem [shape: f32[1,1024], index: 4, kind: input, shape index: {}]   ;;  %s13334_s5 = inlined_call_operand.vmem [shape: bf16[1024,512], index: 5, kind: input, shape index: {}]   ;;  %s13335_s6 = inlined_call_operand.vmem [shape: f32[1,512], index: 6, kind: input, shape index: {}]   ;;  %s13336_s7 = inlined_call_operand.vmem [shape: bf16[512,512], index: 7, kind: input, shape index: {}]   ;;  %s13337_s8 = inlined_call_operand.vmem [shape: f32[1,512], index: 8, kind: input, shape index: {}]   ;;  %s13338_s9 = inlined_call_operand.vmem [shape: f32[2,1,512], index: 9, kind: output, shape index: {}]  }
   0x1 LB: > { %s5750_s10 = sadd.s32 4294967295, %s9024_s30   ;;  %p5754_p0 = scmp.ge.s32.totalorder %s9024_s30, 1  ;;  %s9024_s30 = sphi %s9076_s30, %s19_s30  }
   0x2   : > { %p297_p1 = scmp.lt.s32.totalorder %s9024_s30, 3 }
   0x4   : > { %p298_p2 = pnand %p5754_p0, %p297_p1 }
   0x5   : > { %p337_p3 = scmp.lt.s32.totalorder (!%p298_p2), %s5750_s10, 1 }
   0x6   : > { %301 = sbr.rel (%p298_p2) target bundleno = 994 (0x3e2), region = 56 }
   0xb   : > { %v613_v0 = vld [vmem:[%s13331_s2] sm:$0x77]  ;;  %v614_v1 = vld [vmem:[%s13331_s2 + $0x8] sm:$0x77]  ;;  %v615_v2 = vld [vmem:[%s13331_s2 + $0x10] sm:$0x77] }
   0xc   : > { %621 = vst [vmem:[#allocation1] ss:$2 sm:$0xff] %v613_v0  ;;  %s13340_s10 = smov (!%p337_p3, %s5750_s10), 1  ;;  %v616_v3 = vld [vmem:[%s13331_s2 + $0x18] sm:$0x77]  ;;  %vm643_vm0 = vcmask 1042432  }
   0xd   : > { %623 = vst [vmem:[#allocation1 + $0x10] ss:$2 sm:$0xff] %v614_v1  ;;  %s8362_s19 = sshll.u32 %s13340_s10, 4  ;;  %v6026_v4 = vld [vmem:[%s13332_s3 + $0x1c0] sm:$0xf]  ;;  %vm636_vm1 = vcmask 23552  }
   0xe   : > { %625 = vst [vmem:[#allocation1 + $0x20] ss:$2 sm:$0xff] %v615_v2  ;;  %s9102_s22 = scalar_lea.vmem %s13329_s0, %s8362_s19  ;;  %v8428_v5 = vld [vmem:[%s13332_s3 + $0x1dc] sm:$0xf0]  ;;  %s8363_s26 = sshll.u32 %s13340_s10, 5  ;;  %vm5673_vm2 = vcmask 1040384  }
   0xf   : > { %627 = vst [vmem:[#allocation1 + $0x30] ss:$2 sm:$0xff] %v616_v3  ;;  %v6282_v6 = vld [vmem:[%s13332_s3 + $0x3c0] sm:$0xf]  ;;  %v6027_v23 = vor.u32 %v8428_v5, %v6026_v4  ;;  %v9196_v45 = vld [vmem:[%s9102_s22 + $0x8] sm:$0xff]  ;;  %s9326_s16 = scalar_lea.vmem %s13330_s1, %s8363_s26  ;;  %s5759_s17 = sshll.u32 %s13340_s10, 2 }
  0x10   : > { %v8492_v7 = vld [vmem:[%s13332_s3 + $0x3dc] sm:$0xf0]  ;;  %vm5675_vm3 = vcmask 1042434   ;;  %vm5677_vm4 = vcmask 1041408   ;;  %s350_s20 = scalar_lea.vmem %s13338_s9, %s5759_s17 }
  0x11   : > { %v9117_v8 = vld [vmem:[%s9102_s22] sm:$0xff]  ;;  %v6283_v24 = vor.u32 %v8492_v7, %v6282_v6 }
  0x12   : > { %v6538_v9 = vld [vmem:[%s13332_s3 + $0x5c0] sm:$0xf] }
  0x13   : > { %v8556_v10 = vld [vmem:[%s13332_s3 + $0x5dc] sm:$0xf0]  ;;  %v629_v14 = vld.sshfl [vmem:[#allocation1 + $0x8] sm:$0xff pattern:$0x75316420] }
  0x14   : > { %v6794_v11 = vld [vmem:[%s13332_s3 + $0x7c0] sm:$0xf]  ;;  %5763 = vmatpush.msk.msra.mxu1 %vm643_vm0, %v629_v14  ;;  %v630_v15 = vld.sshfl [vmem:[#allocation1 + $0x10] sm:$0xff pattern:$0x75316420]  ;;  %v6539_v25 = vor.u32 %v8556_v10, %v6538_v9 }
  0x15   : > { %v8620_v12 = vld [vmem:[%s13332_s3 + $0x7dc] sm:$0xf0]  ;;  %v631_v16 = vld.sshfl [vmem:[#allocation1 + $0x18] sm:$0xff pattern:$0x75316420]  ;;  %5766 = vmatpush.msk.msra.mxu2 %vm643_vm0, %v630_v15  ;;  %5764 = vmatmul.msk.f32.vlgmr.msra.gmra.mxu1 %vm636_vm1, %v9117_v8 }
  0x16   : > { %v628_v13 = vld.sshfl [vmem:[#allocation1] sm:$0xff pattern:$0x75316420]  ;;  %5769 = vmatpush.msk.msra.mxu3 %vm643_vm0, %v631_v16  ;;  %v633_v18 = vld.sshfl [vmem:[#allocation1 + $0x28] sm:$0xff pattern:$0x75316420]  ;;  %5767 = vmatmul.msk.f32.vlgmr.msra.gmra.mxu2 %vm636_vm1, %v9117_v8  ;;  %v6795_v26 = vor.u32 %v8620_v12, %v6794_v11 }
  0x17   : > { %5760 = vmatpush.msk.msra.mxu0 %vm643_vm0, %v628_v13  ;;  %v632_v17 = vld.sshfl [vmem:[#allocation1 + $0x20] sm:$0xff pattern:$0x75316420]  ;;  %v634_v21 = vld.sshfl [vmem:[#allocation1 + $0x30] sm:$0xff pattern:$0x75316420]  ;;  %5775 = vmatpush.msk.msrb.mxu1 %vm643_vm0, %v633_v18 }
  0x18   : > { %v5994_v19 = vld [vmem:[%s13332_s3 + $0x180] sm:$0xf]  ;;  %5761 = vmatmul.msk.f32.vlgmr.msra.gmra.mxu0 %vm636_vm1, %v9117_v8  ;;  %v635_v22 = vld.sshfl [vmem:[#allocation1 + $0x38] sm:$0xff pattern:$0x75316420]  ;;  %5778 = vmatpush.msk.msrb.mxu2 %vm643_vm0, %v634_v21 }
  0x19   : > { %v8420_v20 = vld [vmem:[%s13332_s3 + $0x19c] sm:$0xf0]  ;;  %5772 = vmatpush.msk.msrb.mxu0 %vm643_vm0, %v632_v17  ;;  %5781 = vmatpush.msk.msrb.mxu3 %vm643_vm0, %v635_v22 }
  0x1a   : > { %v6250_v27 = vld [vmem:[%s13332_s3 + $0x380] sm:$0xf]  ;;  %5770 = vmatmul.msk.f32.vlgmr.msra.gmra.mxu3 %vm636_vm1, %v9117_v8  ;;  %2158 = vmatpush.bf16.msra.mxu1 %v6283_v24  ;;  %v5995_v33 = vor.u32 %v8420_v20, %v5994_v19 }
  0x1b   : > { %v8484_v28 = vld [vmem:[%s13332_s3 + $0x39c] sm:$0xf0]  ;;  %2144 = vmatpush.bf16.msra.mxu0 %v6027_v23  ;;  %2172 = vmatpush.bf16.msra.mxu2 %v6539_v25 }
  0x1c   : > { %v6506_v29 = vld [vmem:[%s13332_s3 + $0x580] sm:$0xf]  ;;  %v6251_v34 = vor.u32 %v8484_v28, %v6250_v27  ;;  %2186 = vmatpush.bf16.msra.mxu3 %v6795_v26 }
  0x1d   : > { %v8548_v30 = vld [vmem:[%s13332_s3 + $0x59c] sm:$0xf0]  ;;  %5765 = vmatmul.msk.f32.gmra.mxu1 %vm636_vm1, %v9196_v45 }
  0x1e   : > { %v6762_v31 = vld [vmem:[%s13332_s3 + $0x780] sm:$0xf]  ;;  %v6507_v37 = vor.u32 %v8548_v30, %v6506_v29  ;;  %2159 = vmatpush.bf16.msra.mxu1 %v6251_v34  ;;  %5768 = vmatmul.msk.f32.gmra.mxu2 %vm636_vm1, %v9196_v45 }
  0x1f   : > { %v8612_v32 = vld [vmem:[%s13332_s3 + $0x79c] sm:$0xf0]  ;;  %2145 = vmatpush.bf16.msra.mxu0 %v5995_v33 }
  0x20   : > { %v5962_v35 = vld [vmem:[%s13332_s3 + $0x140] sm:$0xf]  ;;  %v6763_v38 = vor.u32 %v8612_v32, %v6762_v31  ;;  %2173 = vmatpush.bf16.msra.mxu2 %v6507_v37  ;;  %5762 = vmatmul.msk.f32.gmra.mxu0 %vm636_vm1, %v9196_v45 }
  0x21   : > { %v8412_v36 = vld [vmem:[%s13332_s3 + $0x15c] sm:$0xf0] }
  0x22   : > { %v6218_v39 = vld [vmem:[%s13332_s3 + $0x340] sm:$0xf]  ;;  %v5963_v46 = vor.u32 %v8412_v36, %v5962_v35  ;;  %2187 = vmatpush.bf16.msra.mxu3 %v6763_v38 }
  0x23   : > { %v8476_v40 = vld [vmem:[%s13332_s3 + $0x35c] sm:$0xf0]  ;;  %5771 = vmatmul.msk.f32.gmra.mxu3 %vm636_vm1, %v9196_v45 }
  0x24   : > { %v6474_v41 = vld [vmem:[%s13332_s3 + $0x540] sm:$0xf]  ;;  %v6219_v47 = vor.u32 %v8476_v40, %v6218_v39  ;;  %2146 = vmatpush.bf16.msra.mxu0 %v5963_v46  ;;  %v6284_v46 = vld [vmem:[%s13332_s3 + $0x3e0] sm:$0xf0] }
  0x25   : > { %v8540_v42 = vld [vmem:[%s13332_s3 + $0x55c] sm:$0xf0]  ;;  %5776 = vmatmul.msk.f32.vlgmr.msrb.gmra.mxu1 %vm636_vm1, %v9117_v8 }
  0x26   : > { %v6730_v43 = vld [vmem:[%s13332_s3 + $0x740] sm:$0xf]  ;;  %v6475_v50 = vor.u32 %v8540_v42, %v6474_v41  ;;  %2160 = vmatpush.bf16.msra.mxu1 %v6219_v47  ;;  %5779 = vmatmul.msk.f32.vlgmr.msrb.gmra.mxu2 %vm636_vm1, %v9117_v8  ;;  %v8424_v42 = vld [vmem:[%s13332_s3 + $0x1c4] sm:$0xf] }
  0x27   : > { %v8604_v44 = vld [vmem:[%s13332_s3 + $0x75c] sm:$0xf0]  ;;  %v8552_v47 = vld [vmem:[%s13332_s3 + $0x5c4] sm:$0xf] }
  0x28   : > { %v5930_v48 = vld [vmem:[%s13332_s3 + $0x100] sm:$0xf]  ;;  %v6731_v51 = vor.u32 %v8604_v44, %v6730_v43  ;;  %2174 = vmatpush.bf16.msra.mxu2 %v6475_v50  ;;  %5773 = vmatmul.msk.f32.vlgmr.msrb.gmra.mxu0 %vm636_vm1, %v9117_v8  ;;  %v6028_v43 = vld [vmem:[%s13332_s3 + $0x1e0] sm:$0xf0] }
  0x29   : > { %v8404_v49 = vld [vmem:[%s13332_s3 + $0x11c] sm:$0xf0]  ;;  %v8488_v44 = vld [vmem:[%s13332_s3 + $0x3c4] sm:$0xf] }
  0x2a   : > { %v6186_v52 = vld [vmem:[%s13332_s3 + $0x300] sm:$0xf]  ;;  %v5931_v58 = vor.u32 %v8404_v49, %v5930_v48  ;;  %2188 = vmatpush.bf16.msra.mxu3 %v6731_v51  ;;  %v6540_v48 = vld [vmem:[%s13332_s3 + $0x5e0] sm:$0xf0] }
  0x2b   : > { %v8468_v53 = vld [vmem:[%s13332_s3 + $0x31c] sm:$0xf0]  ;;  %5782 = vmatmul.msk.f32.vlgmr.msrb.gmra.mxu3 %vm636_vm1, %v9117_v8  ;;  %v8616_v49 = vld [vmem:[%s13332_s3 + $0x7c4] sm:$0xf] }
  0x2c   : > { %v6442_v54 = vld [vmem:[%s13332_s3 + $0x500] sm:$0xf]  ;;  %v6187_v59 = vor.u32 %v8468_v53, %v6186_v52  ;;  %2147 = vmatpush.bf16.msra.mxu0 %v5931_v58  ;;  %v6796_v50 = vld [vmem:[%s13332_s3 + $0x7e0] sm:$0xf0] }
  0x2d   : > { %v8532_v55 = vld [vmem:[%s13332_s3 + $0x51c] sm:$0xf0]  ;;  %5777 = vmatmul.msk.f32.gmra.mxu1 %vm636_vm1, %v9196_v45  ;;  %v8364_v58 = vld [vmem:[%s9326_s16 + $0x4] sm:$0xf] }
  0x2e   : > { %v6698_v56 = vld [vmem:[%s13332_s3 + $0x700] sm:$0xf]  ;;  %v6443_v62 = vor.u32 %v8532_v55, %v6442_v54  ;;  %2161 = vmatpush.bf16.msra.mxu1 %v6187_v59  ;;  %5780 = vmatmul.msk.f32.gmra.mxu2 %vm636_vm1, %v9196_v45  ;;  %v8366_v54 = vld [vmem:[%s9326_s16 + $0xc] sm:$0xf0]  ;;  %v5794_v55 = vld [vmem:[%s9326_s16 + $0x8] sm:$0xf] }
  0x2f   : > { %v8596_v57 = vld [vmem:[%s13332_s3 + $0x71c] sm:$0xf0]  ;;  %v5788_v59 = vld [vmem:[%s9326_s16 + $0x10] sm:$0xf0] }
  0x30   : > { %v5898_v60 = vld [vmem:[%s13332_s3 + $0xc0] sm:$0xf]  ;;  %v6699_v63 = vor.u32 %v8596_v57, %v6698_v56  ;;  %2175 = vmatpush.bf16.msra.mxu2 %v6443_v62  ;;  %5774 = vmatmul.msk.f32.gmra.mxu0 %vm636_vm1, %v9196_v45  ;;  %v8367_v56 = vld [vmem:[%s9326_s16 + $0x14] sm:$0xf0]  ;;  %v6287_v62 = vor.u32 %v8488_v44, %v6284_v46  ;;  %v8456_v44 = vld [vmem:[%s13332_s3 + $0x2c4] sm:$0xf] }
  0x31   : > { %v8396_v61 = vld [vmem:[%s13332_s3 + $0xdc] sm:$0xf0]  ;;  %v6156_v46 = vld [vmem:[%s13332_s3 + $0x2e0] sm:$0xf0] }
  0x32   : > { %v6154_v0 = vld [vmem:[%s13332_s3 + $0x2c0] sm:$0xf]  ;;  %v5899_v6 = vor.u32 %v8396_v61, %v5898_v60  ;;  %2189 = vmatpush.bf16.msra.mxu3 %v6699_v63  ;;  %v8365_v60 = vld [vmem:[%s9326_s16 + $0xc] sm:$0xf]  ;;  %v6031_v61 = vor.u32 %v8424_v42, %v6028_v43  ;;  %v5796_v63 = vld [vmem:[%s9326_s16 + $0x18] sm:$0xf0] }
  0x33   : > { %v8460_v1 = vld [vmem:[%s13332_s3 + $0x2dc] sm:$0xf0]  ;;  %5783 = vmatmul.msk.f32.gmra.mxu3 %vm636_vm1, %v9196_v45 }
  0x34   : > { %v6410_v2 = vld [vmem:[%s13332_s3 + $0x4c0] sm:$0xf]  ;;  %v6155_v7 = vor.u32 %v8460_v1, %v6154_v0  ;;  %2148 = vmatpush.bf16.msra.mxu0 %v5899_v6  ;;  %v8416_v0 = vld [vmem:[%s13332_s3 + $0x184] sm:$0xf] }
  0x35   : > { %v8524_v3 = vld [vmem:[%s13332_s3 + $0x4dc] sm:$0xf0]  ;;  %v5996_v1 = vld [vmem:[%s13332_s3 + $0x1a0] sm:$0xf0] }
  0x36   : > { %v6666_v4 = vld [vmem:[%s13332_s3 + $0x6c0] sm:$0xf]  ;;  %v6411_v11 = vor.u32 %v8524_v3, %v6410_v2  ;;  %2162 = vmatpush.bf16.msra.mxu1 %v6155_v7  ;;  %v6543_v2 = vor.u32 %v8552_v47, %v6540_v48  ;;  %v6799_v3 = vor.u32 %v8616_v49, %v6796_v50  ;;  %v8544_v6 = vld [vmem:[%s13332_s3 + $0x584] sm:$0xf] }
  0x37   : > { %v8588_v5 = vld [vmem:[%s13332_s3 + $0x6dc] sm:$0xf0]  ;;  %v8520_v47 = vld [vmem:[%s13332_s3 + $0x4c4] sm:$0xf] }
  0x38   : > { %v5866_v9 = vld [vmem:[%s13332_s3 + $0x80] sm:$0xf]  ;;  %v6667_v12 = vor.u32 %v8588_v5, %v6666_v4  ;;  %2176 = vmatpush.bf16.msra.mxu2 %v6411_v11  ;;  %v8480_v4 = vld [vmem:[%s13332_s3 + $0x384] sm:$0xf] }
  0x39   : > { %v8388_v10 = vld [vmem:[%s13332_s3 + $0x9c] sm:$0xf0]  ;;  %v6252_v5 = vld [vmem:[%s13332_s3 + $0x3a0] sm:$0xf0] }
  0x3a   : > { %v6122_v13 = vld [vmem:[%s13332_s3 + $0x280] sm:$0xf]  ;;  %v5867_v19 = vor.u32 %v8388_v10, %v5866_v9  ;;  %2190 = vmatpush.bf16.msra.mxu3 %v6667_v12  ;;  %v9397_v9 = vor.u32 %v8367_v56, %v5794_v55  ;;  %v6508_v10 = vld [vmem:[%s13332_s3 + $0x5a0] sm:$0xf0] }
  0x3b   : > { %v8452_v14 = vld [vmem:[%s13332_s3 + $0x29c] sm:$0xf0]  ;;  %v8608_v11 = vld [vmem:[%s13332_s3 + $0x784] sm:$0xf] }
  0x3c   : > { %v6378_v15 = vld [vmem:[%s13332_s3 + $0x480] sm:$0xf]  ;;  %v6123_v20 = vor.u32 %v8452_v14, %v6122_v13  ;;  %2149 = vmatpush.bf16.msra.mxu0 %v5867_v19  ;;  %v6764_v12 = vld [vmem:[%s13332_s3 + $0x7a0] sm:$0xf0]  ;;  %v9408_v13 = vor.u32 %v8364_v58, %v5788_v59  ;;  %v9410_v14 = vor.u32 %v8365_v60, %v5796_v63  ;;  %v6511_v19 = vor.u32 %v8544_v6, %v6508_v10 }
  0x3d   : > { %v8516_v16 = vld [vmem:[%s13332_s3 + $0x49c] sm:$0xf0]  ;;  %v6412_v48 = vld [vmem:[%s13332_s3 + $0x4e0] sm:$0xf0] }
  0x3e   : > { %v6634_v17 = vld [vmem:[%s13332_s3 + $0x680] sm:$0xf]  ;;  %v6379_v23 = vor.u32 %v8516_v16, %v6378_v15  ;;  %2163 = vmatpush.bf16.msra.mxu1 %v6123_v20  ;;  %v5999_v15 = vor.u32 %v8416_v0, %v5996_v1  ;;  %v6255_v16 = vor.u32 %v8480_v4, %v6252_v5  ;;  %v6767_v20 = vor.u32 %v8608_v11, %v6764_v12  ;;  %v8584_v49 = vld [vmem:[%s13332_s3 + $0x6c4] sm:$0xf] }
  0x3f   : > { %v8580_v18 = vld [vmem:[%s13332_s3 + $0x69c] sm:$0xf0]  ;;  %v6668_v50 = vld [vmem:[%s13332_s3 + $0x6e0] sm:$0xf0]  ;;  %v6415_v55 = vor.u32 %v8520_v47, %v6412_v48  ;;  %v6514_v47 = vld [vmem:[%s13332_s3 + $0x588] sm:$0xf] }
  0x40   : > { %v5834_v21 = vld [vmem:[%s13332_s3 + $0x40] sm:$0xf]  ;;  %v6635_v24 = vor.u32 %v8580_v18, %v6634_v17  ;;  %2177 = vmatpush.bf16.msra.mxu2 %v6379_v23  ;;  %v8408_v17 = vld [vmem:[%s13332_s3 + $0x144] sm:$0xf]  ;;  %v6671_v56 = vor.u32 %v8584_v49, %v6668_v50  ;;  %v8549_v48 = vld [vmem:[%s13332_s3 + $0x5a4] sm:$0xf0] }
  0x41   : > { %v8380_v22 = vld [vmem:[%s13332_s3 + $0x5c] sm:$0xf0]  ;;  %v5964_v18 = vld [vmem:[%s13332_s3 + $0x160] sm:$0xf0]  ;;  %v6770_v49 = vld [vmem:[%s13332_s3 + $0x788] sm:$0xf] }
  0x42   : > { %v6090_v8 = vld [vmem:[%s13332_s3 + $0x240] sm:$0xf]  ;;  %v5835_v34 = vor.u32 %v8380_v22, %v5834_v21  ;;  %2191 = vmatpush.bf16.msra.mxu3 %v6635_v24  ;;  %v8472_v21 = vld [vmem:[%s13332_s3 + $0x344] sm:$0xf]  ;;  %v8613_v50 = vld [vmem:[%s13332_s3 + $0x7a4] sm:$0xf0] }
  0x43   : > { %v8444_v25 = vld [vmem:[%s13332_s3 + $0x25c] sm:$0xf0]  ;;  %v6220_v22 = vld [vmem:[%s13332_s3 + $0x360] sm:$0xf0] }
  0x44   : > { %v6346_v26 = vld [vmem:[%s13332_s3 + $0x440] sm:$0xf]  ;;  %v6091_v35 = vor.u32 %v8444_v25, %v6090_v8  ;;  %2150 = vmatpush.bf16.msra.mxu0 %v5835_v34  ;;  %v8536_v23 = vld [vmem:[%s13332_s3 + $0x544] sm:$0xf] }
  0x45   : > { %v8508_v27 = vld [vmem:[%s13332_s3 + $0x45c] sm:$0xf0]  ;;  %v6476_v24 = vld [vmem:[%s13332_s3 + $0x560] sm:$0xf0] }
  0x46   : > { %v6602_v28 = vld [vmem:[%s13332_s3 + $0x640] sm:$0xf]  ;;  %v6347_v40 = vor.u32 %v8508_v27, %v6346_v26  ;;  %2164 = vmatpush.bf16.msra.mxu1 %v6091_v35  ;;  %v8600_v8 = vld [vmem:[%s13332_s3 + $0x744] sm:$0xf]  ;;  %v5967_v26 = vor.u32 %v8408_v17, %v5964_v18  ;;  %v6223_v27 = vor.u32 %v8472_v21, %v6220_v22 }
  0x47   : > { %v8572_v29 = vld [vmem:[%s13332_s3 + $0x65c] sm:$0xf0]  ;;  %v6732_v25 = vld [vmem:[%s13332_s3 + $0x760] sm:$0xf0] }
  0x48   : > { %v5802_v30 = vld [vmem:[%s13332_s3] sm:$0xf]  ;;  %v6603_v41 = vor.u32 %v8572_v29, %v6602_v28  ;;  %2178 = vmatpush.bf16.msra.mxu2 %v6347_v40  ;;  %v8400_v28 = vld [vmem:[%s13332_s3 + $0x104] sm:$0xf] }
  0x49   : > { %v8372_v31 = vld [vmem:[%s13332_s3 + $0x1c] sm:$0xf0]  ;;  %v5932_v29 = vld [vmem:[%s13332_s3 + $0x120] sm:$0xf0] }
  0x4a   : > { %v6058_v32 = vld [vmem:[%s13332_s3 + $0x200] sm:$0xf]  ;;  %v5803_v52 = vor.u32 %v8372_v31, %v5802_v30  ;;  %2192 = vmatpush.bf16.msra.mxu3 %v6603_v41  ;;  %v6479_v30 = vor.u32 %v8536_v23, %v6476_v24  ;;  %v6735_v31 = vor.u32 %v8600_v8, %v6732_v25  ;;  %v8528_v34 = vld [vmem:[%s13332_s3 + $0x504] sm:$0xf] }
  0x4b   : > { %v8436_v33 = vld [vmem:[%s13332_s3 + $0x21c] sm:$0xf0]  ;;  %v6444_v35 = vld [vmem:[%s13332_s3 + $0x520] sm:$0xf0] }
  0x4c   : > { %v6314_v36 = vld [vmem:[%s13332_s3 + $0x400] sm:$0xf]  ;;  %v6059_v53 = vor.u32 %v8436_v33, %v6058_v32  ;;  %2151 = vmatpush.bf16.msra.mxu0 %v5803_v52  ;;  %v8464_v32 = vld [vmem:[%s13332_s3 + $0x304] sm:$0xf]  ;;  %v6447_v42 = vor.u32 %v8528_v34, %v6444_v35  ;;  %v6159_v52 = vor.u32 %v8456_v44, %v6156_v46  ;;  %v6802_v34 = vld [vmem:[%s13332_s3 + $0x7c8] sm:$0xf] }
  0x4d   : > { %v8500_v37 = vld [vmem:[%s13332_s3 + $0x41c] sm:$0xf0]  ;;  %v6188_v33 = vld [vmem:[%s13332_s3 + $0x320] sm:$0xf0]  ;;  %v8621_v35 = vld [vmem:[%s13332_s3 + $0x7e4] sm:$0xf0] }
  0x4e   : > { %v6570_v38 = vld [vmem:[%s13332_s3 + $0x600] sm:$0xf]  ;;  %v6315_v45 = vor.u32 %v8500_v37, %v6314_v36  ;;  %2165 = vmatpush.bf16.msra.mxu1 %v6059_v53  ;;  %v8592_v36 = vld [vmem:[%s13332_s3 + $0x704] sm:$0xf]  ;;  %v6258_v44 = vld [vmem:[%s13332_s3 + $0x388] sm:$0xf] }
  0x4f   : > { %v8564_v39 = vld [vmem:[%s13332_s3 + $0x61c] sm:$0xf0]  ;;  %v6700_v37 = vld [vmem:[%s13332_s3 + $0x720] sm:$0xf0]  ;;  %v8485_v46 = vld [vmem:[%s13332_s3 + $0x3a4] sm:$0xf0] }
  0x50   : > { %v5786_v51 = vld [vmem:[%s9326_s16] sm:$0xf]  ;;  %v6571_v57 = vor.u32 %v8564_v39, %v6570_v38  ;;  %2179 = vmatpush.bf16.msra.mxu2 %v6315_v45  ;;  %2200 = vmatpush.bf16.msrb.mxu0 %v6031_v61  ;;  %v5935_v38 = vor.u32 %v8400_v28, %v5932_v29  ;;  %v6191_v39 = vor.u32 %v8464_v32, %v6188_v33  ;;  %v8392_v40 = vld [vmem:[%s13332_s3 + $0xc4] sm:$0xf]  ;;  %v6290_v28 = vld [vmem:[%s13332_s3 + $0x3c8] sm:$0xf] }
  0x51   : > { %v9395_v7 = vor.u32 %v8366_v54, %v5786_v51  ;;  %2166 = vmatmul.bf16.vlgmr.msra.gmra.mxu1 %v9408_v13  ;;  %v5900_v41 = vld [vmem:[%s13332_s3 + $0xe0] sm:$0xf0]  ;;  %v6703_v43 = vor.u32 %v8592_v36, %v6700_v37  ;;  %v8493_v29 = vld [vmem:[%s13332_s3 + $0x3e4] sm:$0xf0] }
  0x52   : > { %2193 = vmatpush.bf16.msra.mxu3 %v6571_v57  ;;  %2214 = vmatpush.bf16.msrb.mxu1 %v6287_v62  ;;  %v5903_v51 = vor.u32 %v8392_v40, %v5900_v41  ;;  %v8384_v53 = vld [vmem:[%s13332_s3 + $0x84] sm:$0xf]  ;;  %v8557_v33 = vld [vmem:[%s13332_s3 + $0x5e4] sm:$0xf0] }
  0x53   : > { %2152 = vmatmul.bf16.vlgmr.msra.gmra.mxu0 %v9395_v7  ;;  %2180 = vmatmul.bf16.vlgmr.msra.gmra.mxu2 %v9397_v9  ;;  %v5868_v54 = vld [vmem:[%s13332_s3 + $0xa0] sm:$0xf0]  ;;  %v6002_v40 = vld [vmem:[%s13332_s3 + $0x188] sm:$0xf] }
  0x54   : > { %2228 = vmatpush.bf16.msrb.mxu2 %v6543_v2  ;;  %2201 = vmatpush.bf16.msrb.mxu0 %v5999_v15  ;;  %v8448_v45 = vld [vmem:[%s13332_s3 + $0x284] sm:$0xf]  ;;  %v5871_v62 = vor.u32 %v8384_v53, %v5868_v54  ;;  %v8421_v41 = vld [vmem:[%s13332_s3 + $0x1a4] sm:$0xf0] }
  0x55   : > { %2194 = vmatmul.bf16.vlgmr.msra.gmra.mxu3 %v9410_v14  ;;  %v6124_v57 = vld [vmem:[%s13332_s3 + $0x2a0] sm:$0xf0]  ;;  %v5970_v53 = vld [vmem:[%s13332_s3 + $0x148] sm:$0xf] }
  0x56   : > { %2242 = vmatpush.bf16.msrb.mxu3 %v6799_v3  ;;  %2215 = vmatpush.bf16.msrb.mxu1 %v6255_v16  ;;  %v8512_v58 = vld [vmem:[%s13332_s3 + $0x484] sm:$0xf]  ;;  %v6127_v63 = vor.u32 %v8448_v45, %v6124_v57  ;;  %v8413_v54 = vld [vmem:[%s13332_s3 + $0x164] sm:$0xf0] }
  0x57   : > { %v6380_v59 = vld [vmem:[%s13332_s3 + $0x4a0] sm:$0xf0]  ;;  %v6226_v45 = vld [vmem:[%s13332_s3 + $0x348] sm:$0xf] }
  0x58   : > { %2229 = vmatpush.bf16.msrb.mxu2 %v6511_v19  ;;  %2202 = vmatpush.bf16.msrb.mxu0 %v5967_v26  ;;  %v8576_v60 = vld [vmem:[%s13332_s3 + $0x684] sm:$0xf]  ;;  %v6383_v2 = vor.u32 %v8512_v58, %v6380_v59  ;;  %v6034_v26 = vld [vmem:[%s13332_s3 + $0x1c8] sm:$0xf] }
  0x59   : > { %v6636_v61 = vld [vmem:[%s13332_s3 + $0x6a0] sm:$0xf0]  ;;  %v8477_v57 = vld [vmem:[%s13332_s3 + $0x364] sm:$0xf0] }
  0x5a   : > { %2243 = vmatpush.bf16.msrb.mxu3 %v6767_v20  ;;  %2216 = vmatpush.bf16.msrb.mxu1 %v6223_v27  ;;  %v8376_v0 = vld [vmem:[%s13332_s3 + $0x44] sm:$0xf]  ;;  %v6639_v3 = vor.u32 %v8576_v60, %v6636_v61  ;;  %v8429_v27 = vld [vmem:[%s13332_s3 + $0x1e4] sm:$0xf0] }
  0x5b   : > { %v5836_v1 = vld [vmem:[%s13332_s3 + $0x60] sm:$0xf0]  ;;  %v6482_v58 = vld [vmem:[%s13332_s3 + $0x548] sm:$0xf] }
  0x5c   : > { %2230 = vmatpush.bf16.msrb.mxu2 %v6479_v30  ;;  %2203 = vmatpush.bf16.msrb.mxu0 %v5935_v38  ;;  %v8440_v4 = vld [vmem:[%s13332_s3 + $0x244] sm:$0xf]  ;;  %v5839_v16 = vor.u32 %v8376_v0, %v5836_v1  ;;  %v6546_v30 = vld [vmem:[%s13332_s3 + $0x5c8] sm:$0xf]  ;;  %v6035_v38 = vor.u32 %v8429_v27, %v6034_v26 }
  0x5d   : > { %v6092_v5 = vld [vmem:[%s13332_s3 + $0x260] sm:$0xf0]  ;;  %v8541_v59 = vld [vmem:[%s13332_s3 + $0x564] sm:$0xf0] }
  0x5e   : > { %2244 = vmatpush.bf16.msrb.mxu3 %v6735_v31  ;;  %2217 = vmatpush.bf16.msrb.mxu1 %v6191_v39  ;;  %v8504_v6 = vld [vmem:[%s13332_s3 + $0x444] sm:$0xf]  ;;  %v6095_v17 = vor.u32 %v8440_v4, %v6092_v5  ;;  %v6291_v39 = vor.u32 %v8493_v29, %v6290_v28  ;;  %v6738_v60 = vld [vmem:[%s13332_s3 + $0x748] sm:$0xf] }
  0x5f   : > { %v6348_v10 = vld [vmem:[%s13332_s3 + $0x460] sm:$0xf0]  ;;  %v8605_v61 = vld [vmem:[%s13332_s3 + $0x764] sm:$0xf0] }
  0x60   : > { %2231 = vmatpush.bf16.msrb.mxu2 %v6447_v42  ;;  %2204 = vmatpush.bf16.msrb.mxu0 %v5903_v51  ;;  %v8568_v11 = vld [vmem:[%s13332_s3 + $0x644] sm:$0xf]  ;;  %v6351_v21 = vor.u32 %v8504_v6, %v6348_v10  ;;  %v6547_v42 = vor.u32 %v8557_v33, %v6546_v30  ;;  %v6003_v51 = vor.u32 %v8421_v41, %v6002_v40  ;;  %v5938_v0 = vld [vmem:[%s13332_s3 + $0x108] sm:$0xf] }
  0x61   : > { %v6604_v12 = vld [vmem:[%s13332_s3 + $0x660] sm:$0xf0]  ;;  %v8405_v1 = vld [vmem:[%s13332_s3 + $0x124] sm:$0xf0] }
  0x62   : > { %2245 = vmatpush.bf16.msrb.mxu3 %v6703_v43  ;;  %2218 = vmatpush.bf16.msrb.mxu1 %v6159_v52  ;;  %v8368_v15 = vld [vmem:[%s13332_s3 + $0x4] sm:$0xf]  ;;  %v6607_v22 = vor.u32 %v8568_v11, %v6604_v12  ;;  %v6803_v43 = vor.u32 %v8621_v35, %v6802_v34  ;;  %v6259_v52 = vor.u32 %v8485_v46, %v6258_v44  ;;  %v6194_v4 = vld [vmem:[%s13332_s3 + $0x308] sm:$0xf] }
  0x63   : > { %v5804_v18 = vld [vmem:[%s13332_s3 + $0x20] sm:$0xf0]  ;;  %v8469_v5 = vld [vmem:[%s13332_s3 + $0x324] sm:$0xf0] }
  0x64   : > { %2232 = vmatpush.bf16.msrb.mxu2 %v6415_v55  ;;  %2205 = vmatpush.bf16.msrb.mxu0 %v5871_v62  ;;  %v8432_v19 = vld [vmem:[%s13332_s3 + $0x204] sm:$0xf]  ;;  %v5807_v31 = vor.u32 %v8368_v15, %v5804_v18  ;;  %v6515_v55 = vor.u32 %v8549_v48, %v6514_v47  ;;  %v5971_v62 = vor.u32 %v8413_v54, %v5970_v53  ;;  %v6450_v6 = vld [vmem:[%s13332_s3 + $0x508] sm:$0xf] }
  0x65   : > { %v6060_v20 = vld [vmem:[%s13332_s3 + $0x220] sm:$0xf0]  ;;  %v8533_v10 = vld [vmem:[%s13332_s3 + $0x524] sm:$0xf0]  ;;  %v5939_v15 = vor.u32 %v8405_v1, %v5938_v0  ;;  %v8489_v0 = vld [vmem:[%s13332_s3 + $0x3cc] sm:$0xf] }
  0x66   : > { %2246 = vmatpush.bf16.msrb.mxu3 %v6671_v56  ;;  %2219 = vmatpush.bf16.msrb.mxu1 %v6127_v63  ;;  %v8496_v23 = vld [vmem:[%s13332_s3 + $0x404] sm:$0xf]  ;;  %v6063_v32 = vor.u32 %v8432_v19, %v6060_v20  ;;  %v6771_v56 = vor.u32 %v8613_v50, %v6770_v49  ;;  %v6227_v63 = vor.u32 %v8477_v57, %v6226_v45  ;;  %v6706_v11 = vld [vmem:[%s13332_s3 + $0x708] sm:$0xf]  ;;  %v6292_v1 = vld [vmem:[%s13332_s3 + $0x3e8] sm:$0xf0] }
  0x67   : > { %v6316_v24 = vld [vmem:[%s13332_s3 + $0x420] sm:$0xf0]  ;;  %v8597_v12 = vld [vmem:[%s13332_s3 + $0x724] sm:$0xf0]  ;;  %v6451_v19 = vor.u32 %v8533_v10, %v6450_v6  ;;  %v8617_v6 = vld [vmem:[%s13332_s3 + $0x7cc] sm:$0xf] }
  0x68   : > { %2233 = vmatpush.bf16.msrb.mxu2 %v6383_v2  ;;  %v8560_v8 = vld [vmem:[%s13332_s3 + $0x604] sm:$0xf]  ;;  %2206 = vmatpush.bf16.msrb.mxu0 %v5839_v16  ;;  %v6319_v36 = vor.u32 %v8496_v23, %v6316_v24  ;;  %v6483_v2 = vor.u32 %v8541_v59, %v6482_v58  ;;  %v6195_v16 = vor.u32 %v8469_v5, %v6194_v4  ;;  %v8397_v18 = vld [vmem:[%s13332_s3 + $0xe4] sm:$0xf0]  ;;  %v6548_v5 = vld [vmem:[%s13332_s3 + $0x5e8] sm:$0xf0] }
  0x69   : > { %v6572_v25 = vld [vmem:[%s13332_s3 + $0x620] sm:$0xf0]  ;;  %v6707_v20 = vor.u32 %v8597_v12, %v6706_v11  ;;  %v6418_v23 = vld [vmem:[%s13332_s3 + $0x4c8] sm:$0xf]  ;;  %v6804_v10 = vld [vmem:[%s13332_s3 + $0x7e8] sm:$0xf0] }
  0x6a   : > { %2247 = vmatpush.bf16.msrb.mxu3 %v6639_v3  ;;  %2220 = vmatpush.bf16.msrb.mxu1 %v6095_v17  ;;  %v6575_v37 = vor.u32 %v8560_v8, %v6572_v25  ;;  %v6739_v3 = vor.u32 %v8605_v61, %v6738_v60  ;;  %v5906_v17 = vld [vmem:[%s13332_s3 + $0xc8] sm:$0xf] }
  0x6b   : > { %v8525_v24 = vld [vmem:[%s13332_s3 + $0x4e4] sm:$0xf0]  ;;  %v5907_v26 = vor.u32 %v8397_v18, %v5906_v17  ;;  %v8417_v17 = vld [vmem:[%s13332_s3 + $0x18c] sm:$0xf] }
  0x6c   : > { %2234 = vmatpush.bf16.msrb.mxu2 %v6351_v21  ;;  %2207 = vmatpush.bf16.msrb.mxu0 %v5807_v31  ;;  %v6162_v21 = vld [vmem:[%s13332_s3 + $0x2c8] sm:$0xf]  ;;  %v6419_v30 = vor.u32 %v8525_v24, %v6418_v23  ;;  %v6004_v18 = vld [vmem:[%s13332_s3 + $0x1a8] sm:$0xf0] }
  0x6d   : > { %v6674_v8 = vld [vmem:[%s13332_s3 + $0x6c8] sm:$0xf]  ;;  %v8545_v23 = vld [vmem:[%s13332_s3 + $0x58c] sm:$0xf] }
  0x6e   : > { %2248 = vmatpush.bf16.msrb.mxu3 %v6607_v22  ;;  %2221 = vmatpush.bf16.msrb.mxu1 %v6063_v32  ;;  %v8461_v22 = vld [vmem:[%s13332_s3 + $0x2e4] sm:$0xf0]  ;;  %v6516_v24 = vld [vmem:[%s13332_s3 + $0x5a8] sm:$0xf0] }
  0x6f   : > { %2208 = vmatmul.bf16.vlgmr.msrb.gmra.mxu0 %v9395_v7  ;;  %v8589_v25 = vld [vmem:[%s13332_s3 + $0x6e4] sm:$0xf0]  ;;  %v6163_v27 = vor.u32 %v8461_v22, %v6162_v21  ;;  %v8481_v21 = vld [vmem:[%s13332_s3 + $0x38c] sm:$0xf] }
  0x70   : > { %2235 = vmatpush.bf16.msrb.mxu2 %v6319_v36  ;;  %2256 = vmatpush.bf16.msra.mxu0 %v6035_v38  ;;  %v5874_v28 = vld [vmem:[%s13332_s3 + $0x88] sm:$0xf]  ;;  %v6675_v31 = vor.u32 %v8589_v25, %v6674_v8  ;;  %v6260_v22 = vld [vmem:[%s13332_s3 + $0x3a8] sm:$0xf0] }
  0x71   : > { %2222 = vmatmul.bf16.vlgmr.msrb.gmra.mxu1 %v9408_v13  ;;  %v8389_v29 = vld [vmem:[%s13332_s3 + $0xa4] sm:$0xf0]  ;;  %v8609_v8 = vld [vmem:[%s13332_s3 + $0x78c] sm:$0xf] }
  0x72   : > { %2249 = vmatpush.bf16.msrb.mxu3 %v6575_v37  ;;  %2270 = vmatpush.bf16.msra.mxu1 %v6291_v39  ;;  %v6130_v32 = vld [vmem:[%s13332_s3 + $0x288] sm:$0xf]  ;;  %v5875_v38 = vor.u32 %v8389_v29, %v5874_v28  ;;  %v6772_v25 = vld [vmem:[%s13332_s3 + $0x7a8] sm:$0xf0] }
  0x73   : > { %2236 = vmatmul.bf16.vlgmr.msrb.gmra.mxu2 %v9397_v9  ;;  %v8453_v33 = vld [vmem:[%s13332_s3 + $0x2a4] sm:$0xf0]  ;;  %v8409_v28 = vld [vmem:[%s13332_s3 + $0x14c] sm:$0xf] }
  0x74   : > { %2284 = vmatpush.bf16.msra.mxu2 %v6547_v42  ;;  %2257 = vmatpush.bf16.msra.mxu0 %v6003_v51  ;;  %v6386_v34 = vld [vmem:[%s13332_s3 + $0x488] sm:$0xf]  ;;  %v6131_v39 = vor.u32 %v8453_v33, %v6130_v32  ;;  %v5972_v29 = vld [vmem:[%s13332_s3 + $0x168] sm:$0xf0] }
  0x75   : > { %2250 = vmatmul.bf16.vlgmr.msrb.gmra.mxu3 %v9410_v14  ;;  %v8517_v35 = vld [vmem:[%s13332_s3 + $0x4a4] sm:$0xf0]  ;;  %v8473_v32 = vld [vmem:[%s13332_s3 + $0x34c] sm:$0xf] }
  0x76   : > { %2298 = vmatpush.bf16.msra.mxu3 %v6803_v43  ;;  %2271 = vmatpush.bf16.msra.mxu1 %v6259_v52  ;;  %v6642_v36 = vld [vmem:[%s13332_s3 + $0x688] sm:$0xf]  ;;  %v6387_v42 = vor.u32 %v8517_v35, %v6386_v34  ;;  %v6228_v33 = vld [vmem:[%s13332_s3 + $0x368] sm:$0xf0] }
  0x77   : > { %v8581_v37 = vld [vmem:[%s13332_s3 + $0x6a4] sm:$0xf0]  ;;  %v8537_v34 = vld [vmem:[%s13332_s3 + $0x54c] sm:$0xf] }
  0x78   : > { %2285 = vmatpush.bf16.msra.mxu2 %v6515_v55  ;;  %2258 = vmatpush.bf16.msra.mxu0 %v5971_v62  ;;  %v5842_v40 = vld [vmem:[%s13332_s3 + $0x48] sm:$0xf]  ;;  %v6643_v43 = vor.u32 %v8581_v37, %v6642_v36  ;;  %v8425_v62 = vld [vmem:[%s13332_s3 + $0x1cc] sm:$0xf] }
  0x79   : > { %v8381_v41 = vld [vmem:[%s13332_s3 + $0x64] sm:$0xf0]  ;;  %v6484_v35 = vld [vmem:[%s13332_s3 + $0x568] sm:$0xf0] }
  0x7a   : > { %2299 = vmatpush.bf16.msra.mxu3 %v6771_v56  ;;  %2272 = vmatpush.bf16.msra.mxu1 %v6227_v63  ;;  %v6098_v44 = vld [vmem:[%s13332_s3 + $0x248] sm:$0xf]  ;;  %v5843_v52 = vor.u32 %v8381_v41, %v5842_v40  ;;  %v6036_v63 = vld [vmem:[%s13332_s3 + $0x1e8] sm:$0xf0] }
  0x7b   : > { %v8445_v46 = vld [vmem:[%s13332_s3 + $0x264] sm:$0xf0]  ;;  %v8601_v36 = vld [vmem:[%s13332_s3 + $0x74c] sm:$0xf] }
  0x7c   : > { %2286 = vmatpush.bf16.msra.mxu2 %v6483_v2  ;;  %2259 = vmatpush.bf16.msra.mxu0 %v5939_v15  ;;  %v6354_v47 = vld [vmem:[%s13332_s3 + $0x448] sm:$0xf]  ;;  %v6099_v53 = vor.u32 %v8445_v46, %v6098_v44  ;;  %v8553_v2 = vld [vmem:[%s13332_s3 + $0x5cc] sm:$0xf]  ;;  %v6039_v15 = vor.u32 %v8425_v62, %v6036_v63 }
  0x7d   : > { %v8509_v48 = vld [vmem:[%s13332_s3 + $0x464] sm:$0xf0]  ;;  %v6740_v37 = vld [vmem:[%s13332_s3 + $0x768] sm:$0xf0] }
  0x7e   : > { %2300 = vmatpush.bf16.msra.mxu3 %v6739_v3  ;;  %2273 = vmatpush.bf16.msra.mxu1 %v6195_v16  ;;  %v6610_v49 = vld [vmem:[%s13332_s3 + $0x648] sm:$0xf]  ;;  %v6355_v45 = vor.u32 %v8509_v48, %v6354_v47  ;;  %v6295_v16 = vor.u32 %v8489_v0, %v6292_v1  ;;  %v8401_v40 = vld [vmem:[%s13332_s3 + $0x10c] sm:$0xf] }
  0x7f   : > { %v8573_v50 = vld [vmem:[%s13332_s3 + $0x664] sm:$0xf0]  ;;  %v5940_v41 = vld [vmem:[%s13332_s3 + $0x128] sm:$0xf0] }
  0x80   : > { %2287 = vmatpush.bf16.msra.mxu2 %v6451_v19  ;;  %2260 = vmatpush.bf16.msra.mxu0 %v5907_v26  ;;  %v5810_v51 = vld [vmem:[%s13332_s3 + $0x8] sm:$0xf]  ;;  %v6611_v57 = vor.u32 %v8573_v50, %v6610_v49  ;;  %v6551_v19 = vor.u32 %v8553_v2, %v6548_v5  ;;  %v6007_v26 = vor.u32 %v8417_v17, %v6004_v18  ;;  %v8465_v44 = vld [vmem:[%s13332_s3 + $0x30c] sm:$0xf] }
  0x81   : > { %v8373_v54 = vld [vmem:[%s13332_s3 + $0x24] sm:$0xf0]  ;;  %v6196_v46 = vld [vmem:[%s13332_s3 + $0x328] sm:$0xf0] }
  0x82   : > { %2301 = vmatpush.bf16.msra.mxu3 %v6707_v20  ;;  %2274 = vmatpush.bf16.msra.mxu1 %v6163_v27  ;;  %v6066_v55 = vld [vmem:[%s13332_s3 + $0x208] sm:$0xf]  ;;  %v5811_v3 = vor.u32 %v8373_v54, %v5810_v51  ;;  %v6807_v20 = vor.u32 %v8617_v6, %v6804_v10  ;;  %v6263_v27 = vor.u32 %v8481_v21, %v6260_v22  ;;  %v8529_v47 = vld [vmem:[%s13332_s3 + $0x50c] sm:$0xf] }
  0x83   : > { %v8437_v56 = vld [vmem:[%s13332_s3 + $0x224] sm:$0xf0]  ;;  %v6452_v48 = vld [vmem:[%s13332_s3 + $0x528] sm:$0xf0]  ;;  %v5943_v51 = vor.u32 %v8401_v40, %v5940_v41  ;;  %v6298_v40 = vld [vmem:[%s13332_s3 + $0x3d0] sm:$0xf] }
  0x84   : > { %2288 = vmatpush.bf16.msra.mxu2 %v6419_v30  ;;  %2261 = vmatpush.bf16.msra.mxu0 %v5875_v38  ;;  %v6322_v58 = vld [vmem:[%s13332_s3 + $0x408] sm:$0xf]  ;;  %v6067_v4 = vor.u32 %v8437_v56, %v6066_v55  ;;  %v6519_v30 = vor.u32 %v8545_v23, %v6516_v24  ;;  %v5975_v38 = vor.u32 %v8409_v28, %v5972_v29  ;;  %v8593_v49 = vld [vmem:[%s13332_s3 + $0x70c] sm:$0xf]  ;;  %v8494_v41 = vld [vmem:[%s13332_s3 + $0x3ec] sm:$0xf0] }
  0x85   : > { %v8501_v59 = vld [vmem:[%s13332_s3 + $0x424] sm:$0xf0]  ;;  %v6708_v50 = vld [vmem:[%s13332_s3 + $0x728] sm:$0xf0]  ;;  %v6455_v55 = vor.u32 %v8529_v47, %v6452_v48  ;;  %v6810_v47 = vld [vmem:[%s13332_s3 + $0x7d0] sm:$0xf] }
  0x86   : > { %2302 = vmatpush.bf16.msra.mxu3 %v6675_v31  ;;  %2275 = vmatpush.bf16.msra.mxu1 %v6131_v39  ;;  %v6578_v60 = vld [vmem:[%s13332_s3 + $0x608] sm:$0xf]  ;;  %v6323_v11 = vor.u32 %v8501_v59, %v6322_v58  ;;  %v6775_v31 = vor.u32 %v8609_v8, %v6772_v25  ;;  %v6231_v39 = vor.u32 %v8473_v32, %v6228_v33  ;;  %v5908_v54 = vld [vmem:[%s13332_s3 + $0xe8] sm:$0xf0]  ;;  %v8622_v48 = vld [vmem:[%s13332_s3 + $0x7ec] sm:$0xf0] }
  0x87   : > { %v8565_v61 = vld [vmem:[%s13332_s3 + $0x624] sm:$0xf0]  ;;  %v6711_v56 = vor.u32 %v8593_v49, %v6708_v50  ;;  %v8521_v58 = vld [vmem:[%s13332_s3 + $0x4cc] sm:$0xf] }
  0x88   : > { %2289 = vmatpush.bf16.msra.mxu2 %v6387_v42  ;;  %2262 = vmatpush.bf16.msra.mxu0 %v5843_v52  ;;  %v6579_v12 = vor.u32 %v8565_v61, %v6578_v60  ;;  %v6487_v42 = vor.u32 %v8537_v34, %v6484_v35  ;;  %v6199_v52 = vor.u32 %v8465_v44, %v6196_v46  ;;  %v6420_v59 = vld [vmem:[%s13332_s3 + $0x4e8] sm:$0xf0]  ;;  %v8558_v46 = vld [vmem:[%s13332_s3 + $0x5ec] sm:$0xf0] }
  0x89   : > { %v8585_v60 = vld [vmem:[%s13332_s3 + $0x6cc] sm:$0xf]  ;;  %v6423_v2 = vor.u32 %v8521_v58, %v6420_v59  ;;  %v6522_v58 = vld [vmem:[%s13332_s3 + $0x590] sm:$0xf] }
  0x8a   : > { %2303 = vmatpush.bf16.msra.mxu3 %v6643_v43  ;;  %2276 = vmatpush.bf16.msra.mxu1 %v6099_v53  ;;  %v6743_v43 = vor.u32 %v8601_v36, %v6740_v37  ;;  %v8393_v53 = vld [vmem:[%s13332_s3 + $0xcc] sm:$0xf]  ;;  %v8550_v59 = vld [vmem:[%s13332_s3 + $0x5ac] sm:$0xf0] }
  0x8b   : > { %v6676_v61 = vld [vmem:[%s13332_s3 + $0x6e8] sm:$0xf0]  ;;  %v5911_v62 = vor.u32 %v8393_v53, %v5908_v54  ;;  %v6010_v53 = vld [vmem:[%s13332_s3 + $0x190] sm:$0xf] }
  0x8c   : > { %2290 = vmatpush.bf16.msra.mxu2 %v6355_v45  ;;  %2263 = vmatpush.bf16.msra.mxu0 %v5811_v3  ;;  %v8457_v45 = vld [vmem:[%s13332_s3 + $0x2cc] sm:$0xf]  ;;  %v6679_v3 = vor.u32 %v8585_v60, %v6676_v61  ;;  %v8422_v54 = vld [vmem:[%s13332_s3 + $0x1ac] sm:$0xf0] }
  0x8d   : > { %v8385_v0 = vld [vmem:[%s13332_s3 + $0x8c] sm:$0xf]  ;;  %v6778_v60 = vld [vmem:[%s13332_s3 + $0x790] sm:$0xf] }
  0x8e   : > { %2304 = vmatpush.bf16.msra.mxu3 %v6611_v57  ;;  %2277 = vmatpush.bf16.msra.mxu1 %v6067_v4  ;;  %v6164_v57 = vld [vmem:[%s13332_s3 + $0x2e8] sm:$0xf0]  ;;  %v8614_v61 = vld [vmem:[%s13332_s3 + $0x7ac] sm:$0xf0] }
  0x8f   : > { %2264 = vmatmul.bf16.vlgmr.msra.gmra.mxu0 %v9395_v7  ;;  %v6167_v63 = vor.u32 %v8457_v45, %v6164_v57  ;;  %v5876_v1 = vld [vmem:[%s13332_s3 + $0xa8] sm:$0xf0]  ;;  %v6266_v45 = vld [vmem:[%s13332_s3 + $0x390] sm:$0xf] }
  0x90   : > { %2291 = vmatpush.bf16.msra.mxu2 %v6323_v11  ;;  %2312 = vmatpush.bf16.msrb.mxu0 %v6039_v15  ;;  %v8449_v4 = vld [vmem:[%s13332_s3 + $0x28c] sm:$0xf]  ;;  %v5879_v15 = vor.u32 %v8385_v0, %v5876_v1  ;;  %v8486_v57 = vld [vmem:[%s13332_s3 + $0x3ac] sm:$0xf0] }
  0x91   : > { %2278 = vmatmul.bf16.vlgmr.msra.gmra.mxu1 %v9408_v13  ;;  %v6132_v5 = vld [vmem:[%s13332_s3 + $0x2a8] sm:$0xf0]  ;;  %v5978_v0 = vld [vmem:[%s13332_s3 + $0x150] sm:$0xf] }
  0x92   : > { %2305 = vmatpush.bf16.msra.mxu3 %v6579_v12  ;;  %2326 = vmatpush.bf16.msrb.mxu1 %v6295_v16  ;;  %v8513_v6 = vld [vmem:[%s13332_s3 + $0x48c] sm:$0xf]  ;;  %v6135_v16 = vor.u32 %v8449_v4, %v6132_v5  ;;  %v8414_v1 = vld [vmem:[%s13332_s3 + $0x16c] sm:$0xf0] }
  0x93   : > { %2292 = vmatmul.bf16.vlgmr.msra.gmra.mxu2 %v9397_v9  ;;  %v6388_v10 = vld [vmem:[%s13332_s3 + $0x4a8] sm:$0xf0]  ;;  %v6234_v4 = vld [vmem:[%s13332_s3 + $0x350] sm:$0xf] }
  0x94   : > { %2340 = vmatpush.bf16.msrb.mxu2 %v6551_v19  ;;  %2313 = vmatpush.bf16.msrb.mxu0 %v6007_v26  ;;  %v8577_v11 = vld [vmem:[%s13332_s3 + $0x68c] sm:$0xf]  ;;  %v6391_v19 = vor.u32 %v8513_v6, %v6388_v10  ;;  %v8478_v5 = vld [vmem:[%s13332_s3 + $0x36c] sm:$0xf0] }
  0x95   : > { %2306 = vmatmul.bf16.vlgmr.msra.gmra.mxu3 %v9410_v14  ;;  %v6644_v12 = vld [vmem:[%s13332_s3 + $0x6a8] sm:$0xf0]  ;;  %v6490_v6 = vld [vmem:[%s13332_s3 + $0x550] sm:$0xf] }
  0x96   : > { %2354 = vmatpush.bf16.msrb.mxu3 %v6807_v20  ;;  %2327 = vmatpush.bf16.msrb.mxu1 %v6263_v27  ;;  %v8377_v17 = vld [vmem:[%s13332_s3 + $0x4c] sm:$0xf]  ;;  %v6647_v20 = vor.u32 %v8577_v11, %v6644_v12  ;;  %v8542_v10 = vld [vmem:[%s13332_s3 + $0x56c] sm:$0xf0] }
  0x97   : > { %v5844_v18 = vld [vmem:[%s13332_s3 + $0x68] sm:$0xf0]  ;;  %v6746_v11 = vld [vmem:[%s13332_s3 + $0x750] sm:$0xf] }
  0x98   : > { %2341 = vmatpush.bf16.msrb.mxu2 %v6519_v30  ;;  %2314 = vmatpush.bf16.msrb.mxu0 %v5975_v38  ;;  %v8441_v21 = vld [vmem:[%s13332_s3 + $0x24c] sm:$0xf]  ;;  %v5847_v27 = vor.u32 %v8377_v17, %v5844_v18  ;;  %v6042_v38 = vld [vmem:[%s13332_s3 + $0x1d0] sm:$0xf] }
  0x99   : > { %v6100_v22 = vld [vmem:[%s13332_s3 + $0x268] sm:$0xf0]  ;;  %v8606_v12 = vld [vmem:[%s13332_s3 + $0x76c] sm:$0xf0] }
  0x9a   : > { %2355 = vmatpush.bf16.msrb.mxu3 %v6775_v31  ;;  %2328 = vmatpush.bf16.msrb.mxu1 %v6231_v39  ;;  %v8505_v23 = vld [vmem:[%s13332_s3 + $0x44c] sm:$0xf]  ;;  %v6103_v28 = vor.u32 %v8441_v21, %v6100_v22  ;;  %v8430_v39 = vld [vmem:[%s13332_s3 + $0x1ec] sm:$0xf0] }
  0x9b   : > { %v6356_v24 = vld [vmem:[%s13332_s3 + $0x468] sm:$0xf0]  ;;  %v5946_v17 = vld [vmem:[%s13332_s3 + $0x110] sm:$0xf] }
  0x9c   : > { %2342 = vmatpush.bf16.msrb.mxu2 %v6487_v42  ;;  %2315 = vmatpush.bf16.msrb.mxu0 %v5943_v51  ;;  %v8569_v8 = vld [vmem:[%s13332_s3 + $0x64c] sm:$0xf]  ;;  %v6359_v32 = vor.u32 %v8505_v23, %v6356_v24  ;;  %v6554_v42 = vld [vmem:[%s13332_s3 + $0x5d0] sm:$0xf]  ;;  %v6043_v51 = vor.u32 %v8430_v39, %v6042_v38 }
  0x9d   : > { %v6612_v25 = vld [vmem:[%s13332_s3 + $0x668] sm:$0xf0]  ;;  %v8406_v18 = vld [vmem:[%s13332_s3 + $0x12c] sm:$0xf0] }
  0x9e   : > { %2356 = vmatpush.bf16.msrb.mxu3 %v6743_v43  ;;  %2329 = vmatpush.bf16.msrb.mxu1 %v6199_v52  ;;  %v8369_v26 = vld [vmem:[%s13332_s3 + $0xc] sm:$0xf]  ;;  %v6615_v33 = vor.u32 %v8569_v8, %v6612_v25  ;;  %v6299_v52 = vor.u32 %v8494_v41, %v6298_v40  ;;  %v6202_v21 = vld [vmem:[%s13332_s3 + $0x310] sm:$0xf] }
  0x9f   : > { %v5812_v29 = vld [vmem:[%s13332_s3 + $0x28] sm:$0xf0]  ;;  %v8470_v22 = vld [vmem:[%s13332_s3 + $0x32c] sm:$0xf0] }
  0xa0   : > { %2343 = vmatpush.bf16.msrb.mxu2 %v6455_v55  ;;  %2316 = vmatpush.bf16.msrb.mxu0 %v5911_v62  ;;  %v8433_v30 = vld [vmem:[%s13332_s3 + $0x20c] sm:$0xf]  ;;  %v5815_v43 = vor.u32 %v8369_v26, %v5812_v29  ;;  %v6555_v55 = vor.u32 %v8558_v46, %v6554_v42  ;;  %v6011_v62 = vor.u32 %v8422_v54, %v6010_v53  ;;  %v6458_v23 = vld [vmem:[%s13332_s3 + $0x510] sm:$0xf] }
  0xa1   : > { %v6068_v31 = vld [vmem:[%s13332_s3 + $0x228] sm:$0xf0]  ;;  %v8534_v24 = vld [vmem:[%s13332_s3 + $0x52c] sm:$0xf0]  ;;  %v5947_v26 = vor.u32 %v8406_v18, %v5946_v17  ;;  %v8426_v17 = vld [vmem:[%s13332_s3 + $0x1d4] sm:$0xf] }
  0xa2   : > { %2357 = vmatpush.bf16.msrb.mxu3 %v6711_v56  ;;  %2330 = vmatpush.bf16.msrb.mxu1 %v6167_v63  ;;  %v8497_v34 = vld [vmem:[%s13332_s3 + $0x40c] sm:$0xf]  ;;  %v6071_v44 = vor.u32 %v8433_v30, %v6068_v31  ;;  %v6811_v56 = vor.u32 %v8622_v48, %v6810_v47  ;;  %v6267_v63 = vor.u32 %v8486_v57, %v6266_v45  ;;  %v6714_v8 = vld [vmem:[%s13332_s3 + $0x710] sm:$0xf]  ;;  %v6044_v18 = vld [vmem:[%s13332_s3 + $0x1f0] sm:$0xf0] }
  0xa3   : > { %v6324_v35 = vld [vmem:[%s13332_s3 + $0x428] sm:$0xf0]  ;;  %v8598_v25 = vld [vmem:[%s13332_s3 + $0x72c] sm:$0xf0]  ;;  %v6459_v30 = vor.u32 %v8534_v24, %v6458_v23  ;;  %v6556_v24 = vld [vmem:[%s13332_s3 + $0x5f0] sm:$0xf0] }
  0xa4   : > { %2344 = vmatpush.bf16.msrb.mxu2 %v6423_v2  ;;  %2317 = vmatpush.bf16.msrb.mxu0 %v5879_v15  ;;  %v8561_v36 = vld [vmem:[%s13332_s3 + $0x60c] sm:$0xf]  ;;  %v6327_v49 = vor.u32 %v8497_v34, %v6324_v35  ;;  %v6523_v2 = vor.u32 %v8550_v59, %v6522_v58  ;;  %v5979_v15 = vor.u32 %v8414_v1, %v5978_v0  ;;  %v8398_v29 = vld [vmem:[%s13332_s3 + $0xec] sm:$0xf0] }
  0xa5   : > { %v6580_v37 = vld [vmem:[%s13332_s3 + $0x628] sm:$0xf0]  ;;  %v6715_v31 = vor.u32 %v8598_v25, %v6714_v8  ;;  %v6426_v34 = vld [vmem:[%s13332_s3 + $0x4d0] sm:$0xf]  ;;  %v8618_v8 = vld [vmem:[%s13332_s3 + $0x7d4] sm:$0xf] }
  0xa6   : > { %2358 = vmatpush.bf16.msrb.mxu3 %v6679_v3  ;;  %2331 = vmatpush.bf16.msrb.mxu1 %v6135_v16  ;;  %v6583_v50 = vor.u32 %v8561_v36, %v6580_v37  ;;  %v6779_v3 = vor.u32 %v8614_v61, %v6778_v60  ;;  %v6235_v16 = vor.u32 %v8478_v5, %v6234_v4  ;;  %v8526_v35 = vld [vmem:[%s13332_s3 + $0x4ec] sm:$0xf0]  ;;  %v10136_v4 = vpop.f32.mrf.mxu0  ;;  %v6812_v25 = vld [vmem:[%s13332_s3 + $0x7f0] sm:$0xf0] }
  0xa7   : > { %v6682_v36 = vld [vmem:[%s13332_s3 + $0x6d0] sm:$0xf]  ;;  %v6427_v42 = vor.u32 %v8526_v35, %v6426_v34  ;;  %v6815_v34 = vor.u32 %v8618_v8, %v6812_v25  ;;  %v8482_v35 = vld [vmem:[%s13332_s3 + $0x394] sm:$0xf] }
  0xa8   : > { %2345 = vmatpush.bf16.msrb.mxu2 %v6391_v19  ;;  %2318 = vmatpush.bf16.msrb.mxu0 %v5847_v27  ;;  %v6491_v19 = vor.u32 %v8542_v10, %v6490_v6  ;;  %v6203_v27 = vor.u32 %v8470_v22, %v6202_v21  ;;  %v8590_v37 = vld [vmem:[%s13332_s3 + $0x6ec] sm:$0xf0]  ;;  %v8554_v21 = vld [vmem:[%s13332_s3 + $0x5d4] sm:$0xf] }
  0xa9   : > { %v5882_v40 = vld [vmem:[%s13332_s3 + $0x90] sm:$0xf] }
  0xaa   : > { %2359 = vmatpush.bf16.msrb.mxu3 %v6647_v20  ;;  %2332 = vmatpush.bf16.msrb.mxu1 %v6103_v28  ;;  %v6747_v20 = vor.u32 %v8606_v12, %v6746_v11  ;;  %v5914_v28 = vld [vmem:[%s13332_s3 + $0xd0] sm:$0xf] }
  0xab   : > { %v5915_v38 = vor.u32 %v8398_v29, %v5914_v28  ;;  %v8390_v41 = vld [vmem:[%s13332_s3 + $0xac] sm:$0xf0]  ;;  %v6047_v28 = vor.u32 %v8426_v17, %v6044_v18 }
  0xac   : > { %2346 = vmatpush.bf16.msrb.mxu2 %v6359_v32  ;;  %2319 = vmatpush.bf16.msrb.mxu0 %v5815_v43  ;;  %v6170_v32 = vld [vmem:[%s13332_s3 + $0x2d0] sm:$0xf]  ;;  %v6683_v43 = vor.u32 %v8590_v37, %v6682_v36  ;;  %v6268_v36 = vld [vmem:[%s13332_s3 + $0x3b0] sm:$0xf0] }
  0xad   : > { %v8454_v46 = vld [vmem:[%s13332_s3 + $0x2ac] sm:$0xf0]  ;;  %v8546_v37 = vld [vmem:[%s13332_s3 + $0x594] sm:$0xf] }
  0xae   : > { %2360 = vmatpush.bf16.msrb.mxu3 %v6615_v33  ;;  %2333 = vmatpush.bf16.msrb.mxu1 %v6071_v44  ;;  %v8462_v33 = vld [vmem:[%s13332_s3 + $0x2ec] sm:$0xf0] }
  0xaf   : > { %2320 = vmatmul.bf16.vlgmr.msrb.gmra.mxu0 %v9395_v7  ;;  %v6171_v39 = vor.u32 %v8462_v33, %v6170_v32  ;;  %v6138_v44 = vld [vmem:[%s13332_s3 + $0x290] sm:$0xf]  ;;  %v10182_v32 = vpop.f32.mrf.mxu2  ;;  %v6559_v33 = vor.u32 %v8554_v21, %v6556_v24  ;;  %v8522_v21 = vld [vmem:[%s13332_s3 + $0x4d4] sm:$0xf] }
  0xb0   : > { %2347 = vmatpush.bf16.msrb.mxu2 %v6327_v49  ;;  %2368 = vmatpush.bf16.msra.mxu0 %v6043_v51  ;;  %v6394_v47 = vld [vmem:[%s13332_s3 + $0x490] sm:$0xf]  ;;  %v5883_v51 = vor.u32 %v8390_v41, %v5882_v40  ;;  %v8610_v40 = vld [vmem:[%s13332_s3 + $0x794] sm:$0xf] }
  0xb1   : > { %2334 = vmatmul.bf16.vlgmr.msrb.gmra.mxu1 %v9408_v13  ;;  %v8518_v48 = vld [vmem:[%s13332_s3 + $0x4ac] sm:$0xf0]  ;;  %v6780_v41 = vld [vmem:[%s13332_s3 + $0x7b0] sm:$0xf0] }
  0xb2   : > { %2361 = vmatpush.bf16.msrb.mxu3 %v6583_v50  ;;  %2382 = vmatpush.bf16.msra.mxu1 %v6299_v52  ;;  %v6650_v49 = vld [vmem:[%s13332_s3 + $0x690] sm:$0xf]  ;;  %v6139_v52 = vor.u32 %v8454_v46, %v6138_v44  ;;  %v8410_v44 = vld [vmem:[%s13332_s3 + $0x154] sm:$0xf] }
  0xb3   : > { %2348 = vmatmul.bf16.vlgmr.msrb.gmra.mxu2 %v9397_v9  ;;  %v8582_v50 = vld [vmem:[%s13332_s3 + $0x6ac] sm:$0xf0]  ;;  %v5980_v46 = vld [vmem:[%s13332_s3 + $0x170] sm:$0xf0] }
  0xb4   : > { %2396 = vmatpush.bf16.msra.mxu2 %v6555_v55  ;;  %2369 = vmatpush.bf16.msra.mxu0 %v6011_v62  ;;  %v5850_v53 = vld [vmem:[%s13332_s3 + $0x50] sm:$0xf]  ;;  %v6395_v55 = vor.u32 %v8518_v48, %v6394_v47  ;;  %v10210_v47 = vpop.f32.mrf.mxu0  ;;  %v6684_v24 = vld [vmem:[%s13332_s3 + $0x6f0] sm:$0xf0] }
  0xb5   : > { %2362 = vmatmul.bf16.vlgmr.msrb.gmra.mxu3 %v9410_v14  ;;  %v8382_v54 = vld [vmem:[%s13332_s3 + $0x6c] sm:$0xf0] }
  0xb6   : > { %2410 = vmatpush.bf16.msra.mxu3 %v6811_v56  ;;  %2383 = vmatpush.bf16.msra.mxu1 %v6267_v63  ;;  %v6651_v56 = vor.u32 %v8582_v50, %v6650_v49  ;;  %v6106_v45 = vld [vmem:[%s13332_s3 + $0x250] sm:$0xf]  ;;  %v5851_v63 = vor.u32 %v8382_v54, %v5850_v53  ;;  %v6783_v49 = vor.u32 %v8610_v40, %v6780_v41  ;;  %v8474_v50 = vld [vmem:[%s13332_s3 + $0x354] sm:$0xf] }
  0xb7   : > { %v8446_v57 = vld [vmem:[%s13332_s3 + $0x26c] sm:$0xf0]  ;;  %v6492_v54 = vld [vmem:[%s13332_s3 + $0x570] sm:$0xf0] }
  0xb8   : > { %2397 = vmatpush.bf16.msra.mxu2 %v6523_v2  ;;  %2370 = vmatpush.bf16.msra.mxu0 %v5979_v15  ;;  %v6362_v58 = vld [vmem:[%s13332_s3 + $0x450] sm:$0xf]  ;;  %v6107_v0 = vor.u32 %v8446_v57, %v6106_v45  ;;  %v10147_v15 = vpop.f32.mrf.mxu1  ;;  %v5983_v45 = vor.u32 %v8410_v44, %v5980_v46 }
  0xb9   : > { %v8510_v59 = vld [vmem:[%s13332_s3 + $0x46c] sm:$0xf0] }
  0xba   : > { %2411 = vmatpush.bf16.msra.mxu3 %v6779_v3  ;;  %2384 = vmatpush.bf16.msra.mxu1 %v6235_v16  ;;  %v6618_v60 = vld [vmem:[%s13332_s3 + $0x650] sm:$0xf]  ;;  %v6363_v5 = vor.u32 %v8510_v59, %v6362_v58  ;;  %v8402_v58 = vld [vmem:[%s13332_s3 + $0x114] sm:$0xf] }
  0xbb   : > { %v8574_v61 = vld [vmem:[%s13332_s3 + $0x66c] sm:$0xf0]  ;;  %v5948_v59 = vld [vmem:[%s13332_s3 + $0x130] sm:$0xf0] }
  0xbc   : > { %2398 = vmatpush.bf16.msra.mxu2 %v6491_v19  ;;  %2371 = vmatpush.bf16.msra.mxu0 %v5947_v26  ;;  %v5818_v62 = vld [vmem:[%s13332_s3 + $0x10] sm:$0xf]  ;;  %v6619_v6 = vor.u32 %v8574_v61, %v6618_v60  ;;  %v8490_v19 = vld [vmem:[%s13332_s3 + $0x3d4] sm:$0xf]  ;;  %v10288_v8 = vpop.f32.mrf.mxu0 }
  0xbd   : > { %v8374_v1 = vld [vmem:[%s13332_s3 + $0x2c] sm:$0xf0] }
  0xbe   : > { %2412 = vmatpush.bf16.msra.mxu3 %v6747_v20  ;;  %2385 = vmatpush.bf16.msra.mxu1 %v6203_v27  ;;  %v6074_v2 = vld [vmem:[%s13332_s3 + $0x210] sm:$0xf]  ;;  %v6300_v20 = vld [vmem:[%s13332_s3 + $0x3f0] sm:$0xf0]  ;;  %v5819_v22 = vor.u32 %v8374_v1, %v5818_v62 }
  0xbf   : > { %v8438_v3 = vld [vmem:[%s13332_s3 + $0x22c] sm:$0xf0]  ;;  %v6303_v29 = vor.u32 %v8490_v19, %v6300_v20  ;;  %v8466_v62 = vld [vmem:[%s13332_s3 + $0x314] sm:$0xf] }
  0xc0   : > { %2399 = vmatpush.bf16.msra.mxu2 %v6459_v30  ;;  %2372 = vmatpush.bf16.msra.mxu0 %v5915_v38  ;;  %v6330_v10 = vld [vmem:[%s13332_s3 + $0x410] sm:$0xf]  ;;  %v6075_v23 = vor.u32 %v8438_v3, %v6074_v2  ;;  %v8418_v30 = vld [vmem:[%s13332_s3 + $0x194] sm:$0xf]  ;;  %v10193_v38 = vpop.f32.mrf.mxu3  ;;  %v10221_v53 = vpop.f32.mrf.mxu1 }
  0xc1   : > { %v8502_v11 = vld [vmem:[%s13332_s3 + $0x42c] sm:$0xf0]  ;;  %v6460_v1 = vld [vmem:[%s13332_s3 + $0x530] sm:$0xf0] }
  0xc2   : > { %2413 = vmatpush.bf16.msra.mxu3 %v6715_v31  ;;  %2386 = vmatpush.bf16.msra.mxu1 %v6171_v39  ;;  %v6586_v12 = vld [vmem:[%s13332_s3 + $0x610] sm:$0xf]  ;;  %v6331_v26 = vor.u32 %v8502_v11, %v6330_v10  ;;  %v6012_v31 = vld [vmem:[%s13332_s3 + $0x1b0] sm:$0xf0]  ;;  %v5951_v10 = vor.u32 %v8402_v58, %v5948_v59 }
  0xc3   : > { %v8566_v16 = vld [vmem:[%s13332_s3 + $0x62c] sm:$0xf0]  ;;  %v6524_v39 = vld [vmem:[%s13332_s3 + $0x5b0] sm:$0xf0] }
  0xc4   : > { %2400 = vmatpush.bf16.msra.mxu2 %v6427_v42  ;;  %2373 = vmatpush.bf16.msra.mxu0 %v5883_v51  ;;  %v6587_v27 = vor.u32 %v8566_v16, %v6586_v12  ;;  %v6015_v42 = vor.u32 %v8418_v30, %v6012_v31  ;;  %v6527_v48 = vor.u32 %v8546_v37, %v6524_v39  ;;  %v6236_v51 = vld [vmem:[%s13332_s3 + $0x370] sm:$0xf0] }
  0xc5   : > { %v6239_v57 = vor.u32 %v8474_v50, %v6236_v51  ;;  %v8594_v2 = vld [vmem:[%s13332_s3 + $0x714] sm:$0xf] }
  0xc6   : > { %2414 = vmatpush.bf16.msra.mxu3 %v6683_v43  ;;  %2387 = vmatpush.bf16.msra.mxu1 %v6139_v52  ;;  %v6271_v43 = vor.u32 %v8482_v35, %v6268_v36  ;;  %v8538_v52 = vld [vmem:[%s13332_s3 + $0x554] sm:$0xf] }
  0xc7   : > { %v6495_v60 = vor.u32 %v8538_v52, %v6492_v54  ;;  %v6716_v3 = vld [vmem:[%s13332_s3 + $0x730] sm:$0xf0] }
  0xc8   : > { %2401 = vmatpush.bf16.msra.mxu2 %v6395_v55  ;;  %2374 = vmatpush.bf16.msra.mxu0 %v5851_v63  ;;  %v8602_v55 = vld [vmem:[%s13332_s3 + $0x754] sm:$0xf]  ;;  %v6719_v18 = vor.u32 %v8594_v2, %v6716_v3  ;;  %v10290_v25 = vpop.f32.mrf.mxu1 }
  0xc9   : > { %v6204_v63 = vld [vmem:[%s13332_s3 + $0x330] sm:$0xf0] }
  0xca   : > { %2415 = vmatpush.bf16.msra.mxu3 %v6651_v56  ;;  %2388 = vmatpush.bf16.msra.mxu1 %v6107_v0  ;;  %v6748_v56 = vld [vmem:[%s13332_s3 + $0x770] sm:$0xf0]  ;;  %v6207_v11 = vor.u32 %v8466_v62, %v6204_v63  ;;  %v10356_v62 = vpop.f32.mrf.mxu0 }
  0xcb   : > { %v6751_v61 = vor.u32 %v8602_v55, %v6748_v56  ;;  %v8530_v0 = vld [vmem:[%s13332_s3 + $0x514] sm:$0xf] }
  0xcc   : > { %2402 = vmatpush.bf16.msra.mxu2 %v6363_v5  ;;  %2375 = vmatpush.bf16.msra.mxu0 %v5819_v22  ;;  %v10260_v5 = vpop.f32.mrf.mxu2  ;;  %v8394_v12 = vld [vmem:[%s13332_s3 + $0xd4] sm:$0xf]  ;;  %v6463_v17 = vor.u32 %v8530_v0, %v6460_v1 }
  0xcd   : > { %v5916_v16 = vld [vmem:[%s13332_s3 + $0xf0] sm:$0xf0] }
  0xce   : > { %2416 = vmatpush.bf16.msra.mxu3 %v6619_v6  ;;  %2389 = vmatpush.bf16.msra.mxu1 %v6075_v23  ;;  %v10262_v6 = vpop.f32.mrf.mxu3  ;;  %v8458_v19 = vld [vmem:[%s13332_s3 + $0x2d4] sm:$0xf] }
  0xcf   : > { %2376 = vmatmul.bf16.vlgmr.msra.gmra.mxu0 %v9395_v7  ;;  %v6172_v20 = vld [vmem:[%s13332_s3 + $0x2f0] sm:$0xf0] }
  0xd0   : > { %2403 = vmatpush.bf16.msra.mxu2 %v6331_v26  ;;  %2424 = vmatpush.bf16.msrb.mxu0 %v6047_v28  ;;  %v6428_v22 = vld [vmem:[%s13332_s3 + $0x4f0] sm:$0xf0]  ;;  %v5919_v26 = vor.u32 %v8394_v12, %v5916_v16  ;;  %v6050_v12 = vld [vmem:[%s13332_s3 + $0x1d8] sm:$0xf] }
  0xd1   : > { %2390 = vmatmul.bf16.vlgmr.msra.gmra.mxu1 %v9408_v13  ;;  %v8586_v23 = vld [vmem:[%s13332_s3 + $0x6d4] sm:$0xf]  ;;  %v6431_v30 = vor.u32 %v8522_v21, %v6428_v22  ;;  %v8431_v16 = vld [vmem:[%s13332_s3 + $0x1f4] sm:$0xf0] }
  0xd2   : > { %2417 = vmatpush.bf16.msra.mxu3 %v6587_v27  ;;  %2438 = vmatpush.bf16.msrb.mxu1 %v6303_v29  ;;  %v6175_v27 = vor.u32 %v8458_v19, %v6172_v20  ;;  %v8386_v28 = vld [vmem:[%s13332_s3 + $0x94] sm:$0xf]  ;;  %v6687_v31 = vor.u32 %v8586_v23, %v6684_v24  ;;  %v6562_v19 = vld [vmem:[%s13332_s3 + $0x5d8] sm:$0xf] }
  0xd3   : > { %2404 = vmatmul.bf16.vlgmr.msra.gmra.mxu2 %v9397_v9  ;;  %v5884_v29 = vld [vmem:[%s13332_s3 + $0xb0] sm:$0xf0]  ;;  %v8559_v22 = vld [vmem:[%s13332_s3 + $0x5f4] sm:$0xf0] }
  0xd4   : > { %2452 = vmatpush.bf16.msrb.mxu2 %v6559_v33  ;;  %2425 = vmatpush.bf16.msrb.mxu0 %v6015_v42  ;;  %v8450_v33 = vld [vmem:[%s13332_s3 + $0x294] sm:$0xf]  ;;  %v5887_v40 = vor.u32 %v8386_v28, %v5884_v29  ;;  %v10322_v44 = vpop.f32.mrf.mxu2  ;;  %v6818_v23 = vld [vmem:[%s13332_s3 + $0x7d8] sm:$0xf]  ;;  %v6051_v28 = vor.u32 %v8431_v16, %v6050_v12 }
  0xd5   : > { %2418 = vmatmul.bf16.vlgmr.msra.gmra.mxu3 %v9410_v14  ;;  %v8514_v35 = vld [vmem:[%s13332_s3 + $0x494] sm:$0xf]  ;;  %v8623_v24 = vld [vmem:[%s13332_s3 + $0x7f4] sm:$0xf0] }
  0xd6   : > { %2466 = vmatpush.bf16.msrb.mxu3 %v6815_v34  ;;  %2439 = vmatpush.bf16.msrb.mxu1 %v6271_v43  ;;  %v6140_v34 = vld [vmem:[%s13332_s3 + $0x2b0] sm:$0xf0]  ;;  %v10333_v52 = vpop.f32.mrf.mxu3  ;;  %v6210_v12 = vld [vmem:[%s13332_s3 + $0x318] sm:$0xf] }
  0xd7   : > { %v6396_v36 = vld [vmem:[%s13332_s3 + $0x4b0] sm:$0xf0]  ;;  %v6143_v41 = vor.u32 %v8450_v33, %v6140_v34  ;;  %v6563_v34 = vor.u32 %v8559_v22, %v6562_v19  ;;  %v8471_v16 = vld [vmem:[%s13332_s3 + $0x334] sm:$0xf0] }
  0xd8   : > { %2453 = vmatpush.bf16.msrb.mxu2 %v6527_v48  ;;  %2426 = vmatpush.bf16.msrb.mxu0 %v5983_v45  ;;  %v8578_v37 = vld [vmem:[%s13332_s3 + $0x694] sm:$0xf]  ;;  %v6399_v46 = vor.u32 %v8514_v35, %v6396_v36  ;;  %v6819_v35 = vor.u32 %v8623_v24, %v6818_v23  ;;  %v6274_v36 = vld [vmem:[%s13332_s3 + $0x398] sm:$0xf]  ;;  %v6211_v24 = vor.u32 %v8471_v16, %v6210_v12 }
  0xd9   : > { %v6652_v39 = vld [vmem:[%s13332_s3 + $0x6b0] sm:$0xf0]  ;;  %v6722_v19 = vld [vmem:[%s13332_s3 + $0x718] sm:$0xf] }
  0xda   : > { %2467 = vmatpush.bf16.msrb.mxu3 %v6783_v49  ;;  %2440 = vmatpush.bf16.msrb.mxu1 %v6239_v57  ;;  %v8378_v42 = vld [vmem:[%s13332_s3 + $0x54] sm:$0xf]  ;;  %v6655_v48 = vor.u32 %v8578_v37, %v6652_v39  ;;  %v8487_v37 = vld [vmem:[%s13332_s3 + $0x3b4] sm:$0xf0] }
  0xdb   : > { %v5852_v43 = vld [vmem:[%s13332_s3 + $0x70] sm:$0xf0]  ;;  %v6530_v39 = vld [vmem:[%s13332_s3 + $0x598] sm:$0xf] }
  0xdc   : > { %2454 = vmatpush.bf16.msrb.mxu2 %v6495_v60  ;;  %2427 = vmatpush.bf16.msrb.mxu0 %v5951_v10  ;;  %v8442_v49 = vld [vmem:[%s13332_s3 + $0x254] sm:$0xf]  ;;  %v5855_v57 = vor.u32 %v8378_v42, %v5852_v43  ;;  %v10367_v10 = vpop.f32.mrf.mxu1  ;;  %v10402_v33 = vpop.f32.mrf.mxu2  ;;  %v6786_v42 = vld [vmem:[%s13332_s3 + $0x798] sm:$0xf] }
  0xdd   : > { %v6108_v50 = vld [vmem:[%s13332_s3 + $0x270] sm:$0xf0]  ;;  %v8615_v43 = vld [vmem:[%s13332_s3 + $0x7b4] sm:$0xf0] }
  0xde   : > { %2468 = vmatpush.bf16.msrb.mxu3 %v6751_v61  ;;  %2441 = vmatpush.bf16.msrb.mxu1 %v6207_v11  ;;  %v8506_v51 = vld [vmem:[%s13332_s3 + $0x454] sm:$0xf]  ;;  %v6111_v58 = vor.u32 %v8442_v49, %v6108_v50  ;;  %v5986_v49 = vld [vmem:[%s13332_s3 + $0x158] sm:$0xf] }
  0xdf   : > { %v6364_v54 = vld [vmem:[%s13332_s3 + $0x470] sm:$0xf0]  ;;  %v8415_v50 = vld [vmem:[%s13332_s3 + $0x174] sm:$0xf0] }
  0xe0   : > { %2455 = vmatpush.bf16.msrb.mxu2 %v6463_v17  ;;  %2428 = vmatpush.bf16.msrb.mxu0 %v5919_v26  ;;  %v8570_v55 = vld [vmem:[%s13332_s3 + $0x654] sm:$0xf]  ;;  %v6367_v63 = vor.u32 %v8506_v51, %v6364_v54  ;;  %v6306_v17 = vld [vmem:[%s13332_s3 + $0x3d8] sm:$0xf]  ;;  %v10430_v51 = vpop.f32.mrf.mxu0 }
  0xe1   : > { %v6620_v56 = vld [vmem:[%s13332_s3 + $0x670] sm:$0xf0]  ;;  %v8447_v12 = vld [vmem:[%s13332_s3 + $0x274] sm:$0xf0] }
  0xe2   : > { %2469 = vmatpush.bf16.msrb.mxu3 %v6719_v18  ;;  %2442 = vmatpush.bf16.msrb.mxu1 %v6175_v27  ;;  %v8370_v45 = vld [vmem:[%s13332_s3 + $0x14] sm:$0xf]  ;;  %v6623_v0 = vor.u32 %v8570_v55, %v6620_v56  ;;  %v8495_v18 = vld [vmem:[%s13332_s3 + $0x3f4] sm:$0xf0]  ;;  %v6787_v55 = vor.u32 %v8615_v43, %v6786_v42 }
  0xe3   : > { %v5820_v59 = vld [vmem:[%s13332_s3 + $0x30] sm:$0xf0]  ;;  %v6307_v29 = vor.u32 %v8495_v18, %v6306_v17  ;;  %v6242_v56 = vld [vmem:[%s13332_s3 + $0x358] sm:$0xf] }
  0xe4   : > { %2456 = vmatpush.bf16.msrb.mxu2 %v6431_v30  ;;  %2429 = vmatpush.bf16.msrb.mxu0 %v5887_v40  ;;  %v8434_v60 = vld [vmem:[%s13332_s3 + $0x214] sm:$0xf]  ;;  %v5823_v20 = vor.u32 %v8370_v45, %v5820_v59  ;;  %v6018_v30 = vld [vmem:[%s13332_s3 + $0x198] sm:$0xf]  ;;  %v10413_v40 = vpop.f32.mrf.mxu3 }
  0xe5   : > { %v6076_v61 = vld [vmem:[%s13332_s3 + $0x230] sm:$0xf0]  ;;  %v8479_v45 = vld [vmem:[%s13332_s3 + $0x374] sm:$0xf0] }
  0xe6   : > { %2470 = vmatpush.bf16.msrb.mxu3 %v6687_v31  ;;  %2443 = vmatpush.bf16.msrb.mxu1 %v6143_v41  ;;  %v8498_v1 = vld [vmem:[%s13332_s3 + $0x414] sm:$0xf]  ;;  %v6079_v21 = vor.u32 %v8434_v60, %v6076_v61  ;;  %v8423_v31 = vld [vmem:[%s13332_s3 + $0x1b4] sm:$0xf0] }
  0xe7   : > { %v6332_v2 = vld [vmem:[%s13332_s3 + $0x430] sm:$0xf0]  ;;  %v8551_v41 = vld [vmem:[%s13332_s3 + $0x5b4] sm:$0xf0] }
  0xe8   : > { %2457 = vmatpush.bf16.msrb.mxu2 %v6399_v46  ;;  %v8562_v3 = vld [vmem:[%s13332_s3 + $0x614] sm:$0xf]  ;;  %2430 = vmatpush.bf16.msrb.mxu0 %v5855_v57  ;;  %v6335_v26 = vor.u32 %v8498_v1, %v6332_v2  ;;  %v6019_v46 = vor.u32 %v8423_v31, %v6018_v30  ;;  %v6531_v54 = vor.u32 %v8551_v41, %v6530_v39  ;;  %v6498_v57 = vld [vmem:[%s13332_s3 + $0x558] sm:$0xf]  ;;  %v10508_v39 = vpop.f32.mrf.mxu0 }
  0xe9   : > { %v6588_v11 = vld [vmem:[%s13332_s3 + $0x630] sm:$0xf0]  ;;  %v8543_v59 = vld [vmem:[%s13332_s3 + $0x574] sm:$0xf0] }
  0xea   : > { %2471 = vmatpush.bf16.msrb.mxu3 %v6655_v48  ;;  %2444 = vmatpush.bf16.msrb.mxu1 %v6111_v58  ;;  %v6591_v27 = vor.u32 %v8562_v3, %v6588_v11  ;;  %v6275_v48 = vor.u32 %v8487_v37, %v6274_v36  ;;  %v10441_v58 = vpop.f32.mrf.mxu1  ;;  %v6754_v60 = vld [vmem:[%s13332_s3 + $0x758] sm:$0xf]  ;;  %v6499_v3 = vor.u32 %v8543_v59, %v6498_v57 }
  0xeb   : > { %v8607_v61 = vld [vmem:[%s13332_s3 + $0x774] sm:$0xf0] }
  0xec   : > { %2458 = vmatpush.bf16.msrb.mxu2 %v6367_v63  ;;  %2431 = vmatpush.bf16.msrb.mxu0 %v5823_v20  ;;  %v5987_v63 = vor.u32 %v8415_v50, %v5986_v49  ;;  %v5954_v1 = vld [vmem:[%s13332_s3 + $0x118] sm:$0xf]  ;;  %v6755_v11 = vor.u32 %v8607_v61, %v6754_v60  ;;  %v10482_v22 = vpop.f32.mrf.mxu3 }
  0xed   : > { %v8407_v2 = vld [vmem:[%s13332_s3 + $0x134] sm:$0xf0] }
  0xee   : > { %2472 = vmatpush.bf16.msrb.mxu3 %v6623_v0  ;;  %2445 = vmatpush.bf16.msrb.mxu1 %v6079_v21  ;;  %v6243_v0 = vor.u32 %v8479_v45, %v6242_v56  ;;  %v6466_v17 = vld [vmem:[%s13332_s3 + $0x518] sm:$0xf]  ;;  %v10480_v21 = vpop.f32.mrf.mxu2  ;;  %v5955_v23 = vor.u32 %v8407_v2, %v5954_v1 }
  0xef   : > { %2432 = vmatmul.bf16.vlgmr.msrb.gmra.mxu0 %v9395_v7  ;;  %v8535_v18 = vld [vmem:[%s13332_s3 + $0x534] sm:$0xf0] }
  0xf0   : > { %2459 = vmatpush.bf16.msrb.mxu2 %v6335_v26  ;;  %2480 = vmatpush.bf16.msra.mxu0 %v6051_v28  ;;  %v8599_v20 = vld [vmem:[%s13332_s3 + $0x734] sm:$0xf0]  ;;  %v6467_v28 = vor.u32 %v8535_v18, %v6466_v17 }
  0xf1   : > { %2446 = vmatmul.bf16.vlgmr.msrb.gmra.mxu1 %v9408_v13  ;;  %v5922_v26 = vld [vmem:[%s13332_s3 + $0xd8] sm:$0xf] }
  0xf2   : > { %2473 = vmatpush.bf16.msrb.mxu3 %v6591_v27  ;;  %2494 = vmatpush.bf16.msra.mxu1 %v6307_v29  ;;  %v8399_v27 = vld [vmem:[%s13332_s3 + $0xf4] sm:$0xf0]  ;;  %v6723_v29 = vor.u32 %v8599_v20, %v6722_v19  ;;  %v10510_v41 = vpop.f32.mrf.mxu1 }
  0xf3   : > { %2460 = vmatmul.bf16.vlgmr.msrb.gmra.mxu2 %v9397_v9  ;;  %v6178_v30 = vld [vmem:[%s13332_s3 + $0x2d8] sm:$0xf]  ;;  %v5923_v42 = vor.u32 %v8399_v27, %v5922_v26 }
  0xf4   : > { %2508 = vmatpush.bf16.msra.mxu2 %v6563_v34  ;;  %2481 = vmatpush.bf16.msra.mxu0 %v6019_v46  ;;  %v8463_v31 = vld [vmem:[%s13332_s3 + $0x2f4] sm:$0xf0]  ;;  %v10553_v17 = vpop.f32.mrf.mxu3 }
  0xf5   : > { %2474 = vmatmul.bf16.vlgmr.msrb.gmra.mxu3 %v9410_v14  ;;  %v6434_v34 = vld [vmem:[%s13332_s3 + $0x4d8] sm:$0xf]  ;;  %v6179_v43 = vor.u32 %v8463_v31, %v6178_v30 }
  0xf6   : > { %2522 = vmatpush.bf16.msra.mxu3 %v6819_v35  ;;  %2495 = vmatpush.bf16.msra.mxu1 %v6275_v48  ;;  %v8527_v35 = vld [vmem:[%s13332_s3 + $0x4f4] sm:$0xf0]  ;;  %v10542_v1 = vpop.f32.mrf.mxu2 }
  0xf7   : > { %v6690_v36 = vld [vmem:[%s13332_s3 + $0x6d8] sm:$0xf]  ;;  %v6435_v49 = vor.u32 %v8527_v35, %v6434_v34 }
  0xf8   : > { %2509 = vmatpush.bf16.msra.mxu2 %v6531_v54  ;;  %2482 = vmatpush.bf16.msra.mxu0 %v5987_v63  ;;  %v8591_v37 = vld [vmem:[%s13332_s3 + $0x6f4] sm:$0xf0] }
  0xf9   : > { %v5890_v46 = vld [vmem:[%s13332_s3 + $0x98] sm:$0xf]  ;;  %v6691_v50 = vor.u32 %v8591_v37, %v6690_v36 }
  0xfa   : > { %2523 = vmatpush.bf16.msra.mxu3 %v6787_v55  ;;  %2496 = vmatpush.bf16.msra.mxu1 %v6243_v0  ;;  %v8391_v48 = vld [vmem:[%s13332_s3 + $0xb4] sm:$0xf0]  ;;  %v10569_v26 = vpop.f32.mrf.mxu1 }
  0xfb   : > { %v6146_v54 = vld [vmem:[%s13332_s3 + $0x298] sm:$0xf]  ;;  %v5891_v60 = vor.u32 %v8391_v48, %v5890_v46  ;;  %v8427_v46 = vld [vmem:[%s13332_s3 + $0x1dc] sm:$0xf] }
  0xfc   : > { %2510 = vmatpush.bf16.msra.mxu2 %v6499_v3  ;;  %2483 = vmatpush.bf16.msra.mxu0 %v5955_v23  ;;  %v8455_v55 = vld [vmem:[%s13332_s3 + $0x2b4] sm:$0xf0]  ;;  %v10564_v23 = vpop.f32.mrf.mxu0  ;;  %v6052_v48 = vld [vmem:[%s13332_s3 + $0x1f8] sm:$0xf0] }
  0xfd   : > { %v6402_v56 = vld [vmem:[%s13332_s3 + $0x498] sm:$0xf]  ;;  %v6147_v61 = vor.u32 %v8455_v55, %v6146_v54  ;;  %v8555_v54 = vld [vmem:[%s13332_s3 + $0x5dc] sm:$0xf] }
  0xfe   : > { %2524 = vmatpush.bf16.msra.mxu3 %v6755_v11  ;;  %2497 = vmatpush.bf16.msra.mxu1 %v6211_v24  ;;  %v8519_v45 = vld [vmem:[%s13332_s3 + $0x4b4] sm:$0xf0] }
  0xff   : > { %v6658_v57 = vld [vmem:[%s13332_s3 + $0x698] sm:$0xf]  ;;  %v6403_v2 = vor.u32 %v8519_v45, %v6402_v56  ;;  %v6564_v45 = vld [vmem:[%s13332_s3 + $0x5f8] sm:$0xf0] }
 0x100   : > { %2511 = vmatpush.bf16.msra.mxu2 %v6467_v28  ;;  %v8583_v59 = vld [vmem:[%s13332_s3 + $0x6b4] sm:$0xf0]  ;;  %2484 = vmatpush.bf16.msra.mxu0 %v5923_v42 }
 0x101   : > { %v5858_v63 = vld [vmem:[%s13332_s3 + $0x58] sm:$0xf]  ;;  %v6659_v3 = vor.u32 %v8583_v59, %v6658_v57  ;;  %v8619_v57 = vld [vmem:[%s13332_s3 + $0x7dc] sm:$0xf] }
 0x102   : > { %2525 = vmatpush.bf16.msra.mxu3 %v6723_v29  ;;  %2498 = vmatpush.bf16.msra.mxu1 %v6179_v43  ;;  %v8383_v0 = vld [vmem:[%s13332_s3 + $0x74] sm:$0xf0]  ;;  %v6820_v59 = vld [vmem:[%s13332_s3 + $0x7f8] sm:$0xf0] }
 0x103   : > { %v6114_v11 = vld [vmem:[%s13332_s3 + $0x258] sm:$0xf]  ;;  %v5859_v27 = vor.u32 %v8383_v0, %v5858_v63  ;;  %v10618_v0 = vpop.f32.mrf.mxu3 }
 0x104   : > { %2512 = vmatpush.bf16.msra.mxu2 %v6435_v49  ;;  %v6370_v16 = vld [vmem:[%s13332_s3 + $0x458] sm:$0xf]  ;;  %2485 = vmatpush.bf16.msra.mxu0 %v5891_v60  ;;  %v6115_v28 = vor.u32 %v8447_v12, %v6114_v11  ;;  %v8491_v49 = vld [vmem:[%s13332_s3 + $0x3dc] sm:$0xf]  ;;  %v10616_v60 = vpop.f32.mrf.mxu2 }
 0x105   : > { %v8511_v18 = vld [vmem:[%s13332_s3 + $0x474] sm:$0xf0]  ;;  %v8419_v11 = vld [vmem:[%s13332_s3 + $0x19c] sm:$0xf] }
 0x106   : > { %2526 = vmatpush.bf16.msra.mxu3 %v6691_v50  ;;  %v6626_v19 = vld [vmem:[%s13332_s3 + $0x658] sm:$0xf]  ;;  %2499 = vmatpush.bf16.msra.mxu1 %v6147_v61  ;;  %v6371_v34 = vor.u32 %v8511_v18, %v6370_v16  ;;  %v6308_v50 = vld [vmem:[%s13332_s3 + $0x3f8] sm:$0xf0]  ;;  %v6567_v16 = vor.u32 %v8555_v54, %v6564_v45  ;;  %v6823_v18 = vor.u32 %v8619_v57, %v6820_v59 }
 0x107   : > { %v8575_v20 = vld [vmem:[%s13332_s3 + $0x674] sm:$0xf0]  ;;  %v6020_v12 = vld [vmem:[%s13332_s3 + $0x1b8] sm:$0xf0] }
 0x108   : > { %v5826_v24 = vld [vmem:[%s13332_s3 + $0x18] sm:$0xf]  ;;  %2513 = vmatpush.bf16.msra.mxu2 %v6403_v2  ;;  %v6627_v35 = vor.u32 %v8575_v20, %v6626_v19  ;;  %2486 = vmatpush.bf16.msra.mxu0 %v5859_v27  ;;  %v6055_v2 = vor.u32 %v8427_v46, %v6052_v48  ;;  %v8483_v19 = vld [vmem:[%s13332_s3 + $0x39c] sm:$0xf] }
 0x109   : > { %v8375_v29 = vld [vmem:[%s13332_s3 + $0x34] sm:$0xf0]  ;;  %v6276_v20 = vld [vmem:[%s13332_s3 + $0x3b8] sm:$0xf0] }
 0x10a   : > { %v6082_v30 = vld [vmem:[%s13332_s3 + $0x218] sm:$0xf]  ;;  %2527 = vmatpush.bf16.msra.mxu3 %v6659_v3  ;;  %2500 = vmatpush.bf16.msra.mxu1 %v6115_v28  ;;  %v5827_v55 = vor.u32 %v8375_v29, %v5826_v24  ;;  %v6311_v3 = vor.u32 %v8491_v49, %v6308_v50  ;;  %v8547_v24 = vld [vmem:[%s13332_s3 + $0x59c] sm:$0xf] }
 0x10b   : > { %v8439_v31 = vld [vmem:[%s13332_s3 + $0x234] sm:$0xf0]  ;;  %v6532_v27 = vld [vmem:[%s13332_s3 + $0x5b8] sm:$0xf0] }
 0x10c   : > { %v6338_v36 = vld [vmem:[%s13332_s3 + $0x418] sm:$0xf]  ;;  %v6083_v56 = vor.u32 %v8439_v31, %v6082_v30  ;;  %2514 = vmatpush.bf16.msra.mxu2 %v6371_v34  ;;  %2487 = vmatpush.bf16.msra.mxu0 %v5827_v55  ;;  %v8611_v28 = vld [vmem:[%s13332_s3 + $0x79c] sm:$0xf]  ;;  %v2154_v30 = vadd.f32 %v10430_v51, %v10136_v4  ;;  %v2211_v31 = vpop.f32.mrf.mxu0  ;;  %v2156_v34 = vadd.f32 %v10508_v39, %v10210_v47  ;;  %v10682_v55 = vld [vmem:[%s13333_s4] sm:$0xff] }
 0x10d   : > { %v8503_v37 = vld [vmem:[%s13332_s3 + $0x434] sm:$0xf0]  ;;  %v6788_v29 = vld [vmem:[%s13332_s3 + $0x7b8] sm:$0xf0]  ;;  %v6535_v51 = vor.u32 %v8547_v24, %v6532_v27  ;;  %v2212_v24 = vadd.f32 %v2211_v31, %v10221_v53 }
 0x10e   : > { %v6594_v42 = vld [vmem:[%s13332_s3 + $0x618] sm:$0xf]  ;;  %2528 = vmatpush.bf16.msra.mxu3 %v6627_v35  ;;  %v6339_v61 = vor.u32 %v8503_v37, %v6338_v36  ;;  %2501 = vmatpush.bf16.msra.mxu1 %v6083_v56  ;;  %v10648_v35 = vpop.f32.mrf.mxu1  ;;  %v6023_v36 = vor.u32 %v8419_v11, %v6020_v12  ;;  %v6279_v37 = vor.u32 %v8483_v19, %v6276_v20  ;;  %v5988_v4 = vld [vmem:[%s13332_s3 + $0x178] sm:$0xf0] }
 0x10f   : > { %v8567_v43 = vld [vmem:[%s13332_s3 + $0x634] sm:$0xf0]  ;;  %v8475_v47 = vld [vmem:[%s13332_s3 + $0x35c] sm:$0xf]  ;;  %2488 = vmatmul.bf16.vlgmr.msra.gmra.mxu0 %v9395_v7  ;;  %v2168_v54 = vadd.f32 %v10441_v58, %v2154_v30  ;;  %v2170_v56 = vadd.f32 %v10510_v41, %v2156_v34 }
 0x110   : > { %v6595_v63 = vor.u32 %v8567_v43, %v6594_v42  ;;  %2515 = vmatpush.bf16.msra.mxu2 %v6339_v61  ;;  %2536 = vmatpush.bf16.msrb.mxu0 %v6055_v2  ;;  %v8411_v42 = vld [vmem:[%s13332_s3 + $0x15c] sm:$0xf]  ;;  %v6791_v43 = vor.u32 %v8611_v28, %v6788_v29  ;;  %v2210_v61 = vadd.f32 %v10564_v23, %v10147_v15  ;;  %v10703_v15 = vpop.f32.mrf.mxu3 }
 0x111   : > { %v6244_v39 = vld [vmem:[%s13332_s3 + $0x378] sm:$0xf0]  ;;  %2502 = vmatmul.bf16.vlgmr.msra.gmra.mxu1 %v9408_v13  ;;  %v5991_v45 = vor.u32 %v8411_v42, %v5988_v4  ;;  %v2184_v20 = vadd.f32 %v10542_v1, %v2170_v56 }
 0x112   : > { %2529 = vmatpush.bf16.msra.mxu3 %v6595_v63  ;;  %2550 = vmatpush.bf16.msrb.mxu1 %v6311_v3  ;;  %v8539_v46 = vld [vmem:[%s13332_s3 + $0x55c] sm:$0xf]  ;;  %v6247_v57 = vor.u32 %v8475_v47, %v6244_v39  ;;  %v2239_v63 = vpop.f32.mrf.mxu2  ;;  %v2224_v1 = vadd.f32 %v10569_v26, %v2210_v61 }
 0x113   : > { %2516 = vmatmul.bf16.vlgmr.msra.gmra.mxu2 %v9397_v9  ;;  %v6500_v48 = vld [vmem:[%s13332_s3 + $0x578] sm:$0xf0]  ;;  %v2198_v39 = vadd.f32 %v10553_v17, %v2184_v20 }
 0x114   : > { %2564 = vmatpush.bf16.msrb.mxu2 %v6567_v16  ;;  %v8603_v49 = vld [vmem:[%s13332_s3 + $0x75c] sm:$0xf]  ;;  %2537 = vmatpush.bf16.msrb.mxu0 %v6023_v36  ;;  %v6503_v2 = vor.u32 %v8539_v46, %v6500_v48  ;;  %v2182_v16 = vadd.f32 %v10480_v21, %v2168_v54  ;;  %v2265_v27 = vpop.f32.mrf.mxu0  ;;  %v2594_v21 = vperm.slane %v10682_v55, 0  ;;  %v2238_v46 = vadd.f32 %v10616_v60, %v2224_v1 }
 0x115   : > { %v6756_v50 = vld [vmem:[%s13332_s3 + $0x778] sm:$0xf0]  ;;  %2530 = vmatmul.bf16.vlgmr.msra.gmra.mxu3 %v9410_v14  ;;  %v2226_v48 = vadd.f32 %v10648_v35, %v2212_v24 }
 0x116   : > { %2578 = vmatpush.bf16.msrb.mxu3 %v6823_v18  ;;  %2551 = vmatpush.bf16.msrb.mxu1 %v6279_v37  ;;  %v8403_v59 = vld [vmem:[%s13332_s3 + $0x11c] sm:$0xf]  ;;  %v6759_v41 = vor.u32 %v8603_v49, %v6756_v50  ;;  %v2279_v30 = vpop.f32.mrf.mxu1 }
 0x117   : > { %v5956_v58 = vld [vmem:[%s13332_s3 + $0x138] sm:$0xf0]  ;;  %v2240_v60 = vadd.f32 %v2239_v63, %v2226_v48  ;;  %v2595_v63 = vperm.slane %v10682_v55, 1 }
 0x118   : > { %2565 = vmatpush.bf16.msrb.mxu2 %v6535_v51  ;;  %v8467_v3 = vld [vmem:[%s13332_s3 + $0x31c] sm:$0xf]  ;;  %2538 = vmatpush.bf16.msrb.mxu0 %v5991_v45  ;;  %v5959_v28 = vor.u32 %v8403_v59, %v5956_v58  ;;  %v2196_v51 = vadd.f32 %v10482_v22, %v2182_v16  ;;  %v2266_v22 = vadd.f32 %v2265_v27, %v10182_v32 }
 0x119   : > { %v6212_v11 = vld [vmem:[%s13332_s3 + $0x338] sm:$0xf0] }
 0x11a   : > { %2579 = vmatpush.bf16.msrb.mxu3 %v6791_v43  ;;  %v8531_v12 = vld [vmem:[%s13332_s3 + $0x51c] sm:$0xf]  ;;  %2552 = vmatpush.bf16.msrb.mxu1 %v6247_v57  ;;  %v6215_v29 = vor.u32 %v8467_v3, %v6212_v11  ;;  %v2293_v45 = vpop.f32.mrf.mxu2  ;;  %v10765_v61 = vadd.f32 %v2594_v21, %v2196_v51  ;;  %v10774_v11 = vadd.f32 %v2594_v21, %v2198_v39 }
 0x11b   : > { %v6468_v23 = vld [vmem:[%s13332_s3 + $0x538] sm:$0xf0]  ;;  %v2280_v16 = vadd.f32 %v2279_v30, %v2266_v22 }
 0x11c   : > { %v8595_v18 = vld [vmem:[%s13332_s3 + $0x71c] sm:$0xf]  ;;  %2566 = vmatpush.bf16.msrb.mxu2 %v6503_v2  ;;  %v6471_v53 = vor.u32 %v8531_v12, %v6468_v23  ;;  %2539 = vmatpush.bf16.msrb.mxu0 %v5959_v28  ;;  %v2307_v2 = vpop.f32.mrf.mxu3  ;;  %v2252_v12 = vadd.f32 %v10618_v0, %v2238_v46  ;;  %v2267_v23 = vpop.f32.mrf.mxu0  ;;  %v2254_v28 = vadd.f32 %v10703_v15, %v2240_v60 }
 0x11d   : > { %v6724_v19 = vld [vmem:[%s13332_s3 + $0x738] sm:$0xf0] }
 0x11e   : > { %v8395_v34 = vld [vmem:[%s13332_s3 + $0xdc] sm:$0xf]  ;;  %2580 = vmatpush.bf16.msrb.mxu3 %v6759_v41  ;;  %v6727_v31 = vor.u32 %v8595_v18, %v6724_v19  ;;  %2553 = vmatpush.bf16.msrb.mxu1 %v6215_v29  ;;  %v2268_v19 = vadd.f32 %v2267_v23, %v10260_v5  ;;  %v2294_v29 = vadd.f32 %v2293_v45, %v2280_v16  ;;  %v2281_v30 = vpop.f32.mrf.mxu1  ;;  %v8718_v16 = vld [vmem:[%s13334_s5 + $0x2ec] sm:$0xf0] }
 0x11f   : > { %v5924_v36 = vld [vmem:[%s13332_s3 + $0xf8] sm:$0xf0]  ;;  %v2619_v22 = vadd.f32 %v2595_v63, %v2254_v28  ;;  %v8650_v28 = vld [vmem:[%s13334_s5 + $0xcc] sm:$0xf0] }
 0x120   : > { %v8459_v37 = vld [vmem:[%s13332_s3 + $0x2dc] sm:$0xf]  ;;  %v5927_v49 = vor.u32 %v8395_v34, %v5924_v36  ;;  %2567 = vmatpush.bf16.msrb.mxu2 %v6471_v53  ;;  %v2626_v53 = vmax.f32 %v10765_v61, 0.0  ;;  %v7066_v61 = vld [vmem:[%s13334_s5 + $0x1e0] sm:$0xf] }
 0x121   : > { %v6180_v42 = vld [vmem:[%s13332_s3 + $0x2f8] sm:$0xf0]  ;;  %v2635_v23 = vmax.f32 %v2619_v22, 0.0  ;;  %v7162_v22 = vld [vmem:[%s13334_s5 + $0x2a0] sm:$0xf] }
 0x122   : > { %v8523_v4 = vld [vmem:[%s13332_s3 + $0x4dc] sm:$0xf]  ;;  %v6183_v50 = vor.u32 %v8459_v37, %v6180_v42  ;;  %2581 = vmatpush.bf16.msrb.mxu3 %v6727_v31  ;;  %2540 = vmatpush.bf16.msrb.mxu0 %v5927_v49  ;;  %v2634_v37 = vmax.f32 %v10774_v11, 0.0  ;;  %v2611_v42 = vadd.f32 %v2595_v63, %v2252_v12  ;;  %v2308_v49 = vadd.f32 %v2307_v2, %v2294_v29  ;;  %v8686_v63 = vld [vmem:[%s13334_s5 + $0x1ec] sm:$0xf0] }
 0x123   : > { %v6436_v26 = vld [vmem:[%s13332_s3 + $0x4f8] sm:$0xf0]  ;;  %v7194_v12 = vld [vmem:[%s13334_s5 + $0x2e0] sm:$0xf] }
 0x124   : > { %v8587_v43 = vld [vmem:[%s13332_s3 + $0x6dc] sm:$0xf]  ;;  %v6439_v32 = vor.u32 %v8523_v4, %v6436_v26  ;;  %2554 = vmatpush.bf16.msrb.mxu1 %v6183_v50  ;;  %v2596_v4 = vperm.slane %v10682_v55, 2  ;;  %v2282_v26 = vadd.f32 %v2281_v30, %v2268_v19  ;;  %v2627_v2 = vmax.f32 %v2611_v42, 0.0  ;;  %v7050_v29 = vld [vmem:[%s13334_s5 + $0x1c0] sm:$0xf] }
 0x125   : > { %v6692_v47 = vld [vmem:[%s13332_s3 + $0x6f8] sm:$0xf0]  ;;  %v8682_v30 = vld [vmem:[%s13334_s5 + $0x1cc] sm:$0xf0]  ;;  %v2642_v42 = vmax.f32 %v2626_v53, %v2634_v37  ;;  %v7034_v37 = vld [vmem:[%s13334_s5 + $0x1a0] sm:$0xf] }
 0x126   : > { %v8387_v54 = vld [vmem:[%s13332_s3 + $0x9c] sm:$0xf]  ;;  %v6695_v35 = vor.u32 %v8587_v43, %v6692_v47  ;;  %2568 = vmatpush.bf16.msrb.mxu2 %v6439_v32 }
 0x127   : > { %v5892_v56 = vld [vmem:[%s13332_s3 + $0xb8] sm:$0xf0] }
 0x128   : > { %v8451_v17 = vld [vmem:[%s13332_s3 + $0x29c] sm:$0xf]  ;;  %v5895_v18 = vor.u32 %v8387_v54, %v5892_v56  ;;  %2582 = vmatpush.bf16.msrb.mxu3 %v6695_v35  ;;  %v2295_v54 = vpop.f32.mrf.mxu2  ;;  %v2309_v35 = vpop.f32.mrf.mxu3 }
 0x129   : > { %v6148_v57 = vld [vmem:[%s13332_s3 + $0x2b8] sm:$0xf0]  ;;  %v2296_v32 = vadd.f32 %v2295_v54, %v2282_v26  ;;  %v8746_v54 = vld [vmem:[%s13334_s5 + $0x3cc] sm:$0xf0] }
 0x12a   : > { %v8515_v59 = vld [vmem:[%s13332_s3 + $0x49c] sm:$0xf]  ;;  %v6151_v20 = vor.u32 %v8451_v17, %v6148_v57  ;;  %2541 = vmatpush.bf16.msrb.mxu0 %v5895_v18  ;;  %v2612_v18 = vadd.f32 %v2596_v4, %v2308_v49 }
 0x12b   : > { %v6404_v58 = vld [vmem:[%s13332_s3 + $0x4b8] sm:$0xf0] }
 0x12c   : > { %v8579_v41 = vld [vmem:[%s13332_s3 + $0x69c] sm:$0xf]  ;;  %v6407_v24 = vor.u32 %v8515_v59, %v6404_v58  ;;  %2555 = vmatpush.bf16.msrb.mxu1 %v6151_v20  ;;  %v6938_v59 = vld [vmem:[%s13334_s5 + $0xe0] sm:$0xf]  ;;  %v8654_v58 = vld [vmem:[%s13334_s5 + $0xec] sm:$0xf0] }
 0x12d   : > { %v6660_v3 = vld [vmem:[%s13332_s3 + $0x6b8] sm:$0xf0] }
 0x12e   : > { %v8379_v27 = vld [vmem:[%s13332_s3 + $0x5c] sm:$0xf]  ;;  %v6663_v5 = vor.u32 %v8579_v41, %v6660_v3  ;;  %2569 = vmatpush.bf16.msrb.mxu2 %v6407_v24  ;;  %v2310_v41 = vadd.f32 %v2309_v35, %v2296_v32  ;;  %v8642_v32 = vld [vmem:[%s13334_s5 + $0x8c] sm:$0xf0]  ;;  %v7018_v35 = vld [vmem:[%s13334_s5 + $0x180] sm:$0xf] }
 0x12f   : > { %v5860_v21 = vld [vmem:[%s13332_s3 + $0x78] sm:$0xf0] }
 0x130   : > { %v8443_v0 = vld [vmem:[%s13332_s3 + $0x25c] sm:$0xf]  ;;  %v5863_v51 = vor.u32 %v8379_v27, %v5860_v21  ;;  %2583 = vmatpush.bf16.msrb.mxu3 %v6663_v5  ;;  %v2620_v24 = vadd.f32 %v2596_v4, %v2310_v41  ;;  %v6939_v27 = vor.u32 %v8654_v58, %v6938_v59  ;;  %v7067_v21 = vor.u32 %v8686_v63, %v7066_v61  ;;  %v7146_v59 = vld [vmem:[%s13334_s5 + $0x280] sm:$0xf]  ;;  %v8706_v61 = vld [vmem:[%s13334_s5 + $0x28c] sm:$0xf0] }
 0x131   : > { %v6116_v34 = vld [vmem:[%s13332_s3 + $0x278] sm:$0xf0]  ;;  %v7195_v5 = vor.u32 %v8718_v16, %v7194_v12  ;;  %v2649_v4 = vmax.f32 %v2627_v2, %v2635_v23  ;;  %v7290_v63 = vld [vmem:[%s13334_s5 + $0x3a0] sm:$0xf]  ;;  %v8742_v2 = vld [vmem:[%s13334_s5 + $0x3ac] sm:$0xf0]  ;;  %v2335_v23 = vpop.f32.mrf.mxu1 }
 0x132   : > { %v8507_v36 = vld [vmem:[%s13332_s3 + $0x45c] sm:$0xf]  ;;  %v6119_v43 = vor.u32 %v8443_v0, %v6116_v34  ;;  %2542 = vmatpush.bf16.msrb.mxu0 %v5863_v51  ;;  %v6922_v0 = vld [vmem:[%s13334_s5 + $0xc0] sm:$0xf]  ;;  %v2628_v51 = vmax.f32 %v2612_v18, 0.0 }
 0x133   : > { %v6372_v1 = vld [vmem:[%s13332_s3 + $0x478] sm:$0xf0]  ;;  %v7178_v34 = vld [vmem:[%s13334_s5 + $0x2c0] sm:$0xf]  ;;  %v6923_v26 = vor.u32 %v8650_v28, %v6922_v0  ;;  %v7291_v28 = vor.u32 %v8742_v2, %v7290_v63  ;;  %v8730_v2 = vld [vmem:[%s13334_s5 + $0x34c] sm:$0xf0] }
 0x134   : > { %v8571_v15 = vld [vmem:[%s13332_s3 + $0x65c] sm:$0xf]  ;;  %v6375_v47 = vor.u32 %v8507_v36, %v6372_v1  ;;  %2556 = vmatpush.bf16.msrb.mxu1 %v6119_v43  ;;  %v8714_v36 = vld [vmem:[%s13334_s5 + $0x2cc] sm:$0xf0]  ;;  %v2636_v1 = vmax.f32 %v2620_v24, 0.0  ;;  %v7051_v43 = vor.u32 %v8682_v30, %v7050_v29  ;;  %v7147_v24 = vor.u32 %v8706_v61, %v7146_v59 }
 0x135   : > { %v6628_v31 = vld [vmem:[%s13332_s3 + $0x678] sm:$0xf0]  ;;  %v7179_v53 = vor.u32 %v8714_v36, %v7178_v34  ;;  %v6874_v18 = vld [vmem:[%s13334_s5 + $0x60] sm:$0xf]  ;;  %v8738_v34 = vld [vmem:[%s13334_s5 + $0x38c] sm:$0xf0] }
 0x136   : > { %v8371_v39 = vld [vmem:[%s13332_s3 + $0x1c] sm:$0xf]  ;;  %v6631_v50 = vor.u32 %v8571_v15, %v6628_v31  ;;  %2570 = vmatpush.bf16.msrb.mxu2 %v6375_v47  ;;  %v7322_v15 = vld [vmem:[%s13334_s5 + $0x3e0] sm:$0xf]  ;;  %v8750_v31 = vld [vmem:[%s13334_s5 + $0x3ec] sm:$0xf0] }
 0x137   : > { %v5828_v46 = vld [vmem:[%s13332_s3 + $0x38] sm:$0xf0]  ;;  %v6906_v47 = vld [vmem:[%s13334_s5 + $0xa0] sm:$0xf]  ;;  %v7323_v49 = vor.u32 %v8750_v31, %v7322_v15  ;;  %v8694_v61 = vld [vmem:[%s13334_s5 + $0x22c] sm:$0xf0] }
 0x138   : > { %v8435_v48 = vld [vmem:[%s13332_s3 + $0x21c] sm:$0xf]  ;;  %v5831_v3 = vor.u32 %v8371_v39, %v5828_v46  ;;  %2584 = vmatpush.bf16.msrb.mxu3 %v6631_v50  ;;  %v8646_v39 = vld [vmem:[%s13334_s5 + $0xac] sm:$0xf0]  ;;  %v2656_v46 = vmax.f32 %v2628_v51, %v2636_v1  ;;  %v7306_v50 = vld [vmem:[%s13334_s5 + $0x3c0] sm:$0xf] }
 0x139   : > { %v6084_v56 = vld [vmem:[%s13332_s3 + $0x238] sm:$0xf0]  ;;  %v7307_v58 = vor.u32 %v8746_v54, %v7306_v50  ;;  %v7130_v0 = vld [vmem:[%s13334_s5 + $0x260] sm:$0xf] }
 0x13a   : > { %v8499_v17 = vld [vmem:[%s13332_s3 + $0x41c] sm:$0xf]  ;;  %v6087_v11 = vor.u32 %v8435_v48, %v6084_v56  ;;  %2543 = vmatpush.bf16.msrb.mxu0 %v5831_v3  ;;  %v8678_v48 = vld [vmem:[%s13334_s5 + $0x1ac] sm:$0xf0]  ;;  %v2643_v56 = vrot.slane %v2642_v42, 4 }
 0x13b   : > { %v6340_v60 = vld [vmem:[%s13332_s3 + $0x438] sm:$0xf0]  ;;  %v7274_v30 = vld [vmem:[%s13334_s5 + $0x380] sm:$0xf] }
 0x13c   : > { %v8563_v45 = vld [vmem:[%s13332_s3 + $0x61c] sm:$0xf]  ;;  %v6343_v19 = vor.u32 %v8499_v17, %v6340_v60  ;;  %2557 = vmatpush.bf16.msrb.mxu1 %v6087_v11  ;;  %v2650_v17 = vrot.slane %v2649_v4, 4  ;;  %v6890_v60 = vld [vmem:[%s13334_s5 + $0x80] sm:$0xf]  ;;  %v2644_v41 = vmax.f32 %v2642_v42, %v2643_v56  ;;  %v2321_v11 = vpop.f32.mrf.mxu0 }
 0x13d   : > { %v6596_v57 = vld [vmem:[%s13332_s3 + $0x638] sm:$0xf0]  ;;  %2544 = vmatmul.bf16.vlgmr.msrb.gmra.mxu0 %v9395_v7  ;;  %v8710_v7 = vld [vmem:[%s13334_s5 + $0x2ac] sm:$0xf0]  ;;  %v6891_v12 = vor.u32 %v8642_v32, %v6890_v60  ;;  %v2322_v29 = vadd.f32 %v2321_v11, %v10193_v38  ;;  %v6858_v38 = vld [vmem:[%s13334_s5 + $0x40] sm:$0xf] }
 0x13e   : > { %v6599_v20 = vor.u32 %v8563_v45, %v6596_v57  ;;  %2571 = vmatpush.bf16.msrb.mxu2 %v6343_v19  ;;  %4252 = vmatpush.bf16.msra.mxu0 %v6939_v27  ;;  %v2657_v45 = vrot.slane %v2656_v46, 4  ;;  %v7163_v57 = vor.u32 %v8710_v7, %v7162_v22  ;;  %v2651_v3 = vmax.f32 %v2649_v4, %v2650_v17  ;;  %v8638_v19 = vld [vmem:[%s13334_s5 + $0x6c] sm:$0xf0]  ;;  %v7002_v27 = vld [vmem:[%s13334_s5 + $0x160] sm:$0xf] }
 0x13f   : > { %2558 = vmatmul.bf16.vlgmr.msrb.gmra.mxu1 %v9408_v13  ;;  %v6907_v13 = vor.u32 %v8646_v39, %v6906_v47  ;;  %v2645_v36 = vrot.slane %v2644_v41, 2  ;;  %v6875_v15 = vor.u32 %v8638_v19, %v6874_v18  ;;  %v8634_v42 = vld [vmem:[%s13334_s5 + $0x4c] sm:$0xf0]  ;;  %v6986_v4 = vld [vmem:[%s13334_s5 + $0x140] sm:$0xf] }
 0x140   : > { %2585 = vmatpush.bf16.msrb.mxu3 %v6599_v20  ;;  %4265 = vmatpush.bf16.msra.mxu1 %v7067_v21  ;;  %v2658_v20 = vmax.f32 %v2656_v46, %v2657_v45  ;;  %v8670_v21 = vld [vmem:[%s13334_s5 + $0x16c] sm:$0xf0]  ;;  %v2652_v1 = vrot.slane %v2651_v3, 2  ;;  %v7114_v39 = vld [vmem:[%s13334_s5 + $0x240] sm:$0xf]  ;;  %v7275_v46 = vor.u32 %v8738_v34, %v7274_v30  ;;  %v6859_v50 = vor.u32 %v8634_v42, %v6858_v38  ;;  %v2337_v45 = vpop.f32.mrf.mxu1 }
 0x141   : > { %2572 = vmatmul.bf16.vlgmr.msrb.gmra.mxu2 %v9397_v9  ;;  %v7035_v9 = vor.u32 %v8678_v48, %v7034_v37  ;;  %v7003_v31 = vor.u32 %v8670_v21, %v7002_v27  ;;  %v8666_v47 = vld [vmem:[%s13334_s5 + $0x14c] sm:$0xf0]  ;;  %v2363_v37 = vpop.f32.mrf.mxu3  ;;  %v7258_v22 = vld [vmem:[%s13334_s5 + $0x360] sm:$0xf]  ;;  %v2646_v54 = vmax.f32 %v2644_v41, %v2645_v36  ;;  %v2597_v41 = vperm.slane %v10682_v55, 3 }
 0x142   : > { %4278 = vmatpush.bf16.msra.mxu2 %v7195_v5  ;;  %4253 = vmatpush.bf16.msra.mxu0 %v6923_v26  ;;  %v8702_v5 = vld [vmem:[%s13334_s5 + $0x26c] sm:$0xf0]  ;;  %v2659_v51 = vrot.slane %v2658_v20, 2  ;;  %v2653_v56 = vmax.f32 %v2651_v3, %v2652_v1  ;;  %v6842_v60 = vld [vmem:[%s13334_s5 + $0x20] sm:$0xf] }
 0x143   : > { %2586 = vmatmul.bf16.vlgmr.msrb.gmra.mxu3 %v9410_v14  ;;  %v8674_v14 = vld [vmem:[%s13334_s5 + $0x18c] sm:$0xf0]  ;;  %v7131_v26 = vor.u32 %v8702_v5, %v7130_v0  ;;  %v7242_v63 = vld [vmem:[%s13334_s5 + $0x340] sm:$0xf] }
 0x144   : > { %4266 = vmatpush.bf16.msra.mxu1 %v7051_v43  ;;  %4291 = vmatpush.bf16.msra.mxu3 %v7323_v49  ;;  %v7019_v16 = vor.u32 %v8674_v14, %v7018_v35  ;;  %v2349_v43 = vpop.f32.mrf.mxu2  ;;  %v8698_v48 = vld [vmem:[%s13334_s5 + $0x24c] sm:$0xf0]  ;;  %v2323_v7 = vpop.f32.mrf.mxu0  ;;  %v7098_v14 = vld [vmem:[%s13334_s5 + $0x220] sm:$0xf]  ;;  %v2660_v59 = vmax.f32 %v2658_v20, %v2659_v51  ;;  %v7243_v30 = vor.u32 %v8730_v2, %v7242_v63 }
 0x145   : > { %v8734_v49 = vld [vmem:[%s13334_s5 + $0x36c] sm:$0xf0]  ;;  %v7115_v35 = vor.u32 %v8698_v48, %v7114_v39  ;;  %v6826_v11 = vld [vmem:[%s13334_s5] sm:$0xf]  ;;  %v7099_v21 = vor.u32 %v8694_v61, %v7098_v14 }
 0x146   : > { %4279 = vmatpush.bf16.msra.mxu2 %v7179_v53  ;;  %4254 = vmatpush.bf16.msra.mxu0 %v6907_v13  ;;  %v2336_v53 = vadd.f32 %v2335_v23, %v2322_v29  ;;  %v2324_v13 = vadd.f32 %v2323_v7, %v10262_v6  ;;  %v8630_v32 = vld [vmem:[%s13334_s5 + $0x2c] sm:$0xf0]  ;;  %v2661_v5 = vrot.slane %v2660_v59, 1  ;;  %v7450_v1 = vld [vmem:[%s13334_s5 + $0x4e0] sm:$0xf] }
 0x147   : > { %v8662_v6 = vld [vmem:[%s13334_s5 + $0x12c] sm:$0xf0]  ;;  %v6843_v3 = vor.u32 %v8630_v32, %v6842_v60  ;;  %v7546_v2 = vld [vmem:[%s13334_s5 + $0x5a0] sm:$0xf] }
 0x148   : > { %4267 = vmatpush.bf16.msra.mxu1 %v7035_v9  ;;  %4292 = vmatpush.bf16.msra.mxu3 %v7307_v58  ;;  %v2350_v17 = vadd.f32 %v2349_v43, %v2336_v53  ;;  %v6987_v9 = vor.u32 %v8666_v47, %v6986_v4  ;;  %v7259_v58 = vor.u32 %v8734_v49, %v7258_v22  ;;  %v8626_v20 = vld [vmem:[%s13334_s5 + $0xc] sm:$0xf0]  ;;  %v7434_v49 = vld [vmem:[%s13334_s5 + $0x4c0] sm:$0xf] }
 0x149   : > { %v2338_v18 = vadd.f32 %v2337_v45, %v2324_v13  ;;  %v8658_v27 = vld [vmem:[%s13334_s5 + $0x10c] sm:$0xf0]  ;;  %v2365_v36 = vpop.f32.mrf.mxu3  ;;  %v6827_v38 = vor.u32 %v8626_v20, %v6826_v11  ;;  %v2662_v48 = vmax.f32 %v2660_v59, %v2661_v5  ;;  %v7562_v13 = vld [vmem:[%s13334_s5 + $0x5c0] sm:$0xf] }
 0x14a   : > { %4280 = vmatpush.bf16.msra.mxu2 %v7163_v57  ;;  %4255 = vmatpush.bf16.msra.mxu0 %v6891_v12  ;;  %v6970_v57 = vld [vmem:[%s13334_s5 + $0x120] sm:$0xf]  ;;  %v2647_v12 = vrot.slane %v2646_v54, 1  ;;  %v2364_v23 = vadd.f32 %v2363_v37, %v2350_v17  ;;  %v8690_v29 = vld [vmem:[%s13334_s5 + $0x20c] sm:$0xf0] }
 0x14b   : > { %v6971_v19 = vor.u32 %v8662_v6, %v6970_v57  ;;  %v8726_v51 = vld [vmem:[%s13334_s5 + $0x32c] sm:$0xf0]  ;;  %v11057_v57 = vpack.c.bf16 %v2662_v48, %v2662_v48  ;;  %v7418_v59 = vld [vmem:[%s13334_s5 + $0x4a0] sm:$0xf] }
 0x14c   : > { %4268 = vmatpush.bf16.msra.mxu1 %v7019_v16  ;;  %4293 = vmatpush.bf16.msra.mxu3 %v7291_v28  ;;  %v2654_v16 = vrot.slane %v2653_v56, 1  ;;  %v2351_v0 = vpop.f32.mrf.mxu2  ;;  %v7082_v28 = vld [vmem:[%s13334_s5 + $0x200] sm:$0xf]  ;;  %v2648_v42 = vmax.f32 %v2646_v54, %v2647_v12  ;;  %v8814_v43 = vld [vmem:[%s13334_s5 + $0x5ec] sm:$0xf0]  ;;  %v2613_v47 = vadd.f32 %v2597_v41, %v2364_v23 }
 0x14d   : > { %v2352_v34 = vadd.f32 %v2351_v0, %v2338_v18  ;;  %v7083_v53 = vor.u32 %v8690_v29, %v7082_v28  ;;  %v8778_v7 = vld [vmem:[%s13334_s5 + $0x4cc] sm:$0xf0]  ;;  %v7210_v54 = vld [vmem:[%s13334_s5 + $0x300] sm:$0xf] }
 0x14e   : > { %4281 = vmatpush.bf16.msra.mxu2 %v7147_v24  ;;  %4256 = vmatpush.bf16.msra.mxu0 %v6875_v15  ;;  %v6954_v24 = vld [vmem:[%s13334_s5 + $0x100] sm:$0xf]  ;;  %v8782_v15 = vld [vmem:[%s13334_s5 + $0x4ec] sm:$0xf0]  ;;  %v2655_v4 = vmax.f32 %v2653_v56, %v2654_v16  ;;  %v2629_v60 = vmax.f32 %v2613_v47, 0.0  ;;  %v7435_v6 = vor.u32 %v8778_v7, %v7434_v49  ;;  %v2391_v0 = vpop.f32.mrf.mxu1 }
 0x14f   : > { %v2366_v39 = vadd.f32 %v2365_v36, %v2352_v34  ;;  %v7451_v37 = vor.u32 %v8782_v15, %v7450_v1  ;;  %v8722_v17 = vld [vmem:[%s13334_s5 + $0x30c] sm:$0xf0]  ;;  %v7402_v16 = vld [vmem:[%s13334_s5 + $0x480] sm:$0xf] }
 0x150   : > { %4269 = vmatpush.bf16.msra.mxu1 %v7003_v31  ;;  %4294 = vmatpush.bf16.msra.mxu3 %v7275_v46  ;;  %v7226_v31 = vld [vmem:[%s13334_s5 + $0x320] sm:$0xf]  ;;  %v6955_v46 = vor.u32 %v8658_v27, %v6954_v24  ;;  %v11055_v45 = vpack.c.bf16 %v2655_v4, %v2655_v4  ;;  %v7211_v61 = vor.u32 %v8722_v17, %v7210_v54  ;;  %v8770_v23 = vld [vmem:[%s13334_s5 + $0x48c] sm:$0xf0]  ;;  %v2377_v27 = vpop.f32.mrf.mxu0 }
 0x151   : > { %v2621_v22 = vadd.f32 %v2597_v41, %v2366_v39  ;;  %v8806_v41 = vld [vmem:[%s13334_s5 + $0x5ac] sm:$0xf0]  ;;  %v7386_v28 = vld [vmem:[%s13334_s5 + $0x460] sm:$0xf]  ;;  %v2378_v1 = vadd.f32 %v2377_v27, %v10288_v8 }
 0x152   : > { %4282 = vmatpush.bf16.msra.mxu2 %v7131_v26  ;;  %4257 = vmatpush.bf16.msra.mxu0 %v6859_v50  ;;  %v7578_v26 = vld [vmem:[%s13334_s5 + $0x5e0] sm:$0xf]  ;;  %v7227_v50 = vor.u32 %v8726_v51, %v7226_v31  ;;  %v7547_v18 = vor.u32 %v8806_v41, %v7546_v2  ;;  %v8802_v20 = vld [vmem:[%s13334_s5 + $0x58c] sm:$0xf0]  ;;  %v6940_v2 = vld [vmem:[%s13334_s5 + $0xf0] sm:$0xf0] }
 0x153   : > { %v7579_v56 = vor.u32 %v8814_v43, %v7578_v26  ;;  %v2637_v32 = vmax.f32 %v2621_v22, 0.0  ;;  %v8766_v29 = vld [vmem:[%s13334_s5 + $0x46c] sm:$0xf0]  ;;  %v7514_v34 = vld [vmem:[%s13334_s5 + $0x560] sm:$0xf]  ;;  %v2392_v47 = vadd.f32 %v2391_v0, %v2378_v1 }
 0x154   : > { %4270 = vmatpush.bf16.msra.mxu1 %v6987_v9  ;;  %4295 = vmatpush.bf16.msra.mxu3 %v7259_v58  ;;  %v8810_v9 = vld [vmem:[%s13334_s5 + $0x5cc] sm:$0xf0]  ;;  %v7387_v31 = vor.u32 %v8766_v29, %v7386_v28  ;;  %v7498_v43 = vld [vmem:[%s13334_s5 + $0x540] sm:$0xf] }
 0x155   : > { %v2663_v14 = vmax.f32 %v2629_v60, %v2637_v32  ;;  %v8774_v58 = vld [vmem:[%s13334_s5 + $0x4ac] sm:$0xf0]  ;;  %v7563_v63 = vor.u32 %v8810_v9, %v7562_v13  ;;  %v7706_v48 = vld [vmem:[%s13334_s5 + $0x6e0] sm:$0xf]  ;;  %v2598_v60 = vperm.slane %v10682_v55, 4 }
 0x156   : > { %4283 = vmatpush.bf16.msra.mxu2 %v7115_v35  ;;  %4258 = vmatpush.bf16.msra.mxu0 %v6843_v3  ;;  %v11053_v35 = vpack.c.bf16 %v2648_v42, %v2648_v42  ;;  %v7419_v11 = vor.u32 %v8774_v58, %v7418_v59  ;;  %v8798_v36 = vld [vmem:[%s13334_s5 + $0x56c] sm:$0xf0]  ;;  %v2405_v26 = vpop.f32.mrf.mxu2  ;;  %v7354_v7 = vld [vmem:[%s13334_s5 + $0x420] sm:$0xf]  ;;  %v2393_v17 = vpop.f32.mrf.mxu1 }
 0x157   : > { %v2664_v3 = vrot.slane %v2663_v14, 4  ;;  %v8762_v42 = vld [vmem:[%s13334_s5 + $0x44c] sm:$0xf0]  ;;  %v7515_v51 = vor.u32 %v8798_v36, %v7514_v34  ;;  %v2406_v22 = vadd.f32 %v2405_v26, %v2392_v47  ;;  %v8648_v34 = vld [vmem:[%s13334_s5 + $0xc4] sm:$0xf] }
 0x158   : > { %4271 = vmatpush.bf16.msra.mxu1 %v6971_v19  ;;  %4296 = vmatpush.bf16.msra.mxu3 %v7243_v30  ;;  %v7530_v19 = vld [vmem:[%s13334_s5 + $0x580] sm:$0xf]  ;;  %v8794_v8 = vld [vmem:[%s13334_s5 + $0x54c] sm:$0xf0]  ;;  %v2419_v39 = vpop.f32.mrf.mxu3  ;;  %v6924_v36 = vld [vmem:[%s13334_s5 + $0xd0] sm:$0xf0] }
 0x159   : > { %v2665_v12 = vmax.f32 %v2663_v14, %v2664_v3  ;;  %v7531_v30 = vor.u32 %v8802_v20, %v7530_v19  ;;  %v7499_v54 = vor.u32 %v8794_v8, %v7498_v43  ;;  %v8790_v13 = vld [vmem:[%s13334_s5 + $0x52c] sm:$0xf0]  ;;  %v7690_v14 = vld [vmem:[%s13334_s5 + $0x6c0] sm:$0xf]  ;;  %v2420_v58 = vadd.f32 %v2419_v39, %v2406_v22  ;;  %v8684_v19 = vld [vmem:[%s13334_s5 + $0x1e4] sm:$0xf] }
 0x15a   : > { %4284 = vmatpush.bf16.msra.mxu2 %v7099_v21  ;;  %4259 = vmatpush.bf16.msra.mxu0 %v6827_v38  ;;  %v7403_v21 = vor.u32 %v8770_v23, %v7402_v16  ;;  %v7370_v38 = vld [vmem:[%s13334_s5 + $0x440] sm:$0xf]  ;;  %v8842_v59 = vld [vmem:[%s13334_s5 + $0x6cc] sm:$0xf0]  ;;  %v7068_v20 = vld [vmem:[%s13334_s5 + $0x1f0] sm:$0xf0]  ;;  %v6927_v43 = vor.u32 %v8648_v34, %v6924_v36 }
 0x15b   : > { %v2666_v24 = vrot.slane %v2665_v12, 2  ;;  %v8754_v55 = vld [vmem:[%s13334_s5 + $0x40c] sm:$0xf0]  ;;  %v7691_v3 = vor.u32 %v8842_v59, %v7690_v14  ;;  %v2614_v28 = vadd.f32 %v2598_v60, %v2420_v58  ;;  %v7071_v1 = vor.u32 %v8684_v19, %v7068_v20  ;;  %v8644_v47 = vld [vmem:[%s13334_s5 + $0xa4] sm:$0xf] }
 0x15c   : > { %4272 = vmatpush.bf16.msra.mxu1 %v6955_v46  ;;  %4297 = vmatpush.bf16.msra.mxu3 %v7227_v50  ;;  %v8758_v50 = vld [vmem:[%s13334_s5 + $0x42c] sm:$0xf0]  ;;  %v6908_v39 = vld [vmem:[%s13334_s5 + $0xb0] sm:$0xf0]  ;;  %v7594_v34 = vld [vmem:[%s13334_s5 + $0x600] sm:$0xf] }
 0x15d   : > { %4260 = vmatmul.bf16.vlgmr.msra.gmra.mxu0 %v11053_v35  ;;  %v2667_v5 = vmax.f32 %v2665_v12, %v2666_v24  ;;  %v7355_v32 = vor.u32 %v8758_v50, %v7354_v7  ;;  %v7466_v12 = vld [vmem:[%s13334_s5 + $0x500] sm:$0xf]  ;;  %v8786_v16 = vld [vmem:[%s13334_s5 + $0x50c] sm:$0xf0]  ;;  %v7036_v22 = vld [vmem:[%s13334_s5 + $0x1b0] sm:$0xf0] }
 0x15e   : > { %4285 = vmatpush.bf16.msra.mxu2 %v7083_v53  ;;  %4304 = vmatpush.bf16.msrb.mxu0 %v7451_v37  ;;  %v2379_v53 = vpop.f32.mrf.mxu0  ;;  %v7371_v37 = vor.u32 %v8762_v42, %v7370_v38  ;;  %v8838_v0 = vld [vmem:[%s13334_s5 + $0x6ac] sm:$0xf0]  ;;  %v7052_v38 = vld [vmem:[%s13334_s5 + $0x1d0] sm:$0xf0]  ;;  %v7658_v42 = vld [vmem:[%s13334_s5 + $0x680] sm:$0xf] }
 0x15f   : > { %4273 = vmatmul.bf16.vlgmr.msra.gmra.mxu1 %v11055_v45  ;;  %v2668_v15 = vrot.slane %v2667_v5, 1  ;;  %v2380_v49 = vadd.f32 %v2379_v53, %v10356_v62  ;;  %v7482_v62 = vld [vmem:[%s13334_s5 + $0x520] sm:$0xf]  ;;  %v8830_v7 = vld [vmem:[%s13334_s5 + $0x66c] sm:$0xf0] }
 0x160   : > { %4317 = vmatpush.bf16.msrb.mxu1 %v7579_v56  ;;  %4298 = vmatpush.bf16.msra.mxu3 %v7211_v61  ;;  %v8846_v56 = vld [vmem:[%s13334_s5 + $0x6ec] sm:$0xf0]  ;;  %v7483_v41 = vor.u32 %v8790_v13, %v7482_v62  ;;  %v6892_v62 = vld [vmem:[%s13334_s5 + $0x90] sm:$0xf0] }
 0x161   : > { %4286 = vmatmul.bf16.vlgmr.msra.gmra.mxu2 %v11057_v57  ;;  %v2669_v4 = vmax.f32 %v2667_v5, %v2668_v15  ;;  %v7707_v9 = vor.u32 %v8846_v56, %v7706_v48  ;;  %v2394_v61 = vadd.f32 %v2393_v17, %v2380_v49  ;;  %v7467_v5 = vor.u32 %v8786_v16, %v7466_v12  ;;  %v8676_v48 = vld [vmem:[%s13334_s5 + $0x1a4] sm:$0xf]  ;;  %v7642_v49 = vld [vmem:[%s13334_s5 + $0x660] sm:$0xf]  ;;  %v8826_v14 = vld [vmem:[%s13334_s5 + $0x64c] sm:$0xf0] }
 0x162   : > { %4305 = vmatpush.bf16.msrb.mxu0 %v7435_v6  ;;  %v7338_v6 = vld [vmem:[%s13334_s5 + $0x400] sm:$0xf]  ;;  %v7643_v56 = vor.u32 %v8830_v7, %v7642_v49  ;;  %v8640_v17 = vld [vmem:[%s13334_s5 + $0x84] sm:$0xf]  ;;  %v7039_v13 = vor.u32 %v8676_v48, %v7036_v22  ;;  %v7004_v16 = vld [vmem:[%s13334_s5 + $0x170] sm:$0xf0] }
 0x163   : > { %v11111_v46 = vpack.c.bf16 %v2669_v4, %v2669_v4  ;;  %4330 = vmatpush.bf16.msrb.mxu2 %v7707_v9  ;;  %v7339_v24 = vor.u32 %v8754_v55, %v7338_v6  ;;  %v8834_v4 = vld [vmem:[%s13334_s5 + $0x68c] sm:$0xf0]  ;;  %v7626_v6 = vld [vmem:[%s13334_s5 + $0x640] sm:$0xf]  ;;  %v6895_v58 = vor.u32 %v8640_v17, %v6892_v62  ;;  %v6972_v48 = vld [vmem:[%s13334_s5 + $0x130] sm:$0xf0] }
 0x164   : > { %4318 = vmatpush.bf16.msrb.mxu1 %v7563_v63  ;;  %v8652_v63 = vld [vmem:[%s13334_s5 + $0xe4] sm:$0xf]  ;;  %v7659_v8 = vor.u32 %v8834_v4, %v7658_v42  ;;  %v8818_v36 = vld [vmem:[%s13334_s5 + $0x60c] sm:$0xf0]  ;;  %v6844_v4 = vld [vmem:[%s13334_s5 + $0x30] sm:$0xf0] }
 0x165   : > { %4299 = vmatmul.bf16.vlgmr.msra.gmra.mxu3 %v11111_v46  ;;  %v6943_v27 = vor.u32 %v8652_v63, %v6940_v2  ;;  %v8636_v63 = vld [vmem:[%s13334_s5 + $0x64] sm:$0xf]  ;;  %v6876_v2 = vld [vmem:[%s13334_s5 + $0x70] sm:$0xf0] }
 0x166   : > { %4306 = vmatpush.bf16.msrb.mxu0 %v7419_v11  ;;  %v2407_v11 = vpop.f32.mrf.mxu2  ;;  %v8628_v42 = vld [vmem:[%s13334_s5 + $0x24] sm:$0xf]  ;;  %v7196_v7 = vld [vmem:[%s13334_s5 + $0x2f0] sm:$0xf0] }
 0x167   : > { %v2408_v23 = vadd.f32 %v2407_v11, %v2394_v61  ;;  %4331 = vmatpush.bf16.msrb.mxu2 %v7691_v3  ;;  %v7627_v61 = vor.u32 %v8826_v14, %v7626_v6  ;;  %v8668_v3 = vld [vmem:[%s13334_s5 + $0x164] sm:$0xf]  ;;  %v6847_v62 = vor.u32 %v8628_v42, %v6844_v4  ;;  %v7148_v4 = vld [vmem:[%s13334_s5 + $0x290] sm:$0xf0] }
 0x168   : > { %4319 = vmatpush.bf16.msrb.mxu1 %v7547_v18  ;;  %v2421_v18 = vpop.f32.mrf.mxu3  ;;  %v8716_v49 = vld [vmem:[%s13334_s5 + $0x2e4] sm:$0xf] }
 0x169   : > { %v2422_v29 = vadd.f32 %v2421_v18, %v2408_v23  ;;  %v7610_v23 = vld [vmem:[%s13334_s5 + $0x620] sm:$0xf]  ;;  %v8822_v18 = vld [vmem:[%s13334_s5 + $0x62c] sm:$0xf0]  ;;  %v7199_v17 = vor.u32 %v8716_v49, %v7196_v7  ;;  %v8780_v6 = vld [vmem:[%s13334_s5 + $0x4e4] sm:$0xf] }
 0x16a   : > { %4307 = vmatpush.bf16.msrb.mxu0 %v7403_v21  ;;  %v7674_v21 = vld [vmem:[%s13334_s5 + $0x6a0] sm:$0xf]  ;;  %v7611_v19 = vor.u32 %v8822_v18, %v7610_v23  ;;  %v7132_v7 = vld [vmem:[%s13334_s5 + $0x270] sm:$0xf0] }
 0x16b   : > { %v2622_v15 = vadd.f32 %v2598_v60, %v2422_v29  ;;  %v8672_v60 = vld [vmem:[%s13334_s5 + $0x184] sm:$0xf]  ;;  %v7802_v18 = vld [vmem:[%s13334_s5 + $0x7a0] sm:$0xf] }
 0x16c   : > { %4320 = vmatpush.bf16.msrb.mxu1 %v7531_v30  ;;  %v7675_v30 = vor.u32 %v8838_v0, %v7674_v21  ;;  %v2433_v55 = vpop.f32.mrf.mxu0  ;;  %v8632_v21 = vld [vmem:[%s13334_s5 + $0x44] sm:$0xf]  ;;  %v6860_v0 = vld [vmem:[%s13334_s5 + $0x50] sm:$0xf0] }
 0x16d   : > { %v2638_v26 = vmax.f32 %v2622_v15, 0.0  ;;  %v2434_v20 = vadd.f32 %v2433_v55, %v10290_v25  ;;  %v6988_v25 = vld [vmem:[%s13334_s5 + $0x150] sm:$0xf0] }
 0x16e   : > { %4308 = vmatpush.bf16.msrb.mxu0 %v7387_v31  ;;  %v8680_v31 = vld [vmem:[%s13334_s5 + $0x1c4] sm:$0xf]  ;;  %4332 = vmatpush.bf16.msrb.mxu2 %v7675_v30  ;;  %v2447_v11 = vpop.f32.mrf.mxu1 }
 0x16f   : > { %v7055_v53 = vor.u32 %v8680_v31, %v7052_v38  ;;  %v6863_v31 = vor.u32 %v8632_v21, %v6860_v0  ;;  %v7164_v0 = vld [vmem:[%s13334_s5 + $0x2b0] sm:$0xf0] }
 0x170   : > { %4321 = vmatpush.bf16.msrb.mxu1 %v7515_v51  ;;  %v2630_v51 = vmax.f32 %v2614_v28, 0.0  ;;  %v7007_v28 = vor.u32 %v8668_v3, %v7004_v16 }
 0x172   : > { %4309 = vmatpush.bf16.msrb.mxu0 %v7371_v37  ;;  %v2670_v37 = vmax.f32 %v2630_v51, %v2638_v26  ;;  %4333 = vmatpush.bf16.msrb.mxu2 %v7659_v8  ;;  %v7595_v51 = vor.u32 %v8818_v36, %v7594_v34  ;;  %v8660_v8 = vld [vmem:[%s13334_s5 + $0x124] sm:$0xf]  ;;  %v7786_v36 = vld [vmem:[%s13334_s5 + $0x780] sm:$0xf] }
 0x173   : > { %v6975_v14 = vor.u32 %v8660_v8, %v6972_v48  ;;  %v7420_v8 = vld [vmem:[%s13334_s5 + $0x4b0] sm:$0xf0]  ;;  %v8700_v48 = vld [vmem:[%s13334_s5 + $0x264] sm:$0xf] }
 0x174   : > { %4322 = vmatpush.bf16.msrb.mxu1 %v7499_v54  ;;  %v2671_v50 = vrot.slane %v2670_v37, 4  ;;  %v6911_v54 = vor.u32 %v8644_v47, %v6908_v39  ;;  %v2435_v26 = vpop.f32.mrf.mxu0  ;;  %v7834_v47 = vld [vmem:[%s13334_s5 + $0x7e0] sm:$0xf]  ;;  %v8878_v39 = vld [vmem:[%s13334_s5 + $0x7ec] sm:$0xf0] }
 0x175   : > { %v7835_v22 = vor.u32 %v8878_v39, %v7834_v47 }
 0x176   : > { %4310 = vmatpush.bf16.msrb.mxu0 %v7355_v32  ;;  %v2672_v9 = vmax.f32 %v2670_v37, %v2671_v50  ;;  %v7020_v32 = vld [vmem:[%s13334_s5 + $0x190] sm:$0xf0]  ;;  %4334 = vmatpush.bf16.msrb.mxu2 %v7643_v56  ;;  %v2461_v30 = vpop.f32.mrf.mxu2  ;;  %v2436_v37 = vadd.f32 %v2435_v26, %v10367_v10  ;;  %v11292_v50 = vld [vmem:[%s13333_s4] sm:$0xff] }
 0x177   : > { %v2599_v10 = vperm.slane %v11292_v50, 5  ;;  %v8624_v56 = vld [vmem:[%s13334_s5 + $0x4] sm:$0xf]  ;;  %4343 = vmatpush.bf16.msrb.mxu3 %v7835_v22 }
 0x178   : > { %4323 = vmatpush.bf16.msrb.mxu1 %v7483_v41  ;;  %v2673_v59 = vrot.slane %v2672_v9, 2  ;;  %v7023_v41 = vor.u32 %v8672_v60, %v7020_v32  ;;  %v2475_v15 = vpop.f32.mrf.mxu3  ;;  %v8712_v60 = vld [vmem:[%s13334_s5 + $0x2c4] sm:$0xf]  ;;  %v6828_v32 = vld [vmem:[%s13334_s5 + $0x10] sm:$0xf0] }
 0x179   : > { %v6831_v23 = vor.u32 %v8624_v56, %v6828_v32  ;;  %v7404_v56 = vld [vmem:[%s13334_s5 + $0x490] sm:$0xf0] }
 0x17a   : > { %4311 = vmatpush.bf16.msrb.mxu0 %v7339_v24  ;;  %v2674_v12 = vmax.f32 %v2672_v9, %v2673_v59  ;;  %4335 = vmatpush.bf16.msrb.mxu2 %v7627_v61  ;;  %v6879_v24 = vor.u32 %v8636_v63, %v6876_v2  ;;  %v8874_v9 = vld [vmem:[%s13334_s5 + $0x7cc] sm:$0xf0]  ;;  %v7452_v63 = vld [vmem:[%s13334_s5 + $0x4f0] sm:$0xf0]  ;;  %v8656_v2 = vld [vmem:[%s13334_s5 + $0x104] sm:$0xf] }
 0x17c   : > { %4324 = vmatpush.bf16.msrb.mxu1 %v7467_v5  ;;  %v8664_v5 = vld [vmem:[%s13334_s5 + $0x144] sm:$0xf] }
 0x17e   : > { %4356 = vmatpush.bf16.msra.mxu0 %v6943_v27  ;;  %v2675_v27 = vrot.slane %v2674_v12, 1  ;;  %4336 = vmatpush.bf16.msrb.mxu2 %v7611_v19  ;;  %v8870_v19 = vld [vmem:[%s13334_s5 + $0x7ac] sm:$0xf0] }
 0x17f   : > { %v7803_v21 = vor.u32 %v8870_v19, %v7802_v18  ;;  %v8760_v19 = vld [vmem:[%s13334_s5 + $0x444] sm:$0xf] }
 0x180   : > { %4369 = vmatpush.bf16.msra.mxu1 %v7071_v1  ;;  %v2676_v29 = vmax.f32 %v2674_v12, %v2675_v27  ;;  %v2448_v1 = vadd.f32 %v2447_v11, %v2434_v20  ;;  %v2463_v11 = vpop.f32.mrf.mxu2  ;;  %v2477_v16 = vpop.f32.mrf.mxu3  ;;  %v8708_v20 = vld [vmem:[%s13334_s5 + $0x2a4] sm:$0xf] }
 0x182   : > { %4357 = vmatpush.bf16.msra.mxu0 %v6927_v43  ;;  %v11261_v38 = vpack.c.bf16 %v2676_v29, %v2676_v29  ;;  %v6991_v43 = vor.u32 %v8664_v5, %v6988_v25  ;;  %4337 = vmatpush.bf16.msrb.mxu2 %v7595_v51  ;;  %v8776_v5 = vld [vmem:[%s13334_s5 + $0x4c4] sm:$0xf]  ;;  %v7436_v25 = vld [vmem:[%s13334_s5 + $0x4d0] sm:$0xf0] }
 0x184   : > { %4370 = vmatpush.bf16.msra.mxu1 %v7055_v53  ;;  %v2462_v53 = vadd.f32 %v2461_v30, %v2448_v1  ;;  %4312 = vmatmul.bf16.vlgmr.msrb.gmra.mxu0 %v11261_v38  ;;  %v7167_v30 = vor.u32 %v8708_v20, %v7164_v0  ;;  %v8866_v1 = vld [vmem:[%s13334_s5 + $0x78c] sm:$0xf0]  ;;  %v7372_v20 = vld [vmem:[%s13334_s5 + $0x450] sm:$0xf0] }
 0x185   : > { %v7787_v42 = vor.u32 %v8866_v1, %v7786_v36  ;;  %v7580_v0 = vld [vmem:[%s13334_s5 + $0x5f0] sm:$0xf0]  ;;  %v8756_v1 = vld [vmem:[%s13334_s5 + $0x424] sm:$0xf] }
 0x186   : > { %4358 = vmatpush.bf16.msra.mxu0 %v6911_v54  ;;  %v2449_v54 = vpop.f32.mrf.mxu1  ;;  %4382 = vmatpush.bf16.msra.mxu2 %v7199_v17  ;;  %v2476_v61 = vadd.f32 %v2475_v15, %v2462_v53  ;;  %v8704_v15 = vld [vmem:[%s13334_s5 + $0x284] sm:$0xf]  ;;  %v7770_v53 = vld [vmem:[%s13334_s5 + $0x760] sm:$0xf]  ;;  %v7135_v17 = vor.u32 %v8700_v48, %v7132_v7 }
 0x187   : > { %v2450_v55 = vadd.f32 %v2449_v54, %v2436_v37  ;;  %v7151_v47 = vor.u32 %v8704_v15, %v7148_v4  ;;  %v8862_v37 = vld [vmem:[%s13334_s5 + $0x76c] sm:$0xf0]  ;;  %v8768_v54 = vld [vmem:[%s13334_s5 + $0x484] sm:$0xf] }
 0x188   : > { %4371 = vmatpush.bf16.msra.mxu1 %v7039_v13  ;;  %v7818_v13 = vld [vmem:[%s13334_s5 + $0x7c0] sm:$0xf]  ;;  %v7771_v49 = vor.u32 %v8862_v37, %v7770_v53  ;;  %v7407_v32 = vor.u32 %v8768_v54, %v7404_v56  ;;  %v8748_v53 = vld [vmem:[%s13334_s5 + $0x3e4] sm:$0xf]  ;;  %v7324_v37 = vld [vmem:[%s13334_s5 + $0x3f0] sm:$0xf0] }
 0x189   : > { %v7819_v59 = vor.u32 %v8874_v9, %v7818_v13  ;;  %v2464_v12 = vadd.f32 %v2463_v11, %v2450_v55  ;;  %v7754_v13 = vld [vmem:[%s13334_s5 + $0x740] sm:$0xf]  ;;  %v8858_v9 = vld [vmem:[%s13334_s5 + $0x74c] sm:$0xf0]  ;;  %v8752_v56 = vld [vmem:[%s13334_s5 + $0x404] sm:$0xf] }
 0x18a   : > { %4359 = vmatpush.bf16.msra.mxu0 %v6895_v58  ;;  %v7180_v58 = vld [vmem:[%s13334_s5 + $0x2d0] sm:$0xf0] }
 0x18b   : > { %v7183_v3 = vor.u32 %v8712_v60, %v7180_v58  ;;  %4344 = vmatpush.bf16.msrb.mxu3 %v7819_v59  ;;  %v2478_v29 = vadd.f32 %v2477_v16, %v2464_v12  ;;  %v8696_v60 = vld [vmem:[%s13334_s5 + $0x244] sm:$0xf] }
 0x18c   : > { %4372 = vmatpush.bf16.msra.mxu1 %v7023_v41  ;;  %v6956_v41 = vld [vmem:[%s13334_s5 + $0x110] sm:$0xf0]  ;;  %v8764_v58 = vld [vmem:[%s13334_s5 + $0x464] sm:$0xf] }
 0x18d   : > { %v6959_v27 = vor.u32 %v8656_v2, %v6956_v41  ;;  %4383 = vmatpush.bf16.msra.mxu2 %v7183_v3  ;;  %v2623_v34 = vadd.f32 %v2599_v10, %v2478_v29  ;;  %v7738_v2 = vld [vmem:[%s13334_s5 + $0x720] sm:$0xf]  ;;  %v8854_v41 = vld [vmem:[%s13334_s5 + $0x72c] sm:$0xf0]  ;;  %v8692_v3 = vld [vmem:[%s13334_s5 + $0x224] sm:$0xf] }
 0x18e   : > { %4360 = vmatpush.bf16.msra.mxu0 %v6879_v24  ;;  %v7455_v24 = vor.u32 %v8780_v6, %v7452_v63  ;;  %v7755_v6 = vor.u32 %v8858_v9, %v7754_v13  ;;  %v2489_v63 = vpop.f32.mrf.mxu0  ;;  %v2503_v11 = vpop.f32.mrf.mxu1  ;;  %v7739_v16 = vor.u32 %v8854_v41, %v7738_v2  ;;  %v7548_v13 = vld [vmem:[%s13334_s5 + $0x5b0] sm:$0xf0]  ;;  %v8740_v2 = vld [vmem:[%s13334_s5 + $0x3a4] sm:$0xf] }
 0x18f   : > { %4345 = vmatpush.bf16.msrb.mxu3 %v7803_v21  ;;  %v2639_v26 = vmax.f32 %v2623_v34, 0.0  ;;  %v8812_v21 = vld [vmem:[%s13334_s5 + $0x5e4] sm:$0xf]  ;;  %v7375_v34 = vor.u32 %v8760_v19, %v7372_v20  ;;  %v7308_v9 = vld [vmem:[%s13334_s5 + $0x3d0] sm:$0xf0] }
 0x190   : > { %4373 = vmatpush.bf16.msra.mxu1 %v7007_v28  ;;  %v2615_v28 = vadd.f32 %v2599_v10, %v2476_v61  ;;  %v7388_v61 = vld [vmem:[%s13334_s5 + $0x470] sm:$0xf0]  ;;  %v7583_v36 = vor.u32 %v8812_v21, %v7580_v0  ;;  %v6930_v19 = vld [vmem:[%s13334_s5 + $0xc8] sm:$0xf]  ;;  %v8651_v20 = vld [vmem:[%s13334_s5 + $0xd4] sm:$0xf0] }
 0x191   : > { %4384 = vmatpush.bf16.msra.mxu2 %v7167_v30  ;;  %v7391_v18 = vor.u32 %v8764_v58, %v7388_v61  ;;  %v7292_v41 = vld [vmem:[%s13334_s5 + $0x3b0] sm:$0xf0]  ;;  %v8736_v0 = vld [vmem:[%s13334_s5 + $0x384] sm:$0xf] }
 0x192   : > { %4361 = vmatpush.bf16.msra.mxu0 %v6863_v31  ;;  %v7439_v31 = vor.u32 %v8776_v5, %v7436_v25  ;;  %v2631_v51 = vmax.f32 %v2615_v28, 0.0  ;;  %v7722_v5 = vld [vmem:[%s13334_s5 + $0x700] sm:$0xf]  ;;  %v8688_v25 = vld [vmem:[%s13334_s5 + $0x204] sm:$0xf] }
 0x193   : > { %4346 = vmatpush.bf16.msrb.mxu3 %v7787_v42 }
 0x194   : > { %4374 = vmatpush.bf16.msra.mxu1 %v6991_v43  ;;  %v8772_v43 = vld [vmem:[%s13334_s5 + $0x4a4] sm:$0xf]  ;;  %v2677_v39 = vmax.f32 %v2631_v51, %v2639_v26  ;;  %v7356_v26 = vld [vmem:[%s13334_s5 + $0x430] sm:$0xf0] }
 0x195   : > { %v7423_v22 = vor.u32 %v8772_v43, %v7420_v8  ;;  %4385 = vmatpush.bf16.msra.mxu2 %v7151_v47  ;;  %v8808_v43 = vld [vmem:[%s13334_s5 + $0x5c4] sm:$0xf]  ;;  %v7564_v8 = vld [vmem:[%s13334_s5 + $0x5d0] sm:$0xf0] }
 0x196   : > { %4362 = vmatpush.bf16.msra.mxu0 %v6847_v62  ;;  %v2678_v10 = vrot.slane %v2677_v39, 4  ;;  %v2517_v30 = vpop.f32.mrf.mxu2  ;;  %v2505_v7 = vpop.f32.mrf.mxu1  ;;  %v7567_v54 = vor.u32 %v8808_v43, %v7564_v8  ;;  %v8792_v8 = vld [vmem:[%s13334_s5 + $0x544] sm:$0xf] }
 0x197   : > { %4347 = vmatpush.bf16.msrb.mxu3 %v7771_v49  ;;  %v7327_v49 = vor.u32 %v8748_v53, %v7324_v37  ;;  %v6898_v53 = vld [vmem:[%s13334_s5 + $0x88] sm:$0xf]  ;;  %v8643_v37 = vld [vmem:[%s13334_s5 + $0x94] sm:$0xf0] }
 0x198   : > { %4375 = vmatpush.bf16.msra.mxu1 %v6975_v14  ;;  %v2679_v62 = vmax.f32 %v2677_v39, %v2678_v10  ;;  %v7116_v14 = vld [vmem:[%s13334_s5 + $0x250] sm:$0xf0]  ;;  %v2531_v4 = vpop.f32.mrf.mxu3  ;;  %v2491_v39 = vpop.f32.mrf.mxu0  ;;  %v7359_v10 = vor.u32 %v8756_v1, %v7356_v26 }
 0x199   : > { %4386 = vmatpush.bf16.msra.mxu2 %v7135_v17  ;;  %v7119_v55 = vor.u32 %v8696_v60, %v7116_v14  ;;  %v7340_v17 = vld [vmem:[%s13334_s5 + $0x410] sm:$0xf0]  ;;  %v6946_v60 = vld [vmem:[%s13334_s5 + $0xe8] sm:$0xf] }
 0x19a   : > { %4363 = vmatpush.bf16.msra.mxu0 %v6831_v23  ;;  %v2680_v59 = vrot.slane %v2679_v62, 2  ;;  %v7100_v23 = vld [vmem:[%s13334_s5 + $0x230] sm:$0xf0] }
 0x19b   : > { %4348 = vmatpush.bf16.msrb.mxu3 %v7755_v6  ;;  %v7103_v28 = vor.u32 %v8692_v3, %v7100_v23  ;;  %v7532_v23 = vld [vmem:[%s13334_s5 + $0x590] sm:$0xf0] }
 0x19c   : > { %4376 = vmatpush.bf16.msra.mxu1 %v6959_v27  ;;  %v2681_v12 = vmax.f32 %v2679_v62, %v2680_v59  ;;  %v8804_v62 = vld [vmem:[%s13334_s5 + $0x5a4] sm:$0xf]  ;;  %v2600_v59 = vperm.slane %v11292_v50, 6 }
 0x19d   : > { %4364 = vmatmul.bf16.vlgmr.msra.gmra.mxu0 %v11053_v35  ;;  %4387 = vmatpush.bf16.msra.mxu2 %v7119_v55  ;;  %v7343_v55 = vor.u32 %v8752_v56, %v7340_v17  ;;  %v8788_v56 = vld [vmem:[%s13334_s5 + $0x524] sm:$0xf]  ;;  %v7484_v17 = vld [vmem:[%s13334_s5 + $0x530] sm:$0xf0] }
 0x19e   : > { %4408 = vmatpush.bf16.msrb.mxu0 %v7455_v24  ;;  %v2490_v24 = vadd.f32 %v2489_v63, %v10322_v44  ;;  %v2682_v27 = vrot.slane %v2681_v12, 1  ;;  %v8850_v44 = vld [vmem:[%s13334_s5 + $0x70c] sm:$0xf0]  ;;  %v2519_v61 = vpop.f32.mrf.mxu2  ;;  %v7551_v63 = vor.u32 %v8804_v62, %v7548_v13  ;;  %v6882_v62 = vld [vmem:[%s13334_s5 + $0x68] sm:$0xf] }
 0x19f   : > { %4349 = vmatpush.bf16.msrb.mxu3 %v7739_v16  ;;  %v7723_v15 = vor.u32 %v8850_v44, %v7722_v5  ;;  %v8800_v16 = vld [vmem:[%s13334_s5 + $0x584] sm:$0xf]  ;;  %v6931_v5 = vor.u32 %v8651_v20, %v6930_v19  ;;  %v8639_v13 = vld [vmem:[%s13334_s5 + $0x74] sm:$0xf0] }
 0x1a0   : > { %v2683_v29 = vmax.f32 %v2681_v12, %v2682_v27  ;;  %v2504_v42 = vadd.f32 %v2503_v11, %v2490_v24  ;;  %v2533_v11 = vpop.f32.mrf.mxu3  ;;  %v7535_v21 = vor.u32 %v8800_v16, %v7532_v23  ;;  %v8796_v44 = vld [vmem:[%s13334_s5 + $0x564] sm:$0xf]  ;;  %v8687_v19 = vld [vmem:[%s13334_s5 + $0x1f4] sm:$0xf0] }
 0x1a1   : > { %4388 = vmatpush.bf16.msra.mxu2 %v7103_v28  ;;  %v7276_v28 = vld [vmem:[%s13334_s5 + $0x390] sm:$0xf0] }
 0x1a2   : > { %4409 = vmatpush.bf16.msrb.mxu0 %v7439_v31  ;;  %v7084_v31 = vld [vmem:[%s13334_s5 + $0x210] sm:$0xf0]  ;;  %v11438_v51 = vpack.c.bf16 %v2683_v29, %v2683_v29  ;;  %v2518_v48 = vadd.f32 %v2517_v30, %v2504_v42  ;;  %v7279_v30 = vor.u32 %v8736_v0, %v7276_v28  ;;  %v8732_v42 = vld [vmem:[%s13334_s5 + $0x364] sm:$0xf] }
 0x1a3   : > { %v7087_v47 = vor.u32 %v8688_v25, %v7084_v31  ;;  %4350 = vmatpush.bf16.msrb.mxu3 %v7723_v15  ;;  %v7516_v25 = vld [vmem:[%s13334_s5 + $0x570] sm:$0xf0] }
 0x1a4   : > { %4325 = vmatmul.bf16.vlgmr.msrb.gmra.mxu1 %v11438_v51  ;;  %v2532_v14 = vadd.f32 %v2531_v4, %v2518_v48  ;;  %v7519_v31 = vor.u32 %v8796_v44, %v7516_v25  ;;  %v7260_v4 = vld [vmem:[%s13334_s5 + $0x370] sm:$0xf0]  ;;  %v8631_v44 = vld [vmem:[%s13334_s5 + $0x34] sm:$0xf0]  ;;  %v8840_v25 = vld [vmem:[%s13334_s5 + $0x6c4] sm:$0xf] }
 0x1a5   : > { %4421 = vmatpush.bf16.msrb.mxu1 %v7583_v36  ;;  %4389 = vmatpush.bf16.msra.mxu2 %v7087_v47  ;;  %v8647_v36 = vld [vmem:[%s13334_s5 + $0xb4] sm:$0xf0]  ;;  %v7500_v47 = vld [vmem:[%s13334_s5 + $0x550] sm:$0xf0] }
 0x1a6   : > { %4410 = vmatpush.bf16.msrb.mxu0 %v7423_v22  ;;  %v2492_v22 = vadd.f32 %v2491_v39, %v10402_v33  ;;  %v8744_v33 = vld [vmem:[%s13334_s5 + $0x3c4] sm:$0xf]  ;;  %v2616_v24 = vadd.f32 %v2600_v59, %v2532_v14  ;;  %v7263_v39 = vor.u32 %v8732_v42, %v7260_v4  ;;  %v7228_v14 = vld [vmem:[%s13334_s5 + $0x330] sm:$0xf0]  ;;  %v8683_v42 = vld [vmem:[%s13334_s5 + $0x1d4] sm:$0xf0] }
 0x1a7   : > { %4395 = vmatpush.bf16.msra.mxu3 %v7327_v49  ;;  %v7311_v6 = vor.u32 %v8744_v33, %v7308_v9  ;;  %v8728_v49 = vld [vmem:[%s13334_s5 + $0x344] sm:$0xf] }
 0x1a8   : > { %v2506_v58 = vadd.f32 %v2505_v7, %v2492_v22  ;;  %v2632_v1 = vmax.f32 %v2616_v24, 0.0  ;;  %v7503_v22 = vor.u32 %v8792_v8, %v7500_v47  ;;  %v7244_v7 = vld [vmem:[%s13334_s5 + $0x350] sm:$0xf0]  ;;  %v8720_v24 = vld [vmem:[%s13334_s5 + $0x304] sm:$0xf] }
 0x1a9   : > { %4422 = vmatpush.bf16.msrb.mxu1 %v7567_v54  ;;  %v6899_v54 = vor.u32 %v8643_v37, %v6898_v53  ;;  %v7247_v33 = vor.u32 %v8728_v49, %v7244_v7  ;;  %v6834_v53 = vld [vmem:[%s13334_s5 + $0x8] sm:$0xf]  ;;  %v8627_v37 = vld [vmem:[%s13334_s5 + $0x14] sm:$0xf0] }
 0x1aa   : > { %4411 = vmatpush.bf16.msrb.mxu0 %v7407_v32  ;;  %v8655_v32 = vld [vmem:[%s13334_s5 + $0xf4] sm:$0xf0]  ;;  %v2520_v3 = vadd.f32 %v2519_v61, %v2506_v58  ;;  %v8784_v58 = vld [vmem:[%s13334_s5 + $0x504] sm:$0xf]  ;;  %v7468_v61 = vld [vmem:[%s13334_s5 + $0x510] sm:$0xf0] }
 0x1ab   : > { %v6947_v12 = vor.u32 %v8655_v32, %v6946_v60  ;;  %4396 = vmatpush.bf16.msra.mxu3 %v7311_v6  ;;  %v7487_v32 = vor.u32 %v8788_v56, %v7484_v17  ;;  %v8724_v6 = vld [vmem:[%s13334_s5 + $0x324] sm:$0xf]  ;;  %v7471_v20 = vor.u32 %v8784_v58, %v7468_v61  ;;  %v8679_v49 = vld [vmem:[%s13334_s5 + $0x1b4] sm:$0xf0]  ;;  %v2601_v17 = vperm.slane %v11292_v50, 7 }
 0x1ac   : > { %v2534_v27 = vadd.f32 %v2533_v11, %v2520_v3  ;;  %v8635_v3 = vld [vmem:[%s13334_s5 + $0x54] sm:$0xf0]  ;;  %v8844_v11 = vld [vmem:[%s13334_s5 + $0x6e4] sm:$0xf]  ;;  %v7026_v50 = vld [vmem:[%s13334_s5 + $0x188] sm:$0xf] }
 0x1ad   : > { %4423 = vmatpush.bf16.msrb.mxu1 %v7551_v63  ;;  %v8675_v58 = vld [vmem:[%s13334_s5 + $0x194] sm:$0xf0] }
 0x1ae   : > { %4412 = vmatpush.bf16.msrb.mxu0 %v7391_v18  ;;  %v7295_v18 = vor.u32 %v8740_v2, %v7292_v41  ;;  %v2624_v29 = vadd.f32 %v2600_v59, %v2534_v27  ;;  %v6883_v59 = vor.u32 %v8639_v13, %v6882_v62  ;;  %v7231_v2 = vor.u32 %v8724_v6, %v7228_v14  ;;  %v7212_v27 = vld [vmem:[%s13334_s5 + $0x310] sm:$0xf0] }
 0x1af   : > { %v7215_v4 = vor.u32 %v8720_v24, %v7212_v27  ;;  %v6835_v62 = vor.u32 %v8627_v37, %v6834_v53  ;;  %v7426_v24 = vld [vmem:[%s13334_s5 + $0x4a8] sm:$0xf]  ;;  %v8775_v27 = vld [vmem:[%s13334_s5 + $0x4b4] sm:$0xf0]  ;;  %v7612_v53 = vld [vmem:[%s13334_s5 + $0x630] sm:$0xf0] }
 0x1b0   : > { %4397 = vmatpush.bf16.msra.mxu3 %v7295_v18  ;;  %v2640_v15 = vmax.f32 %v2624_v29, 0.0  ;;  %v7074_v18 = vld [vmem:[%s13334_s5 + $0x1e8] sm:$0xf] }
 0x1b1   : > { %4424 = vmatpush.bf16.msrb.mxu1 %v7535_v21  ;;  %v7075_v29 = vor.u32 %v8687_v19, %v7074_v18  ;;  %v7644_v18 = vld [vmem:[%s13334_s5 + $0x670] sm:$0xf0]  ;;  %v7010_v19 = vld [vmem:[%s13334_s5 + $0x168] sm:$0xf] }
 0x1b2   : > { %4413 = vmatpush.bf16.msrb.mxu0 %v7375_v34  ;;  %v6914_v34 = vld [vmem:[%s13334_s5 + $0xa8] sm:$0xf]  ;;  %v2684_v26 = vmax.f32 %v2632_v1, %v2640_v15  ;;  %v7692_v15 = vld [vmem:[%s13334_s5 + $0x6d0] sm:$0xf0] }
 0x1b3   : > { %v6915_v43 = vor.u32 %v8647_v36, %v6914_v34  ;;  %v7695_v47 = vor.u32 %v8840_v25, %v7692_v15  ;;  %v7427_v25 = vor.u32 %v8775_v27, %v7426_v24  ;;  %v7410_v15 = vld [vmem:[%s13334_s5 + $0x488] sm:$0xf]  ;;  %v8759_v24 = vld [vmem:[%s13334_s5 + $0x434] sm:$0xf0]  ;;  %v8872_v27 = vld [vmem:[%s13334_s5 + $0x7c4] sm:$0xf] }
 0x1b4   : > { %4398 = vmatpush.bf16.msra.mxu3 %v7279_v30  ;;  %v2685_v48 = vrot.slane %v2684_v26, 4  ;;  %4377 = vmatmul.bf16.vlgmr.msra.gmra.mxu1 %v11055_v45  ;;  %v6978_v37 = vld [vmem:[%s13334_s5 + $0x128] sm:$0xf] }
 0x1b5   : > { %4425 = vmatpush.bf16.msrb.mxu1 %v7519_v31  ;;  %v7058_v31 = vld [vmem:[%s13334_s5 + $0x1c8] sm:$0xf] }
 0x1b6   : > { %4414 = vmatpush.bf16.msrb.mxu0 %v7359_v10  ;;  %v2686_v10 = vmax.f32 %v2684_v26, %v2685_v48  ;;  %v7676_v48 = vld [vmem:[%s13334_s5 + $0x6b0] sm:$0xf0] }
 0x1b8   : > { %4399 = vmatpush.bf16.msra.mxu3 %v7263_v39  ;;  %v2687_v9 = vrot.slane %v2686_v10, 2  ;;  %v7059_v39 = vor.u32 %v8683_v42, %v7058_v31  ;;  %v8771_v31 = vld [vmem:[%s13334_s5 + $0x494] sm:$0xf0] }
 0x1b9   : > { %4426 = vmatpush.bf16.msrb.mxu1 %v7503_v22  ;;  %v7042_v22 = vld [vmem:[%s13334_s5 + $0x1a8] sm:$0xf] }
 0x1ba   : > { %4415 = vmatpush.bf16.msrb.mxu0 %v7343_v55  ;;  %v2545_v60 = vpop.f32.mrf.mxu0  ;;  %v6866_v55 = vld [vmem:[%s13334_s5 + $0x48] sm:$0xf]  ;;  %v2688_v63 = vmax.f32 %v2686_v10, %v2687_v9 }
 0x1bb   : > { %v2546_v16 = vadd.f32 %v2545_v60, %v10333_v52  ;;  %v6867_v52 = vor.u32 %v8635_v3, %v6866_v55  ;;  %v7458_v10 = vld [vmem:[%s13334_s5 + $0x4e8] sm:$0xf]  ;;  %v7043_v60 = vor.u32 %v8679_v49, %v7042_v22  ;;  %v8767_v22 = vld [vmem:[%s13334_s5 + $0x474] sm:$0xf0] }
 0x1bc   : > { %4400 = vmatpush.bf16.msra.mxu3 %v7247_v33  ;;  %v2559_v41 = vpop.f32.mrf.mxu1  ;;  %v2689_v23 = vrot.slane %v2688_v63, 1  ;;  %v7442_v55 = vld [vmem:[%s13334_s5 + $0x4c8] sm:$0xf] }
 0x1bd   : > { %4416 = vmatmul.bf16.vlgmr.msrb.gmra.mxu0 %v11261_v38  ;;  %4427 = vmatpush.bf16.msrb.mxu1 %v7487_v32  ;;  %v2560_v30 = vadd.f32 %v2559_v41, %v2546_v16  ;;  %v8832_v32 = vld [vmem:[%s13334_s5 + $0x684] sm:$0xf] }
 0x1be   : > { %4460 = vmatpush.bf16.msra.mxu0 %v6947_v12  ;;  %v7708_v12 = vld [vmem:[%s13334_s5 + $0x6f0] sm:$0xf0]  ;;  %v2690_v21 = vmax.f32 %v2688_v63, %v2689_v23  ;;  %v8779_v63 = vld [vmem:[%s13334_s5 + $0x4d4] sm:$0xf0] }
 0x1bf   : > { %v7711_v28 = vor.u32 %v8844_v11, %v7708_v12  ;;  %v7027_v11 = vor.u32 %v8675_v58, %v7026_v50  ;;  %v8828_v12 = vld [vmem:[%s13334_s5 + $0x664] sm:$0xf]  ;;  %v7443_v23 = vor.u32 %v8779_v63, %v7442_v55  ;;  %v7836_v58 = vld [vmem:[%s13334_s5 + $0x7f0] sm:$0xf0]  ;;  %v7202_v55 = vld [vmem:[%s13334_s5 + $0x2e8] sm:$0xf] }
 0x1c0   : > { %4401 = vmatpush.bf16.msra.mxu3 %v7231_v2  ;;  %v11602_v1 = vpack.c.bf16 %v2690_v21, %v2690_v21  ;;  %v8876_v50 = vld [vmem:[%s13334_s5 + $0x7e4] sm:$0xf]  ;;  %v8719_v63 = vld [vmem:[%s13334_s5 + $0x2f4] sm:$0xf0] }
 0x1c1   : > { %4428 = vmatpush.bf16.msrb.mxu1 %v7471_v20  ;;  %v8671_v20 = vld [vmem:[%s13334_s5 + $0x174] sm:$0xf0] }
 0x1c2   : > { %4461 = vmatpush.bf16.msra.mxu0 %v6931_v5  ;;  %v6850_v5 = vld [vmem:[%s13334_s5 + $0x28] sm:$0xf]  ;;  %v2547_v36 = vpop.f32.mrf.mxu0  ;;  %4338 = vmatmul.bf16.vlgmr.msrb.gmra.mxu2 %v11602_v1 }
 0x1c3   : > { %v6851_v8 = vor.u32 %v8631_v44, %v6850_v5  ;;  %4434 = vmatpush.bf16.msrb.mxu2 %v7711_v28  ;;  %v7011_v28 = vor.u32 %v8671_v20, %v7010_v19  ;;  %v8824_v5 = vld [vmem:[%s13334_s5 + $0x644] sm:$0xf]  ;;  %v7203_v19 = vor.u32 %v8719_v63, %v7202_v55  ;;  %v7362_v20 = vld [vmem:[%s13334_s5 + $0x428] sm:$0xf] }
 0x1c4   : > { %v2573_v0 = vpop.f32.mrf.mxu2  ;;  %4429 = vmatmul.bf16.vlgmr.msrb.gmra.mxu1 %v11438_v51  ;;  %4402 = vmatpush.bf16.msra.mxu3 %v7215_v4  ;;  %v2561_v7 = vpop.f32.mrf.mxu1 }
 0x1c5   : > { %v2574_v26 = vadd.f32 %v2573_v0, %v2560_v30  ;;  %4473 = vmatpush.bf16.msra.mxu1 %v7075_v29  ;;  %v7647_v0 = vor.u32 %v8828_v12, %v7644_v18  ;;  %v11681_v29 = vld [vmem:[%s13335_s6] sm:$0xf]  ;;  %v7628_v30 = vld [vmem:[%s13334_s5 + $0x650] sm:$0xf0]  ;;  %v7839_v18 = vor.u32 %v8876_v50, %v7836_v58  ;;  %v8860_v58 = vld [vmem:[%s13334_s5 + $0x764] sm:$0xf] }
 0x1c6   : > { %4462 = vmatpush.bf16.msra.mxu0 %v6915_v43  ;;  %v2587_v34 = vpop.f32.mrf.mxu3  ;;  %v2548_v43 = vadd.f32 %v2547_v36, %v10413_v40  ;;  %v8836_v40 = vld [vmem:[%s13334_s5 + $0x6a4] sm:$0xf]  ;;  %v8667_v36 = vld [vmem:[%s13334_s5 + $0x154] sm:$0xf0]  ;;  %v4244_v4 = vperm.slane %v11681_v29, 0 }
 0x1c7   : > { %v2588_v56 = vadd.f32 %v2587_v34, %v2574_v26  ;;  %4435 = vmatpush.bf16.msrb.mxu2 %v7695_v47  ;;  %v7679_v9 = vor.u32 %v8836_v40, %v7676_v48  ;;  %v6994_v34 = vld [vmem:[%s13334_s5 + $0x148] sm:$0xf]  ;;  %v7631_v26 = vor.u32 %v8824_v5, %v7628_v30  ;;  %v8663_v40 = vld [vmem:[%s13334_s5 + $0x134] sm:$0xf0] }
 0x1c8   : > { %v2562_v33 = vadd.f32 %v2561_v7, %v2548_v43  ;;  %v6995_v43 = vor.u32 %v8667_v36, %v6994_v34  ;;  %v7394_v48 = vld [vmem:[%s13334_s5 + $0x468] sm:$0xf]  ;;  %v8715_v30 = vld [vmem:[%s13334_s5 + $0x2d4] sm:$0xf0] }
 0x1c9   : > { %4474 = vmatpush.bf16.msra.mxu1 %v7059_v39  ;;  %v2617_v2 = vadd.f32 %v2601_v17, %v2588_v56  ;;  %v7411_v39 = vor.u32 %v8771_v31, %v7410_v15  ;;  %v7570_v34 = vld [vmem:[%s13334_s5 + $0x5c8] sm:$0xf]  ;;  %v8811_v36 = vld [vmem:[%s13334_s5 + $0x5d4] sm:$0xf0]  ;;  %v7363_v15 = vor.u32 %v8759_v24, %v7362_v20  ;;  %v8856_v24 = vld [vmem:[%s13334_s5 + $0x744] sm:$0xf] }
 0x1ca   : > { %4463 = vmatpush.bf16.msra.mxu0 %v6899_v54  ;;  %v8783_v54 = vld [vmem:[%s13334_s5 + $0x4f4] sm:$0xf0]  ;;  %v7346_v31 = vld [vmem:[%s13334_s5 + $0x408] sm:$0xf] }
 0x1cb   : > { %v7459_v14 = vor.u32 %v8783_v54, %v7458_v10  ;;  %4436 = vmatpush.bf16.msrb.mxu2 %v7679_v9  ;;  %v6962_v9 = vld [vmem:[%s13334_s5 + $0x108] sm:$0xf] }
 0x1cc   : > { %v2575_v13 = vpop.f32.mrf.mxu2 }
 0x1cd   : > { %v2576_v6 = vadd.f32 %v2575_v13, %v2562_v33  ;;  %4475 = vmatpush.bf16.msra.mxu1 %v7043_v60  ;;  %v8816_v33 = vld [vmem:[%s13334_s5 + $0x604] sm:$0xf]  ;;  %v7395_v13 = vor.u32 %v8767_v22, %v7394_v48  ;;  %v8659_v60 = vld [vmem:[%s13334_s5 + $0x114] sm:$0xf0]  ;;  %v8653_v48 = vld [vmem:[%s13334_s5 + $0xec] sm:$0xf] }
 0x1ce   : > { %4464 = vmatpush.bf16.msra.mxu0 %v6883_v59  ;;  %v7660_v59 = vld [vmem:[%s13334_s5 + $0x690] sm:$0xf0]  ;;  %v2589_v61 = vpop.f32.mrf.mxu3  ;;  %v6948_v22 = vld [vmem:[%s13334_s5 + $0xf8] sm:$0xf0] }
 0x1cf   : > { %v2590_v41 = vadd.f32 %v2589_v61, %v2576_v6  ;;  %v7663_v3 = vor.u32 %v8832_v32, %v7660_v59  ;;  %v7378_v32 = vld [vmem:[%s13334_s5 + $0x448] sm:$0xf]  ;;  %v8763_v59 = vld [vmem:[%s13334_s5 + $0x454] sm:$0xf0] }
 0x1d0   : > { %v7379_v12 = vor.u32 %v8763_v59, %v7378_v32  ;;  %v8803_v32 = vld [vmem:[%s13334_s5 + $0x594] sm:$0xf0] }
 0x1d1   : > { %v2625_v16 = vadd.f32 %v2601_v17, %v2590_v41  ;;  %4437 = vmatpush.bf16.msrb.mxu2 %v7663_v3  ;;  %4476 = vmatpush.bf16.msra.mxu1 %v7027_v11  ;;  %v6979_v17 = vor.u32 %v8663_v40, %v6978_v37  ;;  %v6963_v41 = vor.u32 %v8659_v60, %v6962_v9  ;;  %v7586_v3 = vld [vmem:[%s13334_s5 + $0x5e8] sm:$0xf]  ;;  %v8815_v11 = vld [vmem:[%s13334_s5 + $0x5f4] sm:$0xf0] }
 0x1d2   : > { %4465 = vmatpush.bf16.msra.mxu0 %v6867_v52  ;;  %v2633_v52 = vmax.f32 %v2617_v2, 0.0  ;;  %4390 = vmatmul.bf16.vlgmr.msra.gmra.mxu2 %v11057_v57  ;;  %v7587_v5 = vor.u32 %v8815_v11, %v7586_v3  ;;  %v7554_v37 = vld [vmem:[%s13334_s5 + $0x5a8] sm:$0xf]  ;;  %v8807_v40 = vld [vmem:[%s13334_s5 + $0x5b4] sm:$0xf0] }
 0x1d3   : > { %v2641_v21 = vmax.f32 %v2625_v16, 0.0  ;;  %v8707_v9 = vld [vmem:[%s13334_s5 + $0x294] sm:$0xf0]  ;;  %v7538_v60 = vld [vmem:[%s13334_s5 + $0x588] sm:$0xf] }
 0x1d4   : > { %v7539_v55 = vor.u32 %v8803_v32, %v7538_v60  ;;  %v7522_v3 = vld [vmem:[%s13334_s5 + $0x568] sm:$0xf]  ;;  %v8751_v32 = vld [vmem:[%s13334_s5 + $0x3f4] sm:$0xf0] }
 0x1d5   : > { %v2691_v44 = vmax.f32 %v2633_v52, %v2641_v21  ;;  %4438 = vmatpush.bf16.msrb.mxu2 %v7647_v0  ;;  %4477 = vmatpush.bf16.msra.mxu1 %v7011_v28  ;;  %v7330_v60 = vld [vmem:[%s13334_s5 + $0x3e8] sm:$0xf] }
 0x1d6   : > { %4466 = vmatpush.bf16.msra.mxu0 %v6851_v8  ;;  %v8820_v8 = vld [vmem:[%s13334_s5 + $0x624] sm:$0xf] }
 0x1d7   : > { %v2692_v42 = vrot.slane %v2691_v44, 4  ;;  %v7615_v56 = vor.u32 %v8820_v8, %v7612_v53  ;;  %v7804_v8 = vld [vmem:[%s13334_s5 + $0x7b0] sm:$0xf0]  ;;  %v8711_v53 = vld [vmem:[%s13334_s5 + $0x2b4] sm:$0xf0] }
 0x1d9   : > { %v2693_v47 = vmax.f32 %v2691_v44, %v2692_v42  ;;  %4439 = vmatpush.bf16.msrb.mxu2 %v7631_v26  ;;  %4478 = vmatpush.bf16.msra.mxu1 %v6995_v43  ;;  %v7820_v44 = vld [vmem:[%s13334_s5 + $0x7d0] sm:$0xf0]  ;;  %v8755_v26 = vld [vmem:[%s13334_s5 + $0x414] sm:$0xf0]  ;;  %v8868_v43 = vld [vmem:[%s13334_s5 + $0x7a4] sm:$0xf] }
 0x1da   : > { %4467 = vmatpush.bf16.msra.mxu0 %v6835_v62  ;;  %v4261_v7 = vpop.f32.mrf.mxu0  ;;  %v7596_v62 = vld [vmem:[%s13334_s5 + $0x610] sm:$0xf0]  ;;  %v7823_v42 = vor.u32 %v8872_v27, %v7820_v44  ;;  %v7506_v44 = vld [vmem:[%s13334_s5 + $0x548] sm:$0xf] }
 0x1db   : > { %v2694_v49 = vrot.slane %v2693_v47, 2  ;;  %v4262_v54 = vadd.f32 %v4261_v7, %v4244_v4  ;;  %v7599_v2 = vor.u32 %v8816_v33, %v7596_v62  ;;  %v7555_v33 = vor.u32 %v8807_v40, %v7554_v37  ;;  %v7756_v27 = vld [vmem:[%s13334_s5 + $0x750] sm:$0xf0]  ;;  %v8637_v37 = vld [vmem:[%s13334_s5 + $0x6c] sm:$0xf] }
 0x1dc   : > { %v4274_v10 = vpop.f32.mrf.mxu1  ;;  %v6951_v62 = vor.u32 %v8653_v48, %v6948_v22  ;;  %v6884_v40 = vld [vmem:[%s13334_s5 + $0x78] sm:$0xf0] }
 0x1dd   : > { %4468 = vmatmul.bf16.vlgmr.msra.gmra.mxu0 %v11053_v35  ;;  %v2695_v6 = vmax.f32 %v2693_v47, %v2694_v49  ;;  %4440 = vmatpush.bf16.msrb.mxu2 %v7615_v56  ;;  %v7571_v47 = vor.u32 %v8811_v36, %v7570_v34  ;;  %v7347_v49 = vor.u32 %v8755_v26, %v7346_v31  ;;  %v8864_v56 = vld [vmem:[%s13334_s5 + $0x784] sm:$0xf]  ;;  %v6900_v34 = vld [vmem:[%s13334_s5 + $0x98] sm:$0xf0] }
 0x1de   : > { %4512 = vmatpush.bf16.msrb.mxu0 %v7459_v14  ;;  %v4275_v14 = vadd.f32 %v4274_v10, %v4262_v54  ;;  %4479 = vmatpush.bf16.msra.mxu1 %v6979_v17  ;;  %v7807_v10 = vor.u32 %v8868_v43, %v7804_v8  ;;  %v7788_v17 = vld [vmem:[%s13334_s5 + $0x790] sm:$0xf0]  ;;  %v7759_v36 = vor.u32 %v8856_v24, %v7756_v27  ;;  %v8852_v31 = vld [vmem:[%s13334_s5 + $0x724] sm:$0xf]  ;;  %v7106_v43 = vld [vmem:[%s13334_s5 + $0x228] sm:$0xf] }
 0x1df   : > { %v2696_v61 = vrot.slane %v2695_v6, 1  ;;  %v7791_v59 = vor.u32 %v8864_v56, %v7788_v17  ;;  %v8695_v8 = vld [vmem:[%s13334_s5 + $0x234] sm:$0xf0]  ;;  %v6887_v56 = vor.u32 %v8637_v37, %v6884_v40  ;;  %v8681_v24 = vld [vmem:[%s13334_s5 + $0x1cc] sm:$0xf] }
 0x1e0   : > { %v7107_v22 = vor.u32 %v8695_v8, %v7106_v43  ;;  %v8691_v17 = vld [vmem:[%s13334_s5 + $0x214] sm:$0xf0]  ;;  %v7060_v27 = vld [vmem:[%s13334_s5 + $0x1d8] sm:$0xf0] }
 0x1e1   : > { %v2697_v16 = vmax.f32 %v2695_v6, %v2696_v61  ;;  %4441 = vmatpush.bf16.msrb.mxu2 %v7599_v2  ;;  %v8649_v6 = vld [vmem:[%s13334_s5 + $0xcc] sm:$0xf]  ;;  %v7772_v61 = vld [vmem:[%s13334_s5 + $0x770] sm:$0xf0]  ;;  %v7138_v2 = vld [vmem:[%s13334_s5 + $0x268] sm:$0xf] }
 0x1e2   : > { %4513 = vmatpush.bf16.msrb.mxu0 %v7443_v23  ;;  %v4263_v21 = vpop.f32.mrf.mxu0  ;;  %4480 = vmatpush.bf16.msra.mxu1 %v6963_v41  ;;  %v8703_v41 = vld [vmem:[%s13334_s5 + $0x274] sm:$0xf0] }
 0x1e3   : > { %v11768_v28 = vpack.c.bf16 %v2697_v16, %v2697_v16  ;;  %v8645_v16 = vld [vmem:[%s13334_s5 + $0xac] sm:$0xf]  ;;  %v7139_v20 = vor.u32 %v8703_v41, %v7138_v2  ;;  %v7331_v2 = vor.u32 %v8751_v32, %v7330_v60  ;;  %v8739_v37 = vld [vmem:[%s13334_s5 + $0x394] sm:$0xf0]  ;;  %v7650_v32 = vld [vmem:[%s13334_s5 + $0x668] sm:$0xf] }
 0x1e4   : > { %v4287_v23 = vpop.f32.mrf.mxu2  ;;  %v4276_v0 = vpop.f32.mrf.mxu1  ;;  %4442 = vmatmul.bf16.vlgmr.msrb.gmra.mxu2 %v11602_v1 }
 0x1e5   : > { %v11766_v52 = vadd.f32 %v4287_v23, %v4275_v14  ;;  %4351 = vmatmul.bf16.vlgmr.msrb.gmra.mxu3 %v11768_v28  ;;  %4486 = vmatpush.bf16.msra.mxu2 %v7203_v19  ;;  %v6932_v14 = vld [vmem:[%s13334_s5 + $0xd8] sm:$0xf0]  ;;  %v7775_v19 = vor.u32 %v8860_v58, %v7772_v61  ;;  %v8685_v58 = vld [vmem:[%s13334_s5 + $0x1ec] sm:$0xf] }
 0x1e6   : > { %4514 = vmatpush.bf16.msrb.mxu0 %v7427_v25  ;;  %v7186_v25 = vld [vmem:[%s13334_s5 + $0x2c8] sm:$0xf]  ;;  %4447 = vmatpush.bf16.msrb.mxu3 %v7839_v18  ;;  %v6935_v63 = vor.u32 %v8649_v6, %v6932_v14  ;;  %v6916_v23 = vld [vmem:[%s13334_s5 + $0xb8] sm:$0xf0]  ;;  %v8847_v14 = vld [vmem:[%s13334_s5 + $0x6f4] sm:$0xf0] }
 0x1e7   : > { %v7187_v4 = vor.u32 %v8715_v30, %v7186_v25  ;;  %4525 = vmatpush.bf16.msrb.mxu1 %v7587_v5  ;;  %v6919_v0 = vor.u32 %v8645_v16, %v6916_v23  ;;  %v8699_v5 = vld [vmem:[%s13334_s5 + $0x254] sm:$0xf0]  ;;  %v8641_v30 = vld [vmem:[%s13334_s5 + $0x8c] sm:$0xf]  ;;  %v7714_v6 = vld [vmem:[%s13334_s5 + $0x6e8] sm:$0xf] }
 0x1e8   : > { %4481 = vmatmul.bf16.vlgmr.msra.gmra.mxu1 %v11055_v45  ;;  %v4300_v11 = vpop.f32.mrf.mxu3  ;;  %v8795_v25 = vld [vmem:[%s13334_s5 + $0x554] sm:$0xf0]  ;;  %v6903_v26 = vor.u32 %v8641_v30, %v6900_v34  ;;  %v7076_v61 = vld [vmem:[%s13334_s5 + $0x1f8] sm:$0xf0]  ;;  %v7715_v41 = vor.u32 %v8847_v14, %v7714_v6  ;;  %v7063_v34 = vor.u32 %v8681_v24, %v7060_v27  ;;  %v8669_v14 = vld [vmem:[%s13334_s5 + $0x16c] sm:$0xf] }
 0x1e9   : > { %4487 = vmatpush.bf16.msra.mxu2 %v7187_v4  ;;  %v11868_v18 = vadd.f32 %v4300_v11, %v11766_v52  ;;  %v7122_v52 = vld [vmem:[%s13334_s5 + $0x248] sm:$0xf]  ;;  %v7507_v4 = vor.u32 %v8795_v25, %v7506_v44  ;;  %v6852_v11 = vld [vmem:[%s13334_s5 + $0x38] sm:$0xf0]  ;;  %v7079_v16 = vor.u32 %v8685_v58, %v7076_v61  ;;  %v8747_v23 = vld [vmem:[%s13334_s5 + $0x3d4] sm:$0xf0] }
 0x1ea   : > { %4515 = vmatpush.bf16.msrb.mxu0 %v7411_v39  ;;  %v7170_v39 = vld [vmem:[%s13334_s5 + $0x2a8] sm:$0xf]  ;;  %4448 = vmatpush.bf16.msrb.mxu3 %v7823_v42  ;;  %v7740_v42 = vld [vmem:[%s13334_s5 + $0x730] sm:$0xf0]  ;;  %v6836_v44 = vld [vmem:[%s13334_s5 + $0x18] sm:$0xf0] }
 0x1eb   : > { %v7171_v54 = vor.u32 %v8711_v53, %v7170_v39  ;;  %4526 = vmatpush.bf16.msrb.mxu1 %v7571_v47  ;;  %v7490_v47 = vld [vmem:[%s13334_s5 + $0x528] sm:$0xf]  ;;  %v8791_v53 = vld [vmem:[%s13334_s5 + $0x534] sm:$0xf0]  ;;  %v7743_v48 = vor.u32 %v8852_v31, %v7740_v42  ;;  %v8677_v31 = vld [vmem:[%s13334_s5 + $0x1ac] sm:$0xf] }
 0x1ec   : > { %v4289_v7 = vpop.f32.mrf.mxu2  ;;  %v7298_v25 = vld [vmem:[%s13334_s5 + $0x3a8] sm:$0xf]  ;;  %v8743_v30 = vld [vmem:[%s13334_s5 + $0x3b4] sm:$0xf0]  ;;  %v7044_v42 = vld [vmem:[%s13334_s5 + $0x1b8] sm:$0xf0] }
 0x1ed   : > { %4488 = vmatpush.bf16.msra.mxu2 %v7171_v54  ;;  %v7724_v7 = vld [vmem:[%s13334_s5 + $0x710] sm:$0xf0]  ;;  %v7491_v54 = vor.u32 %v8791_v53, %v7490_v47  ;;  %v7299_v8 = vor.u32 %v8743_v30, %v7298_v25  ;;  %v7282_v53 = vld [vmem:[%s13334_s5 + $0x388] sm:$0xf]  ;;  %v7047_v40 = vor.u32 %v8677_v31, %v7044_v42  ;;  %v8831_v6 = vld [vmem:[%s13334_s5 + $0x674] sm:$0xf0] }
 0x1ee   : > { %4516 = vmatpush.bf16.msrb.mxu0 %v7395_v13  ;;  %v7154_v13 = vld [vmem:[%s13334_s5 + $0x288] sm:$0xf]  ;;  %4449 = vmatpush.bf16.msrb.mxu3 %v7807_v10  ;;  %v7428_v58 = vld [vmem:[%s13334_s5 + $0x4b8] sm:$0xf0]  ;;  %v8823_v25 = vld [vmem:[%s13334_s5 + $0x634] sm:$0xf0] }
 0x1ef   : > { %v7155_v50 = vor.u32 %v8707_v9, %v7154_v13  ;;  %4527 = vmatpush.bf16.msrb.mxu1 %v7555_v33  ;;  %v7090_v10 = vld [vmem:[%s13334_s5 + $0x208] sm:$0xf]  ;;  %v8633_v13 = vld [vmem:[%s13334_s5 + $0x4c] sm:$0xf]  ;;  %v6868_v9 = vld [vmem:[%s13334_s5 + $0x58] sm:$0xf0] }
 0x1f0   : > { %v4302_v39 = vpop.f32.mrf.mxu3  ;;  %v7474_v33 = vld [vmem:[%s13334_s5 + $0x508] sm:$0xf]  ;;  %v8661_v30 = vld [vmem:[%s13334_s5 + $0x12c] sm:$0xf] }
 0x1f1   : > { %4489 = vmatpush.bf16.msra.mxu2 %v7155_v50  ;;  %v7091_v50 = vor.u32 %v8691_v17, %v7090_v10  ;;  %v8673_v10 = vld [vmem:[%s13334_s5 + $0x18c] sm:$0xf]  ;;  %v7283_v17 = vor.u32 %v8739_v37, %v7282_v53  ;;  %v8819_v53 = vld [vmem:[%s13334_s5 + $0x614] sm:$0xf0] }
 0x1f2   : > { %4517 = vmatpush.bf16.msrb.mxu0 %v7379_v12  ;;  %v8799_v12 = vld [vmem:[%s13334_s5 + $0x574] sm:$0xf0]  ;;  %4450 = vmatpush.bf16.msrb.mxu3 %v7791_v59  ;;  %v8657_v37 = vld [vmem:[%s13334_s5 + $0x10c] sm:$0xf] }
 0x1f3   : > { %4528 = vmatpush.bf16.msrb.mxu1 %v7539_v55  ;;  %v7523_v21 = vor.u32 %v8799_v12, %v7522_v3  ;;  %v8629_v3 = vld [vmem:[%s13334_s5 + $0x2c] sm:$0xf]  ;;  %v7314_v12 = vld [vmem:[%s13334_s5 + $0x3c8] sm:$0xf] }
 0x1f5   : > { %4403 = vmatmul.bf16.vlgmr.msra.gmra.mxu3 %v11111_v46  ;;  %4490 = vmatpush.bf16.msra.mxu2 %v7139_v20  ;;  %v8843_v20 = vld [vmem:[%s13334_s5 + $0x6d4] sm:$0xf0] }
 0x1f6   : > { %4518 = vmatpush.bf16.msrb.mxu0 %v7363_v15  ;;  %4451 = vmatpush.bf16.msrb.mxu3 %v7775_v19  ;;  %v7123_v15 = vor.u32 %v8699_v5, %v7122_v52  ;;  %v7698_v19 = vld [vmem:[%s13334_s5 + $0x6c8] sm:$0xf]  ;;  %v7315_v52 = vor.u32 %v8747_v23, %v7314_v12  ;;  %v8827_v12 = vld [vmem:[%s13334_s5 + $0x654] sm:$0xf0]  ;;  %v6996_v23 = vld [vmem:[%s13334_s5 + $0x158] sm:$0xf0] }
 0x1f7   : > { %4529 = vmatpush.bf16.msrb.mxu1 %v7523_v21  ;;  %v6855_v21 = vor.u32 %v8629_v3, %v6852_v11  ;;  %v7699_v5 = vor.u32 %v8843_v20, %v7698_v19  ;;  %v7634_v11 = vld [vmem:[%s13334_s5 + $0x648] sm:$0xf]  ;;  %v8769_v19 = vld [vmem:[%s13334_s5 + $0x48c] sm:$0xf]  ;;  %v7412_v20 = vld [vmem:[%s13334_s5 + $0x498] sm:$0xf0] }
 0x1f8   : > { %v7635_v27 = vor.u32 %v8827_v12, %v7634_v11 }
 0x1f9   : > { %4491 = vmatpush.bf16.msra.mxu2 %v7123_v15  ;;  %v8839_v15 = vld [vmem:[%s13334_s5 + $0x6b4] sm:$0xf0] }
 0x1fa   : > { %4519 = vmatpush.bf16.msrb.mxu0 %v7347_v49  ;;  %4452 = vmatpush.bf16.msrb.mxu3 %v7759_v36  ;;  %v8848_v49 = vld [vmem:[%s13334_s5 + $0x704] sm:$0xf]  ;;  %v7682_v36 = vld [vmem:[%s13334_s5 + $0x6a8] sm:$0xf] }
 0x1fb   : > { %4530 = vmatpush.bf16.msrb.mxu1 %v7507_v4  ;;  %v7727_v59 = vor.u32 %v8848_v49, %v7724_v7  ;;  %v8781_v4 = vld [vmem:[%s13334_s5 + $0x4ec] sm:$0xf]  ;;  %v7683_v47 = vor.u32 %v8839_v15, %v7682_v36  ;;  %v7666_v49 = vld [vmem:[%s13334_s5 + $0x688] sm:$0xf]  ;;  %v8835_v7 = vld [vmem:[%s13334_s5 + $0x694] sm:$0xf0] }
 0x1fc   : > { %v8765_v36 = vld [vmem:[%s13334_s5 + $0x46c] sm:$0xf]  ;;  %v7396_v15 = vld [vmem:[%s13334_s5 + $0x478] sm:$0xf0] }
 0x1fd   : > { %4520 = vmatmul.bf16.vlgmr.msrb.gmra.mxu0 %v11261_v38  ;;  %4492 = vmatpush.bf16.msra.mxu2 %v7107_v22 }
 0x1fe   : > { %4564 = vmatpush.bf16.msra.mxu0 %v6951_v62  ;;  %v8787_v62 = vld [vmem:[%s13334_s5 + $0x514] sm:$0xf0]  ;;  %4453 = vmatpush.bf16.msrb.mxu3 %v7743_v48 }
 0x1ff   : > { %4531 = vmatpush.bf16.msrb.mxu1 %v7491_v54  ;;  %v7475_v55 = vor.u32 %v8787_v62, %v7474_v33  ;;  %v7028_v54 = vld [vmem:[%s13334_s5 + $0x198] sm:$0xf0]  ;;  %v7667_v33 = vor.u32 %v8835_v7, %v7666_v49  ;;  %v7266_v62 = vld [vmem:[%s13334_s5 + $0x368] sm:$0xf] }
 0x200   : > { %v7380_v49 = vld [vmem:[%s13334_s5 + $0x458] sm:$0xf0]  ;;  %v7842_v7 = vld [vmem:[%s13334_s5 + $0x7e8] sm:$0xf] }
 0x201   : > { %4493 = vmatpush.bf16.msra.mxu2 %v7091_v50  ;;  %v4313_v39 = vpop.f32.mrf.mxu0  ;;  %v8773_v50 = vld [vmem:[%s13334_s5 + $0x4ac] sm:$0xf] }
 0x202   : > { %4565 = vmatpush.bf16.msra.mxu0 %v6935_v63  ;;  %v6871_v63 = vor.u32 %v8633_v13, %v6868_v9  ;;  %4454 = vmatpush.bf16.msrb.mxu3 %v7727_v59  ;;  %v12025_v22 = vadd.f32 %v4313_v39, %v11868_v18  ;;  %v8777_v18 = vld [vmem:[%s13334_s5 + $0x4cc] sm:$0xf]  ;;  %v8735_v13 = vld [vmem:[%s13334_s5 + $0x374] sm:$0xf0]  ;;  %v7031_v9 = vor.u32 %v8673_v10, %v7028_v54  ;;  %v7012_v59 = vld [vmem:[%s13334_s5 + $0x178] sm:$0xf0] }
 0x203   : > { %4532 = vmatpush.bf16.msrb.mxu1 %v7475_v55  ;;  %v7267_v61 = vor.u32 %v8735_v13, %v7266_v62  ;;  %v7651_v55 = vor.u32 %v8831_v6, %v7650_v32  ;;  %v7431_v3 = vor.u32 %v8773_v50, %v7428_v58  ;;  %v7399_v39 = vor.u32 %v8765_v36, %v7396_v15  ;;  %v8879_v10 = vld [vmem:[%s13334_s5 + $0x7f4] sm:$0xf0]  ;;  %v8717_v54 = vld [vmem:[%s13334_s5 + $0x2ec] sm:$0xf]  ;;  %v7588_v62 = vld [vmem:[%s13334_s5 + $0x5f8] sm:$0xf0] }
 0x204   : > { %4494 = vmatmul.bf16.vlgmr.msra.gmra.mxu2 %v11057_v57  ;;  %v8757_v6 = vld [vmem:[%s13334_s5 + $0x42c] sm:$0xf]  ;;  %v8875_v58 = vld [vmem:[%s13334_s5 + $0x7d4] sm:$0xf0] }
 0x205   : > { %4538 = vmatpush.bf16.msrb.mxu2 %v7715_v41  ;;  %4455 = vmatmul.bf16.vlgmr.msrb.gmra.mxu3 %v11768_v28  ;;  %v7015_v41 = vor.u32 %v8669_v14, %v7012_v59  ;;  %v7364_v14 = vld [vmem:[%s13334_s5 + $0x438] sm:$0xf0]  ;;  %v7826_v59 = vld [vmem:[%s13334_s5 + $0x7c8] sm:$0xf]  ;;  %v8867_v36 = vld [vmem:[%s13334_s5 + $0x794] sm:$0xf0] }
 0x206   : > { %4566 = vmatpush.bf16.msra.mxu0 %v6919_v0  ;;  %v8625_v0 = vld [vmem:[%s13334_s5 + $0xc] sm:$0xf]  ;;  %4499 = vmatpush.bf16.msra.mxu3 %v7331_v2  ;;  %v8731_v2 = vld [vmem:[%s13334_s5 + $0x354] sm:$0xf0]  ;;  %v7827_v11 = vor.u32 %v8875_v58, %v7826_v59  ;;  %v7508_v58 = vld [vmem:[%s13334_s5 + $0x558] sm:$0xf0] }
 0x207   : > { %4577 = vmatpush.bf16.msra.mxu1 %v7079_v16  ;;  %v6839_v43 = vor.u32 %v8625_v0, %v6836_v44  ;;  %v8665_v16 = vld [vmem:[%s13334_s5 + $0x14c] sm:$0xf]  ;;  %v8727_v0 = vld [vmem:[%s13334_s5 + $0x334] sm:$0xf0]  ;;  %v7618_v44 = vld [vmem:[%s13334_s5 + $0x628] sm:$0xf] }
 0x208   : > { %4533 = vmatmul.bf16.vlgmr.msrb.gmra.mxu1 %v11438_v51  ;;  %v7619_v42 = vor.u32 %v8823_v25, %v7618_v44  ;;  %v8793_v59 = vld [vmem:[%s13334_s5 + $0x54c] sm:$0xf] }
 0x209   : > { %4539 = vmatpush.bf16.msrb.mxu2 %v7699_v5  ;;  %v7415_v5 = vor.u32 %v8769_v19, %v7412_v20  ;;  %v8871_v19 = vld [vmem:[%s13334_s5 + $0x7b4] sm:$0xf0] }
 0x20a   : > { %4567 = vmatpush.bf16.msra.mxu0 %v6903_v26  ;;  %v7460_v26 = vld [vmem:[%s13334_s5 + $0x4f8] sm:$0xf0]  ;;  %4500 = vmatpush.bf16.msra.mxu3 %v7315_v52  ;;  %v6999_v52 = vor.u32 %v8665_v16, %v6996_v23  ;;  %v7810_v23 = vld [vmem:[%s13334_s5 + $0x7a8] sm:$0xf] }
 0x20b   : > { %4578 = vmatpush.bf16.msra.mxu1 %v7063_v34  ;;  %v7463_v48 = vor.u32 %v8781_v4, %v7460_v26  ;;  %v6980_v34 = vld [vmem:[%s13334_s5 + $0x138] sm:$0xf0]  ;;  %v7218_v26 = vld [vmem:[%s13334_s5 + $0x308] sm:$0xf]  ;;  %v7811_v25 = vor.u32 %v8871_v19, %v7810_v23  ;;  %v8789_v23 = vld [vmem:[%s13334_s5 + $0x52c] sm:$0xf] }
 0x20c   : > { %v7348_v16 = vld [vmem:[%s13334_s5 + $0x418] sm:$0xf0] }
 0x20d   : > { %4540 = vmatpush.bf16.msrb.mxu2 %v7683_v47  ;;  %v6983_v47 = vor.u32 %v8661_v30, %v6980_v34 }
 0x20e   : > { %4568 = vmatpush.bf16.msra.mxu0 %v6887_v56  ;;  %v7444_v56 = vld [vmem:[%s13334_s5 + $0x4d8] sm:$0xf0]  ;;  %4501 = vmatpush.bf16.msra.mxu3 %v7299_v8  ;;  %v7602_v8 = vld [vmem:[%s13334_s5 + $0x608] sm:$0xf] }
 0x20f   : > { %4579 = vmatpush.bf16.msra.mxu1 %v7047_v40  ;;  %v7447_v60 = vor.u32 %v8777_v18, %v7444_v56  ;;  %v6964_v40 = vld [vmem:[%s13334_s5 + $0x118] sm:$0xf0] }
 0x210   : > { %v7204_v18 = vld [vmem:[%s13334_s5 + $0x2f8] sm:$0xf0]  ;;  %v6967_v13 = vor.u32 %v8657_v37, %v6964_v40  ;;  %v7778_v40 = vld [vmem:[%s13334_s5 + $0x768] sm:$0xf] }
 0x211   : > { %4541 = vmatpush.bf16.msrb.mxu2 %v7667_v33  ;;  %v8813_v33 = vld [vmem:[%s13334_s5 + $0x5ec] sm:$0xf]  ;;  %v7207_v32 = vor.u32 %v8717_v54, %v7204_v18 }
 0x212   : > { %4569 = vmatpush.bf16.msra.mxu0 %v6871_v63  ;;  %4502 = vmatpush.bf16.msra.mxu3 %v7283_v17  ;;  %v4315_v63 = vpop.f32.mrf.mxu0  ;;  %v7603_v17 = vor.u32 %v8819_v53, %v7602_v8  ;;  %v7591_v50 = vor.u32 %v8813_v33, %v7588_v62  ;;  %v7540_v8 = vld [vmem:[%s13334_s5 + $0x598] sm:$0xf0]  ;;  %v8797_v54 = vld [vmem:[%s13334_s5 + $0x56c] sm:$0xf]  ;;  %v8902_v33 = vld [vmem:[%s13336_s7 + $0xac] sm:$0xf0] }
 0x213   : > { %4580 = vmatpush.bf16.msra.mxu1 %v7031_v9 }
 0x215   : > { %4542 = vmatpush.bf16.msrb.mxu2 %v7651_v55  ;;  %v7188_v55 = vld [vmem:[%s13334_s5 + $0x2d8] sm:$0xf0] }
 0x216   : > { %4570 = vmatpush.bf16.msra.mxu0 %v6855_v21  ;;  %4503 = vmatpush.bf16.msra.mxu3 %v7267_v61  ;;  %v7234_v21 = vld [vmem:[%s13334_s5 + $0x328] sm:$0xf]  ;;  %v8713_v61 = vld [vmem:[%s13334_s5 + $0x2cc] sm:$0xf] }
 0x217   : > { %4581 = vmatpush.bf16.msra.mxu1 %v7015_v41  ;;  %v7235_v31 = vor.u32 %v8727_v0, %v7234_v21  ;;  %v7367_v41 = vor.u32 %v8757_v6, %v7364_v14  ;;  %v7191_v12 = vor.u32 %v8713_v61, %v7188_v55  ;;  %v8805_v21 = vld [vmem:[%s13334_s5 + $0x5ac] sm:$0xf]  ;;  %v7556_v0 = vld [vmem:[%s13334_s5 + $0x5b8] sm:$0xf0]  ;;  %v7914_v61 = vld [vmem:[%s13336_s7 + $0x80] sm:$0xf] }
 0x218   : > { %v7559_v15 = vor.u32 %v8805_v21, %v7556_v0  ;;  %v8697_v6 = vld [vmem:[%s13334_s5 + $0x24c] sm:$0xf]  ;;  %v7124_v14 = vld [vmem:[%s13334_s5 + $0x258] sm:$0xf0]  ;;  %v8898_v55 = vld [vmem:[%s13336_s7 + $0x8c] sm:$0xf0] }
 0x219   : > { %4543 = vmatpush.bf16.msrb.mxu2 %v7635_v27  ;;  %v7172_v27 = vld [vmem:[%s13334_s5 + $0x2b8] sm:$0xf0]  ;;  %v7915_v19 = vor.u32 %v8898_v55, %v7914_v61  ;;  %v8074_v55 = vld [vmem:[%s13336_s7 + $0x1c0] sm:$0xf] }
 0x21a   : > { %4571 = vmatpush.bf16.msra.mxu0 %v6839_v43  ;;  %v12118_v4 = vpop.f32.mrf.mxu0  ;;  %v8723_v43 = vld [vmem:[%s13334_s5 + $0x314] sm:$0xf0] }
 0x21b   : > { %4582 = vmatpush.bf16.msra.mxu1 %v6999_v52  ;;  %v7219_v56 = vor.u32 %v8723_v43, %v7218_v26  ;;  %v7962_v52 = vld [vmem:[%s13336_s7 + $0xe0] sm:$0xf]  ;;  %v8801_v26 = vld [vmem:[%s13334_s5 + $0x58c] sm:$0xf] }
 0x21d   : > { %4572 = vmatmul.bf16.vlgmr.msra.gmra.mxu0 %v11053_v35  ;;  %v7250_v35 = vld [vmem:[%s13334_s5 + $0x348] sm:$0xf]  ;;  %4544 = vmatpush.bf16.msrb.mxu2 %v7619_v42  ;;  %v7156_v42 = vld [vmem:[%s13334_s5 + $0x298] sm:$0xf0] }
 0x21e   : > { %4616 = vmatpush.bf16.msrb.mxu0 %v7463_v48  ;;  %v7251_v24 = vor.u32 %v8731_v2, %v7250_v35  ;;  %v8761_v48 = vld [vmem:[%s13334_s5 + $0x44c] sm:$0xf]  ;;  %v7572_v2 = vld [vmem:[%s13334_s5 + $0x5d8] sm:$0xf0] }
 0x21f   : > { %4583 = vmatpush.bf16.msra.mxu1 %v6983_v47  ;;  %v7383_v9 = vor.u32 %v8761_v48, %v7380_v49  ;;  %v8809_v35 = vld [vmem:[%s13334_s5 + $0x5cc] sm:$0xf]  ;;  %v7946_v47 = vld [vmem:[%s13336_s7 + $0xc0] sm:$0xf]  ;;  %v8863_v48 = vld [vmem:[%s13334_s5 + $0x774] sm:$0xf0]  ;;  %v7543_v49 = vor.u32 %v8801_v26, %v7540_v8 }
 0x220   : > { %4504 = vmatpush.bf16.msra.mxu3 %v7251_v24  ;;  %v7575_v20 = vor.u32 %v8809_v35, %v7572_v2  ;;  %v8709_v24 = vld [vmem:[%s13334_s5 + $0x2ac] sm:$0xf]  ;;  %v7779_v62 = vor.u32 %v8863_v48, %v7778_v40 }
 0x221   : > { %4545 = vmatpush.bf16.msrb.mxu2 %v7603_v17  ;;  %v7175_v30 = vor.u32 %v8709_v24, %v7172_v27  ;;  %v12219_v34 = vpop.f32.mrf.mxu1  ;;  %v7930_v17 = vld [vmem:[%s13336_s7 + $0xa0] sm:$0xf]  ;;  %v8894_v27 = vld [vmem:[%s13336_s7 + $0x6c] sm:$0xf0]  ;;  %v8749_v26 = vld [vmem:[%s13334_s5 + $0x3ec] sm:$0xf] }
 0x222   : > { %4617 = vmatpush.bf16.msrb.mxu0 %v7447_v60  ;;  %v7843_v60 = vor.u32 %v8879_v10, %v7842_v7  ;;  %v4367_v63 = vpop.f32.mrf.mxu0  ;;  %v8701_v7 = vld [vmem:[%s13334_s5 + $0x26c] sm:$0xf]  ;;  %v7140_v10 = vld [vmem:[%s13334_s5 + $0x278] sm:$0xf0]  ;;  %v7898_v24 = vld [vmem:[%s13336_s7 + $0x60] sm:$0xf] }
 0x223   : > { %4584 = vmatpush.bf16.msra.mxu1 %v6967_v13  ;;  %v7143_v13 = vor.u32 %v8701_v7, %v7140_v10  ;;  %v4245_v63 = vperm.slane %v11681_v29, 1  ;;  %v8693_v29 = vld [vmem:[%s13334_s5 + $0x22c] sm:$0xf] }
 0x224   : > { %4505 = vmatpush.bf16.msra.mxu3 %v7235_v31  ;;  %4546 = vmatmul.bf16.vlgmr.msrb.gmra.mxu2 %v11602_v1  ;;  %v8705_v31 = vld [vmem:[%s13334_s5 + $0x28c] sm:$0xf] }
 0x225   : > { %4590 = vmatpush.bf16.msra.mxu2 %v7207_v32  ;;  %v7159_v37 = vor.u32 %v8705_v31, %v7156_v42  ;;  %v4366_v21 = vadd.f32 %v12118_v4, %v4245_v63  ;;  %v7476_v31 = vld [vmem:[%s13334_s5 + $0x518] sm:$0xf0]  ;;  %v7899_v42 = vor.u32 %v8894_v27, %v7898_v24  ;;  %v8845_v8 = vld [vmem:[%s13334_s5 + $0x6ec] sm:$0xf]  ;;  %v8938_v63 = vld [vmem:[%s13336_s7 + $0x1cc] sm:$0xf0] }
 0x226   : > { %4618 = vmatpush.bf16.msrb.mxu0 %v7431_v3  ;;  %v8753_v3 = vld [vmem:[%s13334_s5 + $0x40c] sm:$0xf]  ;;  %4585 = vmatmul.bf16.vlgmr.msra.gmra.mxu1 %v11055_v45  ;;  %v7794_v45 = vld [vmem:[%s13334_s5 + $0x788] sm:$0xf]  ;;  %v8934_v24 = vld [vmem:[%s13336_s7 + $0x1ac] sm:$0xf0] }
 0x227   : > { %4629 = vmatpush.bf16.msrb.mxu1 %v7591_v50  ;;  %v7351_v44 = vor.u32 %v8753_v3, %v7348_v16  ;;  %v7795_v53 = vor.u32 %v8867_v36, %v7794_v45  ;;  %v7931_v50 = vor.u32 %v8902_v33, %v7930_v17  ;;  %v7746_v3 = vld [vmem:[%s13334_s5 + $0x728] sm:$0xf]  ;;  %v7108_v16 = vld [vmem:[%s13334_s5 + $0x238] sm:$0xf0]  ;;  %v8745_v10 = vld [vmem:[%s13334_s5 + $0x3cc] sm:$0xf] }
 0x228   : > { %4506 = vmatpush.bf16.msra.mxu3 %v7219_v56  ;;  %v7524_v56 = vld [vmem:[%s13334_s5 + $0x578] sm:$0xf0]  ;;  %v8090_v33 = vld [vmem:[%s13336_s7 + $0x1e0] sm:$0xf]  ;;  %v8833_v27 = vld [vmem:[%s13334_s5 + $0x68c] sm:$0xf] }
 0x229   : > { %4591 = vmatpush.bf16.msra.mxu2 %v7191_v12  ;;  %v7527_v32 = vor.u32 %v8797_v54, %v7524_v56  ;;  %v7511_v12 = vor.u32 %v8793_v59, %v7508_v58  ;;  %v7092_v36 = vld [vmem:[%s13334_s5 + $0x218] sm:$0xf0]  ;;  %v8841_v56 = vld [vmem:[%s13334_s5 + $0x6cc] sm:$0xf] }
 0x22a   : > { %4619 = vmatpush.bf16.msrb.mxu0 %v7415_v5  ;;  %v8910_v5 = vld [vmem:[%s13336_s7 + $0xec] sm:$0xf0]  ;;  %v7316_v54 = vld [vmem:[%s13334_s5 + $0x3d8] sm:$0xf0]  ;;  %v8837_v58 = vld [vmem:[%s13334_s5 + $0x6ac] sm:$0xf] }
 0x22b   : > { %4507 = vmatmul.bf16.vlgmr.msra.gmra.mxu3 %v11111_v46  ;;  %4630 = vmatpush.bf16.msrb.mxu1 %v7575_v20  ;;  %v7963_v43 = vor.u32 %v8910_v5, %v7962_v52  ;;  %v7492_v20 = vld [vmem:[%s13334_s5 + $0x538] sm:$0xf0]  ;;  %v7111_v52 = vor.u32 %v8693_v29, %v7108_v16  ;;  %v8737_v29 = vld [vmem:[%s13334_s5 + $0x38c] sm:$0xf]  ;;  %v8075_v16 = vor.u32 %v8938_v63, %v8074_v55 }
 0x22c   : > { %4551 = vmatpush.bf16.msrb.mxu3 %v7843_v60  ;;  %v8859_v60 = vld [vmem:[%s13334_s5 + $0x754] sm:$0xf0]  ;;  %v7495_v45 = vor.u32 %v8789_v23, %v7492_v20  ;;  %v8058_v20 = vld [vmem:[%s13336_s7 + $0x1a0] sm:$0xf] }
 0x22d   : > { %4592 = vmatpush.bf16.msra.mxu2 %v7175_v30  ;;  %v8689_v30 = vld [vmem:[%s13334_s5 + $0x20c] sm:$0xf] }
 0x22e   : > { %4620 = vmatpush.bf16.msrb.mxu0 %v7399_v39  ;;  %v8906_v39 = vld [vmem:[%s13336_s7 + $0xcc] sm:$0xf0]  ;;  %v7095_v48 = vor.u32 %v8689_v30, %v7092_v36  ;;  %v8733_v30 = vld [vmem:[%s13334_s5 + $0x36c] sm:$0xf] }
 0x22f   : > { %4631 = vmatpush.bf16.msrb.mxu1 %v7559_v15  ;;  %v7947_v18 = vor.u32 %v8906_v39, %v7946_v47  ;;  %v8785_v15 = vld [vmem:[%s13334_s5 + $0x50c] sm:$0xf]  ;;  %v7716_v47 = vld [vmem:[%s13334_s5 + $0x6f8] sm:$0xf0]  ;;  %v7882_v39 = vld [vmem:[%s13336_s7 + $0x40] sm:$0xf] }
 0x230   : > { %4552 = vmatpush.bf16.msrb.mxu3 %v7827_v11  ;;  %v8855_v11 = vld [vmem:[%s13334_s5 + $0x734] sm:$0xf0] }
 0x231   : > { %4593 = vmatpush.bf16.msra.mxu2 %v7159_v37  ;;  %v7747_v0 = vor.u32 %v8855_v11, %v7746_v3  ;;  %v8882_v3 = vld [vmem:[%s13336_s7 + $0xc] sm:$0xf0]  ;;  %v8908_v11 = vld [vmem:[%s13336_s7 + $0xe4] sm:$0xf] }
 0x232   : > { %4621 = vmatpush.bf16.msrb.mxu0 %v7383_v9  ;;  %v4328_v9 = vpop.f32.mrf.mxu1 }
 0x233   : > { %4632 = vmatpush.bf16.msrb.mxu1 %v7543_v49  ;;  %v7479_v49 = vor.u32 %v8785_v15, %v7476_v31  ;;  %v7866_v9 = vld [vmem:[%s13336_s7 + $0x20] sm:$0xf]  ;;  %v7268_v15 = vld [vmem:[%s13334_s5 + $0x378] sm:$0xf0] }
 0x234   : > { %4553 = vmatpush.bf16.msrb.mxu3 %v7811_v25  ;;  %v8851_v25 = vld [vmem:[%s13334_s5 + $0x714] sm:$0xf0]  ;;  %v8042_v31 = vld [vmem:[%s13336_s7 + $0x180] sm:$0xf] }
 0x235   : > { %4594 = vmatpush.bf16.msra.mxu2 %v7143_v13  ;;  %v7700_v13 = vld [vmem:[%s13334_s5 + $0x6d8] sm:$0xf0] }
 0x236   : > { %4622 = vmatpush.bf16.msrb.mxu0 %v7367_v41  ;;  %v7127_v41 = vor.u32 %v8697_v6, %v7124_v14  ;;  %v8741_v6 = vld [vmem:[%s13334_s5 + $0x3ac] sm:$0xf]  ;;  %v7300_v14 = vld [vmem:[%s13334_s5 + $0x3b8] sm:$0xf0] }
 0x237   : > { %4633 = vmatpush.bf16.msrb.mxu1 %v7527_v32  ;;  %v7319_v32 = vor.u32 %v8745_v10, %v7316_v54  ;;  %v8026_v10 = vld [vmem:[%s13336_s7 + $0x160] sm:$0xf]  ;;  %v8926_v54 = vld [vmem:[%s13336_s7 + $0x16c] sm:$0xf0] }
 0x238   : > { %4554 = vmatpush.bf16.msrb.mxu3 %v7795_v53  ;;  %v8890_v53 = vld [vmem:[%s13336_s7 + $0x4c] sm:$0xf0] }
 0x239   : > { %4595 = vmatpush.bf16.msra.mxu2 %v7127_v41  ;;  %v7883_v17 = vor.u32 %v8890_v53, %v7882_v39  ;;  %v7850_v41 = vld [vmem:[%s13336_s7] sm:$0xf]  ;;  %v8900_v39 = vld [vmem:[%s13336_s7 + $0xa4] sm:$0xf]  ;;  %v7932_v53 = vld [vmem:[%s13336_s7 + $0xb0] sm:$0xf0] }
 0x23a   : > { %4623 = vmatpush.bf16.msrb.mxu0 %v7351_v44  ;;  %v12295_v35 = vpop.f32.mrf.mxu0  ;;  %v4378_v5 = vpop.f32.mrf.mxu1  ;;  %v7730_v44 = vld [vmem:[%s13334_s5 + $0x708] sm:$0xf] }
 0x23b   : > { %4634 = vmatpush.bf16.msrb.mxu1 %v7511_v12  ;;  %v12331_v4 = vadd.f32 %v4378_v5, %v4366_v21  ;;  %v7731_v40 = vor.u32 %v8851_v25, %v7730_v44  ;;  %v7303_v12 = vor.u32 %v8741_v6, %v7300_v14  ;;  %v7668_v21 = vld [vmem:[%s13334_s5 + $0x698] sm:$0xf0]  ;;  %v8904_v5 = vld [vmem:[%s13336_s7 + $0xc4] sm:$0xf]  ;;  %v7948_v44 = vld [vmem:[%s13336_s7 + $0xd0] sm:$0xf0] }
 0x23c   : > { %4555 = vmatpush.bf16.msrb.mxu3 %v7779_v62  ;;  %v8942_v62 = vld [vmem:[%s13336_s7 + $0x1ec] sm:$0xf0]  ;;  %v7671_v36 = vor.u32 %v8833_v27, %v7668_v21  ;;  %v7236_v14 = vld [vmem:[%s13334_s5 + $0x338] sm:$0xf0]  ;;  %v8888_v21 = vld [vmem:[%s13336_s7 + $0x44] sm:$0xf] }
 0x23d   : > { %4624 = vmatmul.bf16.vlgmr.msrb.gmra.mxu0 %v11261_v38  ;;  %v7762_v38 = vld [vmem:[%s13334_s5 + $0x748] sm:$0xf]  ;;  %4596 = vmatpush.bf16.msra.mxu2 %v7111_v52  ;;  %v8091_v59 = vor.u32 %v8942_v62, %v8090_v33  ;;  %v8896_v62 = vld [vmem:[%s13336_s7 + $0x84] sm:$0xf] }
 0x23e   : > { %5454 = vmatpush.bf16.msra.mxu0 %v7963_v43  ;;  %v7763_v2 = vor.u32 %v8859_v60, %v7762_v38  ;;  %v7332_v43 = vld [vmem:[%s13334_s5 + $0x3f8] sm:$0xf0]  ;;  %v8886_v38 = vld [vmem:[%s13336_s7 + $0x2c] sm:$0xf0] }
 0x23f   : > { %4635 = vmatpush.bf16.msrb.mxu1 %v7495_v45  ;;  %v7335_v7 = vor.u32 %v8749_v26, %v7332_v43  ;;  %v7867_v61 = vor.u32 %v8886_v38, %v7866_v9  ;;  %v8059_v45 = vor.u32 %v8934_v24, %v8058_v20  ;;  %v8829_v26 = vld [vmem:[%s13334_s5 + $0x66c] sm:$0xf]  ;;  %v7652_v43 = vld [vmem:[%s13334_s5 + $0x678] sm:$0xf0] }
 0x240   : > { %4556 = vmatpush.bf16.msrb.mxu3 %v7763_v2  ;;  %v7684_v2 = vld [vmem:[%s13334_s5 + $0x6b8] sm:$0xf0]  ;;  %v8877_v20 = vld [vmem:[%s13334_s5 + $0x7ec] sm:$0xf] }
 0x241   : > { %4597 = vmatpush.bf16.msra.mxu2 %v7095_v48  ;;  %v7687_v23 = vor.u32 %v8837_v58, %v7684_v2  ;;  %v8821_v58 = vld [vmem:[%s13334_s5 + $0x62c] sm:$0xf]  ;;  %v8892_v2 = vld [vmem:[%s13336_s7 + $0x64] sm:$0xf]  ;;  %v7844_v24 = vld [vmem:[%s13334_s5 + $0x7f8] sm:$0xf0] }
 0x242   : > { %5455 = vmatpush.bf16.msra.mxu0 %v7947_v18  ;;  %v4419_v37 = vpop.f32.mrf.mxu0  ;;  %v7719_v18 = vor.u32 %v8845_v8, %v7716_v47  ;;  %v4380_v60 = vpop.f32.mrf.mxu1  ;;  %v7951_v8 = vor.u32 %v8904_v5, %v7948_v44 }
 0x243   : > { %4636 = vmatpush.bf16.msrb.mxu1 %v7479_v49  ;;  %v7271_v37 = vor.u32 %v8733_v30, %v7268_v15  ;;  %v7655_v49 = vor.u32 %v8829_v26, %v7652_v43  ;;  %v8725_v60 = vld [vmem:[%s13334_s5 + $0x32c] sm:$0xf]  ;;  %v7978_v15 = vld [vmem:[%s13336_s7 + $0x100] sm:$0xf]  ;;  %v8940_v43 = vld [vmem:[%s13336_s7 + $0x1e4] sm:$0xf] }
 0x244   : > { %4557 = vmatpush.bf16.msrb.mxu3 %v7747_v0  ;;  %4598 = vmatmul.bf16.vlgmr.msra.gmra.mxu2 %v11057_v57  ;;  %v7964_v57 = vld [vmem:[%s13336_s7 + $0xf0] sm:$0xf0] }
 0x245   : > { %4642 = vmatpush.bf16.msrb.mxu2 %v7719_v18  ;;  %v7967_v0 = vor.u32 %v8908_v11, %v7964_v57  ;;  %v12461_v47 = vpop.f32.mrf.mxu2  ;;  %v8825_v18 = vld [vmem:[%s13334_s5 + $0x64c] sm:$0xf]  ;;  %v7220_v57 = vld [vmem:[%s13334_s5 + $0x318] sm:$0xf0] }
 0x246   : > { %5456 = vmatpush.bf16.msra.mxu0 %v7931_v50  ;;  %v7703_v50 = vor.u32 %v8841_v56, %v7700_v13  ;;  %4637 = vmatmul.bf16.vlgmr.msrb.gmra.mxu1 %v11438_v51  ;;  %v7284_v51 = vld [vmem:[%s13334_s5 + $0x398] sm:$0xf0]  ;;  %v7916_v13 = vld [vmem:[%s13336_s7 + $0x90] sm:$0xf0]  ;;  %v8721_v11 = vld [vmem:[%s13334_s5 + $0x30c] sm:$0xf] }
 0x247   : > { %5467 = vmatpush.bf16.msra.mxu1 %v8091_v59  ;;  %v7287_v25 = vor.u32 %v8737_v29, %v7284_v51  ;;  %v7636_v56 = vld [vmem:[%s13334_s5 + $0x658] sm:$0xf0]  ;;  %v8010_v59 = vld [vmem:[%s13336_s7 + $0x140] sm:$0xf]  ;;  %v7919_v55 = vor.u32 %v8896_v62, %v7916_v13  ;;  %v8918_v51 = vld [vmem:[%s13336_s7 + $0x12c] sm:$0xf0]  ;;  %v7223_v44 = vor.u32 %v8721_v11, %v7220_v57 }
 0x248   : > { %4558 = vmatpush.bf16.msrb.mxu3 %v7731_v40  ;;  %v8729_v40 = vld [vmem:[%s13334_s5 + $0x34c] sm:$0xf]  ;;  %v7639_v6 = vor.u32 %v8825_v18, %v7636_v56  ;;  %v8936_v18 = vld [vmem:[%s13336_s7 + $0x1c4] sm:$0xf]  ;;  %v8076_v56 = vld [vmem:[%s13336_s7 + $0x1d0] sm:$0xf0] }
 0x249   : > { %4643 = vmatpush.bf16.msrb.mxu2 %v7703_v50  ;;  %v8922_v50 = vld [vmem:[%s13336_s7 + $0x14c] sm:$0xf0]  ;;  %v12598_v62 = vld [vmem:[%s13335_s6] sm:$0xf] }
 0x24a   : > { %5457 = vmatpush.bf16.msra.mxu0 %v7915_v19  ;;  %v7851_v19 = vor.u32 %v8882_v3, %v7850_v41  ;;  %v12435_v52 = vpop.f32.mrf.mxu1  ;;  %v7900_v41 = vld [vmem:[%s13336_s7 + $0x70] sm:$0xf0]  ;;  %v7239_v3 = vor.u32 %v8725_v60, %v7236_v14  ;;  %v4246_v13 = vperm.slane %v12598_v62, 2  ;;  %v8079_v60 = vor.u32 %v8936_v18, %v8076_v56 }
 0x24b   : > { %4559 = vmatmul.bf16.vlgmr.msrb.gmra.mxu3 %v11768_v28  ;;  %5468 = vmatpush.bf16.msra.mxu1 %v8075_v16  ;;  %v8817_v16 = vld [vmem:[%s13334_s5 + $0x60c] sm:$0xf]  ;;  %v7903_v27 = vor.u32 %v8892_v2, %v7900_v41  ;;  %v8060_v14 = vld [vmem:[%s13336_s7 + $0x1b0] sm:$0xf0]  ;;  %v7780_v41 = vld [vmem:[%s13334_s5 + $0x778] sm:$0xf0] }
 0x24c   : > { %4603 = vmatpush.bf16.msra.mxu3 %v7335_v7  ;;  %v7252_v7 = vld [vmem:[%s13334_s5 + $0x358] sm:$0xf0] }
 0x24d   : > { %4644 = vmatpush.bf16.msrb.mxu2 %v7687_v23  ;;  %v7255_v38 = vor.u32 %v8729_v40, %v7252_v7  ;;  %v4341_v63 = vpop.f32.mrf.mxu2  ;;  %v7994_v23 = vld [vmem:[%s13336_s7 + $0x120] sm:$0xf] }
 0x24e   : > { %5458 = vmatpush.bf16.msra.mxu0 %v7899_v42  ;;  %v8930_v42 = vld [vmem:[%s13336_s7 + $0x18c] sm:$0xf0]  ;;  %v4327_v63 = vadd.f32 %v12219_v34, %v12025_v22 }
 0x24f   : > { %5469 = vmatpush.bf16.msra.mxu1 %v8059_v45  ;;  %v8043_v48 = vor.u32 %v8930_v42, %v8042_v31  ;;  %v7847_v45 = vor.u32 %v8877_v20, %v7844_v24  ;;  %v8914_v31 = vld [vmem:[%s13336_s7 + $0x10c] sm:$0xf0]  ;;  %v7828_v42 = vld [vmem:[%s13334_s5 + $0x7d8] sm:$0xf0]  ;;  %v8924_v20 = vld [vmem:[%s13336_s7 + $0x164] sm:$0xf] }
 0x250   : > { %4604 = vmatpush.bf16.msra.mxu3 %v7319_v32  ;;  %v8027_v32 = vor.u32 %v8926_v54, %v8026_v10  ;;  %v7979_v40 = vor.u32 %v8914_v31, %v7978_v15  ;;  %v7812_v10 = vld [vmem:[%s13334_s5 + $0x7b8] sm:$0xf0]  ;;  %v4340_v57 = vadd.f32 %v12461_v47, %v4327_v63  ;;  %v8911_v47 = vld [vmem:[%s13336_s7 + $0xf4] sm:$0xf0]  ;;  %v8028_v24 = vld [vmem:[%s13336_s7 + $0x170] sm:$0xf0] }
 0x251   : > { %4645 = vmatpush.bf16.msrb.mxu2 %v7671_v36  ;;  %v8873_v36 = vld [vmem:[%s13334_s5 + $0x7cc] sm:$0xf]  ;;  %v8907_v15 = vld [vmem:[%s13336_s7 + $0xd4] sm:$0xf0]  ;;  %v8031_v31 = vor.u32 %v8924_v20, %v8028_v24 }
 0x252   : > { %5459 = vmatpush.bf16.msra.mxu0 %v7883_v17  ;;  %v7935_v17 = vor.u32 %v8900_v39, %v7932_v53  ;;  %v4432_v33 = vpop.f32.mrf.mxu1  ;;  %v8884_v53 = vld [vmem:[%s13336_s7 + $0x24] sm:$0xf] }
 0x253   : > { %5470 = vmatpush.bf16.msra.mxu1 %v8043_v48  ;;  %v7831_v48 = vor.u32 %v8873_v36, %v7828_v42  ;;  %v7852_v33 = vld [vmem:[%s13336_s7 + $0x10] sm:$0xf0]  ;;  %v7954_v36 = vld [vmem:[%s13336_s7 + $0xc8] sm:$0xf]  ;;  %v8920_v42 = vld [vmem:[%s13336_s7 + $0x144] sm:$0xf] }
 0x254   : > { %4605 = vmatpush.bf16.msra.mxu3 %v7303_v12  ;;  %v8011_v12 = vor.u32 %v8922_v50, %v8010_v59 }
 0x255   : > { %4646 = vmatpush.bf16.msrb.mxu2 %v7655_v49  ;;  %v12567_v39 = vpop.f32.mrf.mxu2  ;;  %v8869_v49 = vld [vmem:[%s13334_s5 + $0x7ac] sm:$0xf] }
 0x256   : > { %5460 = vmatpush.bf16.msra.mxu0 %v7867_v61  ;;  %v7620_v61 = vld [vmem:[%s13334_s5 + $0x638] sm:$0xf0] }
 0x257   : > { %5471 = vmatpush.bf16.msra.mxu1 %v8027_v32  ;;  %v7623_v29 = vor.u32 %v8821_v58, %v7620_v61  ;;  %v8861_v61 = vld [vmem:[%s13334_s5 + $0x76c] sm:$0xf] }
 0x258   : > { %4606 = vmatpush.bf16.msra.mxu3 %v7287_v25  ;;  %v7995_v25 = vor.u32 %v8918_v51, %v7994_v23  ;;  %v7783_v34 = vor.u32 %v8861_v61, %v7780_v41  ;;  %v7764_v23 = vld [vmem:[%s13334_s5 + $0x758] sm:$0xf0]  ;;  %v7970_v51 = vld [vmem:[%s13336_s7 + $0xe8] sm:$0xf]  ;;  %v7980_v61 = vld [vmem:[%s13336_s7 + $0x110] sm:$0xf0] }
 0x259   : > { %4647 = vmatpush.bf16.msrb.mxu2 %v7639_v6  ;;  %v8932_v6 = vld [vmem:[%s13336_s7 + $0x1a4] sm:$0xf] }
 0x25a   : > { %5461 = vmatpush.bf16.msra.mxu0 %v7851_v19  ;;  %v12493_v9 = vpop.f32.mrf.mxu0  ;;  %v7604_v19 = vld [vmem:[%s13334_s5 + $0x618] sm:$0xf0] }
 0x25b   : > { %5472 = vmatpush.bf16.msra.mxu1 %v8011_v12  ;;  %v7607_v30 = vor.u32 %v8817_v16, %v7604_v19  ;;  %v4470_v50 = vadd.f32 %v12493_v9, %v4246_v13  ;;  %v8928_v9 = vld [vmem:[%s13336_s7 + $0x184] sm:$0xf]  ;;  %v8857_v12 = vld [vmem:[%s13334_s5 + $0x74c] sm:$0xf]  ;;  %v8202_v13 = vld [vmem:[%s13336_s7 + $0x2c0] sm:$0xf] }
 0x25c   : > { %4607 = vmatpush.bf16.msra.mxu3 %v7271_v37  ;;  %v7868_v37 = vld [vmem:[%s13336_s7 + $0x30] sm:$0xf0] }
 0x25d   : > { %4648 = vmatpush.bf16.msrb.mxu2 %v7623_v29  ;;  %v7871_v54 = vor.u32 %v8884_v53, %v7868_v37  ;;  %v4393_v59 = vpop.f32.mrf.mxu2 }
 0x25e   : > { %5506 = vmatpush.bf16.msrb.mxu0 %v7967_v0  ;;  %v7884_v0 = vld [vmem:[%s13336_s7 + $0x50] sm:$0xf0] }
 0x25f   : > { %v7887_v26 = vor.u32 %v8888_v21, %v7884_v0  ;;  %5473 = vmatpush.bf16.msra.mxu1 %v7995_v25  ;;  %v7767_v21 = vor.u32 %v8857_v12, %v7764_v23  ;;  %v7971_v0 = vor.u32 %v8911_v47, %v7970_v51  ;;  %v8962_v12 = vld [vmem:[%s13336_s7 + $0x28c] sm:$0xf0]  ;;  %v7890_v51 = vld [vmem:[%s13336_s7 + $0x48] sm:$0xf]  ;;  %v8891_v47 = vld [vmem:[%s13336_s7 + $0x54] sm:$0xf0] }
 0x260   : > { %4608 = vmatpush.bf16.msra.mxu3 %v7255_v38  ;;  %v8865_v38 = vld [vmem:[%s13334_s5 + $0x78c] sm:$0xf]  ;;  %v7891_v24 = vor.u32 %v8891_v47, %v7890_v51  ;;  %v8964_v51 = vld [vmem:[%s13336_s7 + $0x2a4] sm:$0xf]  ;;  %v8188_v47 = vld [vmem:[%s13336_s7 + $0x2b0] sm:$0xf0] }
 0x261   : > { %4649 = vmatpush.bf16.msrb.mxu2 %v7607_v30 }
 0x262   : > { %5507 = vmatpush.bf16.msrb.mxu0 %v7951_v8  ;;  %v4471_v5 = vpop.f32.mrf.mxu0  ;;  %v8092_v8 = vld [vmem:[%s13336_s7 + $0x1f0] sm:$0xf0] }
 0x263   : > { %v8095_v7 = vor.u32 %v8940_v43, %v8092_v8  ;;  %5474 = vmatpush.bf16.msra.mxu1 %v7979_v40  ;;  %v8853_v5 = vld [vmem:[%s13334_s5 + $0x72c] sm:$0xf]  ;;  %v8218_v43 = vld [vmem:[%s13336_s7 + $0x2e0] sm:$0xf]  ;;  %v8974_v8 = vld [vmem:[%s13336_s7 + $0x2ec] sm:$0xf0] }
 0x264   : > { %4609 = vmatpush.bf16.msra.mxu3 %v7239_v3  ;;  %4650 = vmatmul.bf16.vlgmr.msrb.gmra.mxu2 %v11602_v1  ;;  %v7796_v1 = vld [vmem:[%s13334_s5 + $0x798] sm:$0xf0]  ;;  %v8044_v3 = vld [vmem:[%s13336_s7 + $0x190] sm:$0xf0]  ;;  %v8219_v53 = vor.u32 %v8974_v8, %v8218_v43  ;;  %v8950_v8 = vld [vmem:[%s13336_s7 + $0x22c] sm:$0xf0] }
 0x265   : > { %v7799_v58 = vor.u32 %v8865_v38, %v7796_v1  ;;  %v4482_v2 = vpop.f32.mrf.mxu1  ;;  %v8047_v29 = vor.u32 %v8928_v9, %v8044_v3  ;;  %v7906_v9 = vld [vmem:[%s13336_s7 + $0x68] sm:$0xf]  ;;  %v8895_v3 = vld [vmem:[%s13336_s7 + $0x74] sm:$0xf0]  ;;  %v7972_v43 = vld [vmem:[%s13336_s7 + $0xf8] sm:$0xf0] }
 0x266   : > { %5508 = vmatpush.bf16.msrb.mxu0 %v7935_v17  ;;  %v8880_v17 = vld [vmem:[%s13336_s7 + $0x4] sm:$0xf]  ;;  %v12628_v11 = vadd.f32 %v4482_v2, %v4470_v50  ;;  %5480 = vmatpush.bf16.msra.mxu2 %v8219_v53  ;;  %v8186_v50 = vld [vmem:[%s13336_s7 + $0x2a0] sm:$0xf]  ;;  %v7907_v23 = vor.u32 %v8895_v3, %v7906_v9  ;;  %v8204_v9 = vld [vmem:[%s13336_s7 + $0x2d0] sm:$0xf0] }
 0x267   : > { %5519 = vmatpush.bf16.msrb.mxu1 %v8095_v7  ;;  %v7855_v32 = vor.u32 %v8880_v17, %v7852_v33  ;;  %v12643_v19 = vpop.f32.mrf.mxu2  ;;  %v7732_v7 = vld [vmem:[%s13334_s5 + $0x718] sm:$0xf0]  ;;  %v8916_v17 = vld [vmem:[%s13336_s7 + $0x124] sm:$0xf]  ;;  %v7996_v33 = vld [vmem:[%s13336_s7 + $0x130] sm:$0xf0] }
 0x268   : > { %4610 = vmatpush.bf16.msra.mxu3 %v7223_v44  ;;  %v4352_v22 = vpop.f32.mrf.mxu3  ;;  %v7748_v44 = vld [vmem:[%s13334_s5 + $0x738] sm:$0xf0]  ;;  %v7999_v59 = vor.u32 %v8916_v17, %v7996_v33 }
 0x269   : > { %v4353_v16 = vadd.f32 %v4352_v22, %v4340_v57  ;;  %v7751_v40 = vor.u32 %v8853_v5, %v7748_v44  ;;  %v8170_v22 = vld [vmem:[%s13336_s7 + $0x280] sm:$0xf] }
 0x26a   : > { %5509 = vmatpush.bf16.msrb.mxu0 %v7919_v55  ;;  %v8063_v55 = vor.u32 %v8932_v6, %v8060_v14  ;;  %v7922_v6 = vld [vmem:[%s13336_s7 + $0x88] sm:$0xf]  ;;  %v8899_v14 = vld [vmem:[%s13336_s7 + $0x94] sm:$0xf0]  ;;  %v8138_v5 = vld [vmem:[%s13336_s7 + $0x240] sm:$0xf] }
 0x26b   : > { %4611 = vmatmul.bf16.vlgmr.msra.gmra.mxu3 %v11111_v46  ;;  %v7815_v46 = vor.u32 %v8869_v49, %v7812_v10  ;;  %5520 = vmatpush.bf16.msrb.mxu1 %v8079_v60  ;;  %v8849_v49 = vld [vmem:[%s13334_s5 + $0x70c] sm:$0xf]  ;;  %v7938_v10 = vld [vmem:[%s13336_s7 + $0xa8] sm:$0xf]  ;;  %v7923_v41 = vor.u32 %v8899_v14, %v7922_v6 }
 0x26c   : > { %4655 = vmatpush.bf16.msrb.mxu3 %v7847_v45  ;;  %v7735_v38 = vor.u32 %v8849_v49, %v7732_v7 }
 0x26d   : > { %v4484_v30 = vpop.f32.mrf.mxu1 }
 0x26e   : > { %5510 = vmatpush.bf16.msrb.mxu0 %v7903_v27  ;;  %v4668_v27 = vmax.f32 %v4353_v16, 0.0 }
 0x26f   : > { %5521 = vmatpush.bf16.msrb.mxu1 %v8063_v55  ;;  %v4445_v56 = vpop.f32.mrf.mxu2  ;;  %v8966_v55 = vld [vmem:[%s13336_s7 + $0x2ac] sm:$0xf0] }
 0x270   : > { %4656 = vmatpush.bf16.msrb.mxu3 %v7831_v48  ;;  %v12657_v25 = vpack.c.bf16 %v4668_v27, %v4668_v27  ;;  %v4354_v37 = vpop.f32.mrf.mxu3  ;;  %v7955_v48 = vor.u32 %v8907_v15, %v7954_v36  ;;  %v8187_v63 = vor.u32 %v8966_v55, %v8186_v50  ;;  %v8905_v56 = vld [vmem:[%s13336_s7 + $0xcc] sm:$0xf] }
 0x271   : > { %v8901_v55 = vld [vmem:[%s13336_s7 + $0xac] sm:$0xf] }
 0x272   : > { %5511 = vmatpush.bf16.msrb.mxu0 %v7887_v26  ;;  %v8012_v26 = vld [vmem:[%s13336_s7 + $0x150] sm:$0xf0] }
 0x273   : > { %5522 = vmatpush.bf16.msrb.mxu1 %v8047_v29  ;;  %5462 = vmatmul.bf16.vlgmr.msra.gmra.mxu0 %v12657_v25  ;;  %v8015_v18 = vor.u32 %v8920_v42, %v8012_v26  ;;  %v8171_v29 = vor.u32 %v8962_v12, %v8170_v22  ;;  %v8883_v42 = vld [vmem:[%s13336_s7 + $0x14] sm:$0xf0]  ;;  %v8909_v26 = vld [vmem:[%s13336_s7 + $0xec] sm:$0xf] }
 0x274   : > { %4657 = vmatpush.bf16.msrb.mxu3 %v7815_v46  ;;  %v8970_v46 = vld [vmem:[%s13336_s7 + $0x2cc] sm:$0xf0]  ;;  %v7975_v7 = vor.u32 %v8909_v26, %v7972_v43  ;;  %v8935_v12 = vld [vmem:[%s13336_s7 + $0x1b4] sm:$0xf0]  ;;  %v8889_v26 = vld [vmem:[%s13336_s7 + $0x4c] sm:$0xf] }
 0x275   : > { %v8203_v1 = vor.u32 %v8970_v46, %v8202_v13  ;;  %v8106_v13 = vld [vmem:[%s13336_s7 + $0x200] sm:$0xf]  ;;  %v8946_v46 = vld [vmem:[%s13336_s7 + $0x20c] sm:$0xf0]  ;;  %v7892_v43 = vld [vmem:[%s13336_s7 + $0x58] sm:$0xf0] }
 0x276   : > { %5512 = vmatpush.bf16.msrb.mxu0 %v7871_v54  ;;  %v8903_v54 = vld [vmem:[%s13336_s7 + $0xb4] sm:$0xf0] }
 0x277   : > { %5523 = vmatpush.bf16.msrb.mxu1 %v8031_v31  ;;  %v7939_v60 = vor.u32 %v8903_v54, %v7938_v10  ;;  %5481 = vmatpush.bf16.msra.mxu2 %v8203_v1  ;;  %v7858_v31 = vld [vmem:[%s13336_s7 + $0x8] sm:$0xf]  ;;  %v8972_v1 = vld [vmem:[%s13336_s7 + $0x2e4] sm:$0xf] }
 0x278   : > { %4658 = vmatpush.bf16.msrb.mxu3 %v7799_v58  ;;  %v8912_v58 = vld [vmem:[%s13336_s7 + $0x104] sm:$0xf]  ;;  %v4404_v2 = vpop.f32.mrf.mxu3  ;;  %v8098_v10 = vld [vmem:[%s13336_s7 + $0x1e8] sm:$0xf] }
 0x279   : > { %v7983_v57 = vor.u32 %v8912_v58, %v7980_v61  ;;  %v8939_v61 = vld [vmem:[%s13336_s7 + $0x1d4] sm:$0xf0] }
 0x27a   : > { %5513 = vmatpush.bf16.msrb.mxu0 %v7855_v32  ;;  %v12659_v45 = vpop.f32.mrf.mxu0 }
 0x27b   : > { %5524 = vmatpush.bf16.msrb.mxu1 %v8015_v18  ;;  %5482 = vmatpush.bf16.msra.mxu2 %v8187_v63  ;;  %v8943_v18 = vld [vmem:[%s13336_s7 + $0x1f4] sm:$0xf0]  ;;  %v7940_v63 = vld [vmem:[%s13336_s7 + $0xb8] sm:$0xf0] }
 0x27c   : > { %4659 = vmatpush.bf16.msrb.mxu3 %v7783_v34  ;;  %v4392_v34 = vadd.f32 %v12567_v39, %v12331_v4  ;;  %v8958_v4 = vld [vmem:[%s13336_s7 + $0x26c] sm:$0xf0]  ;;  %v8099_v6 = vor.u32 %v8943_v18, %v8098_v10  ;;  %v7943_v22 = vor.u32 %v8901_v55, %v7940_v63  ;;  %v8885_v10 = vld [vmem:[%s13336_s7 + $0x2c] sm:$0xf]  ;;  %v8952_v18 = vld [vmem:[%s13336_s7 + $0x244] sm:$0xf] }
 0x27e   : > { %5558 = vmatpush.bf16.msra.mxu0 %v7971_v0  ;;  %v4405_v16 = vadd.f32 %v4404_v2, %v4392_v34  ;;  %v8887_v0 = vld [vmem:[%s13336_s7 + $0x34] sm:$0xf0]  ;;  %v8066_v34 = vld [vmem:[%s13336_s7 + $0x1a8] sm:$0xf] }
 0x27f   : > { %5525 = vmatpush.bf16.msrb.mxu1 %v7999_v59  ;;  %5483 = vmatpush.bf16.msra.mxu2 %v8171_v29  ;;  %v8082_v59 = vld [vmem:[%s13336_s7 + $0x1c8] sm:$0xf]  ;;  %v8897_v29 = vld [vmem:[%s13336_s7 + $0x8c] sm:$0xf] }
 0x280   : > { %4660 = vmatpush.bf16.msrb.mxu3 %v7767_v21  ;;  %v4418_v39 = vadd.f32 %v12295_v35, %v4405_v16  ;;  %v4406_v20 = vpop.f32.mrf.mxu3  ;;  %v7874_v21 = vld [vmem:[%s13336_s7 + $0x28] sm:$0xf]  ;;  %v8954_v35 = vld [vmem:[%s13336_s7 + $0x24c] sm:$0xf0] }
 0x281   : > { %v8139_v30 = vor.u32 %v8954_v35, %v8138_v5  ;;  %v7875_v36 = vor.u32 %v8887_v0, %v7874_v21  ;;  %v8893_v21 = vld [vmem:[%s13336_s7 + $0x6c] sm:$0xf]  ;;  %v7908_v0 = vld [vmem:[%s13336_s7 + $0x78] sm:$0xf0]  ;;  %v8960_v5 = vld [vmem:[%s13336_s7 + $0x284] sm:$0xf] }
 0x282   : > { %5559 = vmatpush.bf16.msra.mxu0 %v7955_v48  ;;  %v4523_v32 = vpop.f32.mrf.mxu0  ;;  %v4431_v15 = vadd.f32 %v12435_v52, %v4418_v39  ;;  %v8122_v52 = vld [vmem:[%s13336_s7 + $0x220] sm:$0xf]  ;;  %v8067_v39 = vor.u32 %v8935_v12, %v8066_v34  ;;  %v8172_v35 = vld [vmem:[%s13336_s7 + $0x290] sm:$0xf0] }
 0x283   : > { %5526 = vmatpush.bf16.msrb.mxu1 %v7983_v57  ;;  %5514 = vmatmul.bf16.vlgmr.msrb.gmra.mxu0 %v12657_v25  ;;  %v8123_v48 = vor.u32 %v8950_v8, %v8122_v52  ;;  %v8220_v32 = vld [vmem:[%s13336_s7 + $0x2f0] sm:$0xf0]  ;;  %v8083_v57 = vor.u32 %v8939_v61, %v8082_v59  ;;  %v4247_v52 = vperm.slane %v12598_v62, 3  ;;  %v8956_v8 = vld [vmem:[%s13336_s7 + $0x264] sm:$0xf] }
 0x284   : > { %4661 = vmatpush.bf16.msrb.mxu3 %v7751_v40  ;;  %v4444_v37 = vadd.f32 %v12643_v19, %v4431_v15  ;;  %v7859_v40 = vor.u32 %v8883_v42, %v7858_v31  ;;  %v7956_v19 = vld [vmem:[%s13336_s7 + $0xd8] sm:$0xf0]  ;;  %v8223_v50 = vor.u32 %v8972_v1, %v8220_v32  ;;  %v7911_v15 = vor.u32 %v8893_v21, %v7908_v0  ;;  %v8034_v31 = vld [vmem:[%s13336_s7 + $0x168] sm:$0xf]  ;;  %v8927_v42 = vld [vmem:[%s13336_s7 + $0x174] sm:$0xf0] }
 0x285   : > { %v12763_v44 = vpop.f32.mrf.mxu1  ;;  %v7959_v14 = vor.u32 %v8905_v56, %v7956_v19  ;;  %v8923_v62 = vld [vmem:[%s13336_s7 + $0x154] sm:$0xf0]  ;;  %v8140_v56 = vld [vmem:[%s13336_s7 + $0x250] sm:$0xf0]  ;;  %v8948_v59 = vld [vmem:[%s13336_s7 + $0x224] sm:$0xf] }
 0x286   : > { %5560 = vmatpush.bf16.msra.mxu0 %v7939_v60  ;;  %v8107_v60 = vor.u32 %v8946_v46, %v8106_v13  ;;  %v8919_v32 = vld [vmem:[%s13336_s7 + $0x134] sm:$0xf0]  ;;  %v8108_v34 = vld [vmem:[%s13336_s7 + $0x210] sm:$0xf0] }
 0x287   : > { %v12784_v53 = vpop.f32.mrf.mxu2 }
 0x288   : > { %4662 = vmatpush.bf16.msrb.mxu3 %v7735_v38  ;;  %v4456_v49 = vpop.f32.mrf.mxu3 }
 0x289   : > { %v4457_v54 = vadd.f32 %v4456_v49, %v4444_v37  ;;  %v8156_v37 = vld [vmem:[%s13336_s7 + $0x270] sm:$0xf0]  ;;  %v8018_v49 = vld [vmem:[%s13336_s7 + $0x148] sm:$0xf] }
 0x28a   : > { %5561 = vmatpush.bf16.msra.mxu0 %v7923_v41  ;;  %v8968_v41 = vld [vmem:[%s13336_s7 + $0x2c4] sm:$0xf]  ;;  %v8019_v46 = vor.u32 %v8923_v62, %v8018_v49  ;;  %v8925_v49 = vld [vmem:[%s13336_s7 + $0x16c] sm:$0xf]  ;;  %v8282_v62 = vld [vmem:[%s13336_s7 + $0x360] sm:$0xf] }
 0x28b   : > { %4663 = vmatmul.bf16.vlgmr.msrb.gmra.mxu3 %v11768_v28  ;;  %v8154_v28 = vld [vmem:[%s13336_s7 + $0x260] sm:$0xf]  ;;  %v4669_v38 = vmax.f32 %v4457_v54, 0.0  ;;  %v8207_v16 = vor.u32 %v8968_v41, %v8204_v9  ;;  %v7876_v54 = vld [vmem:[%s13336_s7 + $0x38] sm:$0xf0] }
 0x28c   : > { %v8155_v27 = vor.u32 %v8958_v4, %v8154_v28  ;;  %v8191_v4 = vor.u32 %v8964_v51, %v8188_v47  ;;  %v7986_v41 = vld [vmem:[%s13336_s7 + $0x108] sm:$0xf]  ;;  %v8346_v47 = vld [vmem:[%s13336_s7 + $0x3e0] sm:$0xf] }
 0x28d   : > { %v4536_v17 = vpop.f32.mrf.mxu1  ;;  %v12816_v58 = vpack.c.bf16 %v4669_v38, %v4669_v38  ;;  %v7879_v38 = vor.u32 %v8885_v10, %v7876_v54  ;;  %v8990_v10 = vld [vmem:[%s13336_s7 + $0x36c] sm:$0xf0] }
 0x28e   : > { %5562 = vmatpush.bf16.msra.mxu0 %v7907_v23  ;;  %5484 = vmatpush.bf16.msra.mxu2 %v8155_v27  ;;  %v7924_v23 = vld [vmem:[%s13336_s7 + $0x98] sm:$0xf0]  ;;  %v8931_v27 = vld [vmem:[%s13336_s7 + $0x194] sm:$0xf0]  ;;  %v8143_v17 = vor.u32 %v8952_v18, %v8140_v56  ;;  %v8283_v54 = vor.u32 %v8990_v10, %v8282_v62  ;;  %v8921_v56 = vld [vmem:[%s13336_s7 + $0x14c] sm:$0xf] }
 0x28f   : > { %v4497_v2 = vpop.f32.mrf.mxu2  ;;  %5475 = vmatmul.bf16.vlgmr.msra.gmra.mxu1 %v12816_v58  ;;  %v7927_v20 = vor.u32 %v8897_v29, %v7924_v23  ;;  %v8146_v10 = vld [vmem:[%s13336_s7 + $0x248] sm:$0xf] }
 0x290   : > { %5571 = vmatpush.bf16.msra.mxu1 %v8099_v6  ;;  %v4458_v3 = vpop.f32.mrf.mxu3  ;;  %v7860_v6 = vld [vmem:[%s13336_s7 + $0x18] sm:$0xf0] }
 0x291   : > { %v8941_v3 = vld [vmem:[%s13336_s7 + $0x1ec] sm:$0xf] }
 0x292   : > { %5563 = vmatpush.bf16.msra.mxu0 %v7891_v24  ;;  %5485 = vmatpush.bf16.msra.mxu2 %v8139_v30  ;;  %v8050_v24 = vld [vmem:[%s13336_s7 + $0x188] sm:$0xf]  ;;  %v8175_v30 = vor.u32 %v8960_v5, %v8172_v35 }
 0x294   : > { %5572 = vmatpush.bf16.msra.mxu1 %v8083_v57  ;;  %v8100_v57 = vld [vmem:[%s13336_s7 + $0x1f8] sm:$0xf0] }
 0x296   : > { %5564 = vmatpush.bf16.msra.mxu0 %v7875_v36  ;;  %5486 = vmatpush.bf16.msra.mxu2 %v8123_v48  ;;  %v8051_v36 = vor.u32 %v8931_v27, %v8050_v24  ;;  %v7895_v48 = vor.u32 %v8889_v26, %v7892_v43  ;;  %v8330_v24 = vld [vmem:[%s13336_s7 + $0x3c0] sm:$0xf]  ;;  %v9002_v27 = vld [vmem:[%s13336_s7 + $0x3cc] sm:$0xf0]  ;;  %v8929_v43 = vld [vmem:[%s13336_s7 + $0x18c] sm:$0xf] }
 0x297   : > { %v8331_v5 = vor.u32 %v9002_v27, %v8330_v24  ;;  %v8332_v24 = vld [vmem:[%s13336_s7 + $0x3d0] sm:$0xf0] }
 0x298   : > { %5573 = vmatpush.bf16.msra.mxu1 %v8067_v39 }
 0x29a   : > { %v12799_v33 = vpop.f32.mrf.mxu0  ;;  %5565 = vmatpush.bf16.msra.mxu0 %v7859_v40  ;;  %5487 = vmatpush.bf16.msra.mxu2 %v8107_v60  ;;  %v8035_v40 = vor.u32 %v8927_v42, %v8034_v31  ;;  %v8002_v60 = vld [vmem:[%s13336_s7 + $0x128] sm:$0xf] }
 0x29b   : > { %v4574_v19 = vadd.f32 %v12799_v33, %v4247_v52  ;;  %v8881_v33 = vld [vmem:[%s13336_s7 + $0xc] sm:$0xf]  ;;  %v8003_v61 = vor.u32 %v8919_v32, %v8002_v60  ;;  %v8052_v52 = vld [vmem:[%s13336_s7 + $0x198] sm:$0xf0] }
 0x29c   : > { %5574 = vmatpush.bf16.msra.mxu1 %v8051_v36  ;;  %v7863_v55 = vor.u32 %v8881_v33, %v7860_v6  ;;  %v8314_v36 = vld [vmem:[%s13336_s7 + $0x3a0] sm:$0xf]  ;;  %v8917_v33 = vld [vmem:[%s13336_s7 + $0x12c] sm:$0xf]  ;;  %v8004_v6 = vld [vmem:[%s13336_s7 + $0x138] sm:$0xf0] }
 0x29d   : > { %5566 = vmatmul.bf16.vlgmr.msra.gmra.mxu0 %v12657_v25 }
 0x29e   : > { %5610 = vmatpush.bf16.msrb.mxu0 %v7975_v7  ;;  %5532 = vmatpush.bf16.msrb.mxu2 %v8223_v50  ;;  %v8159_v7 = vor.u32 %v8956_v8, %v8156_v37  ;;  %v8124_v50 = vld [vmem:[%s13336_s7 + $0x230] sm:$0xf0]  ;;  %v8298_v8 = vld [vmem:[%s13336_s7 + $0x380] sm:$0xf]  ;;  %v8994_v37 = vld [vmem:[%s13336_s7 + $0x38c] sm:$0xf0] }
 0x29f   : > { %5527 = vmatmul.bf16.vlgmr.msrb.gmra.mxu1 %v12816_v58  ;;  %v8127_v63 = vor.u32 %v8948_v59, %v8124_v50  ;;  %v8982_v59 = vld [vmem:[%s13336_s7 + $0x32c] sm:$0xf0] }
 0x2a0   : > { %5575 = vmatpush.bf16.msra.mxu1 %v8035_v40  ;;  %v8299_v40 = vor.u32 %v8994_v37, %v8298_v8  ;;  %v8162_v37 = vld [vmem:[%s13336_s7 + $0x268] sm:$0xf] }
 0x2a2   : > { %5611 = vmatpush.bf16.msrb.mxu0 %v7959_v14  ;;  %v4575_v28 = vpop.f32.mrf.mxu0  ;;  %5533 = vmatpush.bf16.msrb.mxu2 %v8207_v16  ;;  %v4496_v14 = vadd.f32 %v12784_v53, %v12628_v11  ;;  %v8915_v11 = vld [vmem:[%s13336_s7 + $0x114] sm:$0xf0] }
 0x2a3   : > { %v4586_v13 = vpop.f32.mrf.mxu1  ;;  %v7987_v23 = vor.u32 %v8915_v11, %v7986_v41  ;;  %v9006_v28 = vld [vmem:[%s13336_s7 + $0x3ec] sm:$0xf0]  ;;  %v8226_v11 = vld [vmem:[%s13336_s7 + $0x2e8] sm:$0xf] }
 0x2a4   : > { %v12913_v1 = vadd.f32 %v4586_v13, %v4574_v19  ;;  %5576 = vmatpush.bf16.msra.mxu1 %v8019_v46  ;;  %v8347_v39 = vor.u32 %v9006_v28, %v8346_v47  ;;  %v8020_v19 = vld [vmem:[%s13336_s7 + $0x158] sm:$0xf0]  ;;  %v8986_v13 = vld [vmem:[%s13336_s7 + $0x34c] sm:$0xf0] }
 0x2a6   : > { %5612 = vmatpush.bf16.msrb.mxu0 %v7943_v22  ;;  %5534 = vmatpush.bf16.msrb.mxu2 %v8191_v4  ;;  %v8944_v22 = vld [vmem:[%s13336_s7 + $0x204] sm:$0xf]  ;;  %v8103_v4 = vor.u32 %v8941_v3, %v8100_v57  ;;  %v8234_v3 = vld [vmem:[%s13336_s7 + $0x300] sm:$0xf]  ;;  %v8978_v57 = vld [vmem:[%s13336_s7 + $0x30c] sm:$0xf0] }
 0x2a7   : > { %v12938_v9 = vpop.f32.mrf.mxu2  ;;  %v8111_v51 = vor.u32 %v8944_v22, %v8108_v34  ;;  %5493 = vmatpush.bf16.msra.mxu3 %v8347_v39  ;;  %v8235_v34 = vor.u32 %v8978_v57, %v8234_v3  ;;  %v8210_v39 = vld [vmem:[%s13336_s7 + $0x2c8] sm:$0xf]  ;;  %v8969_v57 = vld [vmem:[%s13336_s7 + $0x2cc] sm:$0xf] }
 0x2a8   : > { %5577 = vmatpush.bf16.msra.mxu1 %v8003_v61 }
 0x2aa   : > { %5613 = vmatpush.bf16.msrb.mxu0 %v7927_v20  ;;  %5535 = vmatpush.bf16.msrb.mxu2 %v8175_v30  ;;  %v8084_v20 = vld [vmem:[%s13336_s7 + $0x1d8] sm:$0xf0]  ;;  %v8933_v30 = vld [vmem:[%s13336_s7 + $0x1ac] sm:$0xf] }
 0x2ab   : > { %v4588_v29 = vpop.f32.mrf.mxu1  ;;  %5494 = vmatpush.bf16.msra.mxu3 %v8331_v5 }
 0x2ac   : > { %5578 = vmatpush.bf16.msra.mxu1 %v7987_v23  ;;  %v8348_v29 = vld [vmem:[%s13336_s7 + $0x3f0] sm:$0xf0] }
 0x2ae   : > { %5614 = vmatpush.bf16.msrb.mxu0 %v7911_v15  ;;  %5536 = vmatpush.bf16.msrb.mxu2 %v8159_v7  ;;  %v4508_v2 = vpop.f32.mrf.mxu3  ;;  %v8998_v15 = vld [vmem:[%s13336_s7 + $0x3ac] sm:$0xf0]  ;;  %v8036_v7 = vld [vmem:[%s13336_s7 + $0x178] sm:$0xf0] }
 0x2af   : > { %v4509_v53 = vadd.f32 %v4508_v2, %v4496_v14  ;;  %v4549_v35 = vpop.f32.mrf.mxu2  ;;  %5579 = vmatmul.bf16.vlgmr.msra.gmra.mxu1 %v12816_v58  ;;  %v8315_v42 = vor.u32 %v8998_v15, %v8314_v36  ;;  %v8039_v18 = vor.u32 %v8925_v49, %v8036_v7  ;;  %v8250_v14 = vld [vmem:[%s13336_s7 + $0x320] sm:$0xf]  ;;  %v8316_v36 = vld [vmem:[%s13336_s7 + $0x3b0] sm:$0xf0] }
 0x2b0   : > { %5623 = vmatpush.bf16.msrb.mxu1 %v8103_v4  ;;  %v8251_v50 = vor.u32 %v8982_v59, %v8250_v14  ;;  %v8194_v35 = vld [vmem:[%s13336_s7 + $0x2a8] sm:$0xf]  ;;  %v8284_v49 = vld [vmem:[%s13336_s7 + $0x370] sm:$0xf0] }
 0x2b1   : > { %v4522_v12 = vadd.f32 %v12659_v45, %v4509_v53  ;;  %v8937_v45 = vld [vmem:[%s13336_s7 + $0x1cc] sm:$0xf]  ;;  %5495 = vmatpush.bf16.msra.mxu3 %v8315_v42  ;;  %v8963_v42 = vld [vmem:[%s13336_s7 + $0x294] sm:$0xf0] }
 0x2b2   : > { %5615 = vmatpush.bf16.msrb.mxu0 %v7895_v48  ;;  %5537 = vmatpush.bf16.msrb.mxu2 %v8143_v17  ;;  %v8087_v0 = vor.u32 %v8937_v45, %v8084_v20  ;;  %v8055_v48 = vor.u32 %v8929_v43, %v8052_v52  ;;  %v8266_v17 = vld [vmem:[%s13336_s7 + $0x340] sm:$0xf]  ;;  %v8971_v45 = vld [vmem:[%s13336_s7 + $0x2d4] sm:$0xf0]  ;;  %v9000_v20 = vld [vmem:[%s13336_s7 + $0x3c4] sm:$0xf] }
 0x2b3   : > { %v8267_v46 = vor.u32 %v8986_v13, %v8266_v17  ;;  %v4535_v60 = vadd.f32 %v12763_v44, %v4522_v12  ;;  %v8007_v44 = vor.u32 %v8917_v33, %v8004_v6  ;;  %v9004_v12 = vld [vmem:[%s13336_s7 + $0x3e4] sm:$0xf]  ;;  %v8335_v27 = vor.u32 %v9000_v20, %v8332_v24  ;;  %v8300_v43 = vld [vmem:[%s13336_s7 + $0x390] sm:$0xf0]  ;;  %v8130_v13 = vld [vmem:[%s13336_s7 + $0x228] sm:$0xf] }
 0x2b4   : > { %5624 = vmatpush.bf16.msrb.mxu1 %v8087_v0  ;;  %v8351_v47 = vor.u32 %v9004_v12, %v8348_v29  ;;  %v8211_v5 = vor.u32 %v8971_v45, %v8210_v39  ;;  %v8180_v39 = vld [vmem:[%s13336_s7 + $0x298] sm:$0xf0]  ;;  %v8957_v20 = vld [vmem:[%s13336_s7 + $0x26c] sm:$0xf] }
 0x2b5   : > { %5496 = vmatpush.bf16.msra.mxu3 %v8299_v40  ;;  %v4548_v61 = vadd.f32 %v12938_v9, %v4535_v60  ;;  %v8975_v9 = vld [vmem:[%s13336_s7 + $0x2f4] sm:$0xf0]  ;;  %v8252_v60 = vld [vmem:[%s13336_s7 + $0x330] sm:$0xf0]  ;;  %v8164_v24 = vld [vmem:[%s13336_s7 + $0x278] sm:$0xf0] }
 0x2b6   : > { %5616 = vmatpush.bf16.msrb.mxu0 %v7879_v38  ;;  %5538 = vmatpush.bf16.msrb.mxu2 %v8127_v63  ;;  %v4510_v21 = vpop.f32.mrf.mxu3  ;;  %v8023_v38 = vor.u32 %v8921_v56, %v8020_v19  ;;  %v7988_v63 = vld [vmem:[%s13336_s7 + $0x118] sm:$0xf0]  ;;  %v8227_v28 = vor.u32 %v8975_v9, %v8226_v11  ;;  %v8959_v40 = vld [vmem:[%s13336_s7 + $0x274] sm:$0xf0]  ;;  %v8268_v56 = vld [vmem:[%s13336_s7 + $0x350] sm:$0xf0] }
 0x2b7   : > { %v8163_v62 = vor.u32 %v8959_v40, %v8162_v37 }
 0x2b9   : > { %5497 = vmatpush.bf16.msra.mxu3 %v8283_v54  ;;  %v8955_v54 = vld [vmem:[%s13336_s7 + $0x254] sm:$0xf0] }
 0x2ba   : > { %v12953_v16 = vpop.f32.mrf.mxu0  ;;  %5617 = vmatpush.bf16.msrb.mxu0 %v7863_v55  ;;  %5539 = vmatpush.bf16.msrb.mxu2 %v8111_v51  ;;  %v8913_v55 = vld [vmem:[%s13336_s7 + $0x10c] sm:$0xf]  ;;  %v8147_v17 = vor.u32 %v8955_v54, %v8146_v10  ;;  %v13224_v54 = vld [vmem:[%s13337_s8] sm:$0xf] }
 0x2bb   : > { %v7991_v22 = vor.u32 %v8913_v55, %v7988_v63 }
 0x2bd   : > { %5618 = vmatmul.bf16.vlgmr.msrb.gmra.mxu0 %v12657_v25  ;;  %v8068_v25 = vld [vmem:[%s13336_s7 + $0x1b8] sm:$0xf0]  ;;  %5498 = vmatpush.bf16.msra.mxu3 %v8267_v46  ;;  %v8951_v46 = vld [vmem:[%s13336_s7 + $0x234] sm:$0xf0] }
 0x2be   : > { %v8071_v26 = vor.u32 %v8933_v30, %v8068_v25  ;;  %v8967_v30 = vld [vmem:[%s13336_s7 + $0x2b4] sm:$0xf0]  ;;  %v8996_v25 = vld [vmem:[%s13336_s7 + $0x3a4] sm:$0xf]  ;;  %v8131_v14 = vor.u32 %v8951_v46, %v8130_v13  ;;  %v5446_v13 = vperm.slane %v13224_v54, 0 }
 0x2bf   : > { %v8319_v15 = vor.u32 %v8996_v25, %v8316_v36  ;;  %v8949_v25 = vld [vmem:[%s13336_s7 + $0x22c] sm:$0xf]  ;;  %v8132_v36 = vld [vmem:[%s13336_s7 + $0x238] sm:$0xf0] }
 0x2c0   : > { %5625 = vmatpush.bf16.msrb.mxu1 %v8071_v26  ;;  %v8992_v26 = vld [vmem:[%s13336_s7 + $0x384] sm:$0xf] }
 0x2c1   : > { %5499 = vmatpush.bf16.msra.mxu3 %v8251_v50  ;;  %v8303_v52 = vor.u32 %v8992_v26, %v8300_v43  ;;  %v8947_v50 = vld [vmem:[%s13336_s7 + $0x214] sm:$0xf0]  ;;  %v8945_v26 = vld [vmem:[%s13336_s7 + $0x20c] sm:$0xf] }
 0x2c2   : > { %v4627_v31 = vpop.f32.mrf.mxu0 }
 0x2c3   : > { %v13024_v32 = vpop.f32.mrf.mxu1  ;;  %v8195_v31 = vor.u32 %v8967_v30, %v8194_v35 }
 0x2c4   : > { %5626 = vmatpush.bf16.msrb.mxu1 %v8055_v48  ;;  %v8988_v48 = vld [vmem:[%s13336_s7 + $0x364] sm:$0xf] }
 0x2c5   : > { %5500 = vmatpush.bf16.msra.mxu3 %v8235_v34  ;;  %v8287_v7 = vor.u32 %v8988_v48, %v8284_v49 }
 0x2c7   : > { %v13045_v41 = vpop.f32.mrf.mxu2 }
 0x2c8   : > { %5627 = vmatpush.bf16.msrb.mxu1 %v8039_v18  ;;  %v8984_v18 = vld [vmem:[%s13336_s7 + $0x344] sm:$0xf]  ;;  %v4600_v6 = vadd.f32 %v13045_v41, %v12913_v1  ;;  %v8228_v1 = vld [vmem:[%s13336_s7 + $0x2f8] sm:$0xf0]  ;;  %v8236_v41 = vld [vmem:[%s13336_s7 + $0x310] sm:$0xf0] }
 0x2c9   : > { %5545 = vmatpush.bf16.msrb.mxu3 %v8351_v47  ;;  %v8271_v19 = vor.u32 %v8984_v18, %v8268_v56 }
 0x2cb   : > { %v4640_v51 = vpop.f32.mrf.mxu1 }
 0x2cc   : > { %5628 = vmatpush.bf16.msrb.mxu1 %v8023_v38  ;;  %v8980_v38 = vld [vmem:[%s13336_s7 + $0x324] sm:$0xf] }
 0x2cd   : > { %5546 = vmatpush.bf16.msrb.mxu3 %v8335_v27  ;;  %v8255_v33 = vor.u32 %v8980_v38, %v8252_v60  ;;  %v8306_v38 = vld [vmem:[%s13336_s7 + $0x388] sm:$0xf]  ;;  %v8995_v60 = vld [vmem:[%s13336_s7 + $0x394] sm:$0xf0] }
 0x2ce   : > { %v4560_v2 = vpop.f32.mrf.mxu3 }
 0x2cf   : > { %v4561_v53 = vadd.f32 %v4560_v2, %v4548_v61  ;;  %v4601_v0 = vpop.f32.mrf.mxu2  ;;  %v8973_v61 = vld [vmem:[%s13336_s7 + $0x2ec] sm:$0xf]  ;;  %v8976_v2 = vld [vmem:[%s13336_s7 + $0x304] sm:$0xf] }
 0x2d0   : > { %5629 = vmatpush.bf16.msrb.mxu1 %v8007_v44  ;;  %v8114_v44 = vld [vmem:[%s13336_s7 + $0x208] sm:$0xf]  ;;  %v8239_v11 = vor.u32 %v8976_v2, %v8236_v41  ;;  %v8231_v3 = vor.u32 %v8973_v61, %v8228_v1  ;;  %v8953_v0 = vld [vmem:[%s13336_s7 + $0x24c] sm:$0xf] }
 0x2d1   : > { %v4670_v23 = vmax.f32 %v4561_v53, 0.0  ;;  %5547 = vmatpush.bf16.msrb.mxu3 %v8319_v15  ;;  %v8115_v9 = vor.u32 %v8947_v50, %v8114_v44  ;;  %v8307_v44 = vor.u32 %v8995_v60, %v8306_v38  ;;  %v8991_v50 = vld [vmem:[%s13336_s7 + $0x374] sm:$0xf0] }
 0x2d3   : > { %v13065_v4 = vpack.c.bf16 %v4670_v23, %v4670_v23  ;;  %v8196_v23 = vld [vmem:[%s13336_s7 + $0x2b8] sm:$0xf0] }
 0x2d4   : > { %5630 = vmatpush.bf16.msrb.mxu1 %v7991_v22  ;;  %v8212_v22 = vld [vmem:[%s13336_s7 + $0x2d8] sm:$0xf0] }
 0x2d5   : > { %5488 = vmatmul.bf16.vlgmr.msra.gmra.mxu2 %v13065_v4  ;;  %5548 = vmatpush.bf16.msrb.mxu3 %v8303_v52  ;;  %v8215_v12 = vor.u32 %v8969_v57, %v8212_v22  ;;  %v8354_v52 = vld [vmem:[%s13336_s7 + $0x3e8] sm:$0xf]  ;;  %v8979_v22 = vld [vmem:[%s13336_s7 + $0x314] sm:$0xf0] }
 0x2d6   : > { %5584 = vmatpush.bf16.msra.mxu2 %v8227_v28  ;;  %v4562_v21 = vpop.f32.mrf.mxu3  ;;  %v8961_v28 = vld [vmem:[%s13336_s7 + $0x28c] sm:$0xf]  ;;  %v8242_v57 = vld [vmem:[%s13336_s7 + $0x308] sm:$0xf] }
 0x2d7   : > { %5631 = vmatmul.bf16.vlgmr.msrb.gmra.mxu1 %v12816_v58  ;;  %v8178_v58 = vld [vmem:[%s13336_s7 + $0x288] sm:$0xf]  ;;  %v8183_v45 = vor.u32 %v8961_v28, %v8180_v39  ;;  %v8167_v21 = vor.u32 %v8957_v20, %v8164_v24  ;;  %v9001_v28 = vld [vmem:[%s13336_s7 + $0x3cc] sm:$0xf]  ;;  %v8340_v39 = vld [vmem:[%s13336_s7 + $0x3d8] sm:$0xf0] }
 0x2d8   : > { %v8179_v8 = vor.u32 %v8963_v42, %v8178_v58  ;;  %v8135_v58 = vor.u32 %v8949_v25, %v8132_v36  ;;  %v8997_v20 = vld [vmem:[%s13336_s7 + $0x3ac] sm:$0xf]  ;;  %v8324_v24 = vld [vmem:[%s13336_s7 + $0x3b8] sm:$0xf0] }
 0x2d9   : > { %5549 = vmatpush.bf16.msrb.mxu3 %v8287_v7  ;;  %v8338_v7 = vld [vmem:[%s13336_s7 + $0x3c8] sm:$0xf] }
 0x2da   : > { %5585 = vmatpush.bf16.msra.mxu2 %v8211_v5  ;;  %v8148_v5 = vld [vmem:[%s13336_s7 + $0x258] sm:$0xf0] }
 0x2db   : > { %v8151_v30 = vor.u32 %v8953_v0, %v8148_v5  ;;  %v5448_v0 = vperm.slane %v13224_v54, 2  ;;  %v8993_v5 = vld [vmem:[%s13336_s7 + $0x38c] sm:$0xf] }
 0x2dd   : > { %5550 = vmatpush.bf16.msrb.mxu3 %v8271_v19  ;;  %v8322_v19 = vld [vmem:[%s13336_s7 + $0x3a8] sm:$0xf] }
 0x2de   : > { %5586 = vmatpush.bf16.msra.mxu2 %v8195_v31 }
 0x2e1   : > { %5551 = vmatpush.bf16.msrb.mxu3 %v8255_v33 }
 0x2e2   : > { %5587 = vmatpush.bf16.msra.mxu2 %v8179_v8  ;;  %v9007_v8 = vld [vmem:[%s13336_s7 + $0x3f4] sm:$0xf0] }
 0x2e3   : > { %v8355_v48 = vor.u32 %v9007_v8, %v8354_v52 }
 0x2e5   : > { %5540 = vmatmul.bf16.vlgmr.msrb.gmra.mxu2 %v13065_v4  ;;  %5552 = vmatpush.bf16.msrb.mxu3 %v8239_v11  ;;  %v8258_v11 = vld [vmem:[%s13336_s7 + $0x328] sm:$0xf] }
 0x2e6   : > { %5588 = vmatpush.bf16.msra.mxu2 %v8163_v62  ;;  %v9003_v62 = vld [vmem:[%s13336_s7 + $0x3d4] sm:$0xf0] }
 0x2e7   : > { %v4651_v63 = vpop.f32.mrf.mxu2  ;;  %v8339_v56 = vor.u32 %v9003_v62, %v8338_v7  ;;  %v8977_v62 = vld [vmem:[%s13336_s7 + $0x30c] sm:$0xf] }
 0x2ea   : > { %5589 = vmatpush.bf16.msra.mxu2 %v8147_v17  ;;  %v8999_v17 = vld [vmem:[%s13336_s7 + $0x3b4] sm:$0xf0] }
 0x2eb   : > { %v8323_v46 = vor.u32 %v8999_v17, %v8322_v19 }
 0x2ee   : > { %v4612_v59 = vpop.f32.mrf.mxu3  ;;  %5590 = vmatpush.bf16.msra.mxu2 %v8131_v14 }
 0x2ef   : > { %v4613_v55 = vadd.f32 %v4612_v59, %v4600_v6  ;;  %v4653_v29 = vpop.f32.mrf.mxu2 }
 0x2f0   : > { %v5463_v51 = vpop.f32.mrf.mxu0  ;;  %v8356_v29 = vld [vmem:[%s13336_s7 + $0x3f8] sm:$0xf0] }
 0x2f1   : > { %v4626_v53 = vadd.f32 %v12953_v16, %v4613_v55  ;;  %v8965_v16 = vld [vmem:[%s13336_s7 + $0x2ac] sm:$0xf]  ;;  %v5464_v33 = vadd.f32 %v5463_v51, %v5446_v13  ;;  %v8274_v55 = vld [vmem:[%s13336_s7 + $0x348] sm:$0xf]  ;;  %v8243_v51 = vor.u32 %v8979_v22, %v8242_v57 }
 0x2f2   : > { %5591 = vmatpush.bf16.msra.mxu2 %v8115_v9  ;;  %v8199_v47 = vor.u32 %v8965_v16, %v8196_v23  ;;  %v5447_v9 = vperm.slane %v13224_v54, 1 }
 0x2f3   : > { %v4639_v35 = vadd.f32 %v13024_v32, %v4626_v53  ;;  %v8116_v32 = vld [vmem:[%s13336_s7 + $0x218] sm:$0xf0]  ;;  %v8983_v53 = vld [vmem:[%s13336_s7 + $0x334] sm:$0xf0] }
 0x2f4   : > { %v8119_v40 = vor.u32 %v8945_v26, %v8116_v32  ;;  %v8985_v32 = vld [vmem:[%s13336_s7 + $0x34c] sm:$0xf] }
 0x2f5   : > { %5592 = vmatmul.bf16.vlgmr.msra.gmra.mxu2 %v13065_v4  ;;  %v4652_v31 = vadd.f32 %v4651_v63, %v4639_v35  ;;  %v8987_v63 = vld [vmem:[%s13336_s7 + $0x354] sm:$0xf0]  ;;  %v8308_v35 = vld [vmem:[%s13336_s7 + $0x398] sm:$0xf0] }
 0x2f6   : > { %5636 = vmatpush.bf16.msrb.mxu2 %v8231_v3  ;;  %v4614_v34 = vpop.f32.mrf.mxu3  ;;  %v8275_v41 = vor.u32 %v8987_v63, %v8274_v55  ;;  %v8259_v3 = vor.u32 %v8983_v53, %v8258_v11  ;;  %v8311_v25 = vor.u32 %v8993_v5, %v8308_v35 }
 0x2f8   : > { %v5465_v27 = vpop.f32.mrf.mxu0 }
 0x2fa   : > { %5637 = vmatpush.bf16.msrb.mxu2 %v8215_v12  ;;  %v9005_v12 = vld [vmem:[%s13336_s7 + $0x3ec] sm:$0xf] }
 0x2fe   : > { %5638 = vmatpush.bf16.msrb.mxu2 %v8199_v47  ;;  %v8359_v47 = vor.u32 %v9005_v12, %v8356_v29 }
 0x300   : > { %v5515_v15 = vpop.f32.mrf.mxu0 }
 0x301   : > { %v5516_v34 = vadd.f32 %v5515_v15, %v5447_v9  ;;  %v8989_v15 = vld [vmem:[%s13336_s7 + $0x36c] sm:$0xf] }
 0x302   : > { %5639 = vmatpush.bf16.msrb.mxu2 %v8183_v45  ;;  %v8343_v45 = vor.u32 %v9001_v28, %v8340_v39 }
 0x306   : > { %5640 = vmatpush.bf16.msrb.mxu2 %v8167_v21  ;;  %v8327_v21 = vor.u32 %v8997_v20, %v8324_v24 }
 0x308   : > { %v5517_v10 = vpop.f32.mrf.mxu0 }
 0x309   : > { %v8244_v10 = vld [vmem:[%s13336_s7 + $0x318] sm:$0xf0] }
 0x30a   : > { %5641 = vmatpush.bf16.msrb.mxu2 %v8151_v30 }
 0x30c   : > { %v5476_v14 = vpop.f32.mrf.mxu1 }
 0x30d   : > { %v13241_v59 = vadd.f32 %v5476_v14, %v5464_v33 }
 0x30e   : > { %v4664_v42 = vpop.f32.mrf.mxu3  ;;  %5642 = vmatpush.bf16.msrb.mxu2 %v8135_v58 }
 0x30f   : > { %v4665_v43 = vadd.f32 %v4664_v42, %v4652_v31  ;;  %v8292_v31 = vld [vmem:[%s13336_s7 + $0x378] sm:$0xf0] }
 0x310   : > { %v8295_v26 = vor.u32 %v8989_v15, %v8292_v31 }
 0x311   : > { %v4671_v37 = vmax.f32 %v4665_v43, 0.0  ;;  %v8276_v43 = vld [vmem:[%s13336_s7 + $0x358] sm:$0xf0] }
 0x312   : > { %5643 = vmatpush.bf16.msrb.mxu2 %v8119_v40  ;;  %v8279_v8 = vor.u32 %v8985_v32, %v8276_v43  ;;  %v8260_v40 = vld [vmem:[%s13336_s7 + $0x338] sm:$0xf0] }
 0x313   : > { %v13213_v49 = vpack.c.bf16 %v4671_v37, %v4671_v37  ;;  %v8981_v37 = vld [vmem:[%s13336_s7 + $0x32c] sm:$0xf] }
 0x314   : > { %v5478_v2 = vpop.f32.mrf.mxu1  ;;  %v8263_v7 = vor.u32 %v8981_v37, %v8260_v40 }
 0x315   : > { %5501 = vmatmul.bf16.vlgmr.msra.gmra.mxu3 %v13213_v49  ;;  %5644 = vmatmul.bf16.vlgmr.msrb.gmra.mxu2 %v13065_v4  ;;  %v8290_v4 = vld [vmem:[%s13336_s7 + $0x368] sm:$0xf] }
 0x316   : > { %5597 = vmatpush.bf16.msra.mxu3 %v8355_v48  ;;  %v4666_v18 = vpop.f32.mrf.mxu3  ;;  %v8291_v61 = vor.u32 %v8991_v50, %v8290_v4 }
 0x317   : > { %v8247_v18 = vor.u32 %v8977_v62, %v8244_v10 }
 0x31a   : > { %5598 = vmatpush.bf16.msra.mxu3 %v8339_v56  ;;  %v5567_v6 = vpop.f32.mrf.mxu0  ;;  %v5449_v56 = vperm.slane %v13224_v54, 3 }
 0x31b   : > { %v5568_v36 = vadd.f32 %v5567_v6, %v5448_v0 }
 0x31c   : > { %v5528_v16 = vpop.f32.mrf.mxu1 }
 0x31d   : > { %v5529_v23 = vadd.f32 %v5528_v16, %v5516_v34 }
 0x31e   : > { %5599 = vmatpush.bf16.msra.mxu3 %v8323_v46 }
 0x322   : > { %5600 = vmatpush.bf16.msra.mxu3 %v8307_v44  ;;  %v5569_v1 = vpop.f32.mrf.mxu0 }
 0x324   : > { %v5530_v27 = vpop.f32.mrf.mxu1 }
 0x325   : > { %5553 = vmatmul.bf16.vlgmr.msrb.gmra.mxu3 %v13213_v49 }
 0x326   : > { %5601 = vmatpush.bf16.msra.mxu3 %v8291_v61 }
 0x32a   : > { %5602 = vmatpush.bf16.msra.mxu3 %v8275_v41 }
 0x32c   : > { %v5580_v58 = vpop.f32.mrf.mxu1 }
 0x32d   : > { %v5581_v42 = vadd.f32 %v5580_v58, %v5568_v36 }
 0x32e   : > { %5603 = vmatpush.bf16.msra.mxu3 %v8259_v3 }
 0x332   : > { %5604 = vmatpush.bf16.msra.mxu3 %v8243_v51  ;;  %v5680_v51 = vlaneseq }
 0x334   : > { %v5582_v48 = vpop.f32.mrf.mxu1  ;;  %vm5682_vm5 = vcmp.lt.s32.totalorder %v5680_v51, 512 }
 0x335   : > { %5605 = vmatmul.bf16.vlgmr.msra.gmra.mxu3 %v13213_v49 }
 0x336   : > { %5649 = vmatpush.bf16.msrb.mxu3 %v8359_v47 }
 0x33a   : > { %5650 = vmatpush.bf16.msrb.mxu3 %v8343_v45  ;;  %v5619_v30 = vpop.f32.mrf.mxu0 }
 0x33b   : > { %v5620_v19 = vadd.f32 %v5619_v30, %v5449_v56 }
 0x33e   : > { %5651 = vmatpush.bf16.msrb.mxu3 %v8327_v21 }
 0x342   : > { %5652 = vmatpush.bf16.msrb.mxu3 %v8311_v25  ;;  %v5621_v52 = vpop.f32.mrf.mxu0 }
 0x346   : > { %5653 = vmatpush.bf16.msrb.mxu3 %v8295_v26 }
 0x34a   : > { %5654 = vmatpush.bf16.msrb.mxu3 %v8279_v8 }
 0x34e   : > { %5655 = vmatpush.bf16.msrb.mxu3 %v8263_v7 }
 0x352   : > { %5656 = vmatpush.bf16.msrb.mxu3 %v8247_v18 }
 0x354   : > { %v5632_v17 = vpop.f32.mrf.mxu1 }
 0x355   : > { %5657 = vmatmul.bf16.vlgmr.msrb.gmra.mxu3 %v13213_v49  ;;  %v5633_v13 = vadd.f32 %v5632_v17, %v5620_v19 }
 0x358   : > { %v5489_v46 = vpop.f32.mrf.mxu2 }
 0x359   : > { %v5490_v38 = vadd.f32 %v5489_v46, %v13241_v59 }
 0x35c   : > { %v5634_v60 = vpop.f32.mrf.mxu1 }
 0x360   : > { %v5491_v33 = vpop.f32.mrf.mxu2 }
 0x368   : > { %v5541_v6 = vpop.f32.mrf.mxu2 }
 0x369   : > { %v5542_v14 = vadd.f32 %v5541_v6, %v5529_v23 }
 0x370   : > { %v5543_v44 = vpop.f32.mrf.mxu2 }
 0x378   : > { %v5593_v4 = vpop.f32.mrf.mxu2 }
 0x379   : > { %v5594_v50 = vadd.f32 %v5593_v4, %v5581_v42 }
 0x380   : > { %v5595_v61 = vpop.f32.mrf.mxu2 }
 0x398   : > { %v5502_v55 = vpop.f32.mrf.mxu3  ;;  %v5645_v63 = vpop.f32.mrf.mxu2 }
 0x399   : > { %v5503_v54 = vadd.f32 %v5502_v55, %v5490_v38  ;;  %v5646_v12 = vadd.f32 %v5645_v63, %v5633_v13 }
 0x39b   : > { %v5662_v53 = vmax.f32 %v5503_v54, 0.0 }
 0x3a0   : > { %v5504_v1 = vpop.f32.mrf.mxu3  ;;  %v5647_v49 = vpop.f32.mrf.mxu2 }
 0x3a8   : > { %v5554_v2 = vpop.f32.mrf.mxu3 }
 0x3a9   : > { %v5555_v41 = vadd.f32 %v5554_v2, %v5542_v14 }
 0x3ab   : > { %v5663_v11 = vmax.f32 %v5555_v41, 0.0 }
 0x3ad   : > { %v5670_v59 = vrot.slane %v5663_v11, 7 }
 0x3af   : > { %v5674_v9 = vsel %vm5673_vm2, %v5662_v53, %v5670_v59 }
 0x3b0   : > { %v5556_v3 = vpop.f32.mrf.mxu3 }
 0x3b8   : > { %v5606_v57 = vpop.f32.mrf.mxu3 }
 0x3b9   : > { %v5607_v34 = vadd.f32 %v5606_v57, %v5594_v50 }
 0x3bb   : > { %v5664_v16 = vmax.f32 %v5607_v34, 0.0 }
 0x3bd   : > { %v5671_v28 = vrot.slane %v5664_v16, 6 }
 0x3c0   : > { %v5608_v22 = vpop.f32.mrf.mxu3 }
 0x3d8   : > { %v5658_v29 = vpop.f32.mrf.mxu3 }
 0x3d9   : > { %v5659_v23 = vadd.f32 %v5658_v29, %v5646_v12 }
 0x3db   : > { %v5665_v47 = vmax.f32 %v5659_v23, 0.0 }
 0x3dd   : > { %v5672_v39 = vrot.slane %v5665_v47, 5 }
 0x3df   : > { %v5676_v45 = vsel %vm5675_vm3, %v5671_v28, %v5672_v39 }
 0x3e0   : > { %v5678_v20 = vsel %vm5677_vm4, %v5674_v9, %v5676_v45  ;;  %v5660_v24 = vpop.f32.mrf.mxu3 }
 0x3e1   : > { %5684 = vst.msk [vmem:[%s350_s20] sm:$0xf] %vm5682_vm5, %v5678_v20 }
 0x3e2 PF: > { %s19_s30 = sadd.s32 1, %s9024_s30  }
 0x3e3   : > { %p16_p4 = scmp.ge.s32.totalorder %s19_s30, 4  }
 0x3e5   :  { %18 = sbr.rel (!%p16_p4) target bundleno = 1 (0x1), region = 92 }

</bundles_post_ra>
